<compile_context>
chip_gen: v7x
topology: tpu7x:2x2x1
jax: 0.10.0
libtpu: 0.0.40
codegen_flags: <defaults>
</compile_context>

<pallas_src>
import functools

import jax
import jax.numpy as jnp
from jax.experimental import pallas as pl
from jax.experimental.pallas import tpu as pltpu


# ----------------------------------------------------------------------------
# Pallas matmul kernel (channel-major: output last dim = M = B*OH*OW)
# ----------------------------------------------------------------------------
def _matmul_kernel(w_ref, p_ref, b_ref, o_ref, *, relu):
    # w_ref: (OC, K) bf16, p_ref: (K, tn) bf16, b_ref: (OC, 1) f32, o_ref: (OC, tn) f32
    acc = jnp.dot(w_ref[...], p_ref[...], preferred_element_type=jnp.float32)
    acc = acc + b_ref[...]                       # broadcast (OC,1) over columns
    if relu:
        acc = jnp.maximum(acc, 0.0)
    o_ref[...] = acc


def _pick_tile(m, max_tn=512):
    """Pick an M tile: full M if small, else a multiple of 128 dividing padded M."""
    if m <= max_tn:
        return m, m                              # single block == full dim (allowed)
    m_pad = ((m + 127) // 128) * 128
    best = 128
    t = 256
    while t <= max_tn:
        if m_pad % t == 0:
            best = t
        t += 128
    return m_pad, best


def matmul_bias_cm(w, p, bias, relu=False, max_tn=512):
    """w: (OC, K), p: (K, M), bias: (OC,) -> (OC, M) float32 (channel-major)."""
    OC, K = w.shape
    M = p.shape[1]

    # Pad contraction dim to a multiple of 8 (sublane alignment of patches operand).
    k_pad = (-K) % 8
    if k_pad:
        w = jnp.pad(w, ((0, 0), (0, k_pad)))
        p = jnp.pad(p, ((0, k_pad), (0, 0)))
    Kp = K + k_pad

    m_pad_total, tn = _pick_tile(M, max_tn)
    if m_pad_total != M:
        p = jnp.pad(p, ((0, 0), (0, m_pad_total - M)))
    grid = (m_pad_total // tn,)

    out = pl.pallas_call(
        functools.partial(_matmul_kernel, relu=relu),
        grid=grid,
        in_specs=[
            pl.BlockSpec((OC, Kp), lambda i: (0, 0)),   # weights: resident across grid
            pl.BlockSpec((Kp, tn), lambda i: (0, i)),   # patches: tiled over M
            pl.BlockSpec((OC, 1), lambda i: (0, 0)),    # bias
        ],
        out_specs=pl.BlockSpec((OC, tn), lambda i: (0, i)),
        out_shape=jax.ShapeDtypeStruct((OC, m_pad_total), jnp.float32),
        compiler_params=pltpu.CompilerParams(
            dimension_semantics=("parallel",),          # v7x: split M tiles across 2 TCs
            vmem_limit_bytes=32 * 1024 * 1024,
        ),
    )(w.astype(jnp.bfloat16), p.astype(jnp.bfloat16),
      bias.reshape(OC, 1).astype(jnp.float32))

    return out[:, :M] if m_pad_total != M else out


# ----------------------------------------------------------------------------
# AvgPool2d(kernel=3, stride=1, padding=1) — single read of the padded input
# ----------------------------------------------------------------------------
def _avgpool3x3_kernel(xp_ref, o_ref):
    cb, hp, wp = xp_ref.shape
    h, w = hp - 2, wp - 2
    acc = jnp.zeros((cb, h, w), jnp.float32)
    for i in range(3):
        for j in range(3):
            acc = acc + xp_ref[:, i:i + h, j:j + w]
    # PyTorch AvgPool2d default count_include_pad=True -> divisor is always 9.
    o_ref[...] = acc * (1.0 / 9.0)


def avgpool3x3_cm(x):
    """x: channel-major (C, B, H, W) -> (C, B, H, W)."""
    C, B, H, W = x.shape
    xp = jnp.pad(x, ((0, 0), (0, 0), (1, 1), (1, 1))).reshape(C * B, H + 2, W + 2)
    out = pl.pallas_call(
        _avgpool3x3_kernel,
        out_shape=jax.ShapeDtypeStruct((C * B, H, W), jnp.float32),
    )(xp.astype(jnp.float32))
    return out.reshape(C, B, H, W)


# ----------------------------------------------------------------------------
# MaxPool2d(kernel=2) — plain JAX (per perf review: standalone kernel was overhead)
# ----------------------------------------------------------------------------
def maxpool2x2_cm(x):
    a = x[:, :, 0::2, 0::2]
    b = x[:, :, 0::2, 1::2]
    c = x[:, :, 1::2, 0::2]
    d = x[:, :, 1::2, 1::2]
    return jnp.maximum(jnp.maximum(a, b), jnp.maximum(c, d))


# ----------------------------------------------------------------------------
# Conv2d (stride=1) on channel-major activations via flipped im2col matmul
# ----------------------------------------------------------------------------
def conv2d_cm(x, weight, bias=None, padding=0, relu=False):
    """x: (C, B, H, W), weight: (OC, IC, KH, KW) -> (OC, B, OH, OW)."""
    OC, IC, KH, KW = weight.shape
    C, B, H, W = x.shape
    oh = H + 2 * padding - KH + 1
    ow = W + 2 * padding - KW + 1

    if KH == 1 and KW == 1 and padding == 0:
        # 1x1 conv: the patch matrix is just the channel-major activation.
        patches = x.reshape(C, B * H * W)
    else:
        xp = jnp.pad(x, ((0, 0), (0, 0), (padding, padding), (padding, padding))) \
            if padding else x
        cols = [xp[:, :, i:i + oh, j:j + ow] for i in range(KH) for j in range(KW)]
        patches = jnp.stack(cols, axis=1)            # (C, KH*KW, B, oh, ow)
        patches = patches.reshape(C * KH * KW, B * oh * ow)

    w2d = weight.reshape(OC, IC * KH * KW)           # K order (IC, KH, KW) matches patches
    if bias is None:
        bias = jnp.zeros((OC,), jnp.float32)
    out = matmul_bias_cm(w2d, patches, bias, relu=relu)   # (OC, B*oh*ow)
    return out.reshape(OC, B, oh, ow)


# ----------------------------------------------------------------------------
# Parameters (deterministic, PyTorch-default-like uniform init)
# ----------------------------------------------------------------------------
def _init_conv(key, oc, ic, kh, kw, bias=True):
    kw_, kb_ = jax.random.split(key)
    fan_in = ic * kh * kw
    bound = 1.0 / float(fan_in) ** 0.5
    w = jax.random.uniform(kw_, (oc, ic, kh, kw), jnp.float32, -bound, bound)
    b = jax.random.uniform(kb_, (oc,), jnp.float32, -bound, bound) if bias else None
    return {"w": w, "b": b}


def _init_inception(key, in_channels):
    k = jax.random.split(key, 5)
    return {
        "b1x1_1": _init_conv(k[0], 24, in_channels, 1, 1),
        "b1x1_2": _init_conv(k[1], 16, in_channels, 1, 1),
        "b5x5":   _init_conv(k[2], 24, 16, 5, 5),
        "b3x3_1": _init_conv(k[3], 24, 16, 3, 3),
        "b3x3_2": _init_conv(k[4], 24, 24, 3, 3),
    }


def init_params(key):
    k = jax.random.split(key, 5)
    p = {
        "conv1": _init_conv(k[0], 10, 1, 5, 5, bias=False),    # spec: bias=False
        "conv2": _init_conv(k[1], 20, 88, 5, 5, bias=False),   # spec: bias=False
        "inc1": _init_inception(k[2], 10),
        "inc2": _init_inception(k[3], 20),
    }
    kw_, kb_ = jax.random.split(k[4])
    bound = 1.0 / 1408.0 ** 0.5
    p["fc_w"] = jax.random.uniform(kw_, (10, 1408), jnp.float32, -bound, bound)
    p["fc_b"] = jax.random.uniform(kb_, (10,), jnp.float32, -bound, bound)
    return p


# ----------------------------------------------------------------------------
# Forward pass (mirrors NetModel.forward / InceptionModel.forward)
# ----------------------------------------------------------------------------
def inception_forward(p, x):
    # x: (C, B, H, W) channel-major
    net1 = conv2d_cm(avgpool3x3_cm(x), p["b1x1_1"]["w"], p["b1x1_1"]["b"])     # (24,...)
    net2 = conv2d_cm(x, p["b1x1_2"]["w"], p["b1x1_2"]["b"])                    # (16,...) reused
    net3 = conv2d_cm(net2, p["b5x5"]["w"], p["b5x5"]["b"], padding=2)          # (24,...)
    t = conv2d_cm(net2, p["b3x3_1"]["w"], p["b3x3_1"]["b"], padding=1)
    net4 = conv2d_cm(t, p["b3x3_2"]["w"], p["b3x3_2"]["b"], padding=1)         # (24,...)
    return jnp.concatenate([net1, net2, net3, net4], axis=0)                   # 88 channels


def net_forward(p, x):
    # x: NCHW (B, 1, 28, 28)
    B = x.shape[0]
    x = jnp.transpose(x, (1, 0, 2, 3))                               # -> channel-major (1,B,28,28)
    x = conv2d_cm(x, p["conv1"]["w"], None, padding=0, relu=True)    # (10,B,24,24), ReLU fused
    x = maxpool2x2_cm(x)                                             # (10,B,12,12)
    x = inception_forward(p["inc1"], x)                              # (88,B,12,12)
    x = conv2d_cm(x, p["conv2"]["w"], None, padding=0, relu=True)    # (20,B,8,8), ReLU fused
    x = maxpool2x2_cm(x)                                             # (20,B,4,4)
    x = inception_forward(p["inc2"], x)                              # (88,B,4,4)
    # torch .view(B, -1) flattens NCHW as (C, H, W) per batch element:
    xT = jnp.transpose(x, (0, 2, 3, 1)).reshape(88 * 4 * 4, B)       # (1408, B)
    out_t = matmul_bias_cm(p["fc_w"], xT, p["fc_b"])                 # (10, B)
    return out_t.T                                                   # (B, 10)


if __name__ == "__main__":
    key = jax.random.PRNGKey(0)
    kp, kx = jax.random.split(key)
    params = init_params(kp)
    x = jax.random.normal(kx, (2, 1, 28, 28), dtype=jnp.float32)

    fwd = jax.jit(net_forward)
    out = fwd(params, x)
    jax.block_until_ready(out)
    assert out.shape == (2, 10), out.shape
    assert out.dtype == jnp.float32
    print("KERNEL_OK")
</pallas_src>

<mosaic_0001>
module attributes {stable_mosaic.version = 11 : i64} {
  func.func @_matmul_kernel(%arg0: i32, %arg1: memref<10x32xbf16, #tpu.memory_space<vmem>>, %arg2: memref<32x384xbf16, #tpu.memory_space<vmem>>, %arg3: memref<10x1xf32, #tpu.memory_space<vmem>>, %arg4: memref<10x384xf32, #tpu.memory_space<vmem>>) attributes {dimension_semantics = [#tpu.dimension_semantics<parallel>], iteration_bounds = array<i64: 3>, scalar_prefetch = 0 : i64, scratch_operands = 0 : i64, tpu.core_type = #tpu.core_type<tc>, window_params = [{pipeline_mode = #tpu.pipeline_mode<synchronous>, transform_indices = @transform_0, window_bounds = array<i64: 10, 32>}, {transform_indices = @transform_1, window_bounds = array<i64: 32, 384>}, {pipeline_mode = #tpu.pipeline_mode<synchronous>, transform_indices = @transform_2, window_bounds = array<i64: 10, 1>}, {transform_indices = @transform_3, window_bounds = array<i64: 10, 384>}]} {
    %c0 = arith.constant 0 : index
    %c0_0 = arith.constant 0 : index
    %0 = vector.load %arg1[%c0, %c0_0] : memref<10x32xbf16, #tpu.memory_space<vmem>>, vector<10x32xbf16>
    %c0_1 = arith.constant 0 : index
    %c0_2 = arith.constant 0 : index
    %1 = vector.load %arg2[%c0_1, %c0_2] : memref<32x384xbf16, #tpu.memory_space<vmem>>, vector<32x384xbf16>
    %cst = arith.constant dense<0.000000e+00> : vector<10x384xf32>
    %2 = tpu.matmul %0, %1, %cst {dimension_numbers = #tpu.dot_dimension_numbers<[1], [0], [0], [1], [0, 0, 1, 1], [], []>} : vector<10x32xbf16>, vector<32x384xbf16>, vector<10x384xf32> -> vector<10x384xf32>
    %c0_3 = arith.constant 0 : index
    %c0_4 = arith.constant 0 : index
    %3 = vector.load %arg3[%c0_3, %c0_4] : memref<10x1xf32, #tpu.memory_space<vmem>>, vector<10x1xf32>
    %4 = vector.broadcast %3 : vector<10x1xf32> to vector<10x384xf32>
    %5 = arith.addf %2, %4 : vector<10x384xf32>
    %cst_5 = arith.constant 0.000000e+00 : f32
    %6 = vector.broadcast %cst_5 : f32 to vector<10x384xf32>
    %7 = arith.maximumf %5, %6 : vector<10x384xf32>
    %c0_6 = arith.constant 0 : index
    %c0_7 = arith.constant 0 : index
    %8 = vector.load %arg4[%c0_6, %c0_7] : memref<10x384xf32, #tpu.memory_space<vmem>>, vector<10x384xf32>
    tpu.vector_store %arg4[%c0_6, %c0_7], %7 {strides = array<i32>} : memref<10x384xf32, #tpu.memory_space<vmem>>, vector<10x384xf32>,
    return
  }
  func.func @transform_0(%arg0: i32) -> (i32, i32) {
    %c0_i32 = arith.constant 0 : i32
    %c0_i32_0 = arith.constant 0 : i32
    %c0_i32_1 = arith.constant 0 : i32
    return %c0_i32, %c0_i32_0 : i32, i32
  }
  func.func @transform_1(%arg0: i32) -> (i32, i32) {
    %c0_i32 = arith.constant 0 : i32
    %c0_i32_0 = arith.constant 0 : i32
    return %c0_i32, %arg0 : i32, i32
  }
  func.func @transform_2(%arg0: i32) -> (i32, i32) {
    %c0_i32 = arith.constant 0 : i32
    %c0_i32_0 = arith.constant 0 : i32
    %c0_i32_1 = arith.constant 0 : i32
    return %c0_i32, %c0_i32_0 : i32, i32
  }
  func.func @transform_3(%arg0: i32) -> (i32, i32) {
    %c0_i32 = arith.constant 0 : i32
    %c0_i32_0 = arith.constant 0 : i32
    return %c0_i32, %arg0 : i32, i32
  }
}

module attributes {stable_mosaic.version = 11 : i64} {
  func.func @_matmul_kernel(%arg0: i32, %arg1: memref<16x16xbf16, #tpu.memory_space<vmem>>, %arg2: memref<16x288xbf16, #tpu.memory_space<vmem>>, %arg3: memref<16x1xf32, #tpu.memory_space<vmem>>, %arg4: memref<16x288xf32, #tpu.memory_space<vmem>>) attributes {dimension_semantics = [#tpu.dimension_semantics<parallel>], iteration_bounds = array<i64: 1>, scalar_prefetch = 0 : i64, scratch_operands = 0 : i64, tpu.core_type = #tpu.core_type<tc>, window_params = [{pipeline_mode = #tpu.pipeline_mode<synchronous>, transform_indices = @transform_0, window_bounds = array<i64: 16, 16>}, {transform_indices = @transform_1, window_bounds = array<i64: 16, 288>}, {pipeline_mode = #tpu.pipeline_mode<synchronous>, transform_indices = @transform_2, window_bounds = array<i64: 16, 1>}, {transform_indices = @transform_3, window_bounds = array<i64: 16, 288>}]} {
    %c0 = arith.constant 0 : index
    %c0_0 = arith.constant 0 : index
    %0 = vector.load %arg1[%c0, %c0_0] : memref<16x16xbf16, #tpu.memory_space<vmem>>, vector<16x16xbf16>
    %c0_1 = arith.constant 0 : index
    %c0_2 = arith.constant 0 : index
    %1 = vector.load %arg2[%c0_1, %c0_2] : memref<16x288xbf16, #tpu.memory_space<vmem>>, vector<16x288xbf16>
    %cst = arith.constant dense<0.000000e+00> : vector<16x288xf32>
    %2 = tpu.matmul %0, %1, %cst {dimension_numbers = #tpu.dot_dimension_numbers<[1], [0], [0], [1], [0, 0, 1, 1], [], []>} : vector<16x16xbf16>, vector<16x288xbf16>, vector<16x288xf32> -> vector<16x288xf32>
    %c0_3 = arith.constant 0 : index
    %c0_4 = arith.constant 0 : index
    %3 = vector.load %arg3[%c0_3, %c0_4] : memref<16x1xf32, #tpu.memory_space<vmem>>, vector<16x1xf32>
    %4 = vector.broadcast %3 : vector<16x1xf32> to vector<16x288xf32>
    %5 = arith.addf %2, %4 : vector<16x288xf32>
    %c0_5 = arith.constant 0 : index
    %c0_6 = arith.constant 0 : index
    %6 = vector.load %arg4[%c0_5, %c0_6] : memref<16x288xf32, #tpu.memory_space<vmem>>, vector<16x288xf32>
    tpu.vector_store %arg4[%c0_5, %c0_6], %5 {strides = array<i32>} : memref<16x288xf32, #tpu.memory_space<vmem>>, vector<16x288xf32>,
    return
  }
  func.func @transform_0(%arg0: i32) -> (i32, i32) {
    %c0_i32 = arith.constant 0 : i32
    %c0_i32_0 = arith.constant 0 : i32
    %c0_i32_1 = arith.constant 0 : i32
    return %c0_i32, %c0_i32_0 : i32, i32
  }
  func.func @transform_1(%arg0: i32) -> (i32, i32) {
    %c0_i32 = arith.constant 0 : i32
    %c0_i32_0 = arith.constant 0 : i32
    return %c0_i32, %arg0 : i32, i32
  }
  func.func @transform_2(%arg0: i32) -> (i32, i32) {
    %c0_i32 = arith.constant 0 : i32
    %c0_i32_0 = arith.constant 0 : i32
    %c0_i32_1 = arith.constant 0 : i32
    return %c0_i32, %c0_i32_0 : i32, i32
  }
  func.func @transform_3(%arg0: i32) -> (i32, i32) {
    %c0_i32 = arith.constant 0 : i32
    %c0_i32_0 = arith.constant 0 : i32
    return %c0_i32, %arg0 : i32, i32
  }
}

module attributes {stable_mosaic.version = 11 : i64} {
  func.func @_matmul_kernel(%arg0: i32, %arg1: memref<24x400xbf16, #tpu.memory_space<vmem>>, %arg2: memref<400x288xbf16, #tpu.memory_space<vmem>>, %arg3: memref<24x1xf32, #tpu.memory_space<vmem>>, %arg4: memref<24x288xf32, #tpu.memory_space<vmem>>) attributes {dimension_semantics = [#tpu.dimension_semantics<parallel>], iteration_bounds = array<i64: 1>, scalar_prefetch = 0 : i64, scratch_operands = 0 : i64, tpu.core_type = #tpu.core_type<tc>, window_params = [{pipeline_mode = #tpu.pipeline_mode<synchronous>, transform_indices = @transform_0, window_bounds = array<i64: 24, 400>}, {transform_indices = @transform_1, window_bounds = array<i64: 400, 288>}, {pipeline_mode = #tpu.pipeline_mode<synchronous>, transform_indices = @transform_2, window_bounds = array<i64: 24, 1>}, {transform_indices = @transform_3, window_bounds = array<i64: 24, 288>}]} {
    %c0 = arith.constant 0 : index
    %c0_0 = arith.constant 0 : index
    %0 = vector.load %arg1[%c0, %c0_0] : memref<24x400xbf16, #tpu.memory_space<vmem>>, vector<24x400xbf16>
    %c0_1 = arith.constant 0 : index
    %c0_2 = arith.constant 0 : index
    %1 = vector.load %arg2[%c0_1, %c0_2] : memref<400x288xbf16, #tpu.memory_space<vmem>>, vector<400x288xbf16>
    %cst = arith.constant dense<0.000000e+00> : vector<24x288xf32>
    %2 = tpu.matmul %0, %1, %cst {dimension_numbers = #tpu.dot_dimension_numbers<[1], [0], [0], [1], [0, 0, 1, 1], [], []>} : vector<24x400xbf16>, vector<400x288xbf16>, vector<24x288xf32> -> vector<24x288xf32>
    %c0_3 = arith.constant 0 : index
    %c0_4 = arith.constant 0 : index
    %3 = vector.load %arg3[%c0_3, %c0_4] : memref<24x1xf32, #tpu.memory_space<vmem>>, vector<24x1xf32>
    %4 = vector.broadcast %3 : vector<24x1xf32> to vector<24x288xf32>
    %5 = arith.addf %2, %4 : vector<24x288xf32>
    %c0_5 = arith.constant 0 : index
    %c0_6 = arith.constant 0 : index
    %6 = vector.load %arg4[%c0_5, %c0_6] : memref<24x288xf32, #tpu.memory_space<vmem>>, vector<24x288xf32>
    tpu.vector_store %arg4[%c0_5, %c0_6], %5 {strides = array<i32>} : memref<24x288xf32, #tpu.memory_space<vmem>>, vector<24x288xf32>,
    return
  }
  func.func @transform_0(%arg0: i32) -> (i32, i32) {
    %c0_i32 = arith.constant 0 : i32
    %c0_i32_0 = arith.constant 0 : i32
    %c0_i32_1 = arith.constant 0 : i32
    return %c0_i32, %c0_i32_0 : i32, i32
  }
  func.func @transform_1(%arg0: i32) -> (i32, i32) {
    %c0_i32 = arith.constant 0 : i32
    %c0_i32_0 = arith.constant 0 : i32
    return %c0_i32, %arg0 : i32, i32
  }
  func.func @transform_2(%arg0: i32) -> (i32, i32) {
    %c0_i32 = arith.constant 0 : i32
    %c0_i32_0 = arith.constant 0 : i32
    %c0_i32_1 = arith.constant 0 : i32
    return %c0_i32, %c0_i32_0 : i32, i32
  }
  func.func @transform_3(%arg0: i32) -> (i32, i32) {
    %c0_i32 = arith.constant 0 : i32
    %c0_i32_0 = arith.constant 0 : i32
    return %c0_i32, %arg0 : i32, i32
  }
}

module attributes {stable_mosaic.version = 11 : i64} {
  func.func @_matmul_kernel(%arg0: i32, %arg1: memref<24x144xbf16, #tpu.memory_space<vmem>>, %arg2: memref<144x288xbf16, #tpu.memory_space<vmem>>, %arg3: memref<24x1xf32, #tpu.memory_space<vmem>>, %arg4: memref<24x288xf32, #tpu.memory_space<vmem>>) attributes {dimension_semantics = [#tpu.dimension_semantics<parallel>], iteration_bounds = array<i64: 1>, scalar_prefetch = 0 : i64, scratch_operands = 0 : i64, tpu.core_type = #tpu.core_type<tc>, window_params = [{pipeline_mode = #tpu.pipeline_mode<synchronous>, transform_indices = @transform_0, window_bounds = array<i64: 24, 144>}, {transform_indices = @transform_1, window_bounds = array<i64: 144, 288>}, {pipeline_mode = #tpu.pipeline_mode<synchronous>, transform_indices = @transform_2, window_bounds = array<i64: 24, 1>}, {transform_indices = @transform_3, window_bounds = array<i64: 24, 288>}]} {
    %c0 = arith.constant 0 : index
    %c0_0 = arith.constant 0 : index
    %0 = vector.load %arg1[%c0, %c0_0] : memref<24x144xbf16, #tpu.memory_space<vmem>>, vector<24x144xbf16>
    %c0_1 = arith.constant 0 : index
    %c0_2 = arith.constant 0 : index
    %1 = vector.load %arg2[%c0_1, %c0_2] : memref<144x288xbf16, #tpu.memory_space<vmem>>, vector<144x288xbf16>
    %cst = arith.constant dense<0.000000e+00> : vector<24x288xf32>
    %2 = tpu.matmul %0, %1, %cst {dimension_numbers = #tpu.dot_dimension_numbers<[1], [0], [0], [1], [0, 0, 1, 1], [], []>} : vector<24x144xbf16>, vector<144x288xbf16>, vector<24x288xf32> -> vector<24x288xf32>
    %c0_3 = arith.constant 0 : index
    %c0_4 = arith.constant 0 : index
    %3 = vector.load %arg3[%c0_3, %c0_4] : memref<24x1xf32, #tpu.memory_space<vmem>>, vector<24x1xf32>
    %4 = vector.broadcast %3 : vector<24x1xf32> to vector<24x288xf32>
    %5 = arith.addf %2, %4 : vector<24x288xf32>
    %c0_5 = arith.constant 0 : index
    %c0_6 = arith.constant 0 : index
    %6 = vector.load %arg4[%c0_5, %c0_6] : memref<24x288xf32, #tpu.memory_space<vmem>>, vector<24x288xf32>
    tpu.vector_store %arg4[%c0_5, %c0_6], %5 {strides = array<i32>} : memref<24x288xf32, #tpu.memory_space<vmem>>, vector<24x288xf32>,
    return
  }
  func.func @transform_0(%arg0: i32) -> (i32, i32) {
    %c0_i32 = arith.constant 0 : i32
    %c0_i32_0 = arith.constant 0 : i32
    %c0_i32_1 = arith.constant 0 : i32
    return %c0_i32, %c0_i32_0 : i32, i32
  }
  func.func @transform_1(%arg0: i32) -> (i32, i32) {
    %c0_i32 = arith.constant 0 : i32
    %c0_i32_0 = arith.constant 0 : i32
    return %c0_i32, %arg0 : i32, i32
  }
  func.func @transform_2(%arg0: i32) -> (i32, i32) {
    %c0_i32 = arith.constant 0 : i32
    %c0_i32_0 = arith.constant 0 : i32
    %c0_i32_1 = arith.constant 0 : i32
    return %c0_i32, %c0_i32_0 : i32, i32
  }
  func.func @transform_3(%arg0: i32) -> (i32, i32) {
    %c0_i32 = arith.constant 0 : i32
    %c0_i32_0 = arith.constant 0 : i32
    return %c0_i32, %arg0 : i32, i32
  }
}

module attributes {stable_mosaic.version = 11 : i64} {
  func.func @_matmul_kernel(%arg0: i32, %arg1: memref<24x216xbf16, #tpu.memory_space<vmem>>, %arg2: memref<216x288xbf16, #tpu.memory_space<vmem>>, %arg3: memref<24x1xf32, #tpu.memory_space<vmem>>, %arg4: memref<24x288xf32, #tpu.memory_space<vmem>>) attributes {dimension_semantics = [#tpu.dimension_semantics<parallel>], iteration_bounds = array<i64: 1>, scalar_prefetch = 0 : i64, scratch_operands = 0 : i64, tpu.core_type = #tpu.core_type<tc>, window_params = [{pipeline_mode = #tpu.pipeline_mode<synchronous>, transform_indices = @transform_0, window_bounds = array<i64: 24, 216>}, {transform_indices = @transform_1, window_bounds = array<i64: 216, 288>}, {pipeline_mode = #tpu.pipeline_mode<synchronous>, transform_indices = @transform_2, window_bounds = array<i64: 24, 1>}, {transform_indices = @transform_3, window_bounds = array<i64: 24, 288>}]} {
    %c0 = arith.constant 0 : index
    %c0_0 = arith.constant 0 : index
    %0 = vector.load %arg1[%c0, %c0_0] : memref<24x216xbf16, #tpu.memory_space<vmem>>, vector<24x216xbf16>
    %c0_1 = arith.constant 0 : index
    %c0_2 = arith.constant 0 : index
    %1 = vector.load %arg2[%c0_1, %c0_2] : memref<216x288xbf16, #tpu.memory_space<vmem>>, vector<216x288xbf16>
    %cst = arith.constant dense<0.000000e+00> : vector<24x288xf32>
    %2 = tpu.matmul %0, %1, %cst {dimension_numbers = #tpu.dot_dimension_numbers<[1], [0], [0], [1], [0, 0, 1, 1], [], []>} : vector<24x216xbf16>, vector<216x288xbf16>, vector<24x288xf32> -> vector<24x288xf32>
    %c0_3 = arith.constant 0 : index
    %c0_4 = arith.constant 0 : index
    %3 = vector.load %arg3[%c0_3, %c0_4] : memref<24x1xf32, #tpu.memory_space<vmem>>, vector<24x1xf32>
    %4 = vector.broadcast %3 : vector<24x1xf32> to vector<24x288xf32>
    %5 = arith.addf %2, %4 : vector<24x288xf32>
    %c0_5 = arith.constant 0 : index
    %c0_6 = arith.constant 0 : index
    %6 = vector.load %arg4[%c0_5, %c0_6] : memref<24x288xf32, #tpu.memory_space<vmem>>, vector<24x288xf32>
    tpu.vector_store %arg4[%c0_5, %c0_6], %5 {strides = array<i32>} : memref<24x288xf32, #tpu.memory_space<vmem>>, vector<24x288xf32>,
    return
  }
  func.func @transform_0(%arg0: i32) -> (i32, i32) {
    %c0_i32 = arith.constant 0 : i32
    %c0_i32_0 = arith.constant 0 : i32
    %c0_i32_1 = arith.constant 0 : i32
    return %c0_i32, %c0_i32_0 : i32, i32
  }
  func.func @transform_1(%arg0: i32) -> (i32, i32) {
    %c0_i32 = arith.constant 0 : i32
    %c0_i32_0 = arith.constant 0 : i32
    return %c0_i32, %arg0 : i32, i32
  }
  func.func @transform_2(%arg0: i32) -> (i32, i32) {
    %c0_i32 = arith.constant 0 : i32
    %c0_i32_0 = arith.constant 0 : i32
    %c0_i32_1 = arith.constant 0 : i32
    return %c0_i32, %c0_i32_0 : i32, i32
  }
  func.func @transform_3(%arg0: i32) -> (i32, i32) {
    %c0_i32 = arith.constant 0 : i32
    %c0_i32_0 = arith.constant 0 : i32
    return %c0_i32, %arg0 : i32, i32
  }
}

module attributes {stable_mosaic.version = 11 : i64} {
  func.func @_avgpool3x3_kernel(%arg0: memref<20x14x14xf32, #tpu.memory_space<vmem>>, %arg1: memref<20x12x12xf32, #tpu.memory_space<vmem>>) attributes {dimension_semantics = [], scalar_prefetch = 0 : i64, scratch_operands = 0 : i64, tpu.core_type = #tpu.core_type<tc>} {
    %cst = arith.constant 0.000000e+00 : f32
    %0 = vector.broadcast %cst : f32 to vector<20x12x12xf32>
    %c0 = arith.constant 0 : index
    %c0_0 = arith.constant 0 : index
    %c0_1 = arith.constant 0 : index
    %1 = vector.load %arg0[%c0, %c0_0, %c0_1] : memref<20x14x14xf32, #tpu.memory_space<vmem>>, vector<20x12x12xf32>
    %2 = arith.addf %0, %1 : vector<20x12x12xf32>
    %c0_2 = arith.constant 0 : index
    %c0_3 = arith.constant 0 : index
    %c1 = arith.constant 1 : index
    %3 = vector.load %arg0[%c0_2, %c0_3, %c1] : memref<20x14x14xf32, #tpu.memory_space<vmem>>, vector<20x12x12xf32>
    %4 = arith.addf %2, %3 : vector<20x12x12xf32>
    %c0_4 = arith.constant 0 : index
    %c0_5 = arith.constant 0 : index
    %c2 = arith.constant 2 : index
    %5 = vector.load %arg0[%c0_4, %c0_5, %c2] : memref<20x14x14xf32, #tpu.memory_space<vmem>>, vector<20x12x12xf32>
    %6 = arith.addf %4, %5 : vector<20x12x12xf32>
    %c0_6 = arith.constant 0 : index
    %c1_7 = arith.constant 1 : index
    %c0_8 = arith.constant 0 : index
    %7 = vector.load %arg0[%c0_6, %c1_7, %c0_8] : memref<20x14x14xf32, #tpu.memory_space<vmem>>, vector<20x12x12xf32>
    %8 = arith.addf %6, %7 : vector<20x12x12xf32>
    %c0_9 = arith.constant 0 : index
    %c1_10 = arith.constant 1 : index
    %c1_11 = arith.constant 1 : index
    %9 = vector.load %arg0[%c0_9, %c1_10, %c1_11] : memref<20x14x14xf32, #tpu.memory_space<vmem>>, vector<20x12x12xf32>
    %10 = arith.addf %8, %9 : vector<20x12x12xf32>
    %c0_12 = arith.constant 0 : index
    %c1_13 = arith.constant 1 : index
    %c2_14 = arith.constant 2 : index
    %11 = vector.load %arg0[%c0_12, %c1_13, %c2_14] : memref<20x14x14xf32, #tpu.memory_space<vmem>>, vector<20x12x12xf32>
    %12 = arith.addf %10, %11 : vector<20x12x12xf32>
    %c0_15 = arith.constant 0 : index
    %c2_16 = arith.constant 2 : index
    %c0_17 = arith.constant 0 : index
    %13 = vector.load %arg0[%c0_15, %c2_16, %c0_17] : memref<20x14x14xf32, #tpu.memory_space<vmem>>, vector<20x12x12xf32>
    %14 = arith.addf %12, %13 : vector<20x12x12xf32>
    %c0_18 = arith.constant 0 : index
    %c2_19 = arith.constant 2 : index
    %c1_20 = arith.constant 1 : index
    %15 = vector.load %arg0[%c0_18, %c2_19, %c1_20] : memref<20x14x14xf32, #tpu.memory_space<vmem>>, vector<20x12x12xf32>
    %16 = arith.addf %14, %15 : vector<20x12x12xf32>
    %c0_21 = arith.constant 0 : index
    %c2_22 = arith.constant 2 : index
    %c2_23 = arith.constant 2 : index
    %17 = vector.load %arg0[%c0_21, %c2_22, %c2_23] : memref<20x14x14xf32, #tpu.memory_space<vmem>>, vector<20x12x12xf32>
    %18 = arith.addf %16, %17 : vector<20x12x12xf32>
    %cst_24 = arith.constant 0.111111112 : f32
    %19 = vector.broadcast %cst_24 : f32 to vector<20x12x12xf32>
    %20 = arith.mulf %18, %19 : vector<20x12x12xf32>
    %c0_25 = arith.constant 0 : index
    %c0_26 = arith.constant 0 : index
    %c0_27 = arith.constant 0 : index
    %21 = vector.load %arg1[%c0_25, %c0_26, %c0_27] : memref<20x12x12xf32, #tpu.memory_space<vmem>>, vector<20x12x12xf32>
    tpu.vector_store %arg1[%c0_25, %c0_26, %c0_27], %20 {strides = array<i32>} : memref<20x12x12xf32, #tpu.memory_space<vmem>>, vector<20x12x12xf32>,
    return
  }
}

module attributes {stable_mosaic.version = 11 : i64} {
  func.func @_matmul_kernel(%arg0: i32, %arg1: memref<24x16xbf16, #tpu.memory_space<vmem>>, %arg2: memref<16x288xbf16, #tpu.memory_space<vmem>>, %arg3: memref<24x1xf32, #tpu.memory_space<vmem>>, %arg4: memref<24x288xf32, #tpu.memory_space<vmem>>) attributes {dimension_semantics = [#tpu.dimension_semantics<parallel>], iteration_bounds = array<i64: 1>, scalar_prefetch = 0 : i64, scratch_operands = 0 : i64, tpu.core_type = #tpu.core_type<tc>, window_params = [{pipeline_mode = #tpu.pipeline_mode<synchronous>, transform_indices = @transform_0, window_bounds = array<i64: 24, 16>}, {transform_indices = @transform_1, window_bounds = array<i64: 16, 288>}, {pipeline_mode = #tpu.pipeline_mode<synchronous>, transform_indices = @transform_2, window_bounds = array<i64: 24, 1>}, {transform_indices = @transform_3, window_bounds = array<i64: 24, 288>}]} {
    %c0 = arith.constant 0 : index
    %c0_0 = arith.constant 0 : index
    %0 = vector.load %arg1[%c0, %c0_0] : memref<24x16xbf16, #tpu.memory_space<vmem>>, vector<24x16xbf16>
    %c0_1 = arith.constant 0 : index
    %c0_2 = arith.constant 0 : index
    %1 = vector.load %arg2[%c0_1, %c0_2] : memref<16x288xbf16, #tpu.memory_space<vmem>>, vector<16x288xbf16>
    %cst = arith.constant dense<0.000000e+00> : vector<24x288xf32>
    %2 = tpu.matmul %0, %1, %cst {dimension_numbers = #tpu.dot_dimension_numbers<[1], [0], [0], [1], [0, 0, 1, 1], [], []>} : vector<24x16xbf16>, vector<16x288xbf16>, vector<24x288xf32> -> vector<24x288xf32>
    %c0_3 = arith.constant 0 : index
    %c0_4 = arith.constant 0 : index
    %3 = vector.load %arg3[%c0_3, %c0_4] : memref<24x1xf32, #tpu.memory_space<vmem>>, vector<24x1xf32>
    %4 = vector.broadcast %3 : vector<24x1xf32> to vector<24x288xf32>
    %5 = arith.addf %2, %4 : vector<24x288xf32>
    %c0_5 = arith.constant 0 : index
    %c0_6 = arith.constant 0 : index
    %6 = vector.load %arg4[%c0_5, %c0_6] : memref<24x288xf32, #tpu.memory_space<vmem>>, vector<24x288xf32>
    tpu.vector_store %arg4[%c0_5, %c0_6], %5 {strides = array<i32>} : memref<24x288xf32, #tpu.memory_space<vmem>>, vector<24x288xf32>,
    return
  }
  func.func @transform_0(%arg0: i32) -> (i32, i32) {
    %c0_i32 = arith.constant 0 : i32
    %c0_i32_0 = arith.constant 0 : i32
    %c0_i32_1 = arith.constant 0 : i32
    return %c0_i32, %c0_i32_0 : i32, i32
  }
  func.func @transform_1(%arg0: i32) -> (i32, i32) {
    %c0_i32 = arith.constant 0 : i32
    %c0_i32_0 = arith.constant 0 : i32
    return %c0_i32, %arg0 : i32, i32
  }
  func.func @transform_2(%arg0: i32) -> (i32, i32) {
    %c0_i32 = arith.constant 0 : i32
    %c0_i32_0 = arith.constant 0 : i32
    %c0_i32_1 = arith.constant 0 : i32
    return %c0_i32, %c0_i32_0 : i32, i32
  }
  func.func @transform_3(%arg0: i32) -> (i32, i32) {
    %c0_i32 = arith.constant 0 : i32
    %c0_i32_0 = arith.constant 0 : i32
    return %c0_i32, %arg0 : i32, i32
  }
}

module attributes {stable_mosaic.version = 11 : i64} {
  func.func @_matmul_kernel(%arg0: i32, %arg1: memref<20x2200xbf16, #tpu.memory_space<vmem>>, %arg2: memref<2200x128xbf16, #tpu.memory_space<vmem>>, %arg3: memref<20x1xf32, #tpu.memory_space<vmem>>, %arg4: memref<20x128xf32, #tpu.memory_space<vmem>>) attributes {dimension_semantics = [#tpu.dimension_semantics<parallel>], iteration_bounds = array<i64: 1>, scalar_prefetch = 0 : i64, scratch_operands = 0 : i64, tpu.core_type = #tpu.core_type<tc>, window_params = [{pipeline_mode = #tpu.pipeline_mode<synchronous>, transform_indices = @transform_0, window_bounds = array<i64: 20, 2200>}, {transform_indices = @transform_1, window_bounds = array<i64: 2200, 128>}, {pipeline_mode = #tpu.pipeline_mode<synchronous>, transform_indices = @transform_2, window_bounds = array<i64: 20, 1>}, {transform_indices = @transform_3, window_bounds = array<i64: 20, 128>}]} {
    %c0 = arith.constant 0 : index
    %c0_0 = arith.constant 0 : index
    %0 = vector.load %arg1[%c0, %c0_0] : memref<20x2200xbf16, #tpu.memory_space<vmem>>, vector<20x2200xbf16>
    %c0_1 = arith.constant 0 : index
    %c0_2 = arith.constant 0 : index
    %1 = vector.load %arg2[%c0_1, %c0_2] : memref<2200x128xbf16, #tpu.memory_space<vmem>>, vector<2200x128xbf16>
    %cst = arith.constant dense<0.000000e+00> : vector<20x128xf32>
    %2 = tpu.matmul %0, %1, %cst {dimension_numbers = #tpu.dot_dimension_numbers<[1], [0], [0], [1], [0, 0, 1, 1], [], []>} : vector<20x2200xbf16>, vector<2200x128xbf16>, vector<20x128xf32> -> vector<20x128xf32>
    %c0_3 = arith.constant 0 : index
    %c0_4 = arith.constant 0 : index
    %3 = vector.load %arg3[%c0_3, %c0_4] : memref<20x1xf32, #tpu.memory_space<vmem>>, vector<20x1xf32>
    %4 = vector.broadcast %3 : vector<20x1xf32> to vector<20x128xf32>
    %5 = arith.addf %2, %4 : vector<20x128xf32>
    %cst_5 = arith.constant 0.000000e+00 : f32
    %6 = vector.broadcast %cst_5 : f32 to vector<20x128xf32>
    %7 = arith.maximumf %5, %6 : vector<20x128xf32>
    %c0_6 = arith.constant 0 : index
    %c0_7 = arith.constant 0 : index
    %8 = vector.load %arg4[%c0_6, %c0_7] : memref<20x128xf32, #tpu.memory_space<vmem>>, vector<20x128xf32>
    tpu.vector_store %arg4[%c0_6, %c0_7], %7 {strides = array<i32>} : memref<20x128xf32, #tpu.memory_space<vmem>>, vector<20x128xf32>,
    return
  }
  func.func @transform_0(%arg0: i32) -> (i32, i32) {
    %c0_i32 = arith.constant 0 : i32
    %c0_i32_0 = arith.constant 0 : i32
    %c0_i32_1 = arith.constant 0 : i32
    return %c0_i32, %c0_i32_0 : i32, i32
  }
  func.func @transform_1(%arg0: i32) -> (i32, i32) {
    %c0_i32 = arith.constant 0 : i32
    %c0_i32_0 = arith.constant 0 : i32
    return %c0_i32, %arg0 : i32, i32
  }
  func.func @transform_2(%arg0: i32) -> (i32, i32) {
    %c0_i32 = arith.constant 0 : i32
    %c0_i32_0 = arith.constant 0 : i32
    %c0_i32_1 = arith.constant 0 : i32
    return %c0_i32, %c0_i32_0 : i32, i32
  }
  func.func @transform_3(%arg0: i32) -> (i32, i32) {
    %c0_i32 = arith.constant 0 : i32
    %c0_i32_0 = arith.constant 0 : i32
    return %c0_i32, %arg0 : i32, i32
  }
}

module attributes {stable_mosaic.version = 11 : i64} {
  func.func @_matmul_kernel(%arg0: i32, %arg1: memref<16x24xbf16, #tpu.memory_space<vmem>>, %arg2: memref<24x32xbf16, #tpu.memory_space<vmem>>, %arg3: memref<16x1xf32, #tpu.memory_space<vmem>>, %arg4: memref<16x32xf32, #tpu.memory_space<vmem>>) attributes {dimension_semantics = [#tpu.dimension_semantics<parallel>], iteration_bounds = array<i64: 1>, scalar_prefetch = 0 : i64, scratch_operands = 0 : i64, tpu.core_type = #tpu.core_type<tc>, window_params = [{pipeline_mode = #tpu.pipeline_mode<synchronous>, transform_indices = @transform_0, window_bounds = array<i64: 16, 24>}, {transform_indices = @transform_1, window_bounds = array<i64: 24, 32>}, {pipeline_mode = #tpu.pipeline_mode<synchronous>, transform_indices = @transform_2, window_bounds = array<i64: 16, 1>}, {transform_indices = @transform_3, window_bounds = array<i64: 16, 32>}]} {
    %c0 = arith.constant 0 : index
    %c0_0 = arith.constant 0 : index
    %0 = vector.load %arg1[%c0, %c0_0] : memref<16x24xbf16, #tpu.memory_space<vmem>>, vector<16x24xbf16>
    %c0_1 = arith.constant 0 : index
    %c0_2 = arith.constant 0 : index
    %1 = vector.load %arg2[%c0_1, %c0_2] : memref<24x32xbf16, #tpu.memory_space<vmem>>, vector<24x32xbf16>
    %cst = arith.constant dense<0.000000e+00> : vector<16x32xf32>
    %2 = tpu.matmul %0, %1, %cst {dimension_numbers = #tpu.dot_dimension_numbers<[1], [0], [0], [1], [0, 0, 1, 1], [], []>} : vector<16x24xbf16>, vector<24x32xbf16>, vector<16x32xf32> -> vector<16x32xf32>
    %c0_3 = arith.constant 0 : index
    %c0_4 = arith.constant 0 : index
    %3 = vector.load %arg3[%c0_3, %c0_4] : memref<16x1xf32, #tpu.memory_space<vmem>>, vector<16x1xf32>
    %4 = vector.broadcast %3 : vector<16x1xf32> to vector<16x32xf32>
    %5 = arith.addf %2, %4 : vector<16x32xf32>
    %c0_5 = arith.constant 0 : index
    %c0_6 = arith.constant 0 : index
    %6 = vector.load %arg4[%c0_5, %c0_6] : memref<16x32xf32, #tpu.memory_space<vmem>>, vector<16x32xf32>
    tpu.vector_store %arg4[%c0_5, %c0_6], %5 {strides = array<i32>} : memref<16x32xf32, #tpu.memory_space<vmem>>, vector<16x32xf32>,
    return
  }
  func.func @transform_0(%arg0: i32) -> (i32, i32) {
    %c0_i32 = arith.constant 0 : i32
    %c0_i32_0 = arith.constant 0 : i32
    %c0_i32_1 = arith.constant 0 : i32
    return %c0_i32, %c0_i32_0 : i32, i32
  }
  func.func @transform_1(%arg0: i32) -> (i32, i32) {
    %c0_i32 = arith.constant 0 : i32
    %c0_i32_0 = arith.constant 0 : i32
    return %c0_i32, %arg0 : i32, i32
  }
  func.func @transform_2(%arg0: i32) -> (i32, i32) {
    %c0_i32 = arith.constant 0 : i32
    %c0_i32_0 = arith.constant 0 : i32
    %c0_i32_1 = arith.constant 0 : i32
    return %c0_i32, %c0_i32_0 : i32, i32
  }
  func.func @transform_3(%arg0: i32) -> (i32, i32) {
    %c0_i32 = arith.constant 0 : i32
    %c0_i32_0 = arith.constant 0 : i32
    return %c0_i32, %arg0 : i32, i32
  }
}

module attributes {stable_mosaic.version = 11 : i64} {
  func.func @_matmul_kernel(%arg0: i32, %arg1: memref<24x400xbf16, #tpu.memory_space<vmem>>, %arg2: memref<400x32xbf16, #tpu.memory_space<vmem>>, %arg3: memref<24x1xf32, #tpu.memory_space<vmem>>, %arg4: memref<24x32xf32, #tpu.memory_space<vmem>>) attributes {dimension_semantics = [#tpu.dimension_semantics<parallel>], iteration_bounds = array<i64: 1>, scalar_prefetch = 0 : i64, scratch_operands = 0 : i64, tpu.core_type = #tpu.core_type<tc>, window_params = [{pipeline_mode = #tpu.pipeline_mode<synchronous>, transform_indices = @transform_0, window_bounds = array<i64: 24, 400>}, {transform_indices = @transform_1, window_bounds = array<i64: 400, 32>}, {pipeline_mode = #tpu.pipeline_mode<synchronous>, transform_indices = @transform_2, window_bounds = array<i64: 24, 1>}, {transform_indices = @transform_3, window_bounds = array<i64: 24, 32>}]} {
    %c0 = arith.constant 0 : index
    %c0_0 = arith.constant 0 : index
    %0 = vector.load %arg1[%c0, %c0_0] : memref<24x400xbf16, #tpu.memory_space<vmem>>, vector<24x400xbf16>
    %c0_1 = arith.constant 0 : index
    %c0_2 = arith.constant 0 : index
    %1 = vector.load %arg2[%c0_1, %c0_2] : memref<400x32xbf16, #tpu.memory_space<vmem>>, vector<400x32xbf16>
    %cst = arith.constant dense<0.000000e+00> : vector<24x32xf32>
    %2 = tpu.matmul %0, %1, %cst {dimension_numbers = #tpu.dot_dimension_numbers<[1], [0], [0], [1], [0, 0, 1, 1], [], []>} : vector<24x400xbf16>, vector<400x32xbf16>, vector<24x32xf32> -> vector<24x32xf32>
    %c0_3 = arith.constant 0 : index
    %c0_4 = arith.constant 0 : index
    %3 = vector.load %arg3[%c0_3, %c0_4] : memref<24x1xf32, #tpu.memory_space<vmem>>, vector<24x1xf32>
    %4 = vector.broadcast %3 : vector<24x1xf32> to vector<24x32xf32>
    %5 = arith.addf %2, %4 : vector<24x32xf32>
    %c0_5 = arith.constant 0 : index
    %c0_6 = arith.constant 0 : index
    %6 = vector.load %arg4[%c0_5, %c0_6] : memref<24x32xf32, #tpu.memory_space<vmem>>, vector<24x32xf32>
    tpu.vector_store %arg4[%c0_5, %c0_6], %5 {strides = array<i32>} : memref<24x32xf32, #tpu.memory_space<vmem>>, vector<24x32xf32>,
    return
  }
  func.func @transform_0(%arg0: i32) -> (i32, i32) {
    %c0_i32 = arith.constant 0 : i32
    %c0_i32_0 = arith.constant 0 : i32
    %c0_i32_1 = arith.constant 0 : i32
    return %c0_i32, %c0_i32_0 : i32, i32
  }
  func.func @transform_1(%arg0: i32) -> (i32, i32) {
    %c0_i32 = arith.constant 0 : i32
    %c0_i32_0 = arith.constant 0 : i32
    return %c0_i32, %arg0 : i32, i32
  }
  func.func @transform_2(%arg0: i32) -> (i32, i32) {
    %c0_i32 = arith.constant 0 : i32
    %c0_i32_0 = arith.constant 0 : i32
    %c0_i32_1 = arith.constant 0 : i32
    return %c0_i32, %c0_i32_0 : i32, i32
  }
  func.func @transform_3(%arg0: i32) -> (i32, i32) {
    %c0_i32 = arith.constant 0 : i32
    %c0_i32_0 = arith.constant 0 : i32
    return %c0_i32, %arg0 : i32, i32
  }
}

module attributes {stable_mosaic.version = 11 : i64} {
  func.func @_matmul_kernel(%arg0: i32, %arg1: memref<24x144xbf16, #tpu.memory_space<vmem>>, %arg2: memref<144x32xbf16, #tpu.memory_space<vmem>>, %arg3: memref<24x1xf32, #tpu.memory_space<vmem>>, %arg4: memref<24x32xf32, #tpu.memory_space<vmem>>) attributes {dimension_semantics = [#tpu.dimension_semantics<parallel>], iteration_bounds = array<i64: 1>, scalar_prefetch = 0 : i64, scratch_operands = 0 : i64, tpu.core_type = #tpu.core_type<tc>, window_params = [{pipeline_mode = #tpu.pipeline_mode<synchronous>, transform_indices = @transform_0, window_bounds = array<i64: 24, 144>}, {transform_indices = @transform_1, window_bounds = array<i64: 144, 32>}, {pipeline_mode = #tpu.pipeline_mode<synchronous>, transform_indices = @transform_2, window_bounds = array<i64: 24, 1>}, {transform_indices = @transform_3, window_bounds = array<i64: 24, 32>}]} {
    %c0 = arith.constant 0 : index
    %c0_0 = arith.constant 0 : index
    %0 = vector.load %arg1[%c0, %c0_0] : memref<24x144xbf16, #tpu.memory_space<vmem>>, vector<24x144xbf16>
    %c0_1 = arith.constant 0 : index
    %c0_2 = arith.constant 0 : index
    %1 = vector.load %arg2[%c0_1, %c0_2] : memref<144x32xbf16, #tpu.memory_space<vmem>>, vector<144x32xbf16>
    %cst = arith.constant dense<0.000000e+00> : vector<24x32xf32>
    %2 = tpu.matmul %0, %1, %cst {dimension_numbers = #tpu.dot_dimension_numbers<[1], [0], [0], [1], [0, 0, 1, 1], [], []>} : vector<24x144xbf16>, vector<144x32xbf16>, vector<24x32xf32> -> vector<24x32xf32>
    %c0_3 = arith.constant 0 : index
    %c0_4 = arith.constant 0 : index
    %3 = vector.load %arg3[%c0_3, %c0_4] : memref<24x1xf32, #tpu.memory_space<vmem>>, vector<24x1xf32>
    %4 = vector.broadcast %3 : vector<24x1xf32> to vector<24x32xf32>
    %5 = arith.addf %2, %4 : vector<24x32xf32>
    %c0_5 = arith.constant 0 : index
    %c0_6 = arith.constant 0 : index
    %6 = vector.load %arg4[%c0_5, %c0_6] : memref<24x32xf32, #tpu.memory_space<vmem>>, vector<24x32xf32>
    tpu.vector_store %arg4[%c0_5, %c0_6], %5 {strides = array<i32>} : memref<24x32xf32, #tpu.memory_space<vmem>>, vector<24x32xf32>,
    return
  }
  func.func @transform_0(%arg0: i32) -> (i32, i32) {
    %c0_i32 = arith.constant 0 : i32
    %c0_i32_0 = arith.constant 0 : i32
    %c0_i32_1 = arith.constant 0 : i32
    return %c0_i32, %c0_i32_0 : i32, i32
  }
  func.func @transform_1(%arg0: i32) -> (i32, i32) {
    %c0_i32 = arith.constant 0 : i32
    %c0_i32_0 = arith.constant 0 : i32
    return %c0_i32, %arg0 : i32, i32
  }
  func.func @transform_2(%arg0: i32) -> (i32, i32) {
    %c0_i32 = arith.constant 0 : i32
    %c0_i32_0 = arith.constant 0 : i32
    %c0_i32_1 = arith.constant 0 : i32
    return %c0_i32, %c0_i32_0 : i32, i32
  }
  func.func @transform_3(%arg0: i32) -> (i32, i32) {
    %c0_i32 = arith.constant 0 : i32
    %c0_i32_0 = arith.constant 0 : i32
    return %c0_i32, %arg0 : i32, i32
  }
}

module attributes {stable_mosaic.version = 11 : i64} {
  func.func @_matmul_kernel(%arg0: i32, %arg1: memref<24x216xbf16, #tpu.memory_space<vmem>>, %arg2: memref<216x32xbf16, #tpu.memory_space<vmem>>, %arg3: memref<24x1xf32, #tpu.memory_space<vmem>>, %arg4: memref<24x32xf32, #tpu.memory_space<vmem>>) attributes {dimension_semantics = [#tpu.dimension_semantics<parallel>], iteration_bounds = array<i64: 1>, scalar_prefetch = 0 : i64, scratch_operands = 0 : i64, tpu.core_type = #tpu.core_type<tc>, window_params = [{pipeline_mode = #tpu.pipeline_mode<synchronous>, transform_indices = @transform_0, window_bounds = array<i64: 24, 216>}, {transform_indices = @transform_1, window_bounds = array<i64: 216, 32>}, {pipeline_mode = #tpu.pipeline_mode<synchronous>, transform_indices = @transform_2, window_bounds = array<i64: 24, 1>}, {transform_indices = @transform_3, window_bounds = array<i64: 24, 32>}]} {
    %c0 = arith.constant 0 : index
    %c0_0 = arith.constant 0 : index
    %0 = vector.load %arg1[%c0, %c0_0] : memref<24x216xbf16, #tpu.memory_space<vmem>>, vector<24x216xbf16>
    %c0_1 = arith.constant 0 : index
    %c0_2 = arith.constant 0 : index
    %1 = vector.load %arg2[%c0_1, %c0_2] : memref<216x32xbf16, #tpu.memory_space<vmem>>, vector<216x32xbf16>
    %cst = arith.constant dense<0.000000e+00> : vector<24x32xf32>
    %2 = tpu.matmul %0, %1, %cst {dimension_numbers = #tpu.dot_dimension_numbers<[1], [0], [0], [1], [0, 0, 1, 1], [], []>} : vector<24x216xbf16>, vector<216x32xbf16>, vector<24x32xf32> -> vector<24x32xf32>
    %c0_3 = arith.constant 0 : index
    %c0_4 = arith.constant 0 : index
    %3 = vector.load %arg3[%c0_3, %c0_4] : memref<24x1xf32, #tpu.memory_space<vmem>>, vector<24x1xf32>
    %4 = vector.broadcast %3 : vector<24x1xf32> to vector<24x32xf32>
    %5 = arith.addf %2, %4 : vector<24x32xf32>
    %c0_5 = arith.constant 0 : index
    %c0_6 = arith.constant 0 : index
    %6 = vector.load %arg4[%c0_5, %c0_6] : memref<24x32xf32, #tpu.memory_space<vmem>>, vector<24x32xf32>
    tpu.vector_store %arg4[%c0_5, %c0_6], %5 {strides = array<i32>} : memref<24x32xf32, #tpu.memory_space<vmem>>, vector<24x32xf32>,
    return
  }
  func.func @transform_0(%arg0: i32) -> (i32, i32) {
    %c0_i32 = arith.constant 0 : i32
    %c0_i32_0 = arith.constant 0 : i32
    %c0_i32_1 = arith.constant 0 : i32
    return %c0_i32, %c0_i32_0 : i32, i32
  }
  func.func @transform_1(%arg0: i32) -> (i32, i32) {
    %c0_i32 = arith.constant 0 : i32
    %c0_i32_0 = arith.constant 0 : i32
    return %c0_i32, %arg0 : i32, i32
  }
  func.func @transform_2(%arg0: i32) -> (i32, i32) {
    %c0_i32 = arith.constant 0 : i32
    %c0_i32_0 = arith.constant 0 : i32
    %c0_i32_1 = arith.constant 0 : i32
    return %c0_i32, %c0_i32_0 : i32, i32
  }
  func.func @transform_3(%arg0: i32) -> (i32, i32) {
    %c0_i32 = arith.constant 0 : i32
    %c0_i32_0 = arith.constant 0 : i32
    return %c0_i32, %arg0 : i32, i32
  }
}

module attributes {stable_mosaic.version = 11 : i64} {
  func.func @_avgpool3x3_kernel(%arg0: memref<40x6x6xf32, #tpu.memory_space<vmem>>, %arg1: memref<40x4x4xf32, #tpu.memory_space<vmem>>) attributes {dimension_semantics = [], scalar_prefetch = 0 : i64, scratch_operands = 0 : i64, tpu.core_type = #tpu.core_type<tc>} {
    %cst = arith.constant 0.000000e+00 : f32
    %0 = vector.broadcast %cst : f32 to vector<40x4x4xf32>
    %c0 = arith.constant 0 : index
    %c0_0 = arith.constant 0 : index
    %c0_1 = arith.constant 0 : index
    %1 = vector.load %arg0[%c0, %c0_0, %c0_1] : memref<40x6x6xf32, #tpu.memory_space<vmem>>, vector<40x4x4xf32>
    %2 = arith.addf %0, %1 : vector<40x4x4xf32>
    %c0_2 = arith.constant 0 : index
    %c0_3 = arith.constant 0 : index
    %c1 = arith.constant 1 : index
    %3 = vector.load %arg0[%c0_2, %c0_3, %c1] : memref<40x6x6xf32, #tpu.memory_space<vmem>>, vector<40x4x4xf32>
    %4 = arith.addf %2, %3 : vector<40x4x4xf32>
    %c0_4 = arith.constant 0 : index
    %c0_5 = arith.constant 0 : index
    %c2 = arith.constant 2 : index
    %5 = vector.load %arg0[%c0_4, %c0_5, %c2] : memref<40x6x6xf32, #tpu.memory_space<vmem>>, vector<40x4x4xf32>
    %6 = arith.addf %4, %5 : vector<40x4x4xf32>
    %c0_6 = arith.constant 0 : index
    %c1_7 = arith.constant 1 : index
    %c0_8 = arith.constant 0 : index
    %7 = vector.load %arg0[%c0_6, %c1_7, %c0_8] : memref<40x6x6xf32, #tpu.memory_space<vmem>>, vector<40x4x4xf32>
    %8 = arith.addf %6, %7 : vector<40x4x4xf32>
    %c0_9 = arith.constant 0 : index
    %c1_10 = arith.constant 1 : index
    %c1_11 = arith.constant 1 : index
    %9 = vector.load %arg0[%c0_9, %c1_10, %c1_11] : memref<40x6x6xf32, #tpu.memory_space<vmem>>, vector<40x4x4xf32>
    %10 = arith.addf %8, %9 : vector<40x4x4xf32>
    %c0_12 = arith.constant 0 : index
    %c1_13 = arith.constant 1 : index
    %c2_14 = arith.constant 2 : index
    %11 = vector.load %arg0[%c0_12, %c1_13, %c2_14] : memref<40x6x6xf32, #tpu.memory_space<vmem>>, vector<40x4x4xf32>
    %12 = arith.addf %10, %11 : vector<40x4x4xf32>
    %c0_15 = arith.constant 0 : index
    %c2_16 = arith.constant 2 : index
    %c0_17 = arith.constant 0 : index
    %13 = vector.load %arg0[%c0_15, %c2_16, %c0_17] : memref<40x6x6xf32, #tpu.memory_space<vmem>>, vector<40x4x4xf32>
    %14 = arith.addf %12, %13 : vector<40x4x4xf32>
    %c0_18 = arith.constant 0 : index
    %c2_19 = arith.constant 2 : index
    %c1_20 = arith.constant 1 : index
    %15 = vector.load %arg0[%c0_18, %c2_19, %c1_20] : memref<40x6x6xf32, #tpu.memory_space<vmem>>, vector<40x4x4xf32>
    %16 = arith.addf %14, %15 : vector<40x4x4xf32>
    %c0_21 = arith.constant 0 : index
    %c2_22 = arith.constant 2 : index
    %c2_23 = arith.constant 2 : index
    %17 = vector.load %arg0[%c0_21, %c2_22, %c2_23] : memref<40x6x6xf32, #tpu.memory_space<vmem>>, vector<40x4x4xf32>
    %18 = arith.addf %16, %17 : vector<40x4x4xf32>
    %cst_24 = arith.constant 0.111111112 : f32
    %19 = vector.broadcast %cst_24 : f32 to vector<40x4x4xf32>
    %20 = arith.mulf %18, %19 : vector<40x4x4xf32>
    %c0_25 = arith.constant 0 : index
    %c0_26 = arith.constant 0 : index
    %c0_27 = arith.constant 0 : index
    %21 = vector.load %arg1[%c0_25, %c0_26, %c0_27] : memref<40x4x4xf32, #tpu.memory_space<vmem>>, vector<40x4x4xf32>
    tpu.vector_store %arg1[%c0_25, %c0_26, %c0_27], %20 {strides = array<i32>} : memref<40x4x4xf32, #tpu.memory_space<vmem>>, vector<40x4x4xf32>,
    return
  }
}

module attributes {stable_mosaic.version = 11 : i64} {
  func.func @_matmul_kernel(%arg0: i32, %arg1: memref<24x24xbf16, #tpu.memory_space<vmem>>, %arg2: memref<24x32xbf16, #tpu.memory_space<vmem>>, %arg3: memref<24x1xf32, #tpu.memory_space<vmem>>, %arg4: memref<24x32xf32, #tpu.memory_space<vmem>>) attributes {dimension_semantics = [#tpu.dimension_semantics<parallel>], iteration_bounds = array<i64: 1>, scalar_prefetch = 0 : i64, scratch_operands = 0 : i64, tpu.core_type = #tpu.core_type<tc>, window_params = [{pipeline_mode = #tpu.pipeline_mode<synchronous>, transform_indices = @transform_0, window_bounds = array<i64: 24, 24>}, {transform_indices = @transform_1, window_bounds = array<i64: 24, 32>}, {pipeline_mode = #tpu.pipeline_mode<synchronous>, transform_indices = @transform_2, window_bounds = array<i64: 24, 1>}, {transform_indices = @transform_3, window_bounds = array<i64: 24, 32>}]} {
    %c0 = arith.constant 0 : index
    %c0_0 = arith.constant 0 : index
    %0 = vector.load %arg1[%c0, %c0_0] : memref<24x24xbf16, #tpu.memory_space<vmem>>, vector<24x24xbf16>
    %c0_1 = arith.constant 0 : index
    %c0_2 = arith.constant 0 : index
    %1 = vector.load %arg2[%c0_1, %c0_2] : memref<24x32xbf16, #tpu.memory_space<vmem>>, vector<24x32xbf16>
    %cst = arith.constant dense<0.000000e+00> : vector<24x32xf32>
    %2 = tpu.matmul %0, %1, %cst {dimension_numbers = #tpu.dot_dimension_numbers<[1], [0], [0], [1], [0, 0, 1, 1], [], []>} : vector<24x24xbf16>, vector<24x32xbf16>, vector<24x32xf32> -> vector<24x32xf32>
    %c0_3 = arith.constant 0 : index
    %c0_4 = arith.constant 0 : index
    %3 = vector.load %arg3[%c0_3, %c0_4] : memref<24x1xf32, #tpu.memory_space<vmem>>, vector<24x1xf32>
    %4 = vector.broadcast %3 : vector<24x1xf32> to vector<24x32xf32>
    %5 = arith.addf %2, %4 : vector<24x32xf32>
    %c0_5 = arith.constant 0 : index
    %c0_6 = arith.constant 0 : index
    %6 = vector.load %arg4[%c0_5, %c0_6] : memref<24x32xf32, #tpu.memory_space<vmem>>, vector<24x32xf32>
    tpu.vector_store %arg4[%c0_5, %c0_6], %5 {strides = array<i32>} : memref<24x32xf32, #tpu.memory_space<vmem>>, vector<24x32xf32>,
    return
  }
  func.func @transform_0(%arg0: i32) -> (i32, i32) {
    %c0_i32 = arith.constant 0 : i32
    %c0_i32_0 = arith.constant 0 : i32
    %c0_i32_1 = arith.constant 0 : i32
    return %c0_i32, %c0_i32_0 : i32, i32
  }
  func.func @transform_1(%arg0: i32) -> (i32, i32) {
    %c0_i32 = arith.constant 0 : i32
    %c0_i32_0 = arith.constant 0 : i32
    return %c0_i32, %arg0 : i32, i32
  }
  func.func @transform_2(%arg0: i32) -> (i32, i32) {
    %c0_i32 = arith.constant 0 : i32
    %c0_i32_0 = arith.constant 0 : i32
    %c0_i32_1 = arith.constant 0 : i32
    return %c0_i32, %c0_i32_0 : i32, i32
  }
  func.func @transform_3(%arg0: i32) -> (i32, i32) {
    %c0_i32 = arith.constant 0 : i32
    %c0_i32_0 = arith.constant 0 : i32
    return %c0_i32, %arg0 : i32, i32
  }
}

module attributes {stable_mosaic.version = 11 : i64} {
  func.func @_matmul_kernel(%arg0: i32, %arg1: memref<10x1408xbf16, #tpu.memory_space<vmem>>, %arg2: memref<1408x2xbf16, #tpu.memory_space<vmem>>, %arg3: memref<10x1xf32, #tpu.memory_space<vmem>>, %arg4: memref<10x2xf32, #tpu.memory_space<vmem>>) attributes {dimension_semantics = [#tpu.dimension_semantics<parallel>], iteration_bounds = array<i64: 1>, scalar_prefetch = 0 : i64, scratch_operands = 0 : i64, tpu.core_type = #tpu.core_type<tc>, window_params = [{pipeline_mode = #tpu.pipeline_mode<synchronous>, transform_indices = @transform_0, window_bounds = array<i64: 10, 1408>}, {transform_indices = @transform_1, window_bounds = array<i64: 1408, 2>}, {pipeline_mode = #tpu.pipeline_mode<synchronous>, transform_indices = @transform_2, window_bounds = array<i64: 10, 1>}, {transform_indices = @transform_3, window_bounds = array<i64: 10, 2>}]} {
    %c0 = arith.constant 0 : index
    %c0_0 = arith.constant 0 : index
    %0 = vector.load %arg1[%c0, %c0_0] : memref<10x1408xbf16, #tpu.memory_space<vmem>>, vector<10x1408xbf16>
    %c0_1 = arith.constant 0 : index
    %c0_2 = arith.constant 0 : index
    %1 = vector.load %arg2[%c0_1, %c0_2] : memref<1408x2xbf16, #tpu.memory_space<vmem>>, vector<1408x2xbf16>
    %cst = arith.constant dense<0.000000e+00> : vector<10x2xf32>
    %2 = tpu.matmul %0, %1, %cst {dimension_numbers = #tpu.dot_dimension_numbers<[1], [0], [0], [1], [0, 0, 1, 1], [], []>} : vector<10x1408xbf16>, vector<1408x2xbf16>, vector<10x2xf32> -> vector<10x2xf32>
    %c0_3 = arith.constant 0 : index
    %c0_4 = arith.constant 0 : index
    %3 = vector.load %arg3[%c0_3, %c0_4] : memref<10x1xf32, #tpu.memory_space<vmem>>, vector<10x1xf32>
    %4 = vector.broadcast %3 : vector<10x1xf32> to vector<10x2xf32>
    %5 = arith.addf %2, %4 : vector<10x2xf32>
    %c0_5 = arith.constant 0 : index
    %c0_6 = arith.constant 0 : index
    %6 = vector.load %arg4[%c0_5, %c0_6] : memref<10x2xf32, #tpu.memory_space<vmem>>, vector<10x2xf32>
    tpu.vector_store %arg4[%c0_5, %c0_6], %5 {strides = array<i32>} : memref<10x2xf32, #tpu.memory_space<vmem>>, vector<10x2xf32>,
    return
  }
  func.func @transform_0(%arg0: i32) -> (i32, i32) {
    %c0_i32 = arith.constant 0 : i32
    %c0_i32_0 = arith.constant 0 : i32
    %c0_i32_1 = arith.constant 0 : i32
    return %c0_i32, %c0_i32_0 : i32, i32
  }
  func.func @transform_1(%arg0: i32) -> (i32, i32) {
    %c0_i32 = arith.constant 0 : i32
    %c0_i32_0 = arith.constant 0 : i32
    return %c0_i32, %arg0 : i32, i32
  }
  func.func @transform_2(%arg0: i32) -> (i32, i32) {
    %c0_i32 = arith.constant 0 : i32
    %c0_i32_0 = arith.constant 0 : i32
    %c0_i32_1 = arith.constant 0 : i32
    return %c0_i32, %c0_i32_0 : i32, i32
  }
  func.func @transform_3(%arg0: i32) -> (i32, i32) {
    %c0_i32 = arith.constant 0 : i32
    %c0_i32_0 = arith.constant 0 : i32
    return %c0_i32, %arg0 : i32, i32
  }
}

</mosaic_0001>

<bundles_post_ra>
// kernel: net_forward.15
= control target key start
LH: loop header
LB: loop body
LE: loop exit
PB: predicated region body
PF: predicated region fallthrough
CT: control target
= control target key end

     0   :  { %s592_s12 = smov 0   ;;  %s594_s13 = smov 0   ;;  %s665_s0 = inlined_call_operand.vmem [shape: bf16[10,32], index: 0, kind: input, shape index: {}]   ;;  %s666_s1 = inlined_call_operand.vmem [shape: bf16[32,1152], index: 1, kind: input, shape index: {}]   ;;  %s667_s2 = inlined_call_operand.vmem [shape: f32[10,1], index: 2, kind: input, shape index: {}]   ;;  %s668_s3 = inlined_call_operand.vmem [shape: f32[10,1152], index: 3, kind: output, shape index: {}]  }
   0x1   :  { %s596_s14 = smov 0  }
   0x2 LB: > { %s467_s15 = sadd.s32 4294967295, %s567_s14   ;;  %s609_s16 = sadd.s32 1, %s567_s14   ;;  %s567_s14 = sphi %s596_s14, %s672_s14   ;;  %s563_s13 = sphi %s594_s13, %s671_s13   ;;  %s559_s12 = sphi %s592_s12, %s670_s12  }
   0x3   : > { %s38_s17 = ssub.s32 %s567_s14, %s609_s16  ;;  %s41_s18 = sadd.s32 1, %s563_s13 }
   0x4   : > { %p39_p0 = scmp.eq.s32.totalorder %s38_s17, 0  ;;  %p48_p1 = scmp.ne.s32.totalorder %s563_s13, %s559_s12 }
   0x5   : > { %p49_p2 = scmp.eq.s32.totalorder %s567_s14, 0  ;;  %p99_p3 = scmp.eq.s32.totalorder %s467_s15, 2 }
   0x6   : > { %s620_s19 = scalar_select %p39_p0, %s563_s13, %s41_s18  }
   0x7   : > { %p50_p4 = por %p49_p2, %p48_p1  ;;  %p622_p5 = por %p99_p3, %p48_p1 }
   0x8   : > { %p470_p6 = scmp.ge.s32.totalorder %s567_s14, 3 }
   0xa   : > { %127 = sbr.rel (%p470_p6) target bundleno = 26 (0x1a), region = 24 }
  0x11   : > { %130 = sbr.rel (!%p50_p4) target bundleno = 26 (0x1a), region = 28  ;;  %s132_s21 = sand.u32 (%p50_p4), 1, %s563_s13  }
  0x12   : > { %s493_s22 = smul.u32 (%p50_p4), 12, %s567_s14 }
  0x13   : > { %s506_s23 = smul.u32 (%p50_p4), 48, %s132_s21 }
  0x14   : > { %s137_s26 = scalar_lea.vmem (%p50_p4), %s666_s1, %s493_s22 }
  0x15   : > { %v152_v0 = vld [vmem:[%s137_s26] sm:$0xff] (%p50_p4)  ;;  %v156_v2 = vld [vmem:[%s137_s26 + $0x48] sm:$0xff] (%p50_p4)  ;;  %s134_s27 = scalar_lea.vmem (%p50_p4), [#allocation2], %s506_s23  ;;  %v476_v6 = vld [vmem:[%s137_s26 + $0x50] sm:$0xf] (%p50_p4) }
  0x16   : > { %v154_v1 = vld [vmem:[%s137_s26 + $0x24] sm:$0xff] (%p50_p4)  ;;  %153 = vst [vmem:[%s134_s27] sm:$0xff] (%p50_p4), %v152_v0  ;;  %157 = vst [vmem:[%s134_s27 + $0x18] sm:$0xff] (%p50_p4), %v156_v2  ;;  %v158_v3 = vld [vmem:[%s137_s26 + $0x6c] sm:$0xff] (%p50_p4) }
  0x17   : > { %155 = vst [vmem:[%s134_s27 + $0xc] sm:$0xff] (%p50_p4), %v154_v1  ;;  %v472_v4 = vld [vmem:[%s137_s26 + $0x8] sm:$0xf] (%p50_p4)  ;;  %v474_v5 = vld [vmem:[%s137_s26 + $0x2c] sm:$0xf] (%p50_p4)  ;;  %159 = vst [vmem:[%s134_s27 + $0x24] sm:$0xff] (%p50_p4), %v158_v3 }
  0x18   : > { %473 = vst [vmem:[%s134_s27 + $0x8] sm:$0xf] %v472_v4  ;;  %475 = vst [vmem:[%s134_s27 + $0x14] sm:$0xf] %v474_v5  ;;  %v478_v7 = vld [vmem:[%s137_s26 + $0x74] sm:$0xf] }
  0x19   : > { %477 = vst [vmem:[%s134_s27 + $0x20] sm:$0xf] %v476_v6  ;;  %479 = vst [vmem:[%s134_s27 + $0x2c] sm:$0xf] %v478_v7 }
  0x1a PF: > { %p480_p7 = scmp.ge.s32.totalorder %s567_s14, 1  ;;  %p179_p8 = scmp.lt.s32.totalorder %s567_s14, 4 }
  0x1c   : > { %p180_p9 = pnand %p480_p7, %p179_p8 }
  0x1d   : > { %s186_s28 = sand.u32 (!%p180_p9), 1, %s559_s12   ;;  %v569_v8 = vmov (!%p180_p9), 0.0   ;;  %vm570_vm0 = vmmov (!%p180_p9), 0   ;;  %v571_v9 = vmov (!%p180_p9), 0   ;;  %v221_v10 = vld [vmem:[%s667_s2] sm:$0xff] (!%p180_p9)  ;;  %vm270_vm1 = vcmask (!%p180_p9), 261120  }
  0x1e   : > { %183 = sbr.rel (%p180_p9) target bundleno = 271 (0x10f), region = 54  ;;  %498 = vmatprep.subr.bf16.mxu1 (!%p180_p9), %v569_v8  ;;  %502 = vmatprep.mubr.msk.bf16.mxu1 (!%p180_p9), %vm570_vm0, %v569_v8  ;;  %v222_v11 = vld [vmem:[%s667_s2 + $0x8] sm:$0x3] (!%p180_p9)  ;;  %v544_v18 = vld [vmem:[%s665_s0] sm:$0x1f] (!%p180_p9)  }
  0x1f   : > { %s635_s29 = smul.u32 (!%p180_p9), 48, %s186_s28  ;;  %306 = vmatprep.mubr.bf16.mxu0 (!%p180_p9), %v571_v9  ;;  %535 = vset.pattern.permute.xlu0 (!%p180_p9), %v571_v9 }
  0x20   : > { %225 = vperm.xlu0 (!%p180_p9), %535, %v221_v10  }
  0x21   : > { %s188_s7 = scalar_lea.vmem (!%p180_p9), [#allocation2], %s635_s29  ;;  %s207_s10 = scalar_lea.vmem (!%p180_p9), [#allocation3], %s635_s29 }
  0x22   : > { %v536_v12 = vld [vmem:[%s188_s7 + $0x4] ss:$12 sps:$4 sm:$0xff] (!%p180_p9)   ;;  %v538_v13 = vld [vmem:[%s188_s7 + $0x8] ss:$12 sps:$4 sm:$0xff] (!%p180_p9)   ;;  %v539_v14 = vld [vmem:[%s188_s7] ss:$12 sps:$4 sm:$0xff] (!%p180_p9)  }
  0x23   : > { %274 = vmatprep.subr.bf16.mxu0 (!%p180_p9), %v536_v12  ;;  %499 = vmatpush3.bf16.msra.mxu1 (!%p180_p9), %v538_v13  ;;  %v540_v15 = vld [vmem:[%s188_s7 + $0x1c] ss:$12 sps:$4 sm:$0xff] (!%p180_p9)   ;;  %v542_v16 = vld [vmem:[%s188_s7 + $0x20] ss:$12 sps:$4 sm:$0xff] (!%p180_p9)   ;;  %v543_v17 = vld [vmem:[%s188_s7 + $0x18] ss:$12 sps:$4 sm:$0xff] (!%p180_p9)  }
  0x24   : > { %230 = vperm.xlu0 (!%p180_p9), %535, %v222_v11   ;;  %275 = vmatpush1.bf16.msra.mxu0 (!%p180_p9), %v539_v14 }
  0x25   : > { %500 = vmatprep.subr.bf16.mxu1 %v569_v8  ;;  %276 = vmatprep.subr.bf16.mxu0 %v540_v15  ;;  %s494_s11 = smul.u32 (%p622_p5), 24, %s467_s15 }
  0x27   : > { %501 = vmatpush3.bf16.msra.mxu1 %v542_v16  ;;  %s379_s18 = scalar_lea.vmem (%p622_p5), %s668_s3, %s494_s11 }
  0x28   : > { %277 = vmatpush1.bf16.msra.mxu0 %v543_v17 }
  0x2a   : > { %503 = vmatmul.mubr.msk.bf16.vlgmr.msra.gmra.mrb[0].mxu1 %vm270_vm1, %v544_v18 }
  0x2b   : > { %488 = vmatmul.mubr.msk.bf16.vlgmr.msra.gmra.mrb[0].mxu0 %vm270_vm1, %v544_v18 }
  0x9f   : > { %v226_v19 = vpop.permute.xlu0 %225 }
  0xa3   : > { %v231_v20 = vpop.permute.xlu0 %230 }
  0xfd   : > { %v351_v21 = vpop.f32.mrb[0].mxu1 }
  0xfe   : > { %v352_v22 = vadd.f32 %v351_v21, %v226_v19  ;;  %v308_v23 = vpop.f32.mrb[0].mxu0  ;;  %v504_v24 = vpop.f32.mrb[1].mxu1 }
  0xff   : > { %v309_v25 = vadd.f32 %v308_v23, %v226_v19  ;;  %v310_v26 = vpop.f32.mrb[1].mxu0  ;;  %v354_v27 = vpop.f32.mrb[2].mxu1 }
 0x100   : > { %v360_v28 = vmax.f32 %v352_v22, 0.0  ;;  %v311_v29 = vadd.f32 %v310_v26, %v226_v19  ;;  %v355_v30 = vadd.f32 %v354_v27, %v231_v20  ;;  %v312_v31 = vpop.f32.mrb[2].mxu0  ;;  %v505_v32 = vpop.f32.mrb[3].mxu1  ;;  %376 = sbr.rel (!%p622_p5) target bundleno = 271 (0x10f), region = 62 }
 0x101   : > { %v358_v33 = vmax.f32 %v309_v25, 0.0  ;;  %v313_v34 = vadd.f32 %v312_v31, %v231_v20  ;;  %v314_v35 = vpop.f32.mrb[3].mxu0 }
 0x102   : > { %366 = vst [vmem:[%s207_s10 + $0x10] sm:$0xff] %v360_v28  ;;  %v359_v36 = vmax.f32 %v311_v29, 0.0  ;;  %v363_v37 = vmax.f32 %v355_v30, 0.0  ;;  %v315_v38 = vadd.f32 %v314_v35, %v231_v20 }
 0x103   : > { %364 = vst [vmem:[%s207_s10] sm:$0xff] %v358_v33  ;;  %v361_v39 = vmax.f32 %v313_v34, 0.0 }
 0x104   : > { %365 = vst [vmem:[%s207_s10 + $0x8] sm:$0xff] %v359_v36  ;;  %369 = vst [vmem:[%s207_s10 + $0x28] sm:$0x3] %v363_v37  ;;  %v362_v40 = vmax.f32 %v315_v38, 0.0 }
 0x105   : > { %367 = vst [vmem:[%s207_s10 + $0x18] sm:$0x3] %v361_v39 }
 0x106   : > { %368 = vst [vmem:[%s207_s10 + $0x20] sm:$0x3] %v362_v40 }
 0x109   : > { %v396_v43 = vld [vmem:[%s207_s10 + $0x10] sm:$0xff] }
 0x10a   : > { %v392_v41 = vld [vmem:[%s207_s10] sm:$0xff]  ;;  %397 = vst [vmem:[%s379_s18 + $0x10] sm:$0xff] %v396_v43 }
 0x10b   : > { %v394_v42 = vld [vmem:[%s207_s10 + $0x8] sm:$0xff]  ;;  %393 = vst [vmem:[%s379_s18] sm:$0xff] %v392_v41 }
 0x10c   : > { %v398_v44 = vld [vmem:[%s207_s10 + $0x18] sm:$0xff]  ;;  %v402_v46 = vld [vmem:[%s207_s10 + $0x28] sm:$0xff]  ;;  %395 = vst [vmem:[%s379_s18 + $0x8] sm:$0xff] %v394_v42 }
 0x10d   : > { %v400_v45 = vld [vmem:[%s207_s10 + $0x20] sm:$0xff]  ;;  %399 = vst [vmem:[%s379_s18 + $0x48] sm:$0xff] %v398_v44  ;;  %403 = vst [vmem:[%s379_s18 + $0x58] sm:$0xff] %v402_v46 }
 0x10e   : > { %401 = vst [vmem:[%s379_s18 + $0x50] sm:$0xff] %v400_v45 }
 0x10f PF: > { %p10_p10 = scmp.ge.s32.totalorder %s609_s16, 5   ;;  %s670_s12 = smov %s563_s13 }
 0x110   : > { %s671_s13 = smov %s620_s19  ;;  %s672_s14 = smov %s609_s16 }
 0x111   :  { %12 = sbr.rel (!%p10_p10) target bundleno = 2 (0x2), region = 122 }

// kernel: net_forward.18
= control target key start
LH: loop header
LB: loop body
LE: loop exit
PB: predicated region body
PF: predicated region fallthrough
CT: control target
= control target key end

     0   :  { %v176_v0 = vmov 0.0   ;;  %vm177_vm0 = vmmov 0   ;;  %v178_v3 = vmov 0   ;;  %vm54_vm1 = vcmask 130048   ;;  %s237_s1 = inlined_call_operand.vmem [shape: bf16[16,288], index: 1, kind: input, shape index: {}]   ;;  %s238_s0 = inlined_call_operand.vmem [shape: bf16[16,16], index: 0, kind: input, shape index: {}]   ;;  %s239_s2 = inlined_call_operand.vmem [shape: f32[16,1], index: 2, kind: input, shape index: {}]   ;;  %s240_s3 = inlined_call_operand.vmem [shape: f32[16,288], index: 3, kind: output, shape index: {}]  }
   0x1   :  { %161 = vmatprep.subr.bf16.mxu1 %v176_v0  ;;  %v171_v1 = vld [vmem:[%s237_s1 + $0x4] ss:$12 sps:$4 sm:$0xff]   ;;  %163 = vmatprep.mubr.msk.bf16.mxu1 %vm177_vm0, %v176_v0  ;;  %v173_v2 = vld [vmem:[%s237_s1 + $0x8] ss:$12 sps:$4 sm:$0xff]   ;;  %v174_v4 = vld [vmem:[%s237_s1] ss:$12 sps:$4 sm:$0xff]  }
   0x2   :  { %90 = vmatprep.mubr.bf16.mxu0 %v178_v3  ;;  %170 = vset.pattern.permute.xlu0 %v178_v3  ;;  %v175_v5 = vld [vmem:[%s238_s0] sm:$0xff]   ;;  %v22_v7 = vld [vmem:[%s239_s2 + $0x8] sm:$0xff]  ;;  %vm144_vm2 = vcmask 261120  }
   0x3   :  { %58 = vmatprep.subr.bf16.mxu0 %v171_v1  ;;  %162 = vmatpush3.bf16.msra.mxu1 %v173_v2  ;;  %v21_v6 = vld [vmem:[%s239_s2] sm:$0xff] }
   0x4   :  { %59 = vmatpush1.bf16.msra.mxu0 %v174_v4  ;;  %25 = vperm.xlu0 %170, %v21_v6  }
   0x6   :  { %164 = vmatmul.mubr.msk.bf16.vlgmr.msra.gmra.mrb[0].mxu1 %vm54_vm1, %v175_v5 }
   0x7   :  { %157 = vmatmul.mubr.msk.bf16.vlgmr.msra.gmra.mrb[0].mxu0 %vm54_vm1, %v175_v5 }
   0x8   :  { %30 = vperm.xlu0 %170, %v22_v7  }
  0x83   :  { %v26_v8 = vpop.permute.xlu0 %25 }
  0x87   :  { %v31_v9 = vpop.permute.xlu0 %30 }
  0xd9   :  { %v135_v10 = vpop.f32.mrb[0].mxu1 }
  0xda   :  { %v136_v11 = vadd.f32 %v135_v10, %v26_v8  ;;  %v92_v12 = vpop.f32.mrb[0].mxu0  ;;  %v165_v13 = vpop.f32.mrb[1].mxu1 }
  0xdb   :  { %v93_v14 = vadd.f32 %v92_v12, %v26_v8  ;;  %v94_v15 = vpop.f32.mrb[1].mxu0  ;;  %v138_v16 = vpop.f32.mrb[2].mxu1 }
  0xdc   :  { %145 = vst.msk [vmem:[%s240_s3 + $0x10] sm:$0xff] %vm144_vm2, %v136_v11  ;;  %v95_v17 = vadd.f32 %v94_v15, %v26_v8  ;;  %v139_v18 = vadd.f32 %v138_v16, %v31_v9  ;;  %v96_v19 = vpop.f32.mrb[2].mxu0  ;;  %v166_v20 = vpop.f32.mrb[3].mxu1 }
  0xdd   :  { %142 = vst [vmem:[%s240_s3] sm:$0xff] %v93_v14  ;;  %v97_v21 = vadd.f32 %v96_v19, %v31_v9  ;;  %v98_v22 = vpop.f32.mrb[3].mxu0 }
  0xde   :  { %143 = vst [vmem:[%s240_s3 + $0x8] sm:$0xff] %v95_v17  ;;  %148 = vst.msk [vmem:[%s240_s3 + $0x28] sm:$0xff] %vm144_vm2, %v139_v18  ;;  %v99_v23 = vadd.f32 %v98_v22, %v31_v9 }
  0xdf   :  { %146 = vst [vmem:[%s240_s3 + $0x18] sm:$0xff] %v97_v21 }
  0xe0   :  { %147 = vst [vmem:[%s240_s3 + $0x20] sm:$0xff] %v99_v23 }

// kernel: net_forward.19
= control target key start
LH: loop header
LB: loop body
LE: loop exit
PB: predicated region body
PF: predicated region fallthrough
CT: control target
= control target key end

     0   :  { %v1032_v1 = vmov 0   ;;  %vm571_vm0 = vcmask 130048   ;;  %vm778_vm1 = vcmask 261120   ;;  %s1355_s1 = inlined_call_operand.vmem [shape: bf16[400,288], index: 1, kind: input, shape index: {}]   ;;  %s1356_s0 = inlined_call_operand.vmem [shape: bf16[24,400], index: 0, kind: input, shape index: {}]   ;;  %s1357_s2 = inlined_call_operand.vmem [shape: f32[24,1], index: 2, kind: input, shape index: {}]   ;;  %s1358_s3 = inlined_call_operand.vmem [shape: f32[24,288], index: 3, kind: output, shape index: {}]  }
   0x1   :  { %v922_v0 = vld [vmem:[%s1355_s1 + $0x4] ss:$12 sps:$4 sm:$0xff]   ;;  %920 = vset.pattern.permute.xlu0 %v1032_v1  ;;  %921 = vset.pattern.permute.xlu1 %v1032_v1  ;;  %v924_v2 = vld [vmem:[%s1355_s1 + $0xc8] ss:$12 sps:$4 sm:$0xff]   ;;  %v925_v3 = vld [vmem:[%s1355_s1] ss:$12 sps:$4 sm:$0xff]  }
   0x2   :  { %578 = vmatprep.subr.bf16.mxu0 %v922_v0  ;;  %877 = vmatprep.subr.bf16.mxu1 %v924_v2  ;;  %v926_v4 = vld [vmem:[%s1355_s1 + $0x8] ss:$12 sps:$4 sm:$0xff]   ;;  %v929_v6 = vld [vmem:[%s1355_s1 + $0xe0] ss:$12 sps:$4 sm:$0xff]   ;;  %v930_v7 = vld [vmem:[%s1355_s1 + $0x18] ss:$12 sps:$4 sm:$0xff]  }
   0x3   :  { %579 = vmatpush1.bf16.msra.mxu0 %v925_v3  ;;  %v927_v5 = vld [vmem:[%s1355_s1 + $0x1c] ss:$12 sps:$4 sm:$0xff]   ;;  %878 = vmatpush3.bf16.msra.mxu1 %v926_v4  ;;  %v931_v8 = vld [vmem:[%s1355_s1 + $0x20] ss:$12 sps:$4 sm:$0xff]   ;;  %v934_v10 = vld [vmem:[%s1355_s1 + $0xf8] ss:$12 sps:$4 sm:$0xff]  }
   0x4   :  { %580 = vmatprep.subr.bf16.mxu0 %v927_v5  ;;  %879 = vmatprep.subr.bf16.mxu1 %v929_v6  ;;  %v932_v9 = vld [vmem:[%s1355_s1 + $0x34] ss:$12 sps:$4 sm:$0xff]   ;;  %v935_v11 = vld [vmem:[%s1355_s1 + $0x30] ss:$12 sps:$4 sm:$0xff]   ;;  %v936_v12 = vld [vmem:[%s1355_s1 + $0x38] ss:$12 sps:$4 sm:$0xff]  }
   0x5   :  { %v937_v13 = vld [vmem:[%s1355_s1 + $0x4c] ss:$12 sps:$4 sm:$0xff]   ;;  %v939_v14 = vld [vmem:[%s1355_s1 + $0x110] ss:$12 sps:$4 sm:$0xff]   ;;  %v940_v15 = vld [vmem:[%s1355_s1 + $0x48] ss:$12 sps:$4 sm:$0xff]  }
   0x6   :  { %v941_v16 = vld [vmem:[%s1355_s1 + $0x50] ss:$12 sps:$4 sm:$0xff]   ;;  %v944_v18 = vld [vmem:[%s1355_s1 + $0x128] ss:$12 sps:$4 sm:$0xff]   ;;  %v945_v19 = vld [vmem:[%s1355_s1 + $0x60] ss:$12 sps:$4 sm:$0xff]  }
   0x7   :  { %581 = vmatpush1.bf16.msra.mxu0 %v930_v7  ;;  %880 = vmatpush3.bf16.msra.mxu1 %v931_v8  ;;  %v942_v17 = vld [vmem:[%s1355_s1 + $0x64] ss:$12 sps:$4 sm:$0xff]   ;;  %v946_v20 = vld [vmem:[%s1355_s1 + $0x68] ss:$12 sps:$4 sm:$0xff]   ;;  %v949_v22 = vld [vmem:[%s1355_s1 + $0x140] ss:$12 sps:$4 sm:$0xff]  }
   0x8   :  { %582 = vmatprep.subr.bf16.mxu0 %v932_v9  ;;  %881 = vmatprep.subr.bf16.mxu1 %v934_v10  ;;  %v947_v21 = vld [vmem:[%s1355_s1 + $0x7c] ss:$12 sps:$4 sm:$0xff]   ;;  %v950_v23 = vld [vmem:[%s1355_s1 + $0x78] ss:$12 sps:$4 sm:$0xff]   ;;  %v951_v24 = vld [vmem:[%s1355_s1 + $0x80] ss:$12 sps:$4 sm:$0xff]  }
   0x9   :  { %v952_v25 = vld [vmem:[%s1355_s1 + $0x94] ss:$12 sps:$4 sm:$0xff]   ;;  %v954_v26 = vld [vmem:[%s1355_s1 + $0x158] ss:$12 sps:$4 sm:$0xff]   ;;  %v955_v27 = vld [vmem:[%s1355_s1 + $0x90] ss:$12 sps:$4 sm:$0xff]  }
   0xa   :  { %v956_v28 = vld [vmem:[%s1355_s1 + $0x98] ss:$12 sps:$4 sm:$0xff]   ;;  %v959_v30 = vld [vmem:[%s1355_s1 + $0x170] ss:$12 sps:$4 sm:$0xff]   ;;  %v960_v31 = vld [vmem:[%s1355_s1 + $0xa8] ss:$12 sps:$4 sm:$0xff]  }
   0xb   :  { %583 = vmatpush1.bf16.msra.mxu0 %v935_v11  ;;  %882 = vmatpush3.bf16.msra.mxu1 %v936_v12  ;;  %v957_v29 = vld [vmem:[%s1355_s1 + $0xac] ss:$12 sps:$4 sm:$0xff]   ;;  %v961_v32 = vld [vmem:[%s1355_s1 + $0xb0] ss:$12 sps:$4 sm:$0xff]   ;;  %v966_v33 = vld [vmem:[%s1356_s0 + $0x4] ss:$16 sps:$4 sm:$0xff]  }
   0xc   :  { %584 = vmatprep.subr.bf16.mxu0 %v937_v13  ;;  %883 = vmatprep.subr.bf16.mxu1 %v939_v14  ;;  %v962_v34 = vld [vmem:[%s1355_s1 + $0xc4] ss:$12 sps:$4 sm:$0xff]   ;;  %v967_v36 = vld [vmem:[%s1355_s1 + $0xc0] ss:$12 sps:$4 sm:$0xff]   ;;  %v968_v37 = vld [vmem:[%s1355_s1 + $0x188] ss:$12 sps:$4 sm:$0xff]  }
   0xd   :  { %712 = vmatprep.mubr.bf16.mxu1 %v966_v33  ;;  %v1160_v35 = vld [vmem:[%s1356_s0] ss:$16 sps:$4 sm:$0xff]   ;;  %610 = vmatprep.mubr.bf16.mxu0 %v966_v33  ;;  %v969_v38 = vld [vmem:[%s1355_s1 + $0xdc] ss:$12 sps:$4 sm:$0xff]   ;;  %v971_v39 = vld [vmem:[%s1355_s1 + $0xd8] ss:$12 sps:$4 sm:$0xff]  }
   0xe   :  { %v972_v40 = vld [vmem:[%s1355_s1 + $0x1a0] ss:$12 sps:$4 sm:$0xff]   ;;  %v975_v42 = vld [vmem:[%s1355_s1 + $0xf0] ss:$12 sps:$4 sm:$0xff]   ;;  %v976_v43 = vld [vmem:[%s1355_s1 + $0x1b8] ss:$12 sps:$4 sm:$0xff]  }
   0xf   :  { %585 = vmatpush1.bf16.msra.mxu0 %v940_v15  ;;  %884 = vmatpush3.bf16.msra.mxu1 %v941_v16  ;;  %v973_v41 = vld [vmem:[%s1355_s1 + $0xf4] ss:$12 sps:$4 sm:$0xff]   ;;  %v977_v44 = vld [vmem:[%s1355_s1 + $0x10c] ss:$12 sps:$4 sm:$0xff]   ;;  %v980_v47 = vld [vmem:[%s1355_s1 + $0x1d0] ss:$12 sps:$4 sm:$0xff]  }
  0x10   :  { %586 = vmatprep.subr.bf16.mxu0 %v942_v17  ;;  %885 = vmatprep.subr.bf16.mxu1 %v944_v18  ;;  %v979_v45 = vld [vmem:[%s1355_s1 + $0x108] ss:$12 sps:$4 sm:$0xff]   ;;  %v19_v46 = vld [vmem:[%s1356_s0 + $0x20] sm:$0xff]  ;;  %v1005_v54 = vld [vmem:[%s1356_s0 + $0xc] ss:$16 sps:$4 sm:$0xff]  }
  0x11   :  { %v981_v48 = vld [vmem:[%s1355_s1 + $0x124] ss:$12 sps:$4 sm:$0xff]   ;;  %v795_v49 = vcombine.high %v19_v46, %v19_v46  ;;  %v1205_v50 = vcombine.low %v19_v46, %v19_v46  ;;  %v983_v51 = vld [vmem:[%s1355_s1 + $0x120] ss:$12 sps:$4 sm:$0xff]   ;;  %v984_v52 = vld [vmem:[%s1355_s1 + $0x1e8] ss:$12 sps:$4 sm:$0xff]  }
  0x12   :  { %v985_v53 = vld [vmem:[%s1355_s1 + $0x13c] ss:$12 sps:$4 sm:$0xff]   ;;  %v987_v55 = vld [vmem:[%s1355_s1 + $0x138] ss:$12 sps:$4 sm:$0xff]   ;;  %v988_v56 = vld [vmem:[%s1355_s1 + $0x200] ss:$12 sps:$4 sm:$0xff]  }
  0x13   :  { %587 = vmatpush1.bf16.msra.mxu0 %v945_v19  ;;  %886 = vmatpush3.bf16.msra.mxu1 %v946_v20  ;;  %v989_v57 = vld [vmem:[%s1355_s1 + $0x154] ss:$12 sps:$4 sm:$0xff]   ;;  %v991_v58 = vld [vmem:[%s1355_s1 + $0x150] ss:$12 sps:$4 sm:$0xff]   ;;  %v992_v59 = vld [vmem:[%s1355_s1 + $0x218] ss:$12 sps:$4 sm:$0xff]  }
  0x14   :  { %588 = vmatprep.subr.bf16.mxu0 %v947_v21  ;;  %887 = vmatprep.subr.bf16.mxu1 %v949_v22  ;;  %v994_v60 = vld [vmem:[%s1355_s1 + $0x16c] ss:$12 sps:$4 sm:$0xff]   ;;  %v997_v61 = vld [vmem:[%s1355_s1 + $0x168] ss:$12 sps:$4 sm:$0xff]   ;;  %v998_v62 = vld [vmem:[%s1355_s1 + $0x230] ss:$12 sps:$4 sm:$0xff]  }
  0x15   :  { %v1001_v63 = vld [vmem:[%s1355_s1 + $0x184] ss:$12 sps:$4 sm:$0xff]   ;;  %v122_v3 = vld [vmem:[%s1357_s2 + $0x8] sm:$0xff]  ;;  %v1023_v19 = vld [vmem:[%s1355_s1 + $0x214] ss:$12 sps:$4 sm:$0xff]  }
  0x16   :  { %v121_v0 = vld [vmem:[%s1357_s2] sm:$0xff]  ;;  %v123_v2 = vld [vmem:[%s1357_s2 + $0x10] sm:$0xff]  ;;  %v1008_v6 = vld [vmem:[%s1355_s1 + $0x19c] ss:$12 sps:$4 sm:$0xff]  }
  0x17   :  { %589 = vmatpush1.bf16.msra.mxu0 %v950_v23  ;;  %888 = vmatpush3.bf16.msra.mxu1 %v951_v24  ;;  %v999_v4 = vld [vmem:[%s1355_s1 + $0x180] ss:$12 sps:$4 sm:$0xff]   ;;  %v1002_v5 = vld [vmem:[%s1355_s1 + $0x248] ss:$12 sps:$4 sm:$0xff]   ;;  %v1006_v9 = vld [vmem:[%s1355_s1 + $0x198] ss:$12 sps:$4 sm:$0xff]  }
  0x18   :  { %590 = vmatprep.subr.bf16.mxu0 %v952_v25  ;;  %889 = vmatprep.subr.bf16.mxu1 %v954_v26  ;;  %v20_v7 = vld [vmem:[%s1356_s0 + $0x28] sm:$0xff]  ;;  %v1009_v11 = vld [vmem:[%s1355_s1 + $0x1b0] ss:$12 sps:$4 sm:$0xff]   ;;  %v1018_v18 = vld [vmem:[%s1355_s1 + $0x1f8] ss:$12 sps:$4 sm:$0xff]  }
  0x19   :  { %126 = vperm.xlu0 %920, %v121_v0   ;;  %136 = vperm.xlu1 %921, %v123_v2   ;;  %v1003_v8 = vld [vmem:[%s1356_s0 + $0x8] ss:$16 sps:$4 sm:$0xff]   ;;  %v797_v10 = vcombine.high %v20_v7, %v20_v7  ;;  %v796_v14 = vcombine.low %v20_v7, %v20_v7  ;;  %v1017_v15 = vld [vmem:[%s1355_s1 + $0x1e4] ss:$12 sps:$4 sm:$0xff]   ;;  %v1015_v16 = vld [vmem:[%s1355_s1 + $0x1e0] ss:$12 sps:$4 sm:$0xff]  }
  0x1a   :  { %v1014_v12 = vld [vmem:[%s1355_s1 + $0x1cc] ss:$12 sps:$4 sm:$0xff]   ;;  %v1012_v13 = vld [vmem:[%s1355_s1 + $0x1c8] ss:$12 sps:$4 sm:$0xff]   ;;  %v1021_v20 = vld [vmem:[%s1355_s1 + $0x210] ss:$12 sps:$4 sm:$0xff]  }
  0x1b   :  { %591 = vmatpush1.bf16.msra.mxu0 %v955_v27  ;;  %890 = vmatpush3.bf16.msra.mxu1 %v956_v28  ;;  %v1020_v17 = vld [vmem:[%s1355_s1 + $0x1fc] ss:$12 sps:$4 sm:$0xff]   ;;  %v1026_v21 = vld [vmem:[%s1355_s1 + $0x22c] ss:$12 sps:$4 sm:$0xff]   ;;  %v1029_v23 = vld [vmem:[%s1355_s1 + $0x244] ss:$12 sps:$4 sm:$0xff]  }
  0x1c   :  { %592 = vmatprep.subr.bf16.mxu0 %v957_v29  ;;  %891 = vmatprep.subr.bf16.mxu1 %v959_v30  ;;  %v1024_v22 = vld [vmem:[%s1355_s1 + $0x228] ss:$12 sps:$4 sm:$0xff]   ;;  %v1027_v24 = vld [vmem:[%s1355_s1 + $0x240] ss:$12 sps:$4 sm:$0xff]  }
  0x1d   :  { %131 = vperm.xlu0 %920, %v122_v3  }
  0x1f   :  { %593 = vmatpush1.bf16.msra.mxu0 %v960_v31  ;;  %892 = vmatpush3.bf16.msra.mxu1 %v961_v32 }
  0x20   :  { %594 = vmatprep.subr.bf16.mxu0 %v962_v34  ;;  %728 = vmatprep.subr.bf16.mxu1 %v1032_v1 }
  0x22   :  { %713 = vmatmul.mubr.bf16.vlgmr.msra.gmra.mrb[0].mxu1 %v1160_v35 }
  0x23   :  { %595 = vmatpush1.bf16.msra.mxu0 %v967_v36  ;;  %729 = vmatpush1.bf16.msra.mxu1 %v968_v37 }
  0x24   :  { %596 = vmatprep.subr.bf16.mxu0 %v969_v38  ;;  %730 = vmatprep.subr.bf16.mxu1 %v1032_v1 }
  0x25   :  { %720 = vmatprep.mubr.bf16.mxu1 %v795_v49 }
  0x27   :  { %597 = vmatpush1.bf16.msra.mxu0 %v971_v39  ;;  %731 = vmatpush1.bf16.msra.mxu1 %v972_v40 }
  0x28   :  { %598 = vmatprep.subr.bf16.mxu0 %v973_v41  ;;  %732 = vmatprep.subr.bf16.mxu1 %v1032_v1 }
  0x2a   :  { %721 = vmatmul.mubr.bf16.gmra.mrb[4].mxu1 %v1205_v50 }
  0x2b   :  { %599 = vmatpush1.bf16.msra.mxu0 %v975_v42  ;;  %733 = vmatpush1.bf16.msra.mxu1 %v976_v43 }
  0x2c   :  { %600 = vmatprep.subr.bf16.mxu0 %v977_v44  ;;  %734 = vmatprep.subr.bf16.mxu1 %v1032_v1 }
  0x2d   :  { %875 = vmatprep.mubr.msk.bf16.mxu1 %vm571_vm0, %v1005_v54 }
  0x2f   :  { %601 = vmatpush1.bf16.msra.mxu0 %v979_v45  ;;  %735 = vmatpush1.bf16.msra.mxu1 %v980_v47 }
  0x30   :  { %602 = vmatprep.subr.bf16.mxu0 %v981_v48  ;;  %736 = vmatprep.subr.bf16.mxu1 %v1032_v1 }
  0x33   :  { %603 = vmatpush1.bf16.msra.mxu0 %v983_v51  ;;  %737 = vmatpush1.bf16.msra.mxu1 %v984_v52 }
  0x34   :  { %604 = vmatprep.subr.bf16.mxu0 %v985_v53  ;;  %738 = vmatprep.subr.bf16.mxu1 %v1032_v1 }
  0x37   :  { %605 = vmatpush1.bf16.msra.mxu0 %v987_v55  ;;  %739 = vmatpush1.bf16.msra.mxu1 %v988_v56 }
  0x38   :  { %606 = vmatprep.subr.bf16.mxu0 %v989_v57  ;;  %740 = vmatprep.subr.bf16.mxu1 %v1032_v1 }
  0x3b   :  { %607 = vmatpush1.bf16.msra.mxu0 %v991_v58  ;;  %741 = vmatpush1.bf16.msra.mxu1 %v992_v59 }
  0x3c   :  { %608 = vmatprep.subr.bf16.mxu0 %v994_v60  ;;  %742 = vmatprep.subr.bf16.mxu1 %v1032_v1 }
  0x3f   :  { %609 = vmatpush1.bf16.msra.mxu0 %v997_v61  ;;  %743 = vmatpush1.bf16.msra.mxu1 %v998_v62 }
  0x40   :  { %629 = vmatprep.subr.bf16.mxu0 %v1001_v63  ;;  %744 = vmatprep.subr.bf16.mxu1 %v1032_v1  ;;  %v1011_v1 = vld [vmem:[%s1355_s1 + $0x1b4] ss:$12 sps:$4 sm:$0xff]  }
  0x42   :  { %611 = vmatmul.mubr.bf16.vlgmr.msra.gmra.mrb[0].mxu0 %v1160_v35 }
  0x43   :  { %630 = vmatpush1.bf16.msra.mxu0 %v999_v4  ;;  %620 = vmatprep.mubr.bf16.mxu0 %v795_v49 }
  0x44   :  { %745 = vmatpush1.bf16.msra.mxu1 %v1002_v5  ;;  %631 = vmatprep.subr.bf16.mxu0 %v1008_v6 }
  0x47   :  { %761 = vmatmul.mubr.bf16.vlgmr.msra.gmra.mrb[8].mxu1 %v1003_v8  ;;  %632 = vmatpush1.bf16.msra.mxu0 %v1006_v9 }
  0x48   :  { %633 = vmatprep.subr.bf16.mxu0 %v1011_v1  ;;  %876 = vmatprep.mubr.msk.bf16.mxu1 %vm571_vm0, %v797_v10 }
  0x4a   :  { %621 = vmatmul.mubr.bf16.gmra.mrb[4].mxu0 %v1205_v50 }
  0x4b   :  { %634 = vmatpush1.bf16.msra.mxu0 %v1009_v11  ;;  %873 = vmatprep.mubr.msk.bf16.mxu0 %vm571_vm0, %v1005_v54 }
  0x4c   :  { %635 = vmatprep.subr.bf16.mxu0 %v1014_v12 }
  0x4f   :  { %636 = vmatpush1.bf16.msra.mxu0 %v1012_v13  ;;  %769 = vmatmul.mubr.bf16.gmra.mrb[12].mxu1 %v796_v14 }
  0x50   :  { %637 = vmatprep.subr.bf16.mxu0 %v1017_v15 }
  0x53   :  { %638 = vmatpush1.bf16.msra.mxu0 %v1015_v16 }
  0x54   :  { %639 = vmatprep.subr.bf16.mxu0 %v1020_v17 }
  0x57   :  { %640 = vmatpush1.bf16.msra.mxu0 %v1018_v18 }
  0x58   :  { %641 = vmatprep.subr.bf16.mxu0 %v1023_v19 }
  0x5b   :  { %642 = vmatpush1.bf16.msra.mxu0 %v1021_v20 }
  0x5c   :  { %643 = vmatprep.subr.bf16.mxu0 %v1026_v21 }
  0x5f   :  { %644 = vmatpush1.bf16.msra.mxu0 %v1024_v22 }
  0x60   :  { %645 = vmatprep.subr.bf16.mxu0 %v1029_v23 }
  0x63   :  { %646 = vmatpush1.bf16.msra.mxu0 %v1027_v24 }
  0x66   :  { %662 = vmatmul.mubr.bf16.vlgmr.msra.gmra.mrb[0].mxu0 %v1003_v8 }
  0x67   :  { %874 = vmatprep.mubr.msk.bf16.mxu0 %vm571_vm0, %v797_v10 }
  0x6e   :  { %672 = vmatmul.mubr.bf16.gmra.mrb[4].mxu0 %v796_v14 }
  0x98   :  { %v127_v36 = vpop.permute.xlu0 %126  ;;  %v137_v44 = vpop.permute.xlu1 %136 }
  0x9c   :  { %v132_v37 = vpop.permute.xlu0 %131 }
  0xf5   :  { %v893_v25 = vpop.f32.mrb[0].mxu1 }
  0xf6   :  { %v894_v26 = vpop.f32.mrb[1].mxu1 }
  0xf7   :  { %v895_v27 = vadd.f32 %v894_v26, %v893_v25  ;;  %v896_v28 = vpop.f32.mrb[2].mxu1 }
  0xf8   :  { %v897_v29 = vpop.f32.mrb[3].mxu1 }
  0xf9   :  { %v898_v30 = vadd.f32 %v897_v29, %v896_v28  ;;  %v715_v38 = vadd.f32 %v895_v27, %v127_v36 }
  0xfb   :  { %v718_v39 = vadd.f32 %v898_v30, %v132_v37 }
  0xfd   :  { %v899_v31 = vpop.f32.mrb[4].mxu1 }
  0xfe   :  { %v900_v32 = vpop.f32.mrb[5].mxu1 }
  0xff   :  { %v901_v33 = vadd.f32 %v900_v32, %v899_v31  ;;  %v902_v34 = vpop.f32.mrb[6].mxu1 }
 0x100   :  { %v903_v35 = vpop.f32.mrb[7].mxu1 }
 0x101   :  { %v723_v47 = vadd.f32 %v901_v33, %v137_v44 }
 0x11a   :  { %v762_v40 = vpop.f32.mrb[8].mxu1 }
 0x11b   :  { %v763_v41 = vadd.f32 %v762_v40, %v715_v38  ;;  %v764_v42 = vpop.f32.mrb[9].mxu1 }
 0x11c   :  { %v765_v43 = vpop.f32.mrb[10].mxu1 }
 0x11d   :  { %779 = vst.msk [vmem:[%s1358_s3 + $0x10] sm:$0xff] %vm778_vm1, %v763_v41  ;;  %v766_v45 = vadd.f32 %v765_v43, %v718_v39  ;;  %v767_v46 = vpop.f32.mrb[11].mxu1 }
 0x11f   :  { %782 = vst.msk [vmem:[%s1358_s3 + $0x28] sm:$0xff] %vm778_vm1, %v766_v45 }
 0x122   :  { %v770_v48 = vpop.f32.mrb[12].mxu1 }
 0x123   :  { %v771_v49 = vadd.f32 %v770_v48, %v723_v47  ;;  %v772_v50 = vpop.f32.mrb[13].mxu1 }
 0x124   :  { %v773_v51 = vpop.f32.mrb[14].mxu1 }
 0x125   :  { %785 = vst.msk [vmem:[%s1358_s3 + $0x40] sm:$0xff] %vm778_vm1, %v771_v49  ;;  %v774_v52 = vpop.f32.mrb[15].mxu1 }
 0x139   :  { %v663_v53 = vpop.f32.mrb[0].mxu0 }
 0x13a   :  { %v905_v54 = vadd.f32 %v663_v53, %v127_v36  ;;  %v665_v55 = vpop.f32.mrb[1].mxu0 }
 0x13b   :  { %v906_v56 = vadd.f32 %v665_v55, %v127_v36  ;;  %v667_v57 = vpop.f32.mrb[2].mxu0 }
 0x13c   :  { %776 = vst [vmem:[%s1358_s3] sm:$0xff] %v905_v54  ;;  %v907_v58 = vadd.f32 %v667_v57, %v132_v37  ;;  %v669_v59 = vpop.f32.mrb[3].mxu0 }
 0x13d   :  { %777 = vst [vmem:[%s1358_s3 + $0x8] sm:$0xff] %v906_v56  ;;  %v908_v60 = vadd.f32 %v669_v59, %v132_v37 }
 0x13e   :  { %780 = vst [vmem:[%s1358_s3 + $0x18] sm:$0xff] %v907_v58 }
 0x13f   :  { %781 = vst [vmem:[%s1358_s3 + $0x20] sm:$0xff] %v908_v60 }
 0x141   :  { %v673_v61 = vpop.f32.mrb[4].mxu0 }
 0x142   :  { %v909_v62 = vadd.f32 %v673_v61, %v137_v44  ;;  %v675_v63 = vpop.f32.mrb[5].mxu0 }
 0x143   :  { %v910_v0 = vadd.f32 %v675_v63, %v137_v44  ;;  %v677_v2 = vpop.f32.mrb[6].mxu0 }
 0x144   :  { %783 = vst [vmem:[%s1358_s3 + $0x30] sm:$0xff] %v909_v62  ;;  %v678_v3 = vpop.f32.mrb[7].mxu0 }
 0x145   :  { %784 = vst [vmem:[%s1358_s3 + $0x38] sm:$0xff] %v910_v0 }

// kernel: net_forward.20
= control target key start
LH: loop header
LB: loop body
LE: loop exit
PB: predicated region body
PF: predicated region fallthrough
CT: control target
= control target key end

     0   :  { %v430_v0 = vmov 0   ;;  %vm231_vm0 = vcmask 130048   ;;  %vm339_vm1 = vcmask 261120   ;;  %s595_s1 = inlined_call_operand.vmem [shape: bf16[144,288], index: 1, kind: input, shape index: {}]   ;;  %s596_s0 = inlined_call_operand.vmem [shape: bf16[24,144], index: 0, kind: input, shape index: {}]   ;;  %s597_s2 = inlined_call_operand.vmem [shape: f32[24,1], index: 2, kind: input, shape index: {}]   ;;  %s598_s3 = inlined_call_operand.vmem [shape: f32[24,288], index: 3, kind: output, shape index: {}]  }
   0x1   :  { %289 = vmatprep.subr.bf16.mxu1 %v430_v0  ;;  %v389_v1 = vld [vmem:[%s595_s1 + $0x4] ss:$12 sps:$4 sm:$0xff]   ;;  %387 = vset.pattern.permute.xlu0 %v430_v0  ;;  %v391_v2 = vld [vmem:[%s595_s1 + $0x8] ss:$12 sps:$4 sm:$0xff]   ;;  %v392_v3 = vld [vmem:[%s595_s1] ss:$12 sps:$4 sm:$0xff]  }
   0x2   :  { %388 = vset.pattern.permute.xlu1 %v430_v0  ;;  %238 = vmatprep.subr.bf16.mxu0 %v389_v1  ;;  %v393_v4 = vld [vmem:[%s595_s1 + $0x1c] ss:$12 sps:$4 sm:$0xff]   ;;  %v395_v5 = vld [vmem:[%s595_s1 + $0x20] ss:$12 sps:$4 sm:$0xff]   ;;  %v396_v6 = vld [vmem:[%s595_s1 + $0x18] ss:$12 sps:$4 sm:$0xff]  }
   0x3   :  { %290 = vmatpush1.bf16.msra.mxu1 %v391_v2  ;;  %239 = vmatpush1.bf16.msra.mxu0 %v392_v3  ;;  %v397_v7 = vld [vmem:[%s595_s1 + $0x34] ss:$12 sps:$4 sm:$0xff]   ;;  %v399_v8 = vld [vmem:[%s595_s1 + $0x38] ss:$12 sps:$4 sm:$0xff]   ;;  %v400_v9 = vld [vmem:[%s595_s1 + $0x30] ss:$12 sps:$4 sm:$0xff]  }
   0x4   :  { %291 = vmatprep.subr.bf16.mxu1 %v430_v0  ;;  %240 = vmatprep.subr.bf16.mxu0 %v393_v4  ;;  %v401_v10 = vld [vmem:[%s595_s1 + $0x4c] ss:$12 sps:$4 sm:$0xff]   ;;  %v403_v11 = vld [vmem:[%s595_s1 + $0x50] ss:$12 sps:$4 sm:$0xff]   ;;  %v404_v12 = vld [vmem:[%s595_s1 + $0x48] ss:$12 sps:$4 sm:$0xff]  }
   0x5   :  { %v405_v13 = vld [vmem:[%s595_s1 + $0x64] ss:$12 sps:$4 sm:$0xff]   ;;  %v407_v14 = vld [vmem:[%s595_s1 + $0x68] ss:$12 sps:$4 sm:$0xff]   ;;  %v408_v15 = vld [vmem:[%s595_s1 + $0x60] ss:$12 sps:$4 sm:$0xff]  }
   0x6   :  { %v409_v16 = vld [vmem:[%s595_s1 + $0x7c] ss:$12 sps:$4 sm:$0xff]   ;;  %v411_v17 = vld [vmem:[%s595_s1 + $0x80] ss:$12 sps:$4 sm:$0xff]   ;;  %v412_v18 = vld [vmem:[%s595_s1 + $0x78] ss:$12 sps:$4 sm:$0xff]  }
   0x7   :  { %292 = vmatpush1.bf16.msra.mxu1 %v395_v5  ;;  %241 = vmatpush1.bf16.msra.mxu0 %v396_v6  ;;  %v413_v19 = vld [vmem:[%s595_s1 + $0x94] ss:$12 sps:$4 sm:$0xff]   ;;  %v427_v20 = vld [vmem:[%s596_s0 + $0x4] ss:$8 sps:$4 sm:$0xff]   ;;  %v416_v24 = vld [vmem:[%s595_s1 + $0x90] ss:$12 sps:$4 sm:$0xff]  }
   0x8   :  { %293 = vmatprep.subr.bf16.mxu1 %v430_v0  ;;  %242 = vmatprep.subr.bf16.mxu0 %v397_v7  ;;  %v54_v21 = vld [vmem:[%s597_s2] sm:$0xff]  ;;  %v56_v23 = vld [vmem:[%s597_s2 + $0x10] sm:$0xff]  ;;  %v55_v25 = vld [vmem:[%s597_s2 + $0x8] sm:$0xff] }
   0x9   :  { %v415_v22 = vld [vmem:[%s595_s1 + $0x98] ss:$12 sps:$4 sm:$0xff]   ;;  %59 = vperm.xlu0 %387, %v54_v21   ;;  %384 = vmatprep.mubr.msk.bf16.mxu1 %vm231_vm0, %v427_v20  ;;  %v419_v27 = vld [vmem:[%s595_s1 + $0xb0] ss:$12 sps:$4 sm:$0xff]   ;;  %v420_v28 = vld [vmem:[%s595_s1 + $0xa8] ss:$12 sps:$4 sm:$0xff]  }
   0xa   :  { %v417_v26 = vld [vmem:[%s595_s1 + $0xac] ss:$12 sps:$4 sm:$0xff]   ;;  %382 = vmatprep.mubr.msk.bf16.mxu0 %vm231_vm0, %v427_v20  ;;  %69 = vperm.xlu1 %388, %v56_v23   ;;  %v421_v29 = vld [vmem:[%s595_s1 + $0xc4] ss:$12 sps:$4 sm:$0xff]   ;;  %v423_v30 = vld [vmem:[%s595_s1 + $0xc8] ss:$12 sps:$4 sm:$0xff]  }
   0xb   :  { %294 = vmatpush1.bf16.msra.mxu1 %v399_v8  ;;  %243 = vmatpush1.bf16.msra.mxu0 %v400_v9  ;;  %v424_v31 = vld [vmem:[%s595_s1 + $0xc0] ss:$12 sps:$4 sm:$0xff]   ;;  %v17_v32 = vld [vmem:[%s596_s0 + $0x10] sm:$0xff] }
   0xc   :  { %295 = vmatprep.subr.bf16.mxu1 %v430_v0  ;;  %244 = vmatprep.subr.bf16.mxu0 %v401_v10  ;;  %v425_v33 = vld [vmem:[%s596_s0] ss:$8 sps:$4 sm:$0xff]   ;;  %v354_v34 = vcombine.high %v17_v32, %v17_v32  ;;  %v353_v35 = vcombine.low %v17_v32, %v17_v32 }
   0xd   :  { %64 = vperm.xlu0 %387, %v55_v25  }
   0xf   :  { %296 = vmatpush1.bf16.msra.mxu1 %v403_v11  ;;  %245 = vmatpush1.bf16.msra.mxu0 %v404_v12 }
  0x10   :  { %297 = vmatprep.subr.bf16.mxu1 %v430_v0  ;;  %246 = vmatprep.subr.bf16.mxu0 %v405_v13 }
  0x13   :  { %298 = vmatpush1.bf16.msra.mxu1 %v407_v14  ;;  %247 = vmatpush1.bf16.msra.mxu0 %v408_v15 }
  0x14   :  { %299 = vmatprep.subr.bf16.mxu1 %v430_v0  ;;  %248 = vmatprep.subr.bf16.mxu0 %v409_v16 }
  0x17   :  { %300 = vmatpush1.bf16.msra.mxu1 %v411_v17  ;;  %249 = vmatpush1.bf16.msra.mxu0 %v412_v18 }
  0x18   :  { %301 = vmatprep.subr.bf16.mxu1 %v430_v0  ;;  %250 = vmatprep.subr.bf16.mxu0 %v413_v19 }
  0x1b   :  { %302 = vmatpush1.bf16.msra.mxu1 %v415_v22  ;;  %251 = vmatpush1.bf16.msra.mxu0 %v416_v24 }
  0x1c   :  { %303 = vmatprep.subr.bf16.mxu1 %v430_v0  ;;  %252 = vmatprep.subr.bf16.mxu0 %v417_v26 }
  0x1f   :  { %304 = vmatpush1.bf16.msra.mxu1 %v419_v27  ;;  %253 = vmatpush1.bf16.msra.mxu0 %v420_v28 }
  0x20   :  { %305 = vmatprep.subr.bf16.mxu1 %v430_v0  ;;  %254 = vmatprep.subr.bf16.mxu0 %v421_v29 }
  0x23   :  { %306 = vmatpush1.bf16.msra.mxu1 %v423_v30  ;;  %255 = vmatpush1.bf16.msra.mxu0 %v424_v31 }
  0x26   :  { %322 = vmatmul.mubr.bf16.vlgmr.msra.gmra.mrb[0].mxu1 %v425_v33  ;;  %271 = vmatmul.mubr.bf16.vlgmr.msra.gmra.mrb[0].mxu0 %v425_v33 }
  0x27   :  { %385 = vmatprep.mubr.msk.bf16.mxu1 %vm231_vm0, %v354_v34  ;;  %383 = vmatprep.mubr.msk.bf16.mxu0 %vm231_vm0, %v354_v34 }
  0x2e   :  { %330 = vmatmul.mubr.bf16.gmra.mrb[4].mxu1 %v353_v35  ;;  %281 = vmatmul.mubr.bf16.gmra.mrb[4].mxu0 %v353_v35 }
  0x88   :  { %v60_v36 = vpop.permute.xlu0 %59 }
  0x89   :  { %v70_v52 = vpop.permute.xlu1 %69 }
  0x8c   :  { %v65_v38 = vpop.permute.xlu0 %64 }
  0xf9   :  { %v323_v37 = vpop.f32.mrb[0].mxu1  ;;  %v272_v40 = vpop.f32.mrb[0].mxu0 }
  0xfa   :  { %v324_v39 = vadd.f32 %v323_v37, %v60_v36  ;;  %v325_v41 = vpop.f32.mrb[1].mxu1  ;;  %v273_v42 = vadd.f32 %v272_v40, %v60_v36  ;;  %v274_v43 = vpop.f32.mrb[1].mxu0 }
  0xfb   :  { %v326_v44 = vpop.f32.mrb[2].mxu1  ;;  %v275_v45 = vadd.f32 %v274_v43, %v60_v36  ;;  %v276_v47 = vpop.f32.mrb[2].mxu0 }
  0xfc   :  { %340 = vst.msk [vmem:[%s598_s3 + $0x10] sm:$0xff] %vm339_vm1, %v324_v39  ;;  %v327_v46 = vadd.f32 %v326_v44, %v65_v38  ;;  %v328_v48 = vpop.f32.mrb[3].mxu1  ;;  %337 = vst [vmem:[%s598_s3] sm:$0xff] %v273_v42  ;;  %v277_v49 = vadd.f32 %v276_v47, %v65_v38  ;;  %v278_v50 = vpop.f32.mrb[3].mxu0 }
  0xfd   :  { %338 = vst [vmem:[%s598_s3 + $0x8] sm:$0xff] %v275_v45  ;;  %v279_v51 = vadd.f32 %v278_v50, %v65_v38 }
  0xfe   :  { %343 = vst.msk [vmem:[%s598_s3 + $0x28] sm:$0xff] %vm339_vm1, %v327_v46  ;;  %341 = vst [vmem:[%s598_s3 + $0x18] sm:$0xff] %v277_v49 }
  0xff   :  { %342 = vst [vmem:[%s598_s3 + $0x20] sm:$0xff] %v279_v51 }
 0x101   :  { %v331_v53 = vpop.f32.mrb[4].mxu1  ;;  %v282_v55 = vpop.f32.mrb[4].mxu0 }
 0x102   :  { %v332_v54 = vadd.f32 %v331_v53, %v70_v52  ;;  %v333_v56 = vpop.f32.mrb[5].mxu1  ;;  %v283_v57 = vadd.f32 %v282_v55, %v70_v52  ;;  %v284_v58 = vpop.f32.mrb[5].mxu0 }
 0x103   :  { %v334_v59 = vpop.f32.mrb[6].mxu1  ;;  %v285_v60 = vadd.f32 %v284_v58, %v70_v52  ;;  %v286_v61 = vpop.f32.mrb[6].mxu0 }
 0x104   :  { %346 = vst.msk [vmem:[%s598_s3 + $0x40] sm:$0xff] %vm339_vm1, %v332_v54  ;;  %v335_v62 = vpop.f32.mrb[7].mxu1  ;;  %344 = vst [vmem:[%s598_s3 + $0x30] sm:$0xff] %v283_v57  ;;  %v287_v63 = vpop.f32.mrb[7].mxu0 }
 0x105   :  { %345 = vst [vmem:[%s598_s3 + $0x38] sm:$0xff] %v285_v60 }

// kernel: net_forward.21
= control target key start
LH: loop header
LB: loop body
LE: loop exit
PB: predicated region body
PF: predicated region fallthrough
CT: control target
= control target key end

     0   :  { %v565_v0 = vmov 0   ;;  %vm321_vm0 = vcmask 719872   ;;  %vm328_vm1 = vcmask 1043456   ;;  %vm439_vm2 = vcmask 261120   ;;  %s777_s1 = inlined_call_operand.vmem [shape: bf16[216,288], index: 1, kind: input, shape index: {}]   ;;  %s778_s0 = inlined_call_operand.vmem [shape: bf16[24,216], index: 0, kind: input, shape index: {}]   ;;  %s779_s2 = inlined_call_operand.vmem [shape: f32[24,1], index: 2, kind: input, shape index: {}]   ;;  %s780_s3 = inlined_call_operand.vmem [shape: f32[24,288], index: 3, kind: output, shape index: {}]  }
   0x1   :  { %389 = vmatprep.subr.bf16.mxu1 %v565_v0  ;;  %v505_v1 = vld [vmem:[%s777_s1 + $0x4] ss:$12 sps:$4 sm:$0xff]   ;;  %503 = vset.pattern.permute.xlu0 %v565_v0  ;;  %v507_v2 = vld [vmem:[%s777_s1 + $0x8] ss:$12 sps:$4 sm:$0xff]   ;;  %v508_v3 = vld [vmem:[%s777_s1] ss:$12 sps:$4 sm:$0xff]  }
   0x2   :  { %504 = vset.pattern.permute.xlu1 %v565_v0  ;;  %338 = vmatprep.subr.bf16.mxu0 %v505_v1  ;;  %v509_v4 = vld [vmem:[%s777_s1 + $0x1c] ss:$12 sps:$4 sm:$0xff]   ;;  %v511_v5 = vld [vmem:[%s777_s1 + $0x20] ss:$12 sps:$4 sm:$0xff]   ;;  %v512_v6 = vld [vmem:[%s777_s1 + $0x18] ss:$12 sps:$4 sm:$0xff]  }
   0x3   :  { %390 = vmatpush1.bf16.msra.mxu1 %v507_v2  ;;  %339 = vmatpush1.bf16.msra.mxu0 %v508_v3  ;;  %v513_v7 = vld [vmem:[%s777_s1 + $0x34] ss:$12 sps:$4 sm:$0xff]   ;;  %v515_v8 = vld [vmem:[%s777_s1 + $0x38] ss:$12 sps:$4 sm:$0xff]   ;;  %v516_v9 = vld [vmem:[%s777_s1 + $0x30] ss:$12 sps:$4 sm:$0xff]  }
   0x4   :  { %391 = vmatprep.subr.bf16.mxu1 %v565_v0  ;;  %340 = vmatprep.subr.bf16.mxu0 %v509_v4  ;;  %v517_v10 = vld [vmem:[%s777_s1 + $0x4c] ss:$12 sps:$4 sm:$0xff]   ;;  %v519_v11 = vld [vmem:[%s777_s1 + $0x50] ss:$12 sps:$4 sm:$0xff]   ;;  %v520_v12 = vld [vmem:[%s777_s1 + $0x48] ss:$12 sps:$4 sm:$0xff]  }
   0x5   :  { %v521_v13 = vld [vmem:[%s777_s1 + $0x64] ss:$12 sps:$4 sm:$0xff]   ;;  %v523_v14 = vld [vmem:[%s777_s1 + $0x68] ss:$12 sps:$4 sm:$0xff]   ;;  %v524_v15 = vld [vmem:[%s777_s1 + $0x60] ss:$12 sps:$4 sm:$0xff]  }
   0x6   :  { %v525_v16 = vld [vmem:[%s777_s1 + $0x7c] ss:$12 sps:$4 sm:$0xff]   ;;  %v527_v17 = vld [vmem:[%s777_s1 + $0x80] ss:$12 sps:$4 sm:$0xff]   ;;  %v528_v18 = vld [vmem:[%s777_s1 + $0x78] ss:$12 sps:$4 sm:$0xff]  }
   0x7   :  { %392 = vmatpush1.bf16.msra.mxu1 %v511_v5  ;;  %341 = vmatpush1.bf16.msra.mxu0 %v512_v6  ;;  %v529_v19 = vld [vmem:[%s777_s1 + $0x94] ss:$12 sps:$4 sm:$0xff]   ;;  %v531_v20 = vld [vmem:[%s777_s1 + $0x98] ss:$12 sps:$4 sm:$0xff]   ;;  %v532_v21 = vld [vmem:[%s777_s1 + $0x90] ss:$12 sps:$4 sm:$0xff]  }
   0x8   :  { %393 = vmatprep.subr.bf16.mxu1 %v565_v0  ;;  %342 = vmatprep.subr.bf16.mxu0 %v513_v7  ;;  %v533_v22 = vld [vmem:[%s777_s1 + $0xac] ss:$12 sps:$4 sm:$0xff]   ;;  %v535_v23 = vld [vmem:[%s777_s1 + $0xb0] ss:$12 sps:$4 sm:$0xff]   ;;  %v536_v24 = vld [vmem:[%s777_s1 + $0xa8] ss:$12 sps:$4 sm:$0xff]  }
   0x9   :  { %v537_v25 = vld [vmem:[%s777_s1 + $0xc4] ss:$12 sps:$4 sm:$0xff]   ;;  %v539_v26 = vld [vmem:[%s777_s1 + $0xc8] ss:$12 sps:$4 sm:$0xff]   ;;  %v540_v27 = vld [vmem:[%s777_s1 + $0xc0] ss:$12 sps:$4 sm:$0xff]  }
   0xa   :  { %v562_v28 = vld [vmem:[%s778_s0 + $0x4] ss:$8 sps:$4 sm:$0xff]   ;;  %v541_v29 = vld [vmem:[%s777_s1 + $0xdc] ss:$12 sps:$4 sm:$0xff]   ;;  %v74_v31 = vld [vmem:[%s779_s2 + $0x10] sm:$0xff] }
   0xb   :  { %394 = vmatpush1.bf16.msra.mxu1 %v515_v8  ;;  %343 = vmatpush1.bf16.msra.mxu0 %v516_v9  ;;  %v72_v30 = vld [vmem:[%s779_s2] sm:$0xff]  ;;  %v73_v34 = vld [vmem:[%s779_s2 + $0x8] sm:$0xff]  ;;  %v548_v37 = vld [vmem:[%s777_s1 + $0xf0] ss:$12 sps:$4 sm:$0xff]  }
   0xc   :  { %395 = vmatprep.subr.bf16.mxu1 %v565_v0  ;;  %344 = vmatprep.subr.bf16.mxu0 %v517_v10  ;;  %v543_v32 = vld [vmem:[%s777_s1 + $0xe0] ss:$12 sps:$4 sm:$0xff]   ;;  %v544_v33 = vld [vmem:[%s777_s1 + $0xd8] ss:$12 sps:$4 sm:$0xff]   ;;  %v551_v39 = vld [vmem:[%s777_s1 + $0x110] ss:$12 sps:$4 sm:$0xff]  }
   0xd   :  { %500 = vmatprep.mubr.msk.bf16.mxu1 %vm321_vm0, %v562_v28  ;;  %498 = vmatprep.mubr.msk.bf16.mxu0 %vm321_vm0, %v562_v28  ;;  %v545_v35 = vld [vmem:[%s777_s1 + $0xf4] ss:$12 sps:$4 sm:$0xff]   ;;  %v547_v36 = vld [vmem:[%s777_s1 + $0xf8] ss:$12 sps:$4 sm:$0xff]  }
   0xe   :  { %77 = vperm.xlu0 %503, %v72_v30   ;;  %87 = vperm.xlu1 %504, %v74_v31   ;;  %v549_v38 = vld [vmem:[%s777_s1 + $0x10c] ss:$12 sps:$4 sm:$0xff]   ;;  %v552_v40 = vld [vmem:[%s777_s1 + $0x108] ss:$12 sps:$4 sm:$0xff]   ;;  %v553_v41 = vld [vmem:[%s777_s1 + $0x124] ss:$12 sps:$4 sm:$0xff]  }
   0xf   :  { %396 = vmatpush1.bf16.msra.mxu1 %v519_v11  ;;  %345 = vmatpush1.bf16.msra.mxu0 %v520_v12  ;;  %v70_v42 = vld [vmem:[%s777_s1 + $0x138] sm:$0xff]  ;;  %v555_v43 = vld [vmem:[%s777_s1 + $0x128] ss:$12 sps:$4 sm:$0xff]   ;;  %v556_v44 = vld [vmem:[%s777_s1 + $0x120] ss:$12 sps:$4 sm:$0xff]  }
  0x10   :  { %397 = vmatprep.subr.bf16.mxu1 %v565_v0  ;;  %346 = vmatprep.subr.bf16.mxu0 %v521_v13  ;;  %v558_v45 = vld [vmem:[%s777_s1 + $0x140] ss:$0 sps:$4 sm:$0xff]   ;;  %v495_v46 = vcombine.high %v70_v42, %v70_v42  ;;  %v494_v47 = vcombine.low %v70_v42, %v70_v42  ;;  %v17_v49 = vld [vmem:[%s778_s0 + $0x10] sm:$0xff] }
  0x11   :  { %v336_v48 = vsel %vm328_vm1, %v558_v45, 0  ;;  %v560_v51 = vld [vmem:[%s778_s0] ss:$8 sps:$4 sm:$0xff]   ;;  %v454_v52 = vcombine.high %v17_v49, %v17_v49  ;;  %v453_v53 = vcombine.low %v17_v49, %v17_v49 }
  0x12   :  { %82 = vperm.xlu0 %503, %v73_v34   ;;  %v330_v50 = vsel %vm328_vm1, %v494_v47, 0 }
  0x13   :  { %398 = vmatpush1.bf16.msra.mxu1 %v523_v14  ;;  %347 = vmatpush1.bf16.msra.mxu0 %v524_v15 }
  0x14   :  { %399 = vmatprep.subr.bf16.mxu1 %v565_v0  ;;  %348 = vmatprep.subr.bf16.mxu0 %v525_v16 }
  0x17   :  { %400 = vmatpush1.bf16.msra.mxu1 %v527_v17  ;;  %349 = vmatpush1.bf16.msra.mxu0 %v528_v18 }
  0x18   :  { %401 = vmatprep.subr.bf16.mxu1 %v565_v0  ;;  %350 = vmatprep.subr.bf16.mxu0 %v529_v19 }
  0x1b   :  { %402 = vmatpush1.bf16.msra.mxu1 %v531_v20  ;;  %351 = vmatpush1.bf16.msra.mxu0 %v532_v21 }
  0x1c   :  { %403 = vmatprep.subr.bf16.mxu1 %v565_v0  ;;  %352 = vmatprep.subr.bf16.mxu0 %v533_v22 }
  0x1f   :  { %404 = vmatpush1.bf16.msra.mxu1 %v535_v23  ;;  %353 = vmatpush1.bf16.msra.mxu0 %v536_v24 }
  0x20   :  { %405 = vmatprep.subr.bf16.mxu1 %v565_v0  ;;  %354 = vmatprep.subr.bf16.mxu0 %v537_v25 }
  0x23   :  { %406 = vmatpush1.bf16.msra.mxu1 %v539_v26  ;;  %355 = vmatpush1.bf16.msra.mxu0 %v540_v27 }
  0x24   :  { %407 = vmatprep.subr.bf16.mxu1 %v565_v0  ;;  %356 = vmatprep.subr.bf16.mxu0 %v541_v29 }
  0x27   :  { %408 = vmatpush1.bf16.msra.mxu1 %v543_v32  ;;  %357 = vmatpush1.bf16.msra.mxu0 %v544_v33 }
  0x28   :  { %409 = vmatprep.subr.bf16.mxu1 %v565_v0  ;;  %358 = vmatprep.subr.bf16.mxu0 %v545_v35 }
  0x2b   :  { %410 = vmatpush1.bf16.msra.mxu1 %v547_v36  ;;  %359 = vmatpush1.bf16.msra.mxu0 %v548_v37 }
  0x2c   :  { %411 = vmatprep.subr.bf16.mxu1 %v565_v0  ;;  %360 = vmatprep.subr.bf16.mxu0 %v549_v38 }
  0x2f   :  { %412 = vmatpush1.bf16.msra.mxu1 %v551_v39  ;;  %361 = vmatpush1.bf16.msra.mxu0 %v552_v40 }
  0x30   :  { %413 = vmatprep.subr.bf16.mxu1 %v565_v0  ;;  %362 = vmatprep.subr.bf16.mxu0 %v553_v41 }
  0x33   :  { %414 = vmatpush1.bf16.msra.mxu1 %v555_v43  ;;  %363 = vmatpush1.bf16.msra.mxu0 %v556_v44 }
  0x34   :  { %415 = vmatprep.subr.bf16.mxu1 %v565_v0  ;;  %497 = vmatprep.subr.msk.bf16.mxu0 %vm328_vm1, %v495_v46 }
  0x37   :  { %416 = vmatpush1.bf16.msra.mxu1 %v336_v48  ;;  %365 = vmatpush1.bf16.msra.mxu0 %v330_v50 }
  0x3a   :  { %422 = vmatmul.mubr.bf16.vlgmr.msra.gmra.mrb[0].mxu1 %v560_v51  ;;  %371 = vmatmul.mubr.bf16.vlgmr.msra.gmra.mrb[0].mxu0 %v560_v51 }
  0x3b   :  { %501 = vmatprep.mubr.msk.bf16.mxu1 %vm321_vm0, %v454_v52  ;;  %499 = vmatprep.mubr.msk.bf16.mxu0 %vm321_vm0, %v454_v52 }
  0x42   :  { %430 = vmatmul.mubr.bf16.gmra.mrb[4].mxu1 %v453_v53  ;;  %381 = vmatmul.mubr.bf16.gmra.mrb[4].mxu0 %v453_v53 }
  0x8d   :  { %v78_v54 = vpop.permute.xlu0 %77  ;;  %v88_v6 = vpop.permute.xlu1 %87 }
  0x91   :  { %v83_v56 = vpop.permute.xlu0 %82 }
 0x10d   :  { %v423_v55 = vpop.f32.mrb[0].mxu1  ;;  %v372_v58 = vpop.f32.mrb[0].mxu0 }
 0x10e   :  { %v424_v57 = vadd.f32 %v423_v55, %v78_v54  ;;  %v425_v59 = vpop.f32.mrb[1].mxu1  ;;  %v373_v60 = vadd.f32 %v372_v58, %v78_v54  ;;  %v374_v61 = vpop.f32.mrb[1].mxu0 }
 0x10f   :  { %v426_v62 = vpop.f32.mrb[2].mxu1  ;;  %v375_v63 = vadd.f32 %v374_v61, %v78_v54  ;;  %v376_v1 = vpop.f32.mrb[2].mxu0 }
 0x110   :  { %440 = vst.msk [vmem:[%s780_s3 + $0x10] sm:$0xff] %vm439_vm2, %v424_v57  ;;  %v427_v0 = vadd.f32 %v426_v62, %v83_v56  ;;  %v428_v2 = vpop.f32.mrb[3].mxu1  ;;  %437 = vst [vmem:[%s780_s3] sm:$0xff] %v373_v60  ;;  %v377_v3 = vadd.f32 %v376_v1, %v83_v56  ;;  %v378_v4 = vpop.f32.mrb[3].mxu0 }
 0x111   :  { %438 = vst [vmem:[%s780_s3 + $0x8] sm:$0xff] %v375_v63  ;;  %v379_v5 = vadd.f32 %v378_v4, %v83_v56 }
 0x112   :  { %443 = vst.msk [vmem:[%s780_s3 + $0x28] sm:$0xff] %vm439_vm2, %v427_v0  ;;  %441 = vst [vmem:[%s780_s3 + $0x18] sm:$0xff] %v377_v3 }
 0x113   :  { %442 = vst [vmem:[%s780_s3 + $0x20] sm:$0xff] %v379_v5 }
 0x115   :  { %v431_v7 = vpop.f32.mrb[4].mxu1  ;;  %v382_v9 = vpop.f32.mrb[4].mxu0 }
 0x116   :  { %v432_v8 = vadd.f32 %v431_v7, %v88_v6  ;;  %v433_v10 = vpop.f32.mrb[5].mxu1  ;;  %v383_v11 = vadd.f32 %v382_v9, %v88_v6  ;;  %v384_v12 = vpop.f32.mrb[5].mxu0 }
 0x117   :  { %v434_v13 = vpop.f32.mrb[6].mxu1  ;;  %v385_v14 = vadd.f32 %v384_v12, %v88_v6  ;;  %v386_v15 = vpop.f32.mrb[6].mxu0 }
 0x118   :  { %446 = vst.msk [vmem:[%s780_s3 + $0x40] sm:$0xff] %vm439_vm2, %v432_v8  ;;  %v435_v16 = vpop.f32.mrb[7].mxu1  ;;  %444 = vst [vmem:[%s780_s3 + $0x30] sm:$0xff] %v383_v11  ;;  %v387_v17 = vpop.f32.mrb[7].mxu0 }
 0x119   :  { %445 = vst [vmem:[%s780_s3 + $0x38] sm:$0xff] %v385_v14 }

// kernel: net_forward.16
= control target key start
LH: loop header
LB: loop body
LE: loop exit
PB: predicated region body
PF: predicated region fallthrough
CT: control target
= control target key end

     0   :  { %s1470_s10 = smov 127   ;;  %s1471_s2 = smov 126   ;;  %vm1370_vm0 = vcmask 93184   ;;  %vm1368_vm1 = vcmask 97280   ;;  %s3616_s0 = inlined_call_operand.vmem [shape: f32[20,14,14], index: 0, kind: input, shape index: {}]   ;;  %s3617_s1 = inlined_call_operand.vmem [shape: f32[20,12,12], index: 1, kind: output, shape index: {}]  }
   0x1   :  { %v1485_v0 = vld [vmem:[%s3616_s0 + $0x10] sm:$0xff]  ;;  %v1490_v1 = vld [vmem:[%s3616_s0] sm:$0xff]  ;;  %v1499_v2 = vld [vmem:[%s3616_s0 + $0x18] sm:$0xf] }
   0x2   :  { %132 = vrot.lane.b32.xlu1 %v1485_v0, %s1470_s10  ;;  %128 = vrot.lane.b32.xlu0 %v1490_v1, %s1470_s10  ;;  %v1504_v3 = vld [vmem:[%s3616_s0 + $0x8] sm:$0xf]  ;;  %v1518_v5 = vld [vmem:[%s3616_s0 + $0x20] sm:$0xff] }
   0x3   :  { %v1513_v4 = vld [vmem:[%s3616_s0 + $0x28] sm:$0xf]  ;;  %v1527_v6 = vld [vmem:[%s3616_s0 + $0x38] sm:$0xf]  ;;  %v1532_v7 = vld [vmem:[%s3616_s0 + $0x30] sm:$0xff] }
   0x4   :  { %v1541_v8 = vld [vmem:[%s3616_s0 + $0x48] sm:$0xf]  ;;  %v1546_v9 = vld [vmem:[%s3616_s0 + $0x40] sm:$0xff]  ;;  %v1555_v10 = vld [vmem:[%s3616_s0 + $0x58] sm:$0xf] }
   0x5   :  { %v1560_v11 = vld [vmem:[%s3616_s0 + $0x50] sm:$0xff]  ;;  %v1569_v12 = vld [vmem:[%s3616_s0 + $0x68] sm:$0xf]  ;;  %v1574_v13 = vld [vmem:[%s3616_s0 + $0x60] sm:$0xff] }
   0x6   :  { %134 = vrot.lane.b32.xlu1 %v1499_v2, %s1470_s10  ;;  %130 = vrot.lane.b32.xlu0 %v1504_v3, %s1470_s10  ;;  %v1583_v14 = vld [vmem:[%s3616_s0 + $0x78] sm:$0xf]  ;;  %v1588_v15 = vld [vmem:[%s3616_s0 + $0x70] sm:$0xff] }
   0x7   :  { %v1597_v16 = vld [vmem:[%s3616_s0 + $0x88] sm:$0xf]  ;;  %v1602_v17 = vld [vmem:[%s3616_s0 + $0x80] sm:$0xff]  ;;  %v1611_v18 = vld [vmem:[%s3616_s0 + $0x98] sm:$0xf] }
   0x8   :  { %v1616_v19 = vld [vmem:[%s3616_s0 + $0x90] sm:$0xff]  ;;  %v1625_v20 = vld [vmem:[%s3616_s0 + $0xa8] sm:$0xf]  ;;  %v1630_v21 = vld [vmem:[%s3616_s0 + $0xa0] sm:$0xff] }
   0x9   :  { %v1639_v22 = vld [vmem:[%s3616_s0 + $0xb8] sm:$0xf]  ;;  %v1644_v23 = vld [vmem:[%s3616_s0 + $0xb0] sm:$0xff]  ;;  %v1653_v24 = vld [vmem:[%s3616_s0 + $0xc8] sm:$0xf] }
   0xa   :  { %138 = vrot.lane.b32.xlu1 %v1513_v4, %s1470_s10  ;;  %136 = vrot.lane.b32.xlu0 %v1518_v5, %s1470_s10  ;;  %v1658_v25 = vld [vmem:[%s3616_s0 + $0xc0] sm:$0xff]  ;;  %v1667_v26 = vld [vmem:[%s3616_s0 + $0xd8] sm:$0xf] }
   0xb   :  { %v1672_v27 = vld [vmem:[%s3616_s0 + $0xd0] sm:$0xff]  ;;  %v1681_v28 = vld [vmem:[%s3616_s0 + $0xe8] sm:$0xf]  ;;  %v1686_v29 = vld [vmem:[%s3616_s0 + $0xe0] sm:$0xff] }
   0xc   :  { %3664 = vst [vmem:[#allocation2_spill] sm:$0xff] %v1681_v28  ;;  %3665 = vst [vmem:[#allocation3_spill] sm:$0xff] %v1686_v29  ;;  %v1695_v30 = vld [vmem:[%s3616_s0 + $0xf8] sm:$0xf]  ;;  %v1700_v31 = vld [vmem:[%s3616_s0 + $0xf0] sm:$0xff] }
   0xd   :  { %v1709_v32 = vld [vmem:[%s3616_s0 + $0x108] sm:$0xf]  ;;  %v1714_v33 = vld [vmem:[%s3616_s0 + $0x100] sm:$0xff]  ;;  %v1723_v34 = vld [vmem:[%s3616_s0 + $0x118] sm:$0xf] }
   0xe   :  { %142 = vrot.lane.b32.xlu1 %v1527_v6, %s1470_s10  ;;  %140 = vrot.lane.b32.xlu0 %v1532_v7, %s1470_s10  ;;  %v1728_v35 = vld [vmem:[%s3616_s0 + $0x110] sm:$0xff]  ;;  %v1737_v36 = vld [vmem:[%s3616_s0 + $0x128] sm:$0xf] }
   0xf   :  { %v1742_v37 = vld [vmem:[%s3616_s0 + $0x120] sm:$0xff]  ;;  %v1751_v38 = vld [vmem:[%s3616_s0 + $0x138] sm:$0xf]  ;;  %v1756_v39 = vld [vmem:[%s3616_s0 + $0x130] sm:$0xff] }
  0x10   :  { %v1889_v62 = vld [vmem:[%s3616_s0 + $0x9] sm:$0xf]  ;;  %v1894_v63 = vld [vmem:[%s3616_s0 + $0x1] sm:$0xff] }
  0x12   :  { %146 = vrot.lane.b32.xlu1 %v1541_v8, %s1470_s10  ;;  %144 = vrot.lane.b32.xlu0 %v1546_v9, %s1470_s10 }
  0x16   :  { %150 = vrot.lane.b32.xlu1 %v1555_v10, %s1470_s10  ;;  %148 = vrot.lane.b32.xlu0 %v1560_v11, %s1470_s10 }
  0x1a   :  { %154 = vrot.lane.b32.xlu1 %v1569_v12, %s1470_s10  ;;  %152 = vrot.lane.b32.xlu0 %v1574_v13, %s1470_s10 }
  0x1e   :  { %158 = vrot.lane.b32.xlu1 %v1583_v14, %s1470_s10  ;;  %156 = vrot.lane.b32.xlu0 %v1588_v15, %s1470_s10 }
  0x22   :  { %162 = vrot.lane.b32.xlu1 %v1597_v16, %s1470_s10  ;;  %160 = vrot.lane.b32.xlu0 %v1602_v17, %s1470_s10 }
  0x26   :  { %166 = vrot.lane.b32.xlu1 %v1611_v18, %s1470_s10  ;;  %164 = vrot.lane.b32.xlu0 %v1616_v19, %s1470_s10 }
  0x2a   :  { %170 = vrot.lane.b32.xlu1 %v1625_v20, %s1470_s10  ;;  %168 = vrot.lane.b32.xlu0 %v1630_v21, %s1470_s10 }
  0x2e   :  { %174 = vrot.lane.b32.xlu1 %v1639_v22, %s1470_s10  ;;  %172 = vrot.lane.b32.xlu0 %v1644_v23, %s1470_s10 }
  0x32   :  { %178 = vrot.lane.b32.xlu1 %v1653_v24, %s1470_s10  ;;  %176 = vrot.lane.b32.xlu0 %v1658_v25, %s1470_s10 }
  0x36   :  { %182 = vrot.lane.b32.xlu1 %v1667_v26, %s1470_s10  ;;  %180 = vrot.lane.b32.xlu0 %v1672_v27, %s1470_s10 }
  0x3a   :  { %186 = vrot.lane.b32.xlu1 %v1681_v28, %s1470_s10  ;;  %184 = vrot.lane.b32.xlu0 %v1686_v29, %s1470_s10 }
  0x3e   :  { %190 = vrot.lane.b32.xlu1 %v1695_v30, %s1470_s10  ;;  %188 = vrot.lane.b32.xlu0 %v1700_v31, %s1470_s10 }
  0x42   :  { %194 = vrot.lane.b32.xlu1 %v1709_v32, %s1470_s10  ;;  %192 = vrot.lane.b32.xlu0 %v1714_v33, %s1470_s10 }
  0x46   :  { %198 = vrot.lane.b32.xlu1 %v1723_v34, %s1470_s10  ;;  %196 = vrot.lane.b32.xlu0 %v1728_v35, %s1470_s10 }
  0x4a   :  { %202 = vrot.lane.b32.xlu1 %v1737_v36, %s1470_s10  ;;  %200 = vrot.lane.b32.xlu0 %v1742_v37, %s1470_s10 }
  0x4e   :  { %206 = vrot.lane.b32.xlu1 %v1751_v38, %s1470_s10  ;;  %204 = vrot.lane.b32.xlu0 %v1756_v39, %s1470_s10 }
  0x52   :  { %290 = vrot.lane.b32.xlu1 %v1504_v3, %s1471_s2  ;;  %288 = vrot.lane.b32.xlu0 %v1490_v1, %s1471_s2  ;;  %v1912_v3 = vld [vmem:[%s3616_s0 + $0x11] sm:$0xff] }
  0x56   :  { %294 = vrot.lane.b32.xlu1 %v1499_v2, %s1471_s2  ;;  %292 = vrot.lane.b32.xlu0 %v1485_v0, %s1471_s2  ;;  %v1907_v2 = vld [vmem:[%s3616_s0 + $0x19] sm:$0xf] }
  0x5a   :  { %298 = vrot.lane.b32.xlu1 %v1513_v4, %s1471_s2  ;;  %296 = vrot.lane.b32.xlu0 %v1518_v5, %s1471_s2 }
  0x5e   :  { %302 = vrot.lane.b32.xlu1 %v1527_v6, %s1471_s2  ;;  %300 = vrot.lane.b32.xlu0 %v1532_v7, %s1471_s2  ;;  %v1925_v6 = vld [vmem:[%s3616_s0 + $0x29] sm:$0xf]  ;;  %v1930_v7 = vld [vmem:[%s3616_s0 + $0x21] sm:$0xff] }
  0x62   :  { %306 = vrot.lane.b32.xlu1 %v1541_v8, %s1471_s2  ;;  %304 = vrot.lane.b32.xlu0 %v1546_v9, %s1471_s2 }
  0x66   :  { %310 = vrot.lane.b32.xlu1 %v1555_v10, %s1471_s2  ;;  %308 = vrot.lane.b32.xlu0 %v1560_v11, %s1471_s2  ;;  %v1943_v10 = vld [vmem:[%s3616_s0 + $0x39] sm:$0xf]  ;;  %v1948_v11 = vld [vmem:[%s3616_s0 + $0x31] sm:$0xff] }
  0x6a   :  { %314 = vrot.lane.b32.xlu1 %v1569_v12, %s1471_s2  ;;  %312 = vrot.lane.b32.xlu0 %v1574_v13, %s1471_s2 }
  0x6e   :  { %318 = vrot.lane.b32.xlu1 %v1583_v14, %s1471_s2  ;;  %316 = vrot.lane.b32.xlu0 %v1588_v15, %s1471_s2  ;;  %v1961_v14 = vld [vmem:[%s3616_s0 + $0x49] sm:$0xf]  ;;  %v1966_v15 = vld [vmem:[%s3616_s0 + $0x41] sm:$0xff] }
  0x72   :  { %322 = vrot.lane.b32.xlu1 %v1597_v16, %s1471_s2  ;;  %320 = vrot.lane.b32.xlu0 %v1602_v17, %s1471_s2 }
  0x74   :  { %v1798_v40 = vpop.permute.xlu1 %132  ;;  %v1800_v41 = vpop.permute.xlu0 %128 }
  0x75   :  { %3666 = vst [vmem:[#allocation4_spill] sm:$0xff] %v1798_v40  ;;  %3667 = vst [vmem:[#allocation5_spill] sm:$0xff] %v1800_v41 }
  0x76   :  { %326 = vrot.lane.b32.xlu1 %v1611_v18, %s1471_s2  ;;  %324 = vrot.lane.b32.xlu0 %v1616_v19, %s1471_s2  ;;  %v1979_v18 = vld [vmem:[%s3616_s0 + $0x59] sm:$0xf]  ;;  %v1984_v19 = vld [vmem:[%s3616_s0 + $0x51] sm:$0xff] }
  0x78   :  { %v1806_v42 = vpop.permute.xlu1 %134  ;;  %v1808_v43 = vpop.permute.xlu0 %130 }
  0x79   :  { %3668 = vst [vmem:[#allocation6_spill] sm:$0xff] %v1806_v42  ;;  %3669 = vst [vmem:[#allocation7_spill] sm:$0xff] %v1808_v43  ;;  %v2720_v42 = vld [vmem:[%s3616_s0 + $0x112] sm:$0xff] }
  0x7a   :  { %330 = vrot.lane.b32.xlu1 %v1625_v20, %s1471_s2  ;;  %328 = vrot.lane.b32.xlu0 %v1630_v21, %s1471_s2 }
  0x7c   :  { %v1814_v44 = vpop.permute.xlu1 %138  ;;  %v1816_v45 = vpop.permute.xlu0 %136 }
  0x7d   :  { %3670 = vst [vmem:[#allocation8_spill] sm:$0xff] %v1814_v44  ;;  %3671 = vst [vmem:[#allocation9_spill] sm:$0xff] %v1816_v45 }
  0x7e   :  { %334 = vrot.lane.b32.xlu1 %v1639_v22, %s1471_s2  ;;  %332 = vrot.lane.b32.xlu0 %v1644_v23, %s1471_s2 }
  0x80   :  { %v1822_v46 = vpop.permute.xlu1 %142  ;;  %v1824_v47 = vpop.permute.xlu0 %140 }
  0x81   :  { %3672 = vst [vmem:[#allocation10_spill] sm:$0xff] %v1822_v46  ;;  %3673 = vst [vmem:[#allocation11_spill] sm:$0xff] %v1824_v47  ;;  %v2218_v46 = vld [vmem:[%s3616_s0 + $0x121] sm:$0xff] }
  0x82   :  { %338 = vrot.lane.b32.xlu1 %v1653_v24, %s1471_s2  ;;  %336 = vrot.lane.b32.xlu0 %v1658_v25, %s1471_s2  ;;  %3731 = vst [vmem:[#allocation69_spill] sm:$0xff] %v2218_v46 }
  0x84   :  { %v1830_v48 = vpop.permute.xlu1 %146  ;;  %v1832_v49 = vpop.permute.xlu0 %144 }
  0x85   :  { %3674 = vst [vmem:[#allocation12_spill] sm:$0xff] %v1830_v48  ;;  %3675 = vst [vmem:[#allocation13_spill] sm:$0xff] %v1832_v49  ;;  %v2182_v48 = vld [vmem:[%s3616_s0 + $0x101] sm:$0xff] }
  0x86   :  { %342 = vrot.lane.b32.xlu1 %v1667_v26, %s1471_s2  ;;  %340 = vrot.lane.b32.xlu0 %v1672_v27, %s1471_s2  ;;  %3723 = vst [vmem:[#allocation61_spill] sm:$0xff] %v2182_v48 }
  0x88   :  { %v1838_v50 = vpop.permute.xlu1 %150  ;;  %v1840_v51 = vpop.permute.xlu0 %148 }
  0x89   :  { %3676 = vst [vmem:[#allocation14_spill] sm:$0xff] %v1838_v50  ;;  %3677 = vst [vmem:[#allocation15_spill] sm:$0xff] %v1840_v51  ;;  %v2146_v50 = vld [vmem:[%s3616_s0 + $0xe1] sm:$0xff] }
  0x8a   :  { %346 = vrot.lane.b32.xlu1 %v1681_v28, %s1471_s2  ;;  %344 = vrot.lane.b32.xlu0 %v1686_v29, %s1471_s2  ;;  %3715 = vst [vmem:[#allocation53_spill] sm:$0xff] %v2146_v50 }
  0x8c   :  { %v1846_v52 = vpop.permute.xlu1 %154  ;;  %v1848_v53 = vpop.permute.xlu0 %152 }
  0x8d   :  { %3678 = vst [vmem:[#allocation16_spill] sm:$0xff] %v1846_v52  ;;  %3679 = vst [vmem:[#allocation17_spill] sm:$0xff] %v1848_v53  ;;  %v2110_v52 = vld [vmem:[%s3616_s0 + $0xc1] sm:$0xff] }
  0x8e   :  { %350 = vrot.lane.b32.xlu1 %v1695_v30, %s1471_s2  ;;  %348 = vrot.lane.b32.xlu0 %v1700_v31, %s1471_s2  ;;  %v1997_v30 = vld [vmem:[%s3616_s0 + $0x69] sm:$0xf]  ;;  %v2002_v31 = vld [vmem:[%s3616_s0 + $0x61] sm:$0xff]  ;;  %3707 = vst [vmem:[#allocation45_spill] sm:$0xff] %v2110_v52 }
  0x90   :  { %v1854_v54 = vpop.permute.xlu1 %158  ;;  %v1856_v55 = vpop.permute.xlu0 %156 }
  0x91   :  { %3680 = vst [vmem:[#allocation18_spill] sm:$0xff] %v1854_v54  ;;  %3681 = vst [vmem:[#allocation19_spill] sm:$0xff] %v1856_v55  ;;  %v2069_v55 = vld [vmem:[%s3616_s0 + $0xa9] sm:$0xf]  ;;  %v2074_v54 = vld [vmem:[%s3616_s0 + $0xa1] sm:$0xff] }
  0x92   :  { %354 = vrot.lane.b32.xlu1 %v1709_v32, %s1471_s2  ;;  %352 = vrot.lane.b32.xlu0 %v1714_v33, %s1471_s2 }
  0x94   :  { %v1862_v56 = vpop.permute.xlu1 %162  ;;  %v1864_v57 = vpop.permute.xlu0 %160 }
  0x95   :  { %3682 = vst [vmem:[#allocation20_spill] sm:$0xff] %v1862_v56  ;;  %3683 = vst [vmem:[#allocation21_spill] sm:$0xff] %v1864_v57 }
  0x96   :  { %358 = vrot.lane.b32.xlu1 %v1723_v34, %s1471_s2  ;;  %356 = vrot.lane.b32.xlu0 %v1728_v35, %s1471_s2  ;;  %v2015_v34 = vld [vmem:[%s3616_s0 + $0x79] sm:$0xf]  ;;  %v2020_v35 = vld [vmem:[%s3616_s0 + $0x71] sm:$0xff] }
  0x98   :  { %v1870_v58 = vpop.permute.xlu1 %166  ;;  %v1872_v59 = vpop.permute.xlu0 %164 }
  0x99   :  { %3684 = vst [vmem:[#allocation22_spill] sm:$0xff] %v1870_v58  ;;  %3685 = vst [vmem:[#allocation23_spill] sm:$0xff] %v1872_v59  ;;  %v2051_v59 = vld [vmem:[%s3616_s0 + $0x99] sm:$0xf]  ;;  %v2056_v58 = vld [vmem:[%s3616_s0 + $0x91] sm:$0xff] }
  0x9a   :  { %362 = vrot.lane.b32.xlu1 %v1737_v36, %s1471_s2  ;;  %360 = vrot.lane.b32.xlu0 %v1742_v37, %s1471_s2 }
  0x9c   :  { %v1878_v60 = vpop.permute.xlu1 %170  ;;  %v1880_v61 = vpop.permute.xlu0 %168 }
  0x9d   :  { %3686 = vst [vmem:[#allocation24_spill] sm:$0xff] %v1878_v60  ;;  %3687 = vst [vmem:[#allocation25_spill] sm:$0xff] %v1880_v61 }
  0x9e   :  { %366 = vrot.lane.b32.xlu1 %v1751_v38, %s1471_s2  ;;  %364 = vrot.lane.b32.xlu0 %v1756_v39, %s1471_s2  ;;  %v2033_v38 = vld [vmem:[%s3616_s0 + $0x89] sm:$0xf]  ;;  %v2038_v39 = vld [vmem:[%s3616_s0 + $0x81] sm:$0xff] }
  0xa0   :  { %v1896_v0 = vpop.permute.xlu1 %174  ;;  %v1898_v1 = vpop.permute.xlu0 %172 }
  0xa2   :  { %570 = vrot.lane.b32.xlu1 %v1889_v62, %s1470_s10  ;;  %568 = vrot.lane.b32.xlu0 %v1894_v63, %s1470_s10 }
  0xa4   :  { %v1914_v4 = vpop.permute.xlu1 %178  ;;  %v1916_v5 = vpop.permute.xlu0 %176 }
  0xa6   :  { %574 = vrot.lane.b32.xlu1 %v1907_v2, %s1470_s10  ;;  %572 = vrot.lane.b32.xlu0 %v1912_v3, %s1470_s10 }
  0xa8   :  { %v1932_v8 = vpop.permute.xlu1 %182  ;;  %v1934_v9 = vpop.permute.xlu0 %180 }
  0xaa   :  { %578 = vrot.lane.b32.xlu1 %v1925_v6, %s1470_s10  ;;  %576 = vrot.lane.b32.xlu0 %v1930_v7, %s1470_s10 }
  0xac   :  { %v1950_v12 = vpop.permute.xlu1 %186  ;;  %v1952_v13 = vpop.permute.xlu0 %184 }
  0xad   :  { %3688 = vst [vmem:[#allocation26_spill] sm:$0xff] %v1950_v12  ;;  %3689 = vst [vmem:[#allocation27_spill] sm:$0xff] %v1952_v13  ;;  %v2702_v12 = vld [vmem:[%s3616_s0 + $0x102] sm:$0xff] }
  0xae   :  { %582 = vrot.lane.b32.xlu1 %v1943_v10, %s1470_s10  ;;  %580 = vrot.lane.b32.xlu0 %v1948_v11, %s1470_s10 }
  0xb0   :  { %v1968_v16 = vpop.permute.xlu1 %190  ;;  %v1970_v17 = vpop.permute.xlu0 %188 }
  0xb1   :  { %3690 = vst [vmem:[#allocation28_spill] sm:$0xff] %v1968_v16  ;;  %3691 = vst [vmem:[#allocation29_spill] sm:$0xff] %v1970_v17  ;;  %v2236_v16 = vld [vmem:[%s3616_s0 + $0x131] sm:$0xff] }
  0xb2   :  { %586 = vrot.lane.b32.xlu1 %v1961_v14, %s1470_s10  ;;  %584 = vrot.lane.b32.xlu0 %v1966_v15, %s1470_s10  ;;  %3735 = vst [vmem:[#allocation73_spill] sm:$0xff] %v2236_v16 }
  0xb4   :  { %v1986_v20 = vpop.permute.xlu1 %194  ;;  %v1988_v21 = vpop.permute.xlu0 %192 }
  0xb5   :  { %3692 = vst [vmem:[#allocation30_spill] sm:$0xff] %v1986_v20  ;;  %3693 = vst [vmem:[#allocation31_spill] sm:$0xff] %v1988_v21  ;;  %v2200_v20 = vld [vmem:[%s3616_s0 + $0x111] sm:$0xff] }
  0xb6   :  { %590 = vrot.lane.b32.xlu1 %v1979_v18, %s1470_s10  ;;  %588 = vrot.lane.b32.xlu0 %v1984_v19, %s1470_s10  ;;  %3727 = vst [vmem:[#allocation65_spill] sm:$0xff] %v2200_v20 }
  0xb8   :  { %v2004_v32 = vpop.permute.xlu1 %198  ;;  %v2006_v33 = vpop.permute.xlu0 %196 }
  0xb9   :  { %3694 = vst [vmem:[#allocation32_spill] sm:$0xff] %v2004_v32  ;;  %3695 = vst [vmem:[#allocation33_spill] sm:$0xff] %v2006_v33  ;;  %v2164_v32 = vld [vmem:[%s3616_s0 + $0xf1] sm:$0xff] }
  0xba   :  { %594 = vrot.lane.b32.xlu1 %v1997_v30, %s1470_s10  ;;  %592 = vrot.lane.b32.xlu0 %v2002_v31, %s1470_s10  ;;  %3719 = vst [vmem:[#allocation57_spill] sm:$0xff] %v2164_v32 }
  0xbc   :  { %v2022_v36 = vpop.permute.xlu1 %202  ;;  %v2024_v37 = vpop.permute.xlu0 %200 }
  0xbd   :  { %3696 = vst [vmem:[#allocation34_spill] sm:$0xff] %v2022_v36  ;;  %3697 = vst [vmem:[#allocation35_spill] sm:$0xff] %v2024_v37  ;;  %v2128_v36 = vld [vmem:[%s3616_s0 + $0xd1] sm:$0xff] }
  0xbe   :  { %598 = vrot.lane.b32.xlu1 %v2015_v34, %s1470_s10  ;;  %596 = vrot.lane.b32.xlu0 %v2020_v35, %s1470_s10  ;;  %3711 = vst [vmem:[#allocation49_spill] sm:$0xff] %v2128_v36 }
  0xc0   :  { %v2040_v61 = vpop.permute.xlu1 %206  ;;  %v2042_v60 = vpop.permute.xlu0 %204 }
  0xc1   :  { %3698 = vst [vmem:[#allocation36_spill] sm:$0xff] %v2040_v61  ;;  %3699 = vst [vmem:[#allocation37_spill] sm:$0xff] %v2042_v60  ;;  %v2092_v61 = vld [vmem:[%s3616_s0 + $0xb1] sm:$0xff] }
  0xc2   :  { %602 = vrot.lane.b32.xlu1 %v2033_v38, %s1470_s10  ;;  %600 = vrot.lane.b32.xlu0 %v2038_v39, %s1470_s10 }
  0xc4   :  { %v2058_v57 = vpop.permute.xlu1 %290  ;;  %v2060_v56 = vpop.permute.xlu0 %288 }
  0xc5   :  { %3700 = vst [vmem:[#allocation38_spill] sm:$0xff] %v2058_v57  ;;  %3701 = vst [vmem:[#allocation39_spill] sm:$0xff] %v2060_v56  ;;  %v2087_v56 = vld [vmem:[%s3616_s0 + $0xb9] sm:$0xf] }
  0xc6   :  { %606 = vrot.lane.b32.xlu1 %v2051_v59, %s1470_s10  ;;  %604 = vrot.lane.b32.xlu0 %v2056_v58, %s1470_s10 }
  0xc8   :  { %v2076_v60 = vpop.permute.xlu1 %294  ;;  %v2078_v57 = vpop.permute.xlu0 %292 }
  0xc9   :  { %3702 = vst [vmem:[#allocation40_spill] sm:$0xff] %v2076_v60  ;;  %3703 = vst [vmem:[#allocation41_spill] sm:$0xff] %v2078_v57  ;;  %v2105_v57 = vld [vmem:[%s3616_s0 + $0xc9] sm:$0xf] }
  0xca   :  { %610 = vrot.lane.b32.xlu1 %v2069_v55, %s1470_s10  ;;  %608 = vrot.lane.b32.xlu0 %v2074_v54, %s1470_s10  ;;  %3706 = vst [vmem:[#allocation44_spill] sm:$0xff] %v2105_v57 }
  0xcc   :  { %v2094_v53 = vpop.permute.xlu1 %298  ;;  %v2096_v60 = vpop.permute.xlu0 %296 }
  0xcd   :  { %3704 = vst [vmem:[#allocation42_spill] sm:$0xff] %v2094_v53  ;;  %3705 = vst [vmem:[#allocation43_spill] sm:$0xff] %v2096_v60  ;;  %v2123_v60 = vld [vmem:[%s3616_s0 + $0xd9] sm:$0xf] }
  0xce   :  { %614 = vrot.lane.b32.xlu1 %v2087_v56, %s1470_s10  ;;  %612 = vrot.lane.b32.xlu0 %v2092_v61, %s1470_s10  ;;  %3710 = vst [vmem:[#allocation48_spill] sm:$0xff] %v2123_v60 }
  0xd0   :  { %v2112_v37 = vpop.permute.xlu1 %302  ;;  %v2114_v53 = vpop.permute.xlu0 %300 }
  0xd1   :  { %3708 = vst [vmem:[#allocation46_spill] sm:$0xff] %v2112_v37  ;;  %3709 = vst [vmem:[#allocation47_spill] sm:$0xff] %v2114_v53  ;;  %v2141_v53 = vld [vmem:[%s3616_s0 + $0xe9] sm:$0xf] }
  0xd2   :  { %618 = vrot.lane.b32.xlu1 %v2105_v57, %s1470_s10  ;;  %616 = vrot.lane.b32.xlu0 %v2110_v52, %s1470_s10  ;;  %3714 = vst [vmem:[#allocation52_spill] sm:$0xff] %v2141_v53 }
  0xd4   :  { %v2130_v51 = vpop.permute.xlu1 %306  ;;  %v2132_v37 = vpop.permute.xlu0 %304 }
  0xd5   :  { %3712 = vst [vmem:[#allocation50_spill] sm:$0xff] %v2130_v51  ;;  %3713 = vst [vmem:[#allocation51_spill] sm:$0xff] %v2132_v37  ;;  %v2159_v37 = vld [vmem:[%s3616_s0 + $0xf9] sm:$0xf] }
  0xd6   :  { %622 = vrot.lane.b32.xlu1 %v2123_v60, %s1470_s10  ;;  %620 = vrot.lane.b32.xlu0 %v2128_v36, %s1470_s10  ;;  %3718 = vst [vmem:[#allocation56_spill] sm:$0xff] %v2159_v37 }
  0xd8   :  { %v2148_v33 = vpop.permute.xlu1 %310  ;;  %v2150_v51 = vpop.permute.xlu0 %308 }
  0xd9   :  { %3716 = vst [vmem:[#allocation54_spill] sm:$0xff] %v2148_v33  ;;  %3717 = vst [vmem:[#allocation55_spill] sm:$0xff] %v2150_v51  ;;  %v2177_v51 = vld [vmem:[%s3616_s0 + $0x109] sm:$0xf] }
  0xda   :  { %626 = vrot.lane.b32.xlu1 %v2141_v53, %s1470_s10  ;;  %624 = vrot.lane.b32.xlu0 %v2146_v50, %s1470_s10  ;;  %3722 = vst [vmem:[#allocation60_spill] sm:$0xff] %v2177_v51 }
  0xdc   :  { %v2166_v49 = vpop.permute.xlu1 %314  ;;  %v2168_v33 = vpop.permute.xlu0 %312 }
  0xdd   :  { %3720 = vst [vmem:[#allocation58_spill] sm:$0xff] %v2166_v49  ;;  %3721 = vst [vmem:[#allocation59_spill] sm:$0xff] %v2168_v33  ;;  %v2195_v33 = vld [vmem:[%s3616_s0 + $0x119] sm:$0xf] }
  0xde   :  { %630 = vrot.lane.b32.xlu1 %v2159_v37, %s1470_s10  ;;  %628 = vrot.lane.b32.xlu0 %v2164_v32, %s1470_s10  ;;  %3726 = vst [vmem:[#allocation64_spill] sm:$0xff] %v2195_v33 }
  0xe0   :  { %v2184_v21 = vpop.permute.xlu1 %318  ;;  %v2186_v49 = vpop.permute.xlu0 %316 }
  0xe1   :  { %3724 = vst [vmem:[#allocation62_spill] sm:$0xff] %v2184_v21  ;;  %3725 = vst [vmem:[#allocation63_spill] sm:$0xff] %v2186_v49  ;;  %v2213_v49 = vld [vmem:[%s3616_s0 + $0x129] sm:$0xf] }
  0xe2   :  { %634 = vrot.lane.b32.xlu1 %v2177_v51, %s1470_s10  ;;  %632 = vrot.lane.b32.xlu0 %v2182_v48, %s1470_s10  ;;  %3730 = vst [vmem:[#allocation68_spill] sm:$0xff] %v2213_v49 }
  0xe4   :  { %v2202_v47 = vpop.permute.xlu1 %322  ;;  %v2204_v21 = vpop.permute.xlu0 %320 }
  0xe5   :  { %3728 = vst [vmem:[#allocation66_spill] sm:$0xff] %v2202_v47  ;;  %3729 = vst [vmem:[#allocation67_spill] sm:$0xff] %v2204_v21  ;;  %v2231_v21 = vld [vmem:[%s3616_s0 + $0x139] sm:$0xf] }
  0xe6   :  { %638 = vrot.lane.b32.xlu1 %v2195_v33, %s1470_s10  ;;  %636 = vrot.lane.b32.xlu0 %v2200_v20, %s1470_s10  ;;  %3734 = vst [vmem:[#allocation72_spill] sm:$0xff] %v2231_v21 }
  0xe8   :  { %v2220_v17 = vpop.permute.xlu1 %326  ;;  %v2222_v47 = vpop.permute.xlu0 %324 }
  0xe9   :  { %3732 = vst [vmem:[#allocation70_spill] sm:$0xff] %v2220_v17  ;;  %3733 = vst [vmem:[#allocation71_spill] sm:$0xff] %v2222_v47 }
  0xea   :  { %642 = vrot.lane.b32.xlu1 %v2213_v49, %s1470_s10  ;;  %640 = vrot.lane.b32.xlu0 %v2218_v46, %s1470_s10 }
  0xec   :  { %v2238_v45 = vpop.permute.xlu1 %330  ;;  %v2240_v17 = vpop.permute.xlu0 %328 }
  0xed   :  { %3736 = vst [vmem:[#allocation74_spill] sm:$0xff] %v2238_v45  ;;  %3737 = vst [vmem:[#allocation75_spill] sm:$0xff] %v2240_v17 }
  0xee   :  { %646 = vrot.lane.b32.xlu1 %v2231_v21, %s1470_s10  ;;  %644 = vrot.lane.b32.xlu0 %v2236_v16, %s1470_s10 }
  0xf0   :  { %v2246_v47 = vpop.permute.xlu1 %334  ;;  %v2248_v44 = vpop.permute.xlu0 %332 }
  0xf2   :  { %730 = vrot.lane.b32.xlu1 %v1889_v62, %s1471_s2  ;;  %728 = vrot.lane.b32.xlu0 %v1894_v63, %s1471_s2 }
  0xf4   :  { %v2254_v43 = vpop.permute.xlu1 %338  ;;  %v2256_v45 = vpop.permute.xlu0 %336 }
  0xf6   :  { %734 = vrot.lane.b32.xlu1 %v1907_v2, %s1471_s2  ;;  %732 = vrot.lane.b32.xlu0 %v1912_v3, %s1471_s2 }
  0xf8   :  { %v2262_v17 = vpop.permute.xlu1 %342  ;;  %v2264_v13 = vpop.permute.xlu0 %340 }
  0xf9   :  { %3738 = vst [vmem:[#allocation76_spill] sm:$0xff] %v2264_v13  ;;  %v2756_v13 = vld [vmem:[%s3616_s0 + $0x132] sm:$0xff] }
  0xfa   :  { %738 = vrot.lane.b32.xlu1 %v1925_v6, %s1471_s2  ;;  %736 = vrot.lane.b32.xlu0 %v1930_v7, %s1471_s2  ;;  %3833 = vst [vmem:[#allocation171_spill] sm:$0xff] %v2756_v13 }
  0xfc   :  { %v2270_v62 = vpop.permute.xlu1 %346  ;;  %v2272_v63 = vpop.permute.xlu0 %344 }
  0xfd   :  { %3739 = vst [vmem:[#allocation77_spill] sm:$0xff] %v2270_v62  ;;  %3740 = vst [vmem:[#allocation78_spill] sm:$0xff] %v2272_v63  ;;  %v2648_v63 = vld [vmem:[%s3616_s0 + $0xd2] sm:$0xff] }
  0xfe   :  { %742 = vrot.lane.b32.xlu1 %v1943_v10, %s1471_s2  ;;  %740 = vrot.lane.b32.xlu0 %v1948_v11, %s1471_s2 }
 0x100   :  { %v2278_v2 = vpop.permute.xlu1 %350  ;;  %v2280_v3 = vpop.permute.xlu0 %348 }
 0x101   :  { %3741 = vst [vmem:[#allocation79_spill] sm:$0xff] %v2278_v2  ;;  %3742 = vst [vmem:[#allocation80_spill] sm:$0xff] %v2280_v3  ;;  %v2612_v2 = vld [vmem:[%s3616_s0 + $0xb2] sm:$0xff] }
 0x102   :  { %746 = vrot.lane.b32.xlu1 %v1961_v14, %s1471_s2  ;;  %744 = vrot.lane.b32.xlu0 %v1966_v15, %s1471_s2 }
 0x104   :  { %v2286_v6 = vpop.permute.xlu1 %354  ;;  %v2288_v7 = vpop.permute.xlu0 %352 }
 0x105   :  { %3743 = vst [vmem:[#allocation81_spill] sm:$0xff] %v2286_v6  ;;  %3744 = vst [vmem:[#allocation82_spill] sm:$0xff] %v2288_v7  ;;  %v2558_v6 = vld [vmem:[%s3616_s0 + $0x82] sm:$0xff] }
 0x106   :  { %750 = vrot.lane.b32.xlu1 %v1979_v18, %s1471_s2  ;;  %748 = vrot.lane.b32.xlu0 %v1984_v19, %s1471_s2  ;;  %3804 = vst [vmem:[#allocation142_spill] sm:$0xff] %v2558_v6 }
 0x108   :  { %v2294_v10 = vpop.permute.xlu1 %358  ;;  %v2296_v11 = vpop.permute.xlu0 %356 }
 0x109   :  { %3745 = vst [vmem:[#allocation83_spill] sm:$0xff] %v2294_v10  ;;  %3746 = vst [vmem:[#allocation84_spill] sm:$0xff] %v2296_v11 }
 0x10a   :  { %754 = vrot.lane.b32.xlu1 %v1997_v30, %s1471_s2  ;;  %752 = vrot.lane.b32.xlu0 %v2002_v31, %s1471_s2 }
 0x10c   :  { %v2302_v14 = vpop.permute.xlu1 %362  ;;  %v2304_v15 = vpop.permute.xlu0 %360 }
 0x10d   :  { %3747 = vst [vmem:[#allocation85_spill] sm:$0xff] %v2302_v14  ;;  %3748 = vst [vmem:[#allocation86_spill] sm:$0xff] %v2304_v15 }
 0x10e   :  { %758 = vrot.lane.b32.xlu1 %v2015_v34, %s1471_s2  ;;  %756 = vrot.lane.b32.xlu0 %v2020_v35, %s1471_s2 }
 0x110   :  { %v2310_v18 = vpop.permute.xlu1 %366  ;;  %v2312_v19 = vpop.permute.xlu0 %364 }
 0x111   :  { %3749 = vst [vmem:[#allocation87_spill] sm:$0xff] %v2310_v18  ;;  %3750 = vst [vmem:[#allocation88_spill] sm:$0xff] %v2312_v19 }
 0x112   :  { %762 = vrot.lane.b32.xlu1 %v2033_v38, %s1471_s2  ;;  %760 = vrot.lane.b32.xlu0 %v2038_v39, %s1471_s2 }
 0x114   :  { %v2318_v30 = vpop.permute.xlu1 %570  ;;  %v2320_v31 = vpop.permute.xlu0 %568 }
 0x115   :  { %3751 = vst [vmem:[#allocation89_spill] sm:$0xff] %v2318_v30  ;;  %3752 = vst [vmem:[#allocation90_spill] sm:$0xff] %v2320_v31  ;;  %v2445_v31 = vld [vmem:[%s3616_s0 + $0x2a] sm:$0xf]  ;;  %v2450_v30 = vld [vmem:[%s3616_s0 + $0x22] sm:$0xff] }
 0x116   :  { %766 = vrot.lane.b32.xlu1 %v2051_v59, %s1471_s2  ;;  %764 = vrot.lane.b32.xlu0 %v2056_v58, %s1471_s2  ;;  %3779 = vst [vmem:[#allocation117_spill] sm:$0xff] %v2445_v31  ;;  %3780 = vst [vmem:[#allocation118_spill] sm:$0xff] %v2450_v30 }
 0x118   :  { %v2326_v34 = vpop.permute.xlu1 %574  ;;  %v2328_v35 = vpop.permute.xlu0 %572 }
 0x119   :  { %3753 = vst [vmem:[#allocation91_spill] sm:$0xff] %v2326_v34  ;;  %3754 = vst [vmem:[#allocation92_spill] sm:$0xff] %v2328_v35 }
 0x11a   :  { %770 = vrot.lane.b32.xlu1 %v2069_v55, %s1471_s2  ;;  %768 = vrot.lane.b32.xlu0 %v2074_v54, %s1471_s2 }
 0x11c   :  { %v2334_v38 = vpop.permute.xlu1 %578  ;;  %v2336_v39 = vpop.permute.xlu0 %576 }
 0x11d   :  { %3755 = vst [vmem:[#allocation93_spill] sm:$0xff] %v2334_v38  ;;  %3756 = vst [vmem:[#allocation94_spill] sm:$0xff] %v2336_v39  ;;  %v2432_v38 = vld [vmem:[%s3616_s0 + $0x12] sm:$0xff] }
 0x11e   :  { %774 = vrot.lane.b32.xlu1 %v2087_v56, %s1471_s2  ;;  %772 = vrot.lane.b32.xlu0 %v2092_v61, %s1471_s2  ;;  %3776 = vst [vmem:[#allocation114_spill] sm:$0xff] %v2432_v38 }
 0x120   :  { %v2342_v58 = vpop.permute.xlu1 %582  ;;  %v2344_v59 = vpop.permute.xlu0 %580 }
 0x121   :  { %3757 = vst [vmem:[#allocation95_spill] sm:$0xff] %v2342_v58  ;;  %3758 = vst [vmem:[#allocation96_spill] sm:$0xff] %v2344_v59 }
 0x122   :  { %778 = vrot.lane.b32.xlu1 %v2105_v57, %s1471_s2  ;;  %776 = vrot.lane.b32.xlu0 %v2110_v52, %s1471_s2  ;;  %v2738_v52 = vld [vmem:[%s3616_s0 + $0x122] sm:$0xff] }
 0x123   :  { %3830 = vst [vmem:[#allocation168_spill] sm:$0xff] %v2738_v52 }
 0x124   :  { %v2350_v54 = vpop.permute.xlu1 %586  ;;  %v2352_v55 = vpop.permute.xlu0 %584 }
 0x125   :  { %3759 = vst [vmem:[#allocation97_spill] sm:$0xff] %v2350_v54  ;;  %3760 = vst [vmem:[#allocation98_spill] sm:$0xff] %v2352_v55 }
 0x126   :  { %782 = vrot.lane.b32.xlu1 %v2123_v60, %s1471_s2  ;;  %780 = vrot.lane.b32.xlu0 %v2128_v36, %s1471_s2  ;;  %v2666_v60 = vld [vmem:[%s3616_s0 + $0xe2] sm:$0xff] }
 0x128   :  { %v2358_v39 = vpop.permute.xlu1 %590  ;;  %v2360_v58 = vpop.permute.xlu0 %588 }
 0x129   :  { %3761 = vst [vmem:[#allocation99_spill] sm:$0xff] %v2358_v39  ;;  %3762 = vst [vmem:[#allocation100_spill] sm:$0xff] %v2360_v58 }
 0x12a   :  { %786 = vrot.lane.b32.xlu1 %v2141_v53, %s1471_s2  ;;  %784 = vrot.lane.b32.xlu0 %v2146_v50, %s1471_s2  ;;  %v2594_v53 = vld [vmem:[%s3616_s0 + $0xa2] sm:$0xff] }
 0x12b   :  { %3812 = vst [vmem:[#allocation150_spill] sm:$0xff] %v2594_v53 }
 0x12c   :  { %v2366_v59 = vpop.permute.xlu1 %594  ;;  %v2368_v54 = vpop.permute.xlu0 %592 }
 0x12d   :  { %3763 = vst [vmem:[#allocation101_spill] sm:$0xff] %v2366_v59  ;;  %3764 = vst [vmem:[#allocation102_spill] sm:$0xff] %v2368_v54 }
 0x12e   :  { %790 = vrot.lane.b32.xlu1 %v2159_v37, %s1471_s2  ;;  %788 = vrot.lane.b32.xlu0 %v2164_v32, %s1471_s2  ;;  %v2540_v37 = vld [vmem:[%s3616_s0 + $0x72] sm:$0xff] }
 0x12f   :  { %3800 = vst [vmem:[#allocation138_spill] sm:$0xff] %v2540_v37 }
 0x130   :  { %v2374_v55 = vpop.permute.xlu1 %598  ;;  %v2376_v39 = vpop.permute.xlu0 %596 }
 0x131   :  { %3765 = vst [vmem:[#allocation103_spill] sm:$0xff] %v2374_v55  ;;  %3766 = vst [vmem:[#allocation104_spill] sm:$0xff] %v2376_v39 }
 0x132   :  { %794 = vrot.lane.b32.xlu1 %v2177_v51, %s1471_s2  ;;  %792 = vrot.lane.b32.xlu0 %v2182_v48, %s1471_s2  ;;  %v2499_v48 = vld [vmem:[%s3616_s0 + $0x5a] sm:$0xf]  ;;  %v2504_v51 = vld [vmem:[%s3616_s0 + $0x52] sm:$0xff] }
 0x133   :  { %3791 = vst [vmem:[#allocation129_spill] sm:$0xff] %v2499_v48  ;;  %3792 = vst [vmem:[#allocation130_spill] sm:$0xff] %v2504_v51 }
 0x134   :  { %v2382_v58 = vpop.permute.xlu1 %602  ;;  %v2384_v59 = vpop.permute.xlu0 %600 }
 0x135   :  { %3767 = vst [vmem:[#allocation105_spill] sm:$0xff] %v2382_v58  ;;  %3768 = vst [vmem:[#allocation106_spill] sm:$0xff] %v2384_v59 }
 0x136   :  { %798 = vrot.lane.b32.xlu1 %v2195_v33, %s1471_s2  ;;  %796 = vrot.lane.b32.xlu0 %v2200_v20, %s1471_s2  ;;  %v2481_v20 = vld [vmem:[%s3616_s0 + $0x4a] sm:$0xf]  ;;  %v2486_v33 = vld [vmem:[%s3616_s0 + $0x42] sm:$0xff] }
 0x137   :  { %3787 = vst [vmem:[#allocation125_spill] sm:$0xff] %v2481_v20  ;;  %3788 = vst [vmem:[#allocation126_spill] sm:$0xff] %v2486_v33 }
 0x138   :  { %v2390_v54 = vpop.permute.xlu1 %606  ;;  %v2392_v55 = vpop.permute.xlu0 %604 }
 0x139   :  { %3769 = vst [vmem:[#allocation107_spill] sm:$0xff] %v2390_v54  ;;  %3770 = vst [vmem:[#allocation108_spill] sm:$0xff] %v2392_v55  ;;  %v2409_v55 = vld [vmem:[%s3616_s0 + $0xa] sm:$0xf]  ;;  %v2414_v54 = vld [vmem:[%s3616_s0 + $0x2] sm:$0xff] }
 0x13a   :  { %802 = vrot.lane.b32.xlu1 %v2213_v49, %s1471_s2  ;;  %800 = vrot.lane.b32.xlu0 %v2218_v46, %s1471_s2  ;;  %3773 = vst [vmem:[#allocation111_spill] sm:$0xff] %v2409_v55  ;;  %3774 = vst [vmem:[#allocation112_spill] sm:$0xff] %v2414_v54  ;;  %v2463_v46 = vld [vmem:[%s3616_s0 + $0x3a] sm:$0xf]  ;;  %v2468_v49 = vld [vmem:[%s3616_s0 + $0x32] sm:$0xff] }
 0x13b   :  { %3783 = vst [vmem:[#allocation121_spill] sm:$0xff] %v2463_v46  ;;  %3784 = vst [vmem:[#allocation122_spill] sm:$0xff] %v2468_v49 }
 0x13c   :  { %v2398_v39 = vpop.permute.xlu1 %610  ;;  %v2400_v58 = vpop.permute.xlu0 %608 }
 0x13d   :  { %3771 = vst [vmem:[#allocation109_spill] sm:$0xff] %v2398_v39  ;;  %3772 = vst [vmem:[#allocation110_spill] sm:$0xff] %v2400_v58  ;;  %v2427_v58 = vld [vmem:[%s3616_s0 + $0x1a] sm:$0xf] }
 0x13e   :  { %806 = vrot.lane.b32.xlu1 %v2231_v21, %s1471_s2  ;;  %804 = vrot.lane.b32.xlu0 %v2236_v16, %s1471_s2  ;;  %3775 = vst [vmem:[#allocation113_spill] sm:$0xff] %v2427_v58 }
 0x140   :  { %v2416_v59 = vpop.permute.xlu1 %614  ;;  %v2418_v39 = vpop.permute.xlu0 %612 }
 0x142   :  { %1010 = vrot.lane.b32.xlu1 %v2409_v55, %s1470_s10  ;;  %1008 = vrot.lane.b32.xlu0 %v2414_v54, %s1470_s10 }
 0x144   :  { %v2434_v35 = vpop.permute.xlu1 %618  ;;  %v2436_v34 = vpop.permute.xlu0 %616 }
 0x145   :  { %3777 = vst [vmem:[#allocation115_spill] sm:$0xff] %v2434_v35  ;;  %3778 = vst [vmem:[#allocation116_spill] sm:$0xff] %v2436_v34  ;;  %v2684_v35 = vld [vmem:[%s3616_s0 + $0xf2] sm:$0xff] }
 0x146   :  { %1014 = vrot.lane.b32.xlu1 %v2427_v58, %s1470_s10  ;;  %1012 = vrot.lane.b32.xlu0 %v2432_v38, %s1470_s10 }
 0x148   :  { %v2452_v16 = vpop.permute.xlu1 %622  ;;  %v2454_v21 = vpop.permute.xlu0 %620 }
 0x149   :  { %3781 = vst [vmem:[#allocation119_spill] sm:$0xff] %v2452_v16  ;;  %3782 = vst [vmem:[#allocation120_spill] sm:$0xff] %v2454_v21  ;;  %v2630_v16 = vld [vmem:[%s3616_s0 + $0xc2] sm:$0xff] }
 0x14a   :  { %1018 = vrot.lane.b32.xlu1 %v2445_v31, %s1470_s10  ;;  %1016 = vrot.lane.b32.xlu0 %v2450_v30, %s1470_s10 }
 0x14c   :  { %v2470_v19 = vpop.permute.xlu1 %626  ;;  %v2472_v18 = vpop.permute.xlu0 %624 }
 0x14d   :  { %3785 = vst [vmem:[#allocation123_spill] sm:$0xff] %v2470_v19  ;;  %3786 = vst [vmem:[#allocation124_spill] sm:$0xff] %v2472_v18  ;;  %v2576_v19 = vld [vmem:[%s3616_s0 + $0x92] sm:$0xff] }
 0x14e   :  { %1022 = vrot.lane.b32.xlu1 %v2463_v46, %s1470_s10  ;;  %1020 = vrot.lane.b32.xlu0 %v2468_v49, %s1470_s10  ;;  %3808 = vst [vmem:[#allocation146_spill] sm:$0xff] %v2576_v19 }
 0x150   :  { %v2488_v15 = vpop.permute.xlu1 %630  ;;  %v2490_v14 = vpop.permute.xlu0 %628 }
 0x151   :  { %3789 = vst [vmem:[#allocation127_spill] sm:$0xff] %v2488_v15  ;;  %3790 = vst [vmem:[#allocation128_spill] sm:$0xff] %v2490_v14  ;;  %v2517_v14 = vld [vmem:[%s3616_s0 + $0x6a] sm:$0xf]  ;;  %v2522_v15 = vld [vmem:[%s3616_s0 + $0x62] sm:$0xff] }
 0x152   :  { %1026 = vrot.lane.b32.xlu1 %v2481_v20, %s1470_s10  ;;  %1024 = vrot.lane.b32.xlu0 %v2486_v33, %s1470_s10  ;;  %3795 = vst [vmem:[#allocation133_spill] sm:$0xff] %v2517_v14  ;;  %3796 = vst [vmem:[#allocation134_spill] sm:$0xff] %v2522_v15 }
 0x154   :  { %v2506_v11 = vpop.permute.xlu1 %634  ;;  %v2508_v10 = vpop.permute.xlu0 %632 }
 0x155   :  { %3793 = vst [vmem:[#allocation131_spill] sm:$0xff] %v2506_v11  ;;  %3794 = vst [vmem:[#allocation132_spill] sm:$0xff] %v2508_v10  ;;  %v2535_v10 = vld [vmem:[%s3616_s0 + $0x7a] sm:$0xf] }
 0x156   :  { %1030 = vrot.lane.b32.xlu1 %v2499_v48, %s1470_s10  ;;  %1028 = vrot.lane.b32.xlu0 %v2504_v51, %s1470_s10  ;;  %3799 = vst [vmem:[#allocation137_spill] sm:$0xff] %v2535_v10 }
 0x158   :  { %v2524_v32 = vpop.permute.xlu1 %638  ;;  %v2526_v11 = vpop.permute.xlu0 %636 }
 0x159   :  { %3797 = vst [vmem:[#allocation135_spill] sm:$0xff] %v2524_v32  ;;  %3798 = vst [vmem:[#allocation136_spill] sm:$0xff] %v2526_v11  ;;  %v2553_v11 = vld [vmem:[%s3616_s0 + $0x8a] sm:$0xf] }
 0x15a   :  { %1034 = vrot.lane.b32.xlu1 %v2517_v14, %s1470_s10  ;;  %1032 = vrot.lane.b32.xlu0 %v2522_v15, %s1470_s10  ;;  %3803 = vst [vmem:[#allocation141_spill] sm:$0xff] %v2553_v11 }
 0x15c   :  { %v2542_v7 = vpop.permute.xlu1 %642  ;;  %v2544_v32 = vpop.permute.xlu0 %640 }
 0x15d   :  { %3801 = vst [vmem:[#allocation139_spill] sm:$0xff] %v2542_v7  ;;  %3802 = vst [vmem:[#allocation140_spill] sm:$0xff] %v2544_v32  ;;  %v2571_v32 = vld [vmem:[%s3616_s0 + $0x9a] sm:$0xf] }
 0x15e   :  { %1038 = vrot.lane.b32.xlu1 %v2535_v10, %s1470_s10  ;;  %1036 = vrot.lane.b32.xlu0 %v2540_v37, %s1470_s10  ;;  %3807 = vst [vmem:[#allocation145_spill] sm:$0xff] %v2571_v32 }
 0x160   :  { %v2560_v18 = vpop.permute.xlu1 %646  ;;  %v2562_v7 = vpop.permute.xlu0 %644 }
 0x161   :  { %3805 = vst [vmem:[#allocation143_spill] sm:$0xff] %v2560_v18  ;;  %3806 = vst [vmem:[#allocation144_spill] sm:$0xff] %v2562_v7  ;;  %v2589_v7 = vld [vmem:[%s3616_s0 + $0xaa] sm:$0xf] }
 0x162   :  { %1042 = vrot.lane.b32.xlu1 %v2553_v11, %s1470_s10  ;;  %1040 = vrot.lane.b32.xlu0 %v2558_v6, %s1470_s10  ;;  %3811 = vst [vmem:[#allocation149_spill] sm:$0xff] %v2589_v7 }
 0x164   :  { %v2578_v50 = vpop.permute.xlu1 %730  ;;  %v2580_v18 = vpop.permute.xlu0 %728 }
 0x165   :  { %3809 = vst [vmem:[#allocation147_spill] sm:$0xff] %v2578_v50  ;;  %3810 = vst [vmem:[#allocation148_spill] sm:$0xff] %v2580_v18  ;;  %v2607_v18 = vld [vmem:[%s3616_s0 + $0xba] sm:$0xf] }
 0x166   :  { %1046 = vrot.lane.b32.xlu1 %v2571_v32, %s1470_s10  ;;  %1044 = vrot.lane.b32.xlu0 %v2576_v19, %s1470_s10 }
 0x168   :  { %v2596_v3 = vpop.permute.xlu1 %734  ;;  %v2598_v50 = vpop.permute.xlu0 %732 }
 0x169   :  { %3813 = vst [vmem:[#allocation151_spill] sm:$0xff] %v2596_v3  ;;  %3814 = vst [vmem:[#allocation152_spill] sm:$0xff] %v2598_v50  ;;  %v2625_v50 = vld [vmem:[%s3616_s0 + $0xca] sm:$0xf] }
 0x16a   :  { %1050 = vrot.lane.b32.xlu1 %v2589_v7, %s1470_s10  ;;  %1048 = vrot.lane.b32.xlu0 %v2594_v53, %s1470_s10 }
 0x16c   :  { %v2614_v21 = vpop.permute.xlu1 %738  ;;  %v2616_v3 = vpop.permute.xlu0 %736 }
 0x16d   :  { %3815 = vst [vmem:[#allocation153_spill] sm:$0xff] %v2614_v21  ;;  %3816 = vst [vmem:[#allocation154_spill] sm:$0xff] %v2616_v3  ;;  %v2643_v3 = vld [vmem:[%s3616_s0 + $0xda] sm:$0xf] }
 0x16e   :  { %1054 = vrot.lane.b32.xlu1 %v2607_v18, %s1470_s10  ;;  %1052 = vrot.lane.b32.xlu0 %v2612_v2, %s1470_s10 }
 0x170   :  { %v2632_v36 = vpop.permute.xlu1 %742  ;;  %v2634_v21 = vpop.permute.xlu0 %740 }
 0x171   :  { %3817 = vst [vmem:[#allocation155_spill] sm:$0xff] %v2632_v36  ;;  %3818 = vst [vmem:[#allocation156_spill] sm:$0xff] %v2634_v21  ;;  %v2661_v21 = vld [vmem:[%s3616_s0 + $0xea] sm:$0xf] }
 0x172   :  { %1058 = vrot.lane.b32.xlu1 %v2625_v50, %s1470_s10  ;;  %1056 = vrot.lane.b32.xlu0 %v2630_v16, %s1470_s10 }
 0x174   :  { %v2650_v62 = vpop.permute.xlu1 %746  ;;  %v2652_v36 = vpop.permute.xlu0 %744 }
 0x175   :  { %3819 = vst [vmem:[#allocation157_spill] sm:$0xff] %v2650_v62  ;;  %3820 = vst [vmem:[#allocation158_spill] sm:$0xff] %v2652_v36  ;;  %v2679_v36 = vld [vmem:[%s3616_s0 + $0xfa] sm:$0xf] }
 0x176   :  { %1062 = vrot.lane.b32.xlu1 %v2643_v3, %s1470_s10  ;;  %1060 = vrot.lane.b32.xlu0 %v2648_v63, %s1470_s10 }
 0x178   :  { %v2668_v34 = vpop.permute.xlu1 %750  ;;  %v2670_v62 = vpop.permute.xlu0 %748 }
 0x179   :  { %3821 = vst [vmem:[#allocation159_spill] sm:$0xff] %v2668_v34  ;;  %3822 = vst [vmem:[#allocation160_spill] sm:$0xff] %v2670_v62  ;;  %v2697_v62 = vld [vmem:[%s3616_s0 + $0x10a] sm:$0xf] }
 0x17a   :  { %1066 = vrot.lane.b32.xlu1 %v2661_v21, %s1470_s10  ;;  %1064 = vrot.lane.b32.xlu0 %v2666_v60, %s1470_s10 }
 0x17c   :  { %v2686_v29 = vpop.permute.xlu1 %754  ;;  %v2688_v34 = vpop.permute.xlu0 %752 }
 0x17d   :  { %3823 = vst [vmem:[#allocation161_spill] sm:$0xff] %v2686_v29  ;;  %3824 = vst [vmem:[#allocation162_spill] sm:$0xff] %v2688_v34  ;;  %v2715_v34 = vld [vmem:[%s3616_s0 + $0x11a] sm:$0xf] }
 0x17e   :  { %1070 = vrot.lane.b32.xlu1 %v2679_v36, %s1470_s10  ;;  %1068 = vrot.lane.b32.xlu0 %v2684_v35, %s1470_s10 }
 0x180   :  { %v2704_v28 = vpop.permute.xlu1 %758  ;;  %v2706_v29 = vpop.permute.xlu0 %756 }
 0x181   :  { %3825 = vst [vmem:[#allocation163_spill] sm:$0xff] %v2704_v28  ;;  %3826 = vst [vmem:[#allocation164_spill] sm:$0xff] %v2706_v29  ;;  %v2733_v29 = vld [vmem:[%s3616_s0 + $0x12a] sm:$0xf] }
 0x182   :  { %1074 = vrot.lane.b32.xlu1 %v2697_v62, %s1470_s10  ;;  %1072 = vrot.lane.b32.xlu0 %v2702_v12, %s1470_s10  ;;  %3829 = vst [vmem:[#allocation167_spill] sm:$0xff] %v2733_v29 }
 0x184   :  { %v2722_v41 = vpop.permute.xlu1 %762  ;;  %v2724_v28 = vpop.permute.xlu0 %760 }
 0x185   :  { %3827 = vst [vmem:[#allocation165_spill] sm:$0xff] %v2722_v41  ;;  %3828 = vst [vmem:[#allocation166_spill] sm:$0xff] %v2724_v28  ;;  %v2751_v28 = vld [vmem:[%s3616_s0 + $0x13a] sm:$0xf] }
 0x186   :  { %1078 = vrot.lane.b32.xlu1 %v2715_v34, %s1470_s10  ;;  %1076 = vrot.lane.b32.xlu0 %v2720_v42, %s1470_s10 }
 0x188   :  { %v2740_v57 = vpop.permute.xlu1 %766  ;;  %v2742_v41 = vpop.permute.xlu0 %764 }
 0x189   :  { %3831 = vst [vmem:[#allocation169_spill] sm:$0xff] %v2740_v57  ;;  %3832 = vst [vmem:[#allocation170_spill] sm:$0xff] %v2742_v41 }
 0x18a   :  { %1082 = vrot.lane.b32.xlu1 %v2733_v29, %s1470_s10  ;;  %1080 = vrot.lane.b32.xlu0 %v2738_v52, %s1470_s10 }
 0x18c   :  { %v2758_v40 = vpop.permute.xlu1 %770  ;;  %v2760_v57 = vpop.permute.xlu0 %768 }
 0x18d   :  { %3834 = vst [vmem:[#allocation172_spill] sm:$0xff] %v2758_v40  ;;  %3835 = vst [vmem:[#allocation173_spill] sm:$0xff] %v2760_v57 }
 0x18e   :  { %1086 = vrot.lane.b32.xlu1 %v2751_v28, %s1470_s10  ;;  %1084 = vrot.lane.b32.xlu0 %v2756_v13, %s1470_s10 }
 0x190   :  { %v2766_v41 = vpop.permute.xlu1 %774  ;;  %v2768_v52 = vpop.permute.xlu0 %772 }
 0x192   :  { %1170 = vrot.lane.b32.xlu1 %v2409_v55, %s1471_s2  ;;  %1168 = vrot.lane.b32.xlu0 %v2414_v54, %s1471_s2 }
 0x194   :  { %v2774_v29 = vpop.permute.xlu1 %778  ;;  %v2776_v40 = vpop.permute.xlu0 %776 }
 0x196   :  { %1174 = vrot.lane.b32.xlu1 %v2427_v58, %s1471_s2  ;;  %1172 = vrot.lane.b32.xlu0 %v2432_v38, %s1471_s2 }
 0x198   :  { %v2782_v57 = vpop.permute.xlu1 %782  ;;  %v2784_v13 = vpop.permute.xlu0 %780 }
 0x19a   :  { %1178 = vrot.lane.b32.xlu1 %v2445_v31, %s1471_s2  ;;  %1176 = vrot.lane.b32.xlu0 %v2450_v30, %s1471_s2 }
 0x19c   :  { %v2790_v54 = vpop.permute.xlu1 %786  ;;  %v2792_v55 = vpop.permute.xlu0 %784 }
 0x19e   :  { %1182 = vrot.lane.b32.xlu1 %v2463_v46, %s1471_s2  ;;  %1180 = vrot.lane.b32.xlu0 %v2468_v49, %s1471_s2 }
 0x1a0   :  { %v2798_v38 = vpop.permute.xlu1 %790  ;;  %v2800_v58 = vpop.permute.xlu0 %788 }
 0x1a2   :  { %1186 = vrot.lane.b32.xlu1 %v2481_v20, %s1471_s2  ;;  %1184 = vrot.lane.b32.xlu0 %v2486_v33, %s1471_s2 }
 0x1a4   :  { %v2806_v30 = vpop.permute.xlu1 %794  ;;  %v2808_v31 = vpop.permute.xlu0 %792 }
 0x1a6   :  { %1190 = vrot.lane.b32.xlu1 %v2499_v48, %s1471_s2  ;;  %1188 = vrot.lane.b32.xlu0 %v2504_v51, %s1471_s2 }
 0x1a8   :  { %v2814_v49 = vpop.permute.xlu1 %798  ;;  %v2816_v46 = vpop.permute.xlu0 %796 }
 0x1aa   :  { %1194 = vrot.lane.b32.xlu1 %v2517_v14, %s1471_s2  ;;  %1192 = vrot.lane.b32.xlu0 %v2522_v15, %s1471_s2 }
 0x1ac   :  { %v2822_v33 = vpop.permute.xlu1 %802  ;;  %v2824_v20 = vpop.permute.xlu0 %800 }
 0x1ae   :  { %1198 = vrot.lane.b32.xlu1 %v2535_v10, %s1471_s2  ;;  %1196 = vrot.lane.b32.xlu0 %v2540_v37, %s1471_s2 }
 0x1b0   :  { %v2830_v51 = vpop.permute.xlu1 %806  ;;  %v2832_v48 = vpop.permute.xlu0 %804 }
 0x1b2   :  { %1202 = vrot.lane.b32.xlu1 %v2553_v11, %s1471_s2  ;;  %1200 = vrot.lane.b32.xlu0 %v2558_v6, %s1471_s2 }
 0x1b4   :  { %v2838_v15 = vpop.permute.xlu1 %1010  ;;  %v2840_v14 = vpop.permute.xlu0 %1008 }
 0x1b5   :  { %3836 = vst [vmem:[#allocation174_spill] sm:$0xff] %v2838_v15  ;;  %3837 = vst [vmem:[#allocation175_spill] sm:$0xff] %v2840_v14  ;;  %v3887_v14 = vld [vmem:[#allocation53_spill] sm:$0xff] }
 0x1b6   :  { %1206 = vrot.lane.b32.xlu1 %v2571_v32, %s1471_s2  ;;  %1204 = vrot.lane.b32.xlu0 %v2576_v19, %s1471_s2 }
 0x1b8   :  { %v2846_v37 = vpop.permute.xlu1 %1014  ;;  %v2848_v10 = vpop.permute.xlu0 %1012 }
 0x1b9   :  { %3838 = vst [vmem:[#allocation176_spill] sm:$0xff] %v2846_v37  ;;  %3839 = vst [vmem:[#allocation177_spill] sm:$0xff] %v2848_v10 }
 0x1ba   :  { %1210 = vrot.lane.b32.xlu1 %v2589_v7, %s1471_s2  ;;  %1208 = vrot.lane.b32.xlu0 %v2594_v53, %s1471_s2 }
 0x1bc   :  { %v2854_v6 = vpop.permute.xlu1 %1018  ;;  %v2856_v11 = vpop.permute.xlu0 %1016 }
 0x1bd   :  { %3840 = vst [vmem:[#allocation178_spill] sm:$0xff] %v2854_v6  ;;  %3841 = vst [vmem:[#allocation179_spill] sm:$0xff] %v2856_v11  ;;  %v270_v6 = vadd.f32 %v1898_v1, %v1644_v23  ;;  %v272_v23 = vadd.f32 %v1916_v5, %v1658_v25  ;;  %v274_v25 = vadd.f32 %v1934_v9, %v1672_v27  ;;  %v3858_v27 = vld [vmem:[#allocation167_spill] sm:$0xff]  ;;  %v3859_v9 = vld [vmem:[#allocation168_spill] sm:$0xff] }
 0x1be   :  { %1214 = vrot.lane.b32.xlu1 %v2607_v18, %s1471_s2  ;;  %1212 = vrot.lane.b32.xlu0 %v2612_v2, %s1471_s2 }
 0x1c0   :  { %v2862_v19 = vpop.permute.xlu1 %1022  ;;  %v2864_v32 = vpop.permute.xlu0 %1020 }
 0x1c1   :  { %3842 = vst [vmem:[#allocation180_spill] sm:$0xff] %v2862_v19  ;;  %3843 = vst [vmem:[#allocation181_spill] sm:$0xff] %v2864_v32 }
 0x1c2   :  { %1218 = vrot.lane.b32.xlu1 %v2625_v50, %s1471_s2  ;;  %1216 = vrot.lane.b32.xlu0 %v2630_v16, %s1471_s2 }
 0x1c4   :  { %v2870_v53 = vpop.permute.xlu1 %1026  ;;  %v2872_v7 = vpop.permute.xlu0 %1024 }
 0x1c5   :  { %3844 = vst [vmem:[#allocation182_spill] sm:$0xff] %v2870_v53  ;;  %3845 = vst [vmem:[#allocation183_spill] sm:$0xff] %v2872_v7 }
 0x1c6   :  { %1222 = vrot.lane.b32.xlu1 %v2643_v3, %s1471_s2  ;;  %1220 = vrot.lane.b32.xlu0 %v2648_v63, %s1471_s2 }
 0x1c8   :  { %v2878_v11 = vpop.permute.xlu1 %1030  ;;  %v2880_v19 = vpop.permute.xlu0 %1028 }
 0x1c9   :  { %3846 = vst [vmem:[#allocation184_spill] sm:$0xff] %v2878_v11  ;;  %3847 = vst [vmem:[#allocation185_spill] sm:$0xff] %v2880_v19  ;;  %v271_v19 = vadd.f32 %v1896_v0, %v1639_v22  ;;  %v273_v22 = vadd.f32 %v1914_v4, %v1653_v24  ;;  %v275_v0 = vadd.f32 %v1932_v8, %v1667_v26 }
 0x1ca   :  { %1226 = vrot.lane.b32.xlu1 %v2661_v21, %s1471_s2  ;;  %1224 = vrot.lane.b32.xlu0 %v2666_v60, %s1471_s2 }
 0x1cb   :  { %v435_v5 = vadd.f32 %v2262_v17, %v275_v0  ;;  %v3860_v17 = vld [vmem:[#allocation44_spill] sm:$0xff]  ;;  %v3862_v0 = vld [vmem:[#allocation5_spill] sm:$0xff] }
 0x1cc   :  { %v2886_v32 = vpop.permute.xlu1 %1034  ;;  %v2888_v53 = vpop.permute.xlu0 %1032 }
 0x1cd   :  { %3848 = vst [vmem:[#allocation186_spill] sm:$0xff] %v2886_v32  ;;  %3849 = vst [vmem:[#allocation187_spill] sm:$0xff] %v2888_v53  ;;  %v431_v53 = vadd.f32 %v2246_v47, %v271_v19  ;;  %v430_v32 = vadd.f32 %v2248_v44, %v270_v6  ;;  %v433_v44 = vadd.f32 %v2254_v43, %v273_v22  ;;  %v1416_v43 = vld [vmem:[%s3616_s0 + $0x10] sm:$0xff]  ;;  %v3861_v19 = vld [vmem:[#allocation45_spill] sm:$0xff] }
 0x1ce   :  { %1230 = vrot.lane.b32.xlu1 %v2679_v36, %s1471_s2  ;;  %1228 = vrot.lane.b32.xlu0 %v2684_v35, %s1471_s2  ;;  %v432_v47 = vadd.f32 %v2256_v45, %v272_v23  ;;  %v3856_v45 = vld [vmem:[#allocation4_spill] sm:$0xff]  ;;  %v1417_v23 = vld [vmem:[%s3616_s0] sm:$0xff] }
 0x1cf   :  { %v511_v1 = vadd.f32 %v2087_v56, %v431_v53  ;;  %v510_v24 = vadd.f32 %v2092_v61, %v430_v32  ;;  %v2939_v53 = vadd.f32 %v1416_v43, %v3856_v45  ;;  %v3857_v56 = vld [vmem:[#allocation76_spill] sm:$0xff]  ;;  %v513_v32 = vadd.f32 %v3860_v17, %v433_v44  ;;  %v3864_v44 = vld [vmem:[#allocation2_spill] sm:$0xff]  ;;  %v1419_v17 = vld [vmem:[%s3616_s0 + $0x8] sm:$0xf] }
 0x1d0   :  { %v2894_v7 = vpop.permute.xlu1 %1038  ;;  %v2896_v11 = vpop.permute.xlu0 %1036  ;;  %v434_v61 = vadd.f32 %v3857_v56, %v274_v25  ;;  %v3863_v25 = vld [vmem:[#allocation6_spill] sm:$0xff] }
 0x1d1   :  { %3850 = vst [vmem:[#allocation188_spill] sm:$0xff] %v2894_v7  ;;  %3851 = vst [vmem:[#allocation189_spill] sm:$0xff] %v2896_v11  ;;  %v711_v8 = vadd.f32 %v2416_v59, %v511_v1  ;;  %v710_v6 = vadd.f32 %v2418_v39, %v510_v24  ;;  %v512_v59 = vadd.f32 %v3861_v19, %v432_v47  ;;  %v1418_v24 = vld [vmem:[%s3616_s0 + $0x18] sm:$0xf]  ;;  %v3865_v47 = vld [vmem:[#allocation26_spill] sm:$0xff] }
 0x1d2   :  { %1234 = vrot.lane.b32.xlu1 %v2697_v62, %s1471_s2  ;;  %1232 = vrot.lane.b32.xlu0 %v2702_v12, %s1471_s2  ;;  %v2954_v1 = vadd.f32 %v1417_v23, %v3862_v0  ;;  %v2960_v43 = vadd.f32 %v1418_v24, %v3863_v25  ;;  %v277_v45 = vadd.f32 %v3865_v47, %v3864_v44  ;;  %v3870_v19 = vld [vmem:[#allocation7_spill] sm:$0xff]  ;;  %v3872_v25 = vld [vmem:[#allocation116_spill] sm:$0xff]  ;;  %v3874_v47 = vld [vmem:[#allocation77_spill] sm:$0xff] }
 0x1d3   :  { %v871_v39 = vadd.f32 %v2766_v41, %v711_v8  ;;  %v870_v22 = vadd.f32 %v2768_v52, %v710_v6  ;;  %v3866_v41 = vld [vmem:[#allocation3_spill] sm:$0xff]  ;;  %v2974_v23 = vadd.f32 %v1419_v17, %v3870_v19  ;;  %v3885_v11 = vld [vmem:[#allocation80_spill] sm:$0xff] }
 0x1d4   :  { %v2908_v10 = vpop.permute.xlu1 %1042  ;;  %v2910_v7 = vpop.permute.xlu0 %1040  ;;  %v3867_v8 = vld [vmem:[#allocation27_spill] sm:$0xff] }
 0x1d5   :  { %3852 = vst [vmem:[#allocation190_spill] sm:$0xff] %v2908_v10  ;;  %3853 = vst [vmem:[#allocation191_spill] sm:$0xff] %v2910_v7  ;;  %v276_v52 = vadd.f32 %v3867_v8, %v3866_v41  ;;  %v3871_v0 = vld [vmem:[#allocation115_spill] sm:$0xff]  ;;  %v437_v7 = vadd.f32 %v3874_v47, %v277_v45  ;;  %v3875_v41 = vld [vmem:[#allocation78_spill] sm:$0xff] }
 0x1d6   :  { %1238 = vrot.lane.b32.xlu1 %v2715_v34, %s1471_s2  ;;  %1236 = vrot.lane.b32.xlu0 %v2720_v42, %s1471_s2  ;;  %v713_v24 = vadd.f32 %v3871_v0, %v513_v32  ;;  %v3878_v45 = vld [vmem:[#allocation8_spill] sm:$0xff] }
 0x1d7   :  { %v436_v8 = vadd.f32 %v3875_v41, %v276_v52  ;;  %v1421_v52 = vld [vmem:[%s3616_s0 + $0x20] sm:$0xff]  ;;  %v3883_v47 = vld [vmem:[#allocation120_spill] sm:$0xff] }
 0x1d8   :  { %v2928_v4 = vpop.permute.xlu1 %1046  ;;  %v2930_v26 = vpop.permute.xlu0 %1044  ;;  %v873_v17 = vadd.f32 %v2774_v29, %v713_v24  ;;  %v1422_v29 = vld [vmem:[%s3616_s0 + $0xf8] sm:$0xf]  ;;  %v3882_v24 = vld [vmem:[#allocation119_spill] sm:$0xff] }
 0x1d9   :  { %3854 = vst [vmem:[#allocation192_spill] sm:$0xff] %v2928_v4  ;;  %3855 = vst [vmem:[#allocation193_spill] sm:$0xff] %v2930_v26  ;;  %v712_v26 = vadd.f32 %v3872_v25, %v512_v59  ;;  %v3873_v4 = vld [vmem:[#allocation48_spill] sm:$0xff]  ;;  %v951_v59 = vadd.f32 %v2607_v18, %v871_v39  ;;  %v516_v15 = vadd.f32 %v3887_v14, %v436_v8  ;;  %v3891_v8 = vld [vmem:[#allocation31_spill] sm:$0xff] }
 0x1da   :  { %1242 = vrot.lane.b32.xlu1 %v3858_v27, %s1471_s2  ;;  %1240 = vrot.lane.b32.xlu0 %v3859_v9, %s1471_s2  ;;  %v515_v44 = vadd.f32 %v3873_v4, %v435_v5  ;;  %v950_v4 = vadd.f32 %v2612_v2, %v870_v22  ;;  %v1420_v5 = vld [vmem:[%s3616_s0 + $0x28] sm:$0xf]  ;;  %v1423_v18 = vld [vmem:[%s3616_s0 + $0xf0] sm:$0xff] }
 0x1db   :  { %v872_v32 = vadd.f32 %v2776_v40, %v712_v26  ;;  %v3880_v40 = vld [vmem:[#allocation28_spill] sm:$0xff]  ;;  %v3881_v26 = vld [vmem:[#allocation29_spill] sm:$0xff] }
 0x1dc   :  { %v2966_v6 = vpop.permute.xlu1 %1050  ;;  %v2968_v56 = vpop.permute.xlu0 %1048  ;;  %v279_v2 = vadd.f32 %v1422_v29, %v3880_v40  ;;  %v278_v39 = vadd.f32 %v1423_v18, %v3881_v26  ;;  %v715_v25 = vadd.f32 %v3882_v24, %v515_v44  ;;  %v3886_v40 = vld [vmem:[#allocation52_spill] sm:$0xff]  ;;  %v953_v44 = vadd.f32 %v2625_v50, %v873_v17  ;;  %v1426_v50 = vld [vmem:[%s3616_s0 + $0x108] sm:$0xf] }
 0x1dd   :  { %3868 = vst [vmem:[#allocation4_spill] sm:$0xff] %v2966_v6  ;;  %3869 = vst [vmem:[#allocation76_spill] sm:$0xff] %v2968_v56  ;;  %v3876_v6 = vld [vmem:[#allocation49_spill] sm:$0xff]  ;;  %v3877_v56 = vld [vmem:[#allocation171_spill] sm:$0xff]  ;;  %v517_v37 = vadd.f32 %v3886_v40, %v437_v7 }
 0x1de   :  { %v514_v10 = vadd.f32 %v3876_v6, %v434_v61  ;;  %1246 = vrot.lane.b32.xlu1 %v2751_v28, %s1471_s2  ;;  %1244 = vrot.lane.b32.xlu0 %v3877_v56, %s1471_s2  ;;  %v2994_v61 = vadd.f32 %v1420_v5, %v3878_v45  ;;  %v3879_v6 = vld [vmem:[#allocation9_spill] sm:$0xff]  ;;  %v438_v29 = vadd.f32 %v3885_v11, %v278_v39  ;;  %v1425_v7 = vld [vmem:[%s3616_s0 + $0x30] sm:$0xff]  ;;  %v3889_v11 = vld [vmem:[#allocation11_spill] sm:$0xff] }
 0x1df   :  { %v3000_v19 = vadd.f32 %v1421_v52, %v3879_v6  ;;  %v3884_v52 = vld [vmem:[#allocation79_spill] sm:$0xff]  ;;  %v875_v18 = vadd.f32 %v2782_v57, %v715_v25  ;;  %v3034_v14 = vadd.f32 %v1425_v7, %v3889_v11  ;;  %v3890_v57 = vld [vmem:[#allocation30_spill] sm:$0xff]  ;;  %v3893_v24 = vld [vmem:[#allocation124_spill] sm:$0xff] }
 0x1e0   :  { %v1055_v22 = vpop.permute.xlu1 %1054  ;;  %v1053_v0 = vpop.permute.xlu0 %1052  ;;  %v714_v41 = vadd.f32 %v3883_v47, %v514_v10  ;;  %v439_v6 = vadd.f32 %v3884_v52, %v279_v2  ;;  %v952_v10 = vadd.f32 %v2630_v16, %v872_v32  ;;  %v1427_v16 = vld [vmem:[%s3616_s0 + $0x100] sm:$0xff]  ;;  %v716_v25 = vadd.f32 %v3893_v24, %v516_v15  ;;  %v3894_v52 = vld [vmem:[#allocation81_spill] sm:$0xff]  ;;  %v3896_v7 = vld [vmem:[#allocation56_spill] sm:$0xff] }
 0x1e1   :  { %v3012_v5 = vadd.f32 %v1055_v22, %v951_v59  ;;  %v3014_v45 = vadd.f32 %v1053_v0, %v950_v4  ;;  %v1424_v59 = vld [vmem:[%s3616_s0 + $0x38] sm:$0xf]  ;;  %v3888_v4 = vld [vmem:[#allocation10_spill] sm:$0xff]  ;;  %v280_v17 = vadd.f32 %v1427_v16, %v3891_v8  ;;  %v3892_v22 = vld [vmem:[#allocation123_spill] sm:$0xff] }
 0x1e2   :  { %v874_v26 = vadd.f32 %v2784_v13, %v714_v41  ;;  %v3028_v2 = vadd.f32 %v1424_v59, %v3888_v4  ;;  %v281_v13 = vadd.f32 %v1426_v50, %v3890_v57  ;;  %v717_v0 = vadd.f32 %v3892_v22, %v517_v37  ;;  %v3895_v59 = vld [vmem:[#allocation82_spill] sm:$0xff]  ;;  %v3897_v50 = vld [vmem:[#allocation57_spill] sm:$0xff]  ;;  %v3902_v22 = vld [vmem:[#allocation127_spill] sm:$0xff] }
 0x1e3   :  { %v440_v4 = vadd.f32 %v3895_v59, %v280_v17  ;;  %v519_v11 = vadd.f32 %v3896_v7, %v439_v6  ;;  %v518_v57 = vadd.f32 %v3897_v50, %v438_v29  ;;  %v876_v8 = vadd.f32 %v2792_v55, %v716_v25  ;;  %v1429_v6 = vld [vmem:[%s3616_s0 + $0x40] sm:$0xff]  ;;  %v3899_v29 = vld [vmem:[#allocation13_spill] sm:$0xff]  ;;  %v1431_v55 = vld [vmem:[%s3616_s0 + $0x110] sm:$0xff] }
 0x1e4   :  { %v1059_v32 = vpop.permute.xlu1 %1058  ;;  %v1057_v39 = vpop.permute.xlu0 %1056  ;;  %v441_v40 = vadd.f32 %v3894_v52, %v281_v13  ;;  %v877_v16 = vadd.f32 %v2790_v54, %v717_v0  ;;  %v955_v37 = vadd.f32 %v2643_v3, %v875_v18  ;;  %v954_v15 = vadd.f32 %v2648_v63, %v874_v26  ;;  %v1430_v3 = vld [vmem:[%s3616_s0 + $0x118] sm:$0xf]  ;;  %v3900_v54 = vld [vmem:[#allocation32_spill] sm:$0xff]  ;;  %v3904_v7 = vld [vmem:[#allocation83_spill] sm:$0xff] }
 0x1e5   :  { %v3046_v47 = vadd.f32 %v1059_v32, %v953_v44  ;;  %v3048_v41 = vadd.f32 %v1057_v39, %v952_v10  ;;  %v1428_v44 = vld [vmem:[%s3616_s0 + $0x48] sm:$0xf]  ;;  %v3898_v10 = vld [vmem:[#allocation12_spill] sm:$0xff]  ;;  %v3068_v17 = vadd.f32 %v1429_v6, %v3899_v29  ;;  %v283_v63 = vadd.f32 %v1430_v3, %v3900_v54  ;;  %v3901_v18 = vld [vmem:[#allocation33_spill] sm:$0xff] }
 0x1e6   :  { %v3062_v13 = vadd.f32 %v1428_v44, %v3898_v10  ;;  %v282_v26 = vadd.f32 %v1431_v55, %v3901_v18  ;;  %v719_v0 = vadd.f32 %v3902_v22, %v519_v11  ;;  %v3903_v24 = vld [vmem:[#allocation128_spill] sm:$0xff]  ;;  %v3907_v3 = vld [vmem:[#allocation61_spill] sm:$0xff]  ;;  %v957_v11 = vadd.f32 %v2661_v21, %v877_v16  ;;  %v1434_v21 = vld [vmem:[%s3616_s0 + $0x128] sm:$0xf] }
 0x1e7   :  { %v718_v25 = vadd.f32 %v3903_v24, %v518_v57  ;;  %v443_v50 = vadd.f32 %v3904_v7, %v283_v63  ;;  %v3905_v44 = vld [vmem:[#allocation84_spill] sm:$0xff]  ;;  %v520_v54 = vadd.f32 %v3907_v3, %v440_v4  ;;  %v956_v57 = vadd.f32 %v2666_v60, %v876_v8  ;;  %v3909_v4 = vld [vmem:[#allocation15_spill] sm:$0xff] }
 0x1e8   :  { %v1063_v32 = vpop.permute.xlu1 %1062  ;;  %v1061_v39 = vpop.permute.xlu0 %1060  ;;  %v442_v10 = vadd.f32 %v3905_v44, %v282_v26  ;;  %v3906_v6 = vld [vmem:[#allocation60_spill] sm:$0xff]  ;;  %v879_v55 = vadd.f32 %v2798_v38, %v719_v0  ;;  %v3910_v38 = vld [vmem:[#allocation34_spill] sm:$0xff]  ;;  %v3911_v16 = vld [vmem:[#allocation35_spill] sm:$0xff] }
 0x1e9   :  { %v3080_v52 = vadd.f32 %v1063_v32, %v955_v37  ;;  %v3082_v59 = vadd.f32 %v1061_v39, %v954_v15  ;;  %v521_v29 = vadd.f32 %v3906_v6, %v441_v40  ;;  %v878_v18 = vadd.f32 %v2800_v58, %v718_v25  ;;  %v1432_v37 = vld [vmem:[%s3616_s0 + $0x58] sm:$0xf]  ;;  %v3908_v15 = vld [vmem:[#allocation14_spill] sm:$0xff]  ;;  %v1433_v40 = vld [vmem:[%s3616_s0 + $0x50] sm:$0xff] }
 0x1ea   :  { %v3096_v63 = vadd.f32 %v1432_v37, %v3908_v15  ;;  %v3102_v26 = vadd.f32 %v1433_v40, %v3909_v4  ;;  %v285_v60 = vadd.f32 %v1434_v21, %v3910_v38  ;;  %v1435_v58 = vld [vmem:[%s3616_s0 + $0x120] sm:$0xff]  ;;  %v3912_v22 = vld [vmem:[#allocation131_spill] sm:$0xff]  ;;  %v3913_v24 = vld [vmem:[#allocation132_spill] sm:$0xff] }
 0x1eb   :  { %v284_v8 = vadd.f32 %v1435_v58, %v3911_v16  ;;  %v721_v0 = vadd.f32 %v3912_v22, %v521_v29  ;;  %v720_v25 = vadd.f32 %v3913_v24, %v520_v54  ;;  %v3914_v6 = vld [vmem:[#allocation85_spill] sm:$0xff]  ;;  %v3915_v37 = vld [vmem:[#allocation86_spill] sm:$0xff]  ;;  %v3916_v40 = vld [vmem:[#allocation64_spill] sm:$0xff]  ;;  %v959_v29 = vadd.f32 %v2679_v36, %v879_v55 }
 0x1ec   :  { %v1067_v32 = vpop.permute.xlu1 %1066  ;;  %v1065_v39 = vpop.permute.xlu0 %1064  ;;  %v445_v3 = vadd.f32 %v3914_v6, %v285_v60  ;;  %v523_v4 = vadd.f32 %v3916_v40, %v443_v50  ;;  %v3917_v21 = vld [vmem:[#allocation65_spill] sm:$0xff]  ;;  %v958_v54 = vadd.f32 %v2684_v35, %v878_v18  ;;  %v1437_v50 = vld [vmem:[%s3616_s0 + $0x60] sm:$0xff]  ;;  %v1439_v35 = vld [vmem:[%s3616_s0 + $0x130] sm:$0xff] }
 0x1ed   :  { %v3114_v7 = vadd.f32 %v1067_v32, %v957_v11  ;;  %v3116_v44 = vadd.f32 %v1065_v39, %v956_v57  ;;  %v444_v15 = vadd.f32 %v3915_v37, %v284_v8  ;;  %v522_v38 = vadd.f32 %v3917_v21, %v442_v10  ;;  %v1436_v11 = vld [vmem:[%s3616_s0 + $0x68] sm:$0xf]  ;;  %v3918_v57 = vld [vmem:[#allocation16_spill] sm:$0xff]  ;;  %v3919_v10 = vld [vmem:[#allocation17_spill] sm:$0xff] }
 0x1ee   :  { %v881_v58 = vadd.f32 %v2806_v30, %v721_v0  ;;  %v880_v16 = vadd.f32 %v2808_v31, %v720_v25  ;;  %v3130_v60 = vadd.f32 %v1436_v11, %v3918_v57  ;;  %v3136_v8 = vadd.f32 %v1437_v50, %v3919_v10  ;;  %v1438_v36 = vld [vmem:[%s3616_s0 + $0x138] sm:$0xf]  ;;  %v3920_v30 = vld [vmem:[#allocation36_spill] sm:$0xff]  ;;  %v3922_v22 = vld [vmem:[#allocation135_spill] sm:$0xff] }
 0x1ef   :  { %v287_v31 = vadd.f32 %v1438_v36, %v3920_v30  ;;  %v3921_v55 = vld [vmem:[#allocation37_spill] sm:$0xff]  ;;  %v723_v0 = vadd.f32 %v3922_v22, %v523_v4  ;;  %v3923_v24 = vld [vmem:[#allocation136_spill] sm:$0xff]  ;;  %v3924_v40 = vld [vmem:[#allocation87_spill] sm:$0xff] }
 0x1f0   :  { %v286_v18 = vadd.f32 %v1439_v35, %v3921_v55  ;;  %v1071_v32 = vpop.permute.xlu1 %1070  ;;  %v1069_v39 = vpop.permute.xlu0 %1068  ;;  %v722_v25 = vadd.f32 %v3923_v24, %v522_v38  ;;  %v3925_v11 = vld [vmem:[#allocation88_spill] sm:$0xff]  ;;  %v3927_v36 = vld [vmem:[#allocation69_spill] sm:$0xff]  ;;  %v961_v4 = vadd.f32 %v2697_v62, %v881_v58  ;;  %v960_v38 = vadd.f32 %v2702_v12, %v880_v16  ;;  %v3931_v62 = vld [vmem:[#allocation39_spill] sm:$0xff] }
 0x1f1   :  { %v3148_v6 = vadd.f32 %v1071_v32, %v959_v29  ;;  %v3150_v37 = vadd.f32 %v1069_v39, %v958_v54  ;;  %v447_v21 = vadd.f32 %v3924_v40, %v287_v31  ;;  %v3926_v50 = vld [vmem:[#allocation68_spill] sm:$0xff]  ;;  %v524_v30 = vadd.f32 %v3927_v36, %v444_v15  ;;  %v1440_v29 = vld [vmem:[%s3616_s0 + $0x78] sm:$0xf]  ;;  %v3928_v54 = vld [vmem:[#allocation18_spill] sm:$0xff] }
 0x1f2   :  { %v446_v57 = vadd.f32 %v3925_v11, %v286_v18  ;;  %v525_v10 = vadd.f32 %v3926_v50, %v445_v3  ;;  %v883_v35 = vadd.f32 %v2814_v49, %v723_v0  ;;  %v882_v55 = vadd.f32 %v2816_v46, %v722_v25  ;;  %v1441_v3 = vld [vmem:[%s3616_s0 + $0x70] sm:$0xff]  ;;  %v3929_v15 = vld [vmem:[#allocation19_spill] sm:$0xff]  ;;  %v3930_v46 = vld [vmem:[#allocation38_spill] sm:$0xff] }
 0x1f3   :  { %v3164_v31 = vadd.f32 %v1440_v29, %v3928_v54  ;;  %v3170_v18 = vadd.f32 %v1441_v3, %v3929_v15  ;;  %v409_v49 = vadd.f32 %v3930_v46, %v2974_v23  ;;  %v408_v12 = vadd.f32 %v3931_v62, %v2954_v1  ;;  %v3932_v32 = vld [vmem:[#allocation139_spill] sm:$0xff]  ;;  %v3933_v22 = vld [vmem:[#allocation140_spill] sm:$0xff]  ;;  %v1443_v1 = vld [vmem:[%s3616_s0 + $0x80] sm:$0xff] }
 0x1f4   :  { %v1075_v58 = vpop.permute.xlu1 %1074  ;;  %v1073_v16 = vpop.permute.xlu0 %1072  ;;  %v725_v39 = vadd.f32 %v3932_v32, %v525_v10  ;;  %v724_v0 = vadd.f32 %v3933_v22, %v524_v30  ;;  %v1442_v40 = vld [vmem:[%s3616_s0 + $0x88] sm:$0xf]  ;;  %v3934_v11 = vld [vmem:[#allocation20_spill] sm:$0xff]  ;;  %v3935_v23 = vld [vmem:[#allocation21_spill] sm:$0xff]  ;;  %v963_v3 = vadd.f32 %v2715_v34, %v883_v35  ;;  %v962_v15 = vadd.f32 %v2720_v42, %v882_v55 }
 0x1f5   :  { %v3178_v24 = vadd.f32 %v1075_v58, %v961_v4  ;;  %v3180_v25 = vadd.f32 %v1073_v16, %v960_v38  ;;  %v3186_v50 = vadd.f32 %v1442_v40, %v3934_v11  ;;  %v3192_v36 = vadd.f32 %v1443_v1, %v3935_v23  ;;  %v3936_v10 = vld [vmem:[#allocation72_spill] sm:$0xff]  ;;  %v3937_v4 = vld [vmem:[#allocation73_spill] sm:$0xff]  ;;  %v3940_v35 = vld [vmem:[#allocation143_spill] sm:$0xff] }
 0x1f6   :  { %v527_v30 = vadd.f32 %v3936_v10, %v447_v21  ;;  %v526_v29 = vadd.f32 %v3937_v4, %v446_v57  ;;  %v885_v38 = vadd.f32 %v2822_v33, %v725_v39  ;;  %v884_v54 = vadd.f32 %v2824_v20, %v724_v0  ;;  %v3938_v46 = vld [vmem:[#allocation40_spill] sm:$0xff]  ;;  %v3939_v58 = vld [vmem:[#allocation41_spill] sm:$0xff]  ;;  %v1444_v21 = vld [vmem:[%s3616_s0 + $0x9] sm:$0xf] }
 0x1f7   :  { %v411_v62 = vadd.f32 %v3938_v46, %v2960_v43  ;;  %v410_v16 = vadd.f32 %v3939_v58, %v2939_v53  ;;  %v489_v32 = vadd.f32 %v1444_v21, %v409_v49  ;;  %v1445_v33 = vld [vmem:[%s3616_s0 + $0x1] sm:$0xff]  ;;  %v3941_v55 = vld [vmem:[#allocation144_spill] sm:$0xff]  ;;  %v1446_v53 = vld [vmem:[%s3616_s0 + $0x98] sm:$0xf] }
 0x1f8   :  { %v488_v20 = vadd.f32 %v1445_v33, %v408_v12  ;;  %v1079_v57 = vpop.permute.xlu1 %1078  ;;  %v1077_v34 = vpop.permute.xlu0 %1076  ;;  %v727_v42 = vadd.f32 %v3940_v35, %v527_v30  ;;  %v726_v39 = vadd.f32 %v3941_v55, %v526_v29  ;;  %v3942_v49 = vld [vmem:[#allocation22_spill] sm:$0xff]  ;;  %v1447_v12 = vld [vmem:[%s3616_s0 + $0x90] sm:$0xff]  ;;  %v3943_v40 = vld [vmem:[#allocation23_spill] sm:$0xff] }
 0x1f9   :  { %v3212_v43 = vadd.f32 %v1079_v57, %v963_v3  ;;  %v3214_v22 = vadd.f32 %v1077_v34, %v962_v15  ;;  %v3220_v0 = vadd.f32 %v1446_v53, %v3942_v49  ;;  %v3226_v11 = vadd.f32 %v1447_v12, %v3943_v40  ;;  %v3944_v1 = vld [vmem:[#allocation89_spill] sm:$0xff]  ;;  %v3945_v10 = vld [vmem:[#allocation90_spill] sm:$0xff]  ;;  %v3947_v21 = vld [vmem:[#allocation43_spill] sm:$0xff] }
 0x1fa   :  { %v689_v23 = vadd.f32 %v3944_v1, %v489_v32  ;;  %v688_v30 = vadd.f32 %v3945_v10, %v488_v20  ;;  %v887_v4 = vadd.f32 %v2830_v51, %v727_v42  ;;  %v886_v29 = vadd.f32 %v2832_v48, %v726_v39  ;;  %v3946_v46 = vld [vmem:[#allocation42_spill] sm:$0xff]  ;;  %v1448_v32 = vld [vmem:[%s3616_s0 + $0x19] sm:$0xf]  ;;  %v1449_v51 = vld [vmem:[%s3616_s0 + $0x11] sm:$0xff] }
 0x1fb   :  { %v965_v3 = vadd.f32 %v3858_v27, %v885_v38  ;;  %v964_v15 = vadd.f32 %v3859_v9, %v884_v54  ;;  %v413_v58 = vadd.f32 %v3946_v46, %v2994_v61  ;;  %v412_v33 = vadd.f32 %v3947_v21, %v3000_v19  ;;  %v3948_v38 = vld [vmem:[#allocation147_spill] sm:$0xff]  ;;  %v3949_v54 = vld [vmem:[#allocation148_spill] sm:$0xff]  ;;  %v3950_v19 = vld [vmem:[#allocation46_spill] sm:$0xff] }
 0x1fc   :  { %v491_v57 = vadd.f32 %v1448_v32, %v411_v62  ;;  %v490_v48 = vadd.f32 %v1449_v51, %v410_v16  ;;  %v1083_v20 = vpop.permute.xlu1 %1082  ;;  %v1081_v27 = vpop.permute.xlu0 %1080  ;;  %v849_v9 = vadd.f32 %v3948_v38, %v689_v23  ;;  %v848_v34 = vadd.f32 %v3949_v54, %v688_v30  ;;  %v3951_v62 = vld [vmem:[#allocation47_spill] sm:$0xff]  ;;  %v3953_v49 = vld [vmem:[#allocation92_spill] sm:$0xff]  ;;  %v1451_v23 = vld [vmem:[%s3616_s0 + $0xa0] sm:$0xff] }
 0x1fd   :  { %v3246_v61 = vadd.f32 %v1083_v20, %v965_v3  ;;  %v3248_v35 = vadd.f32 %v1081_v27, %v964_v15  ;;  %v415_v42 = vadd.f32 %v3950_v19, %v3028_v2  ;;  %v414_v55 = vadd.f32 %v3951_v62, %v3034_v14  ;;  %v3952_v39 = vld [vmem:[#allocation91_spill] sm:$0xff]  ;;  %v3954_v40 = vld [vmem:[#allocation24_spill] sm:$0xff]  ;;  %v3955_v10 = vld [vmem:[#allocation25_spill] sm:$0xff] }
 0x1fe   :  { %v691_v53 = vadd.f32 %v3952_v39, %v491_v57  ;;  %v690_v16 = vadd.f32 %v3953_v49, %v490_v48  ;;  %v1450_v12 = vld [vmem:[%s3616_s0 + $0xa8] sm:$0xf]  ;;  %v3266_v2 = vadd.f32 %v1451_v23, %v3955_v10  ;;  %v967_v14 = vadd.f32 %v2751_v28, %v887_v4  ;;  %v3957_v51 = vld [vmem:[#allocation152_spill] sm:$0xff]  ;;  %v1454_v39 = vld [vmem:[%s3616_s0 + $0x39] sm:$0xf] }
 0x1ff   :  { %v3260_v1 = vadd.f32 %v1450_v12, %v3954_v40  ;;  %v966_v30 = vadd.f32 %v3877_v56, %v886_v29  ;;  %v1452_v3 = vld [vmem:[%s3616_s0 + $0x29] sm:$0xf]  ;;  %v1453_v46 = vld [vmem:[%s3616_s0 + $0x21] sm:$0xff]  ;;  %v3959_v4 = vld [vmem:[#allocation112_spill] sm:$0xff] }
 0x200   :  { %v493_v15 = vadd.f32 %v1452_v3, %v413_v58  ;;  %v492_v21 = vadd.f32 %v1453_v46, %v412_v33  ;;  %v3956_v32 = vld [vmem:[#allocation151_spill] sm:$0xff]  ;;  %v850_v48 = vadd.f32 %v3957_v51, %v690_v16  ;;  %v1087_v20 = vpop.permute.xlu1 %1086  ;;  %v1085_v27 = vpop.permute.xlu0 %1084  ;;  %v928_v56 = vadd.f32 %v3959_v4, %v848_v34  ;;  %v3960_v58 = vld [vmem:[#allocation50_spill] sm:$0xff]  ;;  %v3962_v49 = vld [vmem:[#allocation93_spill] sm:$0xff] }
 0x201   :  { %v851_v57 = vadd.f32 %v3956_v32, %v691_v53  ;;  %v3958_v38 = vld [vmem:[#allocation111_spill] sm:$0xff]  ;;  %v3280_v29 = vadd.f32 %v1087_v20, %v967_v14  ;;  %v3282_v54 = vadd.f32 %v1085_v27, %v966_v30  ;;  %v417_v19 = vadd.f32 %v3960_v58, %v3062_v13  ;;  %v3963_v12 = vld [vmem:[#allocation94_spill] sm:$0xff] }
 0x202   :  { %v929_v28 = vadd.f32 %v3958_v38, %v849_v9  ;;  %v3961_v62 = vld [vmem:[#allocation51_spill] sm:$0xff]  ;;  %v495_v53 = vadd.f32 %v1454_v39, %v415_v42  ;;  %v1455_v9 = vld [vmem:[%s3616_s0 + $0x31] sm:$0xff]  ;;  %v693_v16 = vadd.f32 %v3962_v49, %v493_v15  ;;  %v692_v40 = vadd.f32 %v3963_v12, %v492_v21  ;;  %v3964_v23 = vld [vmem:[#allocation174_spill] sm:$0xff] }
 0x203   :  { %v416_v33 = vadd.f32 %v3961_v62, %v3068_v17  ;;  %v494_v34 = vadd.f32 %v1455_v9, %v414_v55  ;;  %v3965_v13 = vld [vmem:[#allocation175_spill] sm:$0xff]  ;;  %v3966_v17 = vld [vmem:[#allocation54_spill] sm:$0xff]  ;;  %v3968_v42 = vld [vmem:[#allocation113_spill] sm:$0xff] }
 0x204   :  { %v1129_v10 = vadd.f32 %v3964_v23, %v929_v28  ;;  %v1128_v14 = vadd.f32 %v3965_v13, %v928_v56  ;;  %v419_v30 = vadd.f32 %v3966_v17, %v3096_v63  ;;  %v3967_v3 = vld [vmem:[#allocation55_spill] sm:$0xff]  ;;  %v931_v32 = vadd.f32 %v3968_v42, %v851_v57  ;;  %v3969_v51 = vld [vmem:[#allocation114_spill] sm:$0xff]  ;;  %v1171_v27 = vpop.permute.xlu1 %1170  ;;  %v1169_v55 = vpop.permute.xlu0 %1168  ;;  %v3970_v38 = vld [vmem:[#allocation153_spill] sm:$0xff] }
 0x205   :  { %v418_v46 = vadd.f32 %v3967_v3, %v3102_v26  ;;  %v930_v20 = vadd.f32 %v3969_v51, %v850_v48  ;;  %v853_v15 = vadd.f32 %v3970_v38, %v693_v16  ;;  %v3971_v4 = vld [vmem:[#allocation154_spill] sm:$0xff]  ;;  %v3972_v62 = vld [vmem:[#allocation95_spill] sm:$0xff]  ;;  %v3973_v39 = vld [vmem:[#allocation96_spill] sm:$0xff] }
 0x206   :  { %v852_v21 = vadd.f32 %v3971_v4, %v692_v40  ;;  %v1289_v58 = vadd.f32 %v1171_v27, %v1129_v10  ;;  %v1288_v28 = vadd.f32 %v1169_v55, %v1128_v14  ;;  %v695_v56 = vadd.f32 %v3972_v62, %v495_v53  ;;  %v3974_v63 = vld [vmem:[#allocation176_spill] sm:$0xff]  ;;  %v3975_v49 = vld [vmem:[#allocation177_spill] sm:$0xff]  ;;  %v1456_v16 = vld [vmem:[%s3616_s0 + $0x49] sm:$0xf] }
 0x207   :  { %v694_v9 = vadd.f32 %v3973_v39, %v494_v34  ;;  %v1131_v26 = vadd.f32 %v3974_v63, %v931_v32  ;;  %v1130_v57 = vadd.f32 %v3975_v49, %v930_v20  ;;  %v497_v23 = vadd.f32 %v1456_v16, %v417_v19  ;;  %v1457_v40 = vld [vmem:[%s3616_s0 + $0x41] sm:$0xff]  ;;  %v3977_v13 = vld [vmem:[#allocation156_spill] sm:$0xff]  ;;  %v3978_v42 = vld [vmem:[#allocation117_spill] sm:$0xff] }
 0x208   :  { %v1329_v12 = vmul.f32 0.11111111, %v1289_v58  ;;  %v1328_v48 = vmul.f32 0.11111111, %v1288_v28  ;;  %v496_v53 = vadd.f32 %v1457_v40, %v416_v33  ;;  %v3976_v10 = vld [vmem:[#allocation155_spill] sm:$0xff]  ;;  %v1175_v17 = vpop.permute.xlu1 %1174  ;;  %v1173_v3 = vpop.permute.xlu0 %1172  ;;  %v933_v32 = vadd.f32 %v3978_v42, %v853_v15  ;;  %v3979_v51 = vld [vmem:[#allocation118_spill] sm:$0xff] }
 0x209   :  { %v855_v34 = vadd.f32 %v3976_v10, %v695_v56  ;;  %v854_v14 = vadd.f32 %v3977_v13, %v694_v9  ;;  %v932_v20 = vadd.f32 %v3979_v51, %v852_v21  ;;  %v1291_v19 = vadd.f32 %v1175_v17, %v1131_v26  ;;  %v3980_v27 = vld [vmem:[#allocation97_spill] sm:$0xff]  ;;  %v3981_v38 = vld [vmem:[#allocation98_spill] sm:$0xff]  ;;  %v3983_v39 = vld [vmem:[#allocation179_spill] sm:$0xff] }
 0x20a   :  { %1371 = vst.msk [vmem:[%s3617_s1 + $0x8] sm:$0xf] %vm1370_vm0, %v1329_v12  ;;  %v1290_v33 = vadd.f32 %v1173_v3, %v1130_v57  ;;  %v697_v55 = vadd.f32 %v3980_v27, %v497_v23  ;;  %v696_v4 = vadd.f32 %v3981_v38, %v496_v53  ;;  %v1458_v15 = vld [vmem:[%s3616_s0 + $0x59] sm:$0xf]  ;;  %v1459_v58 = vld [vmem:[%s3616_s0 + $0x51] sm:$0xff]  ;;  %v3982_v62 = vld [vmem:[#allocation178_spill] sm:$0xff] }
 0x20b   :  { %1369 = vst.msk [vmem:[%s3617_s1] sm:$0xff] %vm1368_vm1, %v1328_v48  ;;  %v499_v21 = vadd.f32 %v1458_v15, %v419_v30  ;;  %v498_v28 = vadd.f32 %v1459_v58, %v418_v46  ;;  %v1133_v56 = vadd.f32 %v3982_v62, %v933_v32  ;;  %v1132_v9 = vadd.f32 %v3983_v39, %v932_v20  ;;  %v3984_v49 = vld [vmem:[#allocation58_spill] sm:$0xff]  ;;  %v3985_v12 = vld [vmem:[#allocation59_spill] sm:$0xff]  ;;  %v3986_v16 = vld [vmem:[#allocation121_spill] sm:$0xff] }
 0x20c   :  { %v1331_v63 = vmul.f32 0.11111111, %v1291_v19  ;;  %v1330_v26 = vmul.f32 0.11111111, %v1290_v33  ;;  %v421_v57 = vadd.f32 %v3984_v49, %v3130_v60  ;;  %v420_v48 = vadd.f32 %v3985_v12, %v3136_v8  ;;  %v3987_v30 = vld [vmem:[#allocation122_spill] sm:$0xff]  ;;  %v1179_v53 = vpop.permute.xlu1 %1178  ;;  %v1177_v10 = vpop.permute.xlu0 %1176  ;;  %v3988_v13 = vld [vmem:[#allocation157_spill] sm:$0xff] }
 0x20d   :  { %v935_v23 = vadd.f32 %v3986_v16, %v855_v34  ;;  %v934_v40 = vadd.f32 %v3987_v30, %v854_v14  ;;  %v857_v46 = vadd.f32 %v3988_v13, %v697_v55  ;;  %v3989_v17 = vld [vmem:[#allocation158_spill] sm:$0xff]  ;;  %v1293_v60 = vadd.f32 %v1179_v53, %v1133_v56  ;;  %v3991_v42 = vld [vmem:[#allocation63_spill] sm:$0xff]  ;;  %v3993_v19 = vld [vmem:[#allocation100_spill] sm:$0xff] }
 0x20e   :  { %v856_v3 = vadd.f32 %v3989_v17, %v696_v4  ;;  %1373 = vst.msk [vmem:[%s3617_s1 + $0x18] sm:$0xf] %vm1370_vm0, %v1331_v63  ;;  %v1292_v8 = vadd.f32 %v1177_v10, %v1132_v9  ;;  %v3990_v34 = vld [vmem:[#allocation62_spill] sm:$0xff]  ;;  %v422_v32 = vadd.f32 %v3991_v42, %v3170_v18  ;;  %v3992_v51 = vld [vmem:[#allocation99_spill] sm:$0xff]  ;;  %v698_v33 = vadd.f32 %v3993_v19, %v498_v28  ;;  %v3994_v27 = vld [vmem:[#allocation180_spill] sm:$0xff] }
 0x20f   :  { %1372 = vst.msk [vmem:[%s3617_s1 + $0x10] sm:$0xff] %vm1368_vm1, %v1330_v26  ;;  %v423_v14 = vadd.f32 %v3990_v34, %v3164_v31  ;;  %v699_v20 = vadd.f32 %v3992_v51, %v499_v21  ;;  %v1135_v55 = vadd.f32 %v3994_v27, %v935_v23  ;;  %v3995_v38 = vld [vmem:[#allocation181_spill] sm:$0xff]  ;;  %v1333_v15 = vmul.f32 0.11111111, %v1293_v60  ;;  %v1460_v62 = vld [vmem:[%s3616_s0 + $0x69] sm:$0xf] }
 0x210   :  { %v1134_v4 = vadd.f32 %v3995_v38, %v934_v40  ;;  %v1332_v58 = vmul.f32 0.11111111, %v1292_v8  ;;  %v501_v56 = vadd.f32 %v1460_v62, %v421_v57  ;;  %v1461_v31 = vld [vmem:[%s3616_s0 + $0x61] sm:$0xff]  ;;  %v3997_v9 = vld [vmem:[#allocation160_spill] sm:$0xff]  ;;  %v1183_v63 = vpop.permute.xlu1 %1182  ;;  %v1181_v26 = vpop.permute.xlu0 %1180  ;;  %v3998_v49 = vld [vmem:[#allocation125_spill] sm:$0xff] }
 0x211   :  { %v500_v18 = vadd.f32 %v1461_v31, %v420_v48  ;;  %v3996_v39 = vld [vmem:[#allocation159_spill] sm:$0xff]  ;;  %v858_v28 = vadd.f32 %v3997_v9, %v698_v33  ;;  %v937_v12 = vadd.f32 %v3998_v49, %v857_v46  ;;  %v3999_v16 = vld [vmem:[#allocation126_spill] sm:$0xff]  ;;  %1375 = vst.msk [vmem:[%s3617_s1 + $0x28] sm:$0xf] %vm1370_vm0, %v1333_v15  ;;  %v1295_v57 = vadd.f32 %v1183_v63, %v1135_v55  ;;  %v4000_v30 = vld [vmem:[#allocation101_spill] sm:$0xff] }
 0x212   :  { %v859_v21 = vadd.f32 %v3996_v39, %v699_v20  ;;  %v936_v23 = vadd.f32 %v3999_v16, %v856_v3  ;;  %1374 = vst.msk [vmem:[%s3617_s1 + $0x20] sm:$0xff] %vm1368_vm1, %v1332_v58  ;;  %v1294_v48 = vadd.f32 %v1181_v26, %v1134_v4  ;;  %v701_v40 = vadd.f32 %v4000_v30, %v501_v56  ;;  %v4001_v53 = vld [vmem:[#allocation102_spill] sm:$0xff]  ;;  %v1462_v13 = vld [vmem:[%s3616_s0 + $0x79] sm:$0xf]  ;;  %v1463_v17 = vld [vmem:[%s3616_s0 + $0x71] sm:$0xff] }
 0x213   :  { %v700_v10 = vadd.f32 %v4001_v53, %v500_v18  ;;  %v503_v46 = vadd.f32 %v1462_v13, %v423_v14  ;;  %v502_v3 = vadd.f32 %v1463_v17, %v422_v32  ;;  %v4002_v60 = vld [vmem:[#allocation182_spill] sm:$0xff]  ;;  %v4003_v34 = vld [vmem:[#allocation183_spill] sm:$0xff]  ;;  %v1335_v51 = vmul.f32 0.11111111, %v1295_v57  ;;  %v4006_v38 = vld [vmem:[#allocation129_spill] sm:$0xff] }
 0x214   :  { %v1137_v8 = vadd.f32 %v4002_v60, %v937_v12  ;;  %v1136_v42 = vadd.f32 %v4003_v34, %v936_v23  ;;  %v1334_v20 = vmul.f32 0.11111111, %v1294_v48  ;;  %v4004_v19 = vld [vmem:[#allocation66_spill] sm:$0xff]  ;;  %v4005_v27 = vld [vmem:[#allocation67_spill] sm:$0xff]  ;;  %v939_v4 = vadd.f32 %v4006_v38, %v859_v21  ;;  %v1187_v58 = vpop.permute.xlu1 %1186  ;;  %v1185_v62 = vpop.permute.xlu0 %1184  ;;  %v4008_v56 = vld [vmem:[#allocation161_spill] sm:$0xff] }
 0x215   :  { %v425_v33 = vadd.f32 %v4004_v19, %v3186_v50  ;;  %v424_v55 = vadd.f32 %v4005_v27, %v3192_v36  ;;  %v4007_v14 = vld [vmem:[#allocation130_spill] sm:$0xff]  ;;  %v861_v32 = vadd.f32 %v4008_v56, %v701_v40  ;;  %1377 = vst.msk [vmem:[%s3617_s1 + $0x38] sm:$0xf] %vm1370_vm0, %v1335_v51  ;;  %v4011_v9 = vld [vmem:[#allocation71_spill] sm:$0xff]  ;;  %v4013_v49 = vld [vmem:[#allocation104_spill] sm:$0xff] }
 0x216   :  { %v938_v15 = vadd.f32 %v4007_v14, %v858_v28  ;;  %v4009_v31 = vld [vmem:[#allocation162_spill] sm:$0xff]  ;;  %1376 = vst.msk [vmem:[%s3617_s1 + $0x30] sm:$0xff] %vm1368_vm1, %v1334_v20  ;;  %v1297_v50 = vadd.f32 %v1187_v58, %v1137_v8  ;;  %v1296_v36 = vadd.f32 %v1185_v62, %v1136_v42  ;;  %v426_v28 = vadd.f32 %v4011_v9, %v3226_v11  ;;  %v4012_v63 = vld [vmem:[#allocation103_spill] sm:$0xff]  ;;  %v4014_v16 = vld [vmem:[#allocation184_spill] sm:$0xff] }
 0x217   :  { %v860_v18 = vadd.f32 %v4009_v31, %v700_v10  ;;  %v4010_v39 = vld [vmem:[#allocation70_spill] sm:$0xff]  ;;  %v703_v26 = vadd.f32 %v4012_v63, %v503_v46  ;;  %v702_v12 = vadd.f32 %v4013_v49, %v502_v3  ;;  %v1139_v23 = vadd.f32 %v4014_v16, %v939_v4  ;;  %v4015_v57 = vld [vmem:[#allocation185_spill] sm:$0xff]  ;;  %v1464_v53 = vld [vmem:[%s3616_s0 + $0x89] sm:$0xf] }
 0x218   :  { %v427_v21 = vadd.f32 %v4010_v39, %v3220_v0  ;;  %v1138_v48 = vadd.f32 %v4015_v57, %v938_v15  ;;  %v1337_v30 = vmul.f32 0.11111111, %v1297_v50  ;;  %v1336_v40 = vmul.f32 0.11111111, %v1296_v36  ;;  %v1465_v0 = vld [vmem:[%s3616_s0 + $0x81] sm:$0xff]  ;;  %v4017_v17 = vld [vmem:[#allocation164_spill] sm:$0xff]  ;;  %v1191_v60 = vpop.permute.xlu1 %1190  ;;  %v1189_v8 = vpop.permute.xlu0 %1188 }
 0x219   :  { %v505_v10 = vadd.f32 %v1464_v53, %v425_v33  ;;  %v504_v11 = vadd.f32 %v1465_v0, %v424_v55  ;;  %v4016_v13 = vld [vmem:[#allocation163_spill] sm:$0xff]  ;;  %v862_v3 = vadd.f32 %v4017_v17, %v702_v12  ;;  %v4018_v34 = vld [vmem:[#allocation133_spill] sm:$0xff]  ;;  %v4019_v51 = vld [vmem:[#allocation134_spill] sm:$0xff]  ;;  %v1299_v19 = vadd.f32 %v1191_v60, %v1139_v23 }
 0x21a   :  { %v863_v46 = vadd.f32 %v4016_v13, %v703_v26  ;;  %v941_v42 = vadd.f32 %v4018_v34, %v861_v32  ;;  %v940_v20 = vadd.f32 %v4019_v51, %v860_v18  ;;  %1379 = vst.msk [vmem:[%s3617_s1 + $0x48] sm:$0xf] %vm1370_vm0, %v1337_v30  ;;  %v1298_v33 = vadd.f32 %v1189_v8, %v1138_v48  ;;  %v4020_v27 = vld [vmem:[#allocation105_spill] sm:$0xff]  ;;  %v4021_v38 = vld [vmem:[#allocation106_spill] sm:$0xff]  ;;  %v4023_v31 = vld [vmem:[#allocation187_spill] sm:$0xff] }
 0x21b   :  { %1378 = vst.msk [vmem:[%s3617_s1 + $0x40] sm:$0xff] %vm1368_vm1, %v1336_v40  ;;  %v705_v55 = vadd.f32 %v4020_v27, %v505_v10  ;;  %v704_v4 = vadd.f32 %v4021_v38, %v504_v11  ;;  %v1466_v14 = vld [vmem:[%s3616_s0 + $0x99] sm:$0xf]  ;;  %v1467_v58 = vld [vmem:[%s3616_s0 + $0x91] sm:$0xff]  ;;  %v4022_v56 = vld [vmem:[#allocation186_spill] sm:$0xff] }
 0x21c   :  { %v507_v15 = vadd.f32 %v1466_v14, %v427_v21  ;;  %v506_v62 = vadd.f32 %v1467_v58, %v426_v28  ;;  %v1141_v32 = vadd.f32 %v4022_v56, %v941_v42  ;;  %v1140_v18 = vadd.f32 %v4023_v31, %v940_v20  ;;  %v4024_v39 = vld [vmem:[#allocation74_spill] sm:$0xff]  ;;  %v4025_v63 = vld [vmem:[#allocation75_spill] sm:$0xff]  ;;  %v4026_v49 = vld [vmem:[#allocation137_spill] sm:$0xff]  ;;  %v1195_v23 = vpop.permute.xlu1 %1194  ;;  %v1193_v57 = vpop.permute.xlu0 %1192 }
 0x21d   :  { %v1339_v50 = vmul.f32 0.11111111, %v1299_v19  ;;  %v1338_v36 = vmul.f32 0.11111111, %v1298_v33  ;;  %v429_v9 = vadd.f32 %v4024_v39, %v3260_v1  ;;  %v428_v26 = vadd.f32 %v4025_v63, %v3266_v2  ;;  %v4027_v21 = vld [vmem:[#allocation138_spill] sm:$0xff]  ;;  %v4028_v48 = vld [vmem:[#allocation165_spill] sm:$0xff] }
 0x21e   :  { %v943_v12 = vadd.f32 %v4026_v49, %v863_v46  ;;  %v942_v16 = vadd.f32 %v4027_v21, %v862_v3  ;;  %v865_v28 = vadd.f32 %v4028_v48, %v705_v55  ;;  %v4029_v30 = vld [vmem:[#allocation166_spill] sm:$0xff]  ;;  %v1301_v1 = vadd.f32 %v1195_v23, %v1141_v32  ;;  %v4030_v53 = vld [vmem:[#allocation107_spill] sm:$0xff]  ;;  %v4031_v0 = vld [vmem:[#allocation108_spill] sm:$0xff] }
 0x21f   :  { %v864_v40 = vadd.f32 %v4029_v30, %v704_v4  ;;  %1381 = vst.msk [vmem:[%s3617_s1 + $0x58] sm:$0xf] %vm1370_vm0, %v1339_v50  ;;  %v1300_v2 = vadd.f32 %v1193_v57, %v1140_v18  ;;  %v707_v10 = vadd.f32 %v4030_v53, %v507_v15  ;;  %v706_v11 = vadd.f32 %v4031_v0, %v506_v62  ;;  %v4032_v13 = vld [vmem:[#allocation188_spill] sm:$0xff]  ;;  %v4033_v17 = vld [vmem:[#allocation189_spill] sm:$0xff]  ;;  %v1468_v34 = vld [vmem:[%s3616_s0 + $0xa9] sm:$0xf] }
 0x220   :  { %1380 = vst.msk [vmem:[%s3617_s1 + $0x50] sm:$0xff] %vm1368_vm1, %v1338_v36  ;;  %v1143_v46 = vadd.f32 %v4032_v13, %v943_v12  ;;  %v1142_v3 = vadd.f32 %v4033_v17, %v942_v16  ;;  %v1341_v60 = vmul.f32 0.11111111, %v1301_v1  ;;  %v509_v42 = vadd.f32 %v1468_v34, %v429_v9  ;;  %v1469_v51 = vld [vmem:[%s3616_s0 + $0xa1] sm:$0xff]  ;;  %v4034_v19 = vld [vmem:[#allocation169_spill] sm:$0xff]  ;;  %v1199_v38 = vpop.permute.xlu1 %1198  ;;  %v1197_v4 = vpop.permute.xlu0 %1196  ;;  %v4044_v30 = vld [vmem:[#allocation172_spill] sm:$0xff] }
 0x221   :  { %v1340_v8 = vmul.f32 0.11111111, %v1300_v2  ;;  %v508_v20 = vadd.f32 %v1469_v51, %v428_v26  ;;  %v867_v33 = vadd.f32 %v4034_v19, %v707_v10  ;;  %v4035_v27 = vld [vmem:[#allocation170_spill] sm:$0xff]  ;;  %v4036_v14 = vld [vmem:[#allocation141_spill] sm:$0xff]  ;;  %v4041_v63 = vld [vmem:[#allocation191_spill] sm:$0xff] }
 0x222   :  { %v866_v55 = vadd.f32 %v4035_v27, %v706_v11  ;;  %v945_v15 = vadd.f32 %v4036_v14, %v865_v28  ;;  %v4037_v58 = vld [vmem:[#allocation142_spill] sm:$0xff]  ;;  %1383 = vst.msk [vmem:[%s3617_s1 + $0x68] sm:$0xf] %vm1370_vm0, %v1341_v60  ;;  %v1303_v56 = vadd.f32 %v1199_v38, %v1143_v46  ;;  %v1302_v32 = vadd.f32 %v1197_v4, %v1142_v3  ;;  %v4038_v31 = vld [vmem:[#allocation109_spill] sm:$0xff]  ;;  %v4046_v0 = vld [vmem:[#allocation192_spill] sm:$0xff] }
 0x223   :  { %v944_v62 = vadd.f32 %v4037_v58, %v864_v40  ;;  %1382 = vst.msk [vmem:[%s3617_s1 + $0x60] sm:$0xff] %vm1368_vm1, %v1340_v8  ;;  %v709_v18 = vadd.f32 %v4038_v31, %v509_v42  ;;  %v4039_v50 = vld [vmem:[#allocation110_spill] sm:$0xff]  ;;  %v4042_v21 = vld [vmem:[#allocation145_spill] sm:$0xff]  ;;  %v4050_v27 = vld [vmem:[#allocation4_spill] sm:$0xff] }
 0x224   :  { %v708_v36 = vadd.f32 %v4039_v50, %v508_v20  ;;  %v4040_v39 = vld [vmem:[#allocation190_spill] sm:$0xff]  ;;  %v1343_v49 = vmul.f32 0.11111111, %v1303_v56  ;;  %v1342_v12 = vmul.f32 0.11111111, %v1302_v32  ;;  %v947_v16 = vadd.f32 %v4042_v21, %v867_v33  ;;  %v1203_v48 = vpop.permute.xlu1 %1202  ;;  %v1201_v28 = vpop.permute.xlu0 %1200  ;;  %v4045_v1 = vld [vmem:[#allocation173_spill] sm:$0xff] }
 0x225   :  { %v1145_v9 = vadd.f32 %v4040_v39, %v945_v15  ;;  %v1144_v26 = vadd.f32 %v4041_v63, %v944_v62  ;;  %v4043_v23 = vld [vmem:[#allocation146_spill] sm:$0xff]  ;;  %v869_v40 = vadd.f32 %v4044_v30, %v709_v18  ;;  %v4047_v13 = vld [vmem:[#allocation193_spill] sm:$0xff]  ;;  %v4051_v38 = vld [vmem:[#allocation76_spill] sm:$0xff] }
 0x226   :  { %v946_v57 = vadd.f32 %v4043_v23, %v866_v55  ;;  %v868_v2 = vadd.f32 %v4045_v1, %v708_v36  ;;  %1385 = vst.msk [vmem:[%s3617_s1 + $0x78] sm:$0xf] %vm1370_vm0, %v1343_v49  ;;  %v1147_v11 = vadd.f32 %v4046_v0, %v947_v16  ;;  %v4048_v34 = vld [vmem:[#allocation149_spill] sm:$0xff]  ;;  %v4049_v51 = vld [vmem:[#allocation150_spill] sm:$0xff] }
 0x227   :  { %1384 = vst.msk [vmem:[%s3617_s1 + $0x70] sm:$0xff] %vm1368_vm1, %v1342_v12  ;;  %v1305_v53 = vadd.f32 %v1203_v48, %v1145_v9  ;;  %v1304_v10 = vadd.f32 %v1201_v28, %v1144_v26  ;;  %v949_v42 = vadd.f32 %v4048_v34, %v869_v40 }
 0x228   :  { %v1146_v46 = vadd.f32 %v4047_v13, %v946_v57  ;;  %v1207_v60 = vpop.permute.xlu1 %1206  ;;  %v1205_v8 = vpop.permute.xlu0 %1204  ;;  %v948_v20 = vadd.f32 %v4049_v51, %v868_v2 }
 0x229   :  { %v1345_v17 = vmul.f32 0.11111111, %v1305_v53  ;;  %v1344_v3 = vmul.f32 0.11111111, %v1304_v10  ;;  %v1307_v19 = vadd.f32 %v1207_v60, %v1147_v11  ;;  %v1149_v55 = vadd.f32 %v4050_v27, %v949_v42 }
 0x22a   :  { %v1306_v33 = vadd.f32 %v1205_v8, %v1146_v46  ;;  %v1148_v4 = vadd.f32 %v4051_v38, %v948_v20 }
 0x22b   :  { %1387 = vst.msk [vmem:[%s3617_s1 + $0x88] sm:$0xf] %vm1370_vm0, %v1345_v17  ;;  %v1347_v14 = vmul.f32 0.11111111, %v1307_v19 }
 0x22c   :  { %1386 = vst.msk [vmem:[%s3617_s1 + $0x80] sm:$0xff] %vm1368_vm1, %v1344_v3  ;;  %v1346_v15 = vmul.f32 0.11111111, %v1306_v33  ;;  %v1211_v58 = vpop.permute.xlu1 %1210  ;;  %v1209_v62 = vpop.permute.xlu0 %1208 }
 0x22d   :  { %1389 = vst.msk [vmem:[%s3617_s1 + $0x98] sm:$0xf] %vm1370_vm0, %v1347_v14  ;;  %v1309_v56 = vadd.f32 %v1211_v58, %v1149_v55  ;;  %v1308_v32 = vadd.f32 %v1209_v62, %v1148_v4 }
 0x22e   :  { %1388 = vst.msk [vmem:[%s3617_s1 + $0x90] sm:$0xff] %vm1368_vm1, %v1346_v15 }
 0x22f   :  { %v1349_v31 = vmul.f32 0.11111111, %v1309_v56  ;;  %v1348_v18 = vmul.f32 0.11111111, %v1308_v32 }
 0x230   :  { %v1215_v50 = vpop.permute.xlu1 %1214  ;;  %v1213_v36 = vpop.permute.xlu0 %1212 }
 0x231   :  { %1391 = vst.msk [vmem:[%s3617_s1 + $0xa8] sm:$0xf] %vm1370_vm0, %v1349_v31  ;;  %v1311_v39 = vadd.f32 %v1215_v50, %v3012_v5  ;;  %v1310_v9 = vadd.f32 %v1213_v36, %v3014_v45 }
 0x232   :  { %1390 = vst.msk [vmem:[%s3617_s1 + $0xa0] sm:$0xff] %vm1368_vm1, %v1348_v18 }
 0x233   :  { %v1351_v63 = vmul.f32 0.11111111, %v1311_v39  ;;  %v1350_v26 = vmul.f32 0.11111111, %v1310_v9 }
 0x234   :  { %v1219_v49 = vpop.permute.xlu1 %1218  ;;  %v1217_v12 = vpop.permute.xlu0 %1216 }
 0x235   :  { %1393 = vst.msk [vmem:[%s3617_s1 + $0xb8] sm:$0xf] %vm1370_vm0, %v1351_v63  ;;  %v1313_v21 = vadd.f32 %v1219_v49, %v3046_v47  ;;  %v1312_v5 = vadd.f32 %v1217_v12, %v3048_v41 }
 0x236   :  { %1392 = vst.msk [vmem:[%s3617_s1 + $0xb0] sm:$0xff] %vm1368_vm1, %v1350_v26 }
 0x237   :  { %v1353_v16 = vmul.f32 0.11111111, %v1313_v21  ;;  %v1352_v45 = vmul.f32 0.11111111, %v1312_v5 }
 0x238   :  { %v1223_v23 = vpop.permute.xlu1 %1222  ;;  %v1221_v57 = vpop.permute.xlu0 %1220 }
 0x239   :  { %1395 = vst.msk [vmem:[%s3617_s1 + $0xc8] sm:$0xf] %vm1370_vm0, %v1353_v16  ;;  %v1315_v48 = vadd.f32 %v1223_v23, %v3080_v52  ;;  %v1314_v47 = vadd.f32 %v1221_v57, %v3082_v59 }
 0x23a   :  { %1394 = vst.msk [vmem:[%s3617_s1 + $0xc0] sm:$0xff] %vm1368_vm1, %v1352_v45 }
 0x23b   :  { %v1355_v28 = vmul.f32 0.11111111, %v1315_v48  ;;  %v1354_v41 = vmul.f32 0.11111111, %v1314_v47 }
 0x23c   :  { %v1227_v30 = vpop.permute.xlu1 %1226  ;;  %v1225_v40 = vpop.permute.xlu0 %1224 }
 0x23d   :  { %1397 = vst.msk [vmem:[%s3617_s1 + $0xd8] sm:$0xf] %vm1370_vm0, %v1355_v28  ;;  %v1317_v1 = vadd.f32 %v1227_v30, %v3114_v7  ;;  %v1316_v52 = vadd.f32 %v1225_v40, %v3116_v44 }
 0x23e   :  { %1396 = vst.msk [vmem:[%s3617_s1 + $0xd0] sm:$0xff] %vm1368_vm1, %v1354_v41 }
 0x23f   :  { %v1357_v2 = vmul.f32 0.11111111, %v1317_v1  ;;  %v1356_v59 = vmul.f32 0.11111111, %v1316_v52 }
 0x240   :  { %v1231_v53 = vpop.permute.xlu1 %1230  ;;  %v1229_v10 = vpop.permute.xlu0 %1228 }
 0x241   :  { %1399 = vst.msk [vmem:[%s3617_s1 + $0xe8] sm:$0xf] %vm1370_vm0, %v1357_v2  ;;  %v1319_v0 = vadd.f32 %v1231_v53, %v3148_v6  ;;  %v1318_v7 = vadd.f32 %v1229_v10, %v3150_v37 }
 0x242   :  { %1398 = vst.msk [vmem:[%s3617_s1 + $0xe0] sm:$0xff] %vm1368_vm1, %v1356_v59 }
 0x243   :  { %v1359_v11 = vmul.f32 0.11111111, %v1319_v0  ;;  %v1358_v44 = vmul.f32 0.11111111, %v1318_v7 }
 0x244   :  { %v1235_v13 = vpop.permute.xlu1 %1234  ;;  %v1233_v46 = vpop.permute.xlu0 %1232 }
 0x245   :  { %1401 = vst.msk [vmem:[%s3617_s1 + $0xf8] sm:$0xf] %vm1370_vm0, %v1359_v11  ;;  %v1321_v17 = vadd.f32 %v1235_v13, %v3178_v24  ;;  %v1320_v6 = vadd.f32 %v1233_v46, %v3180_v25 }
 0x246   :  { %1400 = vst.msk [vmem:[%s3617_s1 + $0xf0] sm:$0xff] %vm1368_vm1, %v1358_v44 }
 0x247   :  { %v1361_v3 = vmul.f32 0.11111111, %v1321_v17  ;;  %v1360_v37 = vmul.f32 0.11111111, %v1320_v6 }
 0x248   :  { %v1239_v60 = vpop.permute.xlu1 %1238  ;;  %v1237_v8 = vpop.permute.xlu0 %1236 }
 0x249   :  { %1403 = vst.msk [vmem:[%s3617_s1 + $0x108] sm:$0xf] %vm1370_vm0, %v1361_v3  ;;  %v1323_v34 = vadd.f32 %v1239_v60, %v3212_v43  ;;  %v1322_v24 = vadd.f32 %v1237_v8, %v3214_v22 }
 0x24a   :  { %1402 = vst.msk [vmem:[%s3617_s1 + $0x100] sm:$0xff] %vm1368_vm1, %v1360_v37 }
 0x24b   :  { %v1363_v42 = vmul.f32 0.11111111, %v1323_v34  ;;  %v1362_v25 = vmul.f32 0.11111111, %v1322_v24 }
 0x24c   :  { %v1243_v51 = vpop.permute.xlu1 %1242  ;;  %v1241_v20 = vpop.permute.xlu0 %1240 }
 0x24d   :  { %1405 = vst.msk [vmem:[%s3617_s1 + $0x118] sm:$0xf] %vm1370_vm0, %v1363_v42  ;;  %v1325_v19 = vadd.f32 %v1243_v51, %v3246_v61  ;;  %v1324_v43 = vadd.f32 %v1241_v20, %v3248_v35 }
 0x24e   :  { %1404 = vst.msk [vmem:[%s3617_s1 + $0x110] sm:$0xff] %vm1368_vm1, %v1362_v25 }
 0x24f   :  { %v1365_v33 = vmul.f32 0.11111111, %v1325_v19  ;;  %v1364_v22 = vmul.f32 0.11111111, %v1324_v43 }
 0x250   :  { %v1247_v27 = vpop.permute.xlu1 %1246  ;;  %v1245_v55 = vpop.permute.xlu0 %1244 }
 0x251   :  { %1407 = vst.msk [vmem:[%s3617_s1 + $0x128] sm:$0xf] %vm1370_vm0, %v1365_v33  ;;  %v1327_v38 = vadd.f32 %v1247_v27, %v3280_v29  ;;  %v1326_v61 = vadd.f32 %v1245_v55, %v3282_v54 }
 0x252   :  { %1406 = vst.msk [vmem:[%s3617_s1 + $0x120] sm:$0xff] %vm1368_vm1, %v1364_v22 }
 0x253   :  { %v1367_v4 = vmul.f32 0.11111111, %v1327_v38  ;;  %v1366_v35 = vmul.f32 0.11111111, %v1326_v61 }
 0x255   :  { %1409 = vst.msk [vmem:[%s3617_s1 + $0x138] sm:$0xf] %vm1370_vm0, %v1367_v4 }
 0x256   :  { %1408 = vst.msk [vmem:[%s3617_s1 + $0x130] sm:$0xff] %vm1368_vm1, %v1366_v35 }

// kernel: net_forward.17
= control target key start
LH: loop header
LB: loop body
LE: loop exit
PB: predicated region body
PF: predicated region fallthrough
CT: control target
= control target key end

     0   :  { %v211_v1 = vmov 0   ;;  %vm64_vm0 = vcmask 130048   ;;  %vm172_vm1 = vcmask 261120   ;;  %s290_s1 = inlined_call_operand.vmem [shape: bf16[16,288], index: 1, kind: input, shape index: {}]   ;;  %s291_s0 = inlined_call_operand.vmem [shape: bf16[24,16], index: 0, kind: input, shape index: {}]   ;;  %s292_s2 = inlined_call_operand.vmem [shape: f32[24,1], index: 2, kind: input, shape index: {}]   ;;  %s293_s3 = inlined_call_operand.vmem [shape: f32[24,288], index: 3, kind: output, shape index: {}]  }
   0x1   :  { %v205_v0 = vld [vmem:[%s290_s1 + $0x4] ss:$12 sps:$4 sm:$0xff]   ;;  %103 = vmatprep.mubr.bf16.mxu0 %v211_v1  ;;  %203 = vset.pattern.permute.xlu0 %v211_v1  ;;  %v207_v2 = vld [vmem:[%s290_s1] ss:$12 sps:$4 sm:$0xff]   ;;  %v208_v3 = vld [vmem:[%s290_s1 + $0x8] ss:$12 sps:$4 sm:$0xff]  }
   0x2   :  { %204 = vset.pattern.permute.xlu1 %v211_v1  ;;  %71 = vmatprep.subr.bf16.mxu0 %v205_v0  ;;  %v209_v4 = vld [vmem:[%s291_s0] sm:$0xff]   ;;  %v210_v5 = vld [vmem:[%s291_s0 + $0x8] ss:$0 sps:$4 sm:$0xff]   ;;  %v24_v7 = vld [vmem:[%s292_s2 + $0x10] sm:$0xff] }
   0x3   :  { %72 = vmatpush1.bf16.msra.mxu0 %v207_v2  ;;  %196 = vmatprep.subr.bf16.mxu1 %v208_v3  ;;  %v22_v6 = vld [vmem:[%s292_s2] sm:$0xff]  ;;  %v23_v8 = vld [vmem:[%s292_s2 + $0x8] sm:$0xff] }
   0x4   :  { %197 = vmatpush3.bf16.msra.mxu1 %v208_v3  ;;  %198 = vmatprep.mubr.msk.bf16.mxu1 %vm64_vm0, %v209_v4 }
   0x5   :  { %27 = vperm.xlu0 %203, %v22_v6   ;;  %37 = vperm.xlu1 %204, %v24_v7  }
   0x6   :  { %189 = vmatmul.mubr.msk.bf16.vlgmr.msra.gmra.mrb[0].mxu0 %vm64_vm0, %v209_v4 }
   0x7   :  { %113 = vmatprep.mubr.bf16.mxu0 %v211_v1  ;;  %199 = vmatmul.mubr.msk.bf16.vlgmr.msra.gmra.mrb[0].mxu1 %vm64_vm0, %v210_v5 }
   0x9   :  { %32 = vperm.xlu0 %203, %v23_v8  }
   0xe   :  { %190 = vmatmul.mubr.msk.bf16.gmra.mrb[4].mxu0 %vm64_vm0, %v210_v5 }
  0x84   :  { %v28_v9 = vpop.permute.xlu0 %27  ;;  %v38_v10 = vpop.permute.xlu1 %37 }
  0x88   :  { %v33_v12 = vpop.permute.xlu0 %32 }
  0xd9   :  { %v105_v11 = vpop.f32.mrb[0].mxu0 }
  0xda   :  { %v106_v13 = vadd.f32 %v105_v11, %v28_v9  ;;  %v107_v14 = vpop.f32.mrb[1].mxu0  ;;  %v200_v17 = vpop.f32.mrb[0].mxu1 }
  0xdb   :  { %v108_v15 = vadd.f32 %v107_v14, %v28_v9  ;;  %v109_v16 = vpop.f32.mrb[2].mxu0  ;;  %v156_v20 = vpop.f32.mrb[1].mxu1  ;;  %v165_v21 = vadd.f32 %v200_v17, %v38_v10 }
  0xdc   :  { %170 = vst [vmem:[%s293_s3] sm:$0xff] %v106_v13  ;;  %v110_v18 = vadd.f32 %v109_v16, %v33_v12  ;;  %v111_v19 = vpop.f32.mrb[3].mxu0  ;;  %v157_v23 = vadd.f32 %v156_v20, %v28_v9  ;;  %v201_v24 = vpop.f32.mrb[2].mxu1 }
  0xdd   :  { %171 = vst [vmem:[%s293_s3 + $0x8] sm:$0xff] %v108_v15  ;;  %v112_v22 = vadd.f32 %v111_v19, %v33_v12  ;;  %v159_v25 = vpop.f32.mrb[3].mxu1  ;;  %179 = vst.msk [vmem:[%s293_s3 + $0x40] sm:$0xff] %vm172_vm1, %v165_v21 }
  0xde   :  { %174 = vst [vmem:[%s293_s3 + $0x18] sm:$0xff] %v110_v18  ;;  %173 = vst.msk [vmem:[%s293_s3 + $0x10] sm:$0xff] %vm172_vm1, %v157_v23  ;;  %v160_v26 = vadd.f32 %v159_v25, %v33_v12 }
  0xdf   :  { %175 = vst [vmem:[%s293_s3 + $0x20] sm:$0xff] %v112_v22 }
  0xe0   :  { %176 = vst.msk [vmem:[%s293_s3 + $0x28] sm:$0xff] %vm172_vm1, %v160_v26 }
  0xe1   :  { %v115_v27 = vpop.f32.mrb[4].mxu0 }
  0xe2   :  { %v116_v28 = vadd.f32 %v115_v27, %v38_v10  ;;  %v117_v29 = vpop.f32.mrb[5].mxu0 }
  0xe3   :  { %v118_v30 = vadd.f32 %v117_v29, %v38_v10  ;;  %v119_v31 = vpop.f32.mrb[6].mxu0 }
  0xe4   :  { %177 = vst [vmem:[%s293_s3 + $0x30] sm:$0xff] %v116_v28  ;;  %v120_v32 = vpop.f32.mrb[7].mxu0 }
  0xe5   :  { %178 = vst [vmem:[%s293_s3 + $0x38] sm:$0xff] %v118_v30 }

// kernel: net_forward.22
= control target key start
LH: loop header
LB: loop body
LE: loop exit
PB: predicated region body
PF: predicated region fallthrough
CT: control target
= control target key end

     0   :  { %v2350_v1 = vmov 0   ;;  %vm1311_vm0 = vcmask 195584   ;;  %vm1318_vm1 = vcmask 1043456   ;;  %s2898_s1 = inlined_call_operand.vmem [shape: bf16[2200,128], index: 1, kind: input, shape index: {}]   ;;  %s2899_s0 = inlined_call_operand.vmem [shape: bf16[20,2200], index: 0, kind: input, shape index: {}]   ;;  %s2900_s2 = inlined_call_operand.vmem [shape: f32[20,1], index: 2, kind: input, shape index: {}]   ;;  %s2901_s3 = inlined_call_operand.vmem [shape: f32[20,128], index: 3, kind: output, shape index: {}]  }
   0x1   :  { %v2167_v0 = vld [vmem:[%s2898_s1 + $0x40] sm:$0xff]   ;;  %2165 = vset.pattern.permute.xlu0 %v2350_v1  ;;  %2166 = vset.pattern.permute.xlu1 %v2350_v1  ;;  %v2169_v3 = vld [vmem:[%s2898_s1 + $0x48] sm:$0xff]   ;;  %v2171_v5 = vld [vmem:[%s2898_s1 + $0x50] sm:$0xff]  }
   0x2   :  { %v2168_v2 = vld [vmem:[%s2898_s1] sm:$0xff]   ;;  %1940 = vmatprep.subr.bf16.mxu1 %v2167_v0  ;;  %v2170_v4 = vld [vmem:[%s2898_s1 + $0x8] sm:$0xff]   ;;  %v2172_v6 = vld [vmem:[%s2898_s1 + $0x10] sm:$0xff]  }
   0x3   :  { %1941 = vmatpush3.bf16.msra.mxu1 %v2168_v2  ;;  %v2173_v7 = vld [vmem:[%s2898_s1 + $0x58] sm:$0xff]   ;;  %v2175_v9 = vld [vmem:[%s2898_s1 + $0x60] sm:$0xff]   ;;  %v2177_v13 = vld [vmem:[%s2898_s1 + $0x68] sm:$0xff]  }
   0x4   :  { %1942 = vmatprep.subr.bf16.mxu1 %v2169_v3  ;;  %v2174_v8 = vld [vmem:[%s2898_s1 + $0x18] sm:$0xff]   ;;  %v2176_v10 = vld [vmem:[%s2898_s1 + $0x20] sm:$0xff]   ;;  %v2178_v14 = vld [vmem:[%s2898_s1 + $0x28] sm:$0xff]  }
   0x5   :  { %v2181_v11 = vld [vmem:[%s2898_s1 + $0x140] sm:$0xff]   ;;  %v2185_v15 = vld [vmem:[%s2898_s1 + $0x148] sm:$0xff]   ;;  %v2179_v16 = vld [vmem:[%s2898_s1 + $0x70] sm:$0xff]  }
   0x6   :  { %v2182_v12 = vld [vmem:[%s2898_s1 + $0x100] sm:$0xff]   ;;  %1996 = vmatprep.subr.bf16.mxu0 %v2181_v11  ;;  %v2189_v18 = vld [vmem:[%s2898_s1 + $0x108] sm:$0xff]   ;;  %v2180_v19 = vld [vmem:[%s2898_s1 + $0x30] sm:$0xff]  }
   0x7   :  { %1943 = vmatpush3.bf16.msra.mxu1 %v2170_v4  ;;  %1997 = vmatpush3.bf16.msra.mxu0 %v2182_v12  ;;  %v2188_v17 = vld [vmem:[%s2899_s0 + $0x4] ss:$72 sps:$4 sm:$0xff]   ;;  %v2183_v20 = vld [vmem:[%s2898_s1 + $0x78] sm:$0xff]   ;;  %v2192_v21 = vld [vmem:[%s2898_s1 + $0x150] sm:$0xff]  }
   0x8   :  { %1944 = vmatprep.subr.bf16.mxu1 %v2171_v5  ;;  %1998 = vmatprep.subr.bf16.mxu0 %v2185_v15  ;;  %v2193_v22 = vld [vmem:[%s2898_s1 + $0x110] sm:$0xff]   ;;  %v2184_v23 = vld [vmem:[%s2898_s1 + $0x38] sm:$0xff]   ;;  %v2190_v24 = vld [vmem:[%s2898_s1 + $0xc0] sm:$0xff]  }
   0x9   :  { %1354 = vmatprep.mubr.bf16.mxu1 %v2188_v17  ;;  %v2186_v25 = vld [vmem:[%s2899_s0] ss:$72 sps:$4 sm:$0xff]   ;;  %v2196_v26 = vld [vmem:[%s2898_s1 + $0x158] sm:$0xff]   ;;  %v2198_v33 = vld [vmem:[%s2898_s1 + $0xd0] sm:$0xff]  }
   0xa   :  { %v2197_v27 = vld [vmem:[%s2898_s1 + $0x118] sm:$0xff]   ;;  %v2191_v28 = vld [vmem:[%s2898_s1 + $0x80] sm:$0xff]   ;;  %v2194_v29 = vld [vmem:[%s2898_s1 + $0xc8] sm:$0xff]  }
   0xb   :  { %1945 = vmatpush3.bf16.msra.mxu1 %v2172_v6  ;;  %1999 = vmatpush3.bf16.msra.mxu0 %v2189_v18  ;;  %v2200_v30 = vld [vmem:[%s2898_s1 + $0x160] sm:$0xff]   ;;  %v2195_v32 = vld [vmem:[%s2898_s1 + $0x88] sm:$0xff]   ;;  %v2199_v36 = vld [vmem:[%s2898_s1 + $0x90] sm:$0xff]  }
   0xc   :  { %1946 = vmatprep.subr.bf16.mxu1 %v2173_v7  ;;  %2000 = vmatprep.subr.bf16.mxu0 %v2192_v21  ;;  %v2201_v31 = vld [vmem:[%s2898_s1 + $0x120] sm:$0xff]   ;;  %v2204_v34 = vld [vmem:[%s2898_s1 + $0x168] sm:$0xff]   ;;  %v2202_v37 = vld [vmem:[%s2898_s1 + $0xd8] sm:$0xff]  }
   0xd   :  { %v2205_v35 = vld [vmem:[%s2898_s1 + $0x128] sm:$0xff]   ;;  %v2208_v38 = vld [vmem:[%s2898_s1 + $0x170] sm:$0xff]   ;;  %v2203_v40 = vld [vmem:[%s2898_s1 + $0x98] sm:$0xff]  }
   0xe   :  { %v2209_v39 = vld [vmem:[%s2898_s1 + $0x130] sm:$0xff]   ;;  %v2206_v42 = vld [vmem:[%s2898_s1 + $0xe0] sm:$0xff]   ;;  %v2214_v45 = vld [vmem:[%s2898_s1 + $0x178] sm:$0xff]  }
   0xf   :  { %1947 = vmatpush3.bf16.msra.mxu1 %v2174_v8  ;;  %2001 = vmatpush3.bf16.msra.mxu0 %v2193_v22  ;;  %v33_v41 = vld [vmem:[%s2899_s0 + $0x90] sm:$0x33]  ;;  %v2215_v46 = vld [vmem:[%s2898_s1 + $0x138] sm:$0xff]   ;;  %v2207_v47 = vld [vmem:[%s2898_s1 + $0xa0] sm:$0xff]  }
  0x10   :  { %1948 = vmatprep.subr.bf16.mxu1 %v2175_v9  ;;  %2002 = vmatprep.subr.bf16.mxu0 %v2196_v26  ;;  %v1783_v43 = vcombine.high %v33_v41, %v33_v41  ;;  %v1782_v44 = vcombine.low %v33_v41, %v33_v41  ;;  %v2210_v48 = vld [vmem:[%s2898_s1 + $0xe8] sm:$0xff]   ;;  %v2218_v49 = vld [vmem:[%s2899_s0 + $0x10] ss:$72 sps:$4 sm:$0xff]   ;;  %v2220_v50 = vld [vmem:[%s2899_s0 + $0x14] ss:$72 sps:$4 sm:$0xff]  }
  0x11   :  { %v2221_v51 = vld [vmem:[%s2898_s1 + $0x240] sm:$0xff]   ;;  %1450 = vmatprep.mubr.bf16.mxu0 %v2220_v50  ;;  %v2212_v53 = vld [vmem:[%s2898_s1 + $0xa8] sm:$0xff]   ;;  %v2216_v54 = vld [vmem:[%s2898_s1 + $0xf0] sm:$0xff]  }
  0x12   :  { %v2222_v52 = vld [vmem:[%s2898_s1 + $0x200] sm:$0xff]   ;;  %v2217_v55 = vld [vmem:[%s2898_s1 + $0xb0] sm:$0xff]   ;;  %v2225_v56 = vld [vmem:[%s2898_s1 + $0x248] sm:$0xff]  }
  0x13   :  { %1949 = vmatpush3.bf16.msra.mxu1 %v2176_v10  ;;  %2003 = vmatpush3.bf16.msra.mxu0 %v2197_v27  ;;  %v2223_v57 = vld [vmem:[%s2898_s1 + $0xf8] sm:$0xff]   ;;  %v2228_v58 = vld [vmem:[%s2899_s0 + $0xc] ss:$72 sps:$4 sm:$0xff]   ;;  %v2230_v61 = vld [vmem:[%s2898_s1 + $0x1c0] sm:$0xff]  }
  0x14   :  { %1950 = vmatprep.subr.bf16.mxu1 %v2177_v13  ;;  %2004 = vmatprep.subr.bf16.mxu0 %v2200_v30  ;;  %v2229_v59 = vld [vmem:[%s2898_s1 + $0x208] sm:$0xff]   ;;  %v2224_v60 = vld [vmem:[%s2898_s1 + $0xb8] sm:$0xff]   ;;  %v2232_v62 = vld [vmem:[%s2898_s1 + $0x250] sm:$0xff]  }
  0x15   :  { %v2226_v63 = vld [vmem:[%s2899_s0 + $0x8] ss:$72 sps:$4 sm:$0xff]   ;;  %v2231_v2 = vld [vmem:[%s2898_s1 + $0x180] sm:$0xff]   ;;  %v2236_v4 = vld [vmem:[%s2898_s1 + $0x258] sm:$0xff]  }
  0x16   :  { %v2233_v0 = vld [vmem:[%s2898_s1 + $0x210] sm:$0xff]   ;;  %v2234_v3 = vld [vmem:[%s2898_s1 + $0x1c8] sm:$0xff]   ;;  %v34_v5 = vld [vmem:[%s2899_s0 + $0x98] sm:$0x33] }
  0x17   :  { %1951 = vmatpush3.bf16.msra.mxu1 %v2178_v14  ;;  %2005 = vmatpush3.bf16.msra.mxu0 %v2201_v31  ;;  %v1785_v6 = vcombine.high %v34_v5, %v34_v5  ;;  %v2238_v7 = vld [vmem:[%s2898_s1 + $0x218] sm:$0xff]   ;;  %v2235_v8 = vld [vmem:[%s2898_s1 + $0x188] sm:$0xff]   ;;  %v35_v9 = vld [vmem:[%s2899_s0 + $0xa0] sm:$0x33] }
  0x18   :  { %1952 = vmatprep.subr.bf16.mxu1 %v2179_v16  ;;  %2006 = vmatprep.subr.bf16.mxu0 %v2204_v34  ;;  %v2240_v10 = vld [vmem:[%s2898_s1 + $0x1d0] sm:$0xff]   ;;  %v1787_v11 = vcombine.high %v35_v9, %v35_v9  ;;  %v1786_v12 = vcombine.low %v35_v9, %v35_v9  ;;  %v2244_v13 = vld [vmem:[%s2898_s1 + $0x260] sm:$0xff]   ;;  %v1784_v16 = vcombine.low %v34_v5, %v34_v5  ;;  %v2246_v17 = vld [vmem:[%s2898_s1 + $0x1d8] sm:$0xff]  }
  0x19   :  { %v2245_v14 = vld [vmem:[%s2898_s1 + $0x220] sm:$0xff]   ;;  %v2242_v15 = vld [vmem:[%s2898_s1 + $0x190] sm:$0xff]   ;;  %v2248_v18 = vld [vmem:[%s2898_s1 + $0x268] sm:$0xff]  }
  0x1a   :  { %v2250_v21 = vld [vmem:[%s2898_s1 + $0x1e0] sm:$0xff]   ;;  %v2252_v22 = vld [vmem:[%s2898_s1 + $0x270] sm:$0xff]   ;;  %v2256_v26 = vld [vmem:[%s2898_s1 + $0x278] sm:$0xff]  }
  0x1b   :  { %1953 = vmatpush3.bf16.msra.mxu1 %v2180_v19  ;;  %2007 = vmatpush3.bf16.msra.mxu0 %v2205_v35  ;;  %v2249_v19 = vld [vmem:[%s2898_s1 + $0x228] sm:$0xff]   ;;  %v2257_v27 = vld [vmem:[%s2898_s1 + $0x238] sm:$0xff]   ;;  %v2259_v34 = vld [vmem:[%s2898_s1 + $0x1b0] sm:$0xff]  }
  0x1c   :  { %1954 = vmatprep.subr.bf16.mxu1 %v2183_v20  ;;  %2008 = vmatprep.subr.bf16.mxu0 %v2208_v38  ;;  %v2247_v20 = vld [vmem:[%s2898_s1 + $0x198] sm:$0xff]   ;;  %v2260_v30 = vld [vmem:[%s2899_s0 + $0x20] ss:$72 sps:$4 sm:$0xff]   ;;  %v2262_v31 = vld [vmem:[%s2899_s0 + $0x24] ss:$72 sps:$4 sm:$0xff]  }
  0x1d   :  { %v2265_v35 = vld [vmem:[%s2898_s1 + $0x1f8] sm:$0xff]   ;;  %v2272_v41 = vld [vmem:[%s2898_s1 + $0x2c0] sm:$0xff]   ;;  %v2300_v9 = vld [vmem:[%s2898_s1 + $0x2f0] sm:$0xff]  }
  0x1e   :  { %v2270_v38 = vld [vmem:[%s2899_s0 + $0x1c] ss:$72 sps:$4 sm:$0xff]  }
  0x1f   :  { %1955 = vmatpush3.bf16.msra.mxu1 %v2184_v23  ;;  %2009 = vmatpush3.bf16.msra.mxu0 %v2209_v39  ;;  %v2253_v23 = vld [vmem:[%s2898_s1 + $0x230] sm:$0xff]   ;;  %v2271_v39 = vld [vmem:[%s2898_s1 + $0x308] sm:$0xff]   ;;  %v2280_v50 = vld [vmem:[%s2898_s1 + $0x318] sm:$0xff]  }
  0x20   :  { %1968 = vmatprep.subr.bf16.mxu1 %v2190_v24  ;;  %2010 = vmatprep.subr.bf16.mxu0 %v2214_v45  ;;  %v2251_v24 = vld [vmem:[%s2898_s1 + $0x1a0] sm:$0xff]   ;;  %v2276_v45 = vld [vmem:[%s2898_s1 + $0x2c8] sm:$0xff]  }
  0x21   :  { %v317_v5 = vld [vmem:[%s2900_s2] sm:$0xff] }
  0x22   :  { %1355 = vmatmul.mubr.bf16.vlgmr.msra.gmra.mrb[0].mxu1 %v2186_v25  ;;  %v2254_v25 = vld [vmem:[%s2898_s1 + $0x1e8] sm:$0xff]   ;;  %322 = vperm.xlu0 %2165, %v317_v5  }
  0x23   :  { %1969 = vmatpush3.bf16.msra.mxu1 %v2191_v28  ;;  %1362 = vmatprep.mubr.bf16.mxu1 %v1783_v43  ;;  %v2255_v28 = vld [vmem:[%s2898_s1 + $0x1a8] sm:$0xff]   ;;  %v2274_v43 = vld [vmem:[%s2898_s1 + $0x350] sm:$0xff]  }
  0x24   :  { %1970 = vmatprep.subr.bf16.mxu1 %v2194_v29  ;;  %2011 = vmatpush3.bf16.msra.mxu0 %v2215_v46  ;;  %v2258_v29 = vld [vmem:[%s2898_s1 + $0x1f0] sm:$0xff]   ;;  %v2277_v46 = vld [vmem:[%s2898_s1 + $0x288] sm:$0xff]  }
  0x25   :  { %2052 = vmatprep.subr.bf16.mxu0 %v2221_v51  ;;  %v2282_v51 = vld [vmem:[%s2898_s1 + $0x2d0] sm:$0xff]  }
  0x27   :  { %1971 = vmatpush3.bf16.msra.mxu1 %v2195_v32  ;;  %1451 = vmatmul.mubr.bf16.vlgmr.msra.gmra.mrb[0].mxu0 %v2218_v49  ;;  %v2263_v32 = vld [vmem:[%s2898_s1 + $0x340] sm:$0xff]  }
  0x28   :  { %1972 = vmatprep.subr.bf16.mxu1 %v2198_v33  ;;  %2053 = vmatpush3.bf16.msra.mxu0 %v2222_v52  ;;  %v2264_v33 = vld [vmem:[%s2898_s1 + $0x300] sm:$0xff]   ;;  %v37_v52 = vld [vmem:[%s2899_s0 + $0xb0] sm:$0x33] }
  0x29   :  { %2054 = vmatprep.subr.bf16.mxu0 %v2225_v56  ;;  %1458 = vmatprep.mubr.bf16.mxu0 %v1787_v11  ;;  %v1790_v56 = vcombine.low %v37_v52, %v37_v52  ;;  %v2301_v11 = vld [vmem:[%s2898_s1 + $0x2b0] sm:$0xff]  }
  0x2a   :  { %1363 = vmatmul.mubr.bf16.gmra.mrb[4].mxu1 %v1782_v44  ;;  %v2275_v44 = vld [vmem:[%s2898_s1 + $0x310] sm:$0xff]  }
  0x2b   :  { %1973 = vmatpush3.bf16.msra.mxu1 %v2199_v36  ;;  %1402 = vmatprep.mubr.bf16.mxu1 %v2228_v58  ;;  %v2267_v36 = vld [vmem:[%s2898_s1 + $0x348] sm:$0xff]   ;;  %v2287_v58 = vld [vmem:[%s2898_s1 + $0x320] sm:$0xff]  }
  0x2c   :  { %1974 = vmatprep.subr.bf16.mxu1 %v2202_v37  ;;  %2055 = vmatpush3.bf16.msra.mxu0 %v2229_v59  ;;  %v2266_v37 = vld [vmem:[%s2898_s1 + $0x1b8] sm:$0xff]  }
  0x2d   :  { %2056 = vmatprep.subr.bf16.mxu0 %v2232_v62  ;;  %v2288_v59 = vld [vmem:[%s2898_s1 + $0x2d8] sm:$0xff]   ;;  %v2291_v62 = vld [vmem:[%s2898_s1 + $0x328] sm:$0xff]  }
  0x2f   :  { %1975 = vmatpush3.bf16.msra.mxu1 %v2203_v40  ;;  %1459 = vmatmul.mubr.bf16.gmra.mrb[4].mxu0 %v1786_v12  ;;  %v2268_v40 = vld [vmem:[%s2899_s0 + $0x18] ss:$72 sps:$4 sm:$0xff]  }
  0x30   :  { %1976 = vmatprep.subr.bf16.mxu1 %v2206_v42  ;;  %2057 = vmatpush3.bf16.msra.mxu0 %v2233_v0  ;;  %v2273_v42 = vld [vmem:[%s2898_s1 + $0x280] sm:$0xff]   ;;  %v2302_v12 = vld [vmem:[%s2899_s0 + $0x30] ss:$72 sps:$4 sm:$0xff]  }
  0x31   :  { %2058 = vmatprep.subr.bf16.mxu0 %v2236_v4  ;;  %1546 = vmatprep.mubr.bf16.mxu0 %v2262_v31  ;;  %v2293_v0 = vld [vmem:[%s2898_s1 + $0x2a0] sm:$0xff]   ;;  %v2296_v4 = vld [vmem:[%s2898_s1 + $0x2e8] sm:$0xff]  }
  0x33   :  { %1977 = vmatpush3.bf16.msra.mxu1 %v2207_v47  ;;  %v2278_v47 = vld [vmem:[%s2898_s1 + $0x358] sm:$0xff]  }
  0x34   :  { %1978 = vmatprep.subr.bf16.mxu1 %v2210_v48  ;;  %2059 = vmatpush3.bf16.msra.mxu0 %v2238_v7  ;;  %v36_v48 = vld [vmem:[%s2899_s0 + $0xa8] sm:$0x33]  ;;  %v2298_v7 = vld [vmem:[%s2898_s1 + $0x378] sm:$0xff]  }
  0x35   :  { %2060 = vmatprep.subr.bf16.mxu0 %v2244_v13  ;;  %v1789_v49 = vcombine.high %v36_v48, %v36_v48  ;;  %v2304_v13 = vld [vmem:[%s2899_s0 + $0x34] ss:$72 sps:$4 sm:$0xff]  }
  0x37   :  { %1979 = vmatpush3.bf16.msra.mxu1 %v2212_v53  ;;  %v1788_v53 = vcombine.low %v36_v48, %v36_v48  ;;  %v2336_v48 = vld [vmem:[%s2898_s1 + $0x440] sm:$0xff]  }
  0x38   :  { %1980 = vmatprep.subr.bf16.mxu1 %v2216_v54  ;;  %2061 = vmatpush3.bf16.msra.mxu0 %v2245_v14  ;;  %v1791_v54 = vcombine.high %v37_v52, %v37_v52  ;;  %v2305_v14 = vld [vmem:[%s2898_s1 + $0x400] sm:$0xff]   ;;  %v2338_v52 = vld [vmem:[%s2898_s1 + $0x3b8] sm:$0xff]  }
  0x39   :  { %2062 = vmatprep.subr.bf16.mxu0 %v2248_v18  ;;  %v2310_v18 = vld [vmem:[%s2899_s0 + $0x2c] ss:$72 sps:$4 sm:$0xff]  }
  0x3b   :  { %1981 = vmatpush3.bf16.msra.mxu1 %v2217_v55  ;;  %v2284_v55 = vld [vmem:[%s2898_s1 + $0x290] sm:$0xff]  }
  0x3c   :  { %1982 = vmatprep.subr.bf16.mxu1 %v2223_v57  ;;  %2063 = vmatpush3.bf16.msra.mxu0 %v2249_v19  ;;  %v2286_v57 = vld [vmem:[%s2898_s1 + $0x360] sm:$0xff]   ;;  %v2311_v19 = vld [vmem:[%s2898_s1 + $0x408] sm:$0xff]  }
  0x3d   :  { %2064 = vmatprep.subr.bf16.mxu0 %v2252_v22  ;;  %v2314_v22 = vld [vmem:[%s2898_s1 + $0x410] sm:$0xff]  }
  0x3f   :  { %1983 = vmatpush3.bf16.msra.mxu1 %v2224_v60  ;;  %v2289_v60 = vld [vmem:[%s2898_s1 + $0x298] sm:$0xff]  }
  0x40   :  { %2024 = vmatprep.subr.bf16.mxu1 %v2230_v61  ;;  %2065 = vmatpush3.bf16.msra.mxu0 %v2253_v23  ;;  %v2290_v61 = vld [vmem:[%s2898_s1 + $0x368] sm:$0xff]  }
  0x41   :  { %2066 = vmatprep.subr.bf16.mxu0 %v2256_v26  ;;  %v2315_v23 = vld [vmem:[%s2898_s1 + $0x3c8] sm:$0xff]  }
  0x42   :  { %1403 = vmatmul.mubr.bf16.vlgmr.msra.gmra.mrb[8].mxu1 %v2226_v63  ;;  %v2292_v63 = vld [vmem:[%s2898_s1 + $0x2e0] sm:$0xff]  }
  0x43   :  { %2025 = vmatpush3.bf16.msra.mxu1 %v2231_v2  ;;  %1410 = vmatprep.mubr.bf16.mxu1 %v1785_v6  ;;  %v2294_v2 = vld [vmem:[%s2898_s1 + $0x370] sm:$0xff]   ;;  %v2297_v6 = vld [vmem:[%s2898_s1 + $0x2a8] sm:$0xff]  }
  0x44   :  { %2026 = vmatprep.subr.bf16.mxu1 %v2234_v3  ;;  %2067 = vmatpush3.bf16.msra.mxu0 %v2257_v27  ;;  %v2295_v3 = vld [vmem:[%s2898_s1 + $0x330] sm:$0xff]   ;;  %v2318_v27 = vld [vmem:[%s2898_s1 + $0x418] sm:$0xff]  }
  0x45   :  { %2108 = vmatprep.subr.bf16.mxu0 %v2263_v32  ;;  %v2322_v32 = vld [vmem:[%s2898_s1 + $0x390] sm:$0xff]  }
  0x47   :  { %2027 = vmatpush3.bf16.msra.mxu1 %v2235_v8  ;;  %1547 = vmatmul.mubr.bf16.vlgmr.msra.gmra.mrb[8].mxu0 %v2260_v30  ;;  %v2299_v8 = vld [vmem:[%s2898_s1 + $0x338] sm:$0xff]  }
  0x48   :  { %2028 = vmatprep.subr.bf16.mxu1 %v2240_v10  ;;  %2109 = vmatpush3.bf16.msra.mxu0 %v2264_v33  ;;  %v318_v10 = vld [vmem:[%s2900_s2 + $0x8] sm:$0xff] }
  0x49   :  { %2110 = vmatprep.subr.bf16.mxu0 %v2267_v36  ;;  %1554 = vmatprep.mubr.bf16.mxu0 %v1791_v54  ;;  %v319_v36 = vld [vmem:[%s2900_s2 + $0x10] sm:$0xf] }
  0x4a   :  { %1411 = vmatmul.mubr.bf16.gmra.mrb[12].mxu1 %v1784_v16  ;;  %327 = vperm.xlu0 %2165, %v318_v10   ;;  %v2307_v16 = vld [vmem:[%s2898_s1 + $0x2b8] sm:$0xff]  }
  0x4b   :  { %2029 = vmatpush3.bf16.msra.mxu1 %v2242_v15  ;;  %1498 = vmatprep.mubr.bf16.mxu1 %v2270_v38  ;;  %v2306_v15 = vld [vmem:[%s2898_s1 + $0x2f8] sm:$0xff]   ;;  %v2327_v38 = vld [vmem:[%s2898_s1 + $0x428] sm:$0xff]  }
  0x4c   :  { %2030 = vmatprep.subr.bf16.mxu1 %v2246_v17  ;;  %2111 = vmatpush3.bf16.msra.mxu0 %v2271_v39  ;;  %v2308_v17 = vld [vmem:[%s2899_s0 + $0x28] ss:$72 sps:$4 sm:$0xff]   ;;  %v2328_v39 = vld [vmem:[%s2898_s1 + $0x3e0] sm:$0xff]  }
  0x4d   :  { %2112 = vmatprep.subr.bf16.mxu0 %v2274_v43  ;;  %332 = vperm.xlu1 %2166, %v319_v36   ;;  %v2332_v43 = vld [vmem:[%s2898_s1 + $0x3a8] sm:$0xff]  }
  0x4f   :  { %2031 = vmatpush3.bf16.msra.mxu1 %v2247_v20  ;;  %1555 = vmatmul.mubr.bf16.gmra.mrb[12].mxu0 %v1790_v56  ;;  %v2312_v20 = vld [vmem:[%s2898_s1 + $0x3c0] sm:$0xff]  }
  0x50   :  { %2032 = vmatprep.subr.bf16.mxu1 %v2250_v21  ;;  %2113 = vmatpush3.bf16.msra.mxu0 %v2275_v44  ;;  %v2313_v21 = vld [vmem:[%s2898_s1 + $0x380] sm:$0xff]   ;;  %v2333_v44 = vld [vmem:[%s2898_s1 + $0x438] sm:$0xff]  }
  0x51   :  { %2114 = vmatprep.subr.bf16.mxu0 %v2278_v47  ;;  %1642 = vmatprep.mubr.bf16.mxu0 %v2304_v13  ;;  %v2341_v47 = vld [vmem:[%s2899_s0 + $0x3c] ss:$72 sps:$4 sm:$0xff]   ;;  %v2339_v56 = vld [vmem:[%s2899_s0 + $0x38] ss:$72 sps:$4 sm:$0xff]  }
  0x53   :  { %2033 = vmatpush3.bf16.msra.mxu1 %v2251_v24  ;;  %v2316_v24 = vld [vmem:[%s2898_s1 + $0x388] sm:$0xff]  }
  0x54   :  { %2034 = vmatprep.subr.bf16.mxu1 %v2254_v25  ;;  %2115 = vmatpush3.bf16.msra.mxu0 %v2280_v50  ;;  %v38_v25 = vld [vmem:[%s2899_s0 + $0xb8] sm:$0x33]  ;;  %v2345_v50 = vld [vmem:[%s2899_s0 + $0x44] ss:$72 sps:$4 sm:$0xff]  }
  0x55   :  { %2116 = vmatprep.subr.bf16.mxu0 %v2286_v57  ;;  %v1793_v26 = vcombine.high %v38_v25, %v38_v25  ;;  %v1792_v30 = vcombine.low %v38_v25, %v38_v25  ;;  %v2343_v57 = vld [vmem:[%s2899_s0 + $0x40] ss:$72 sps:$4 sm:$0xff]  }
  0x57   :  { %2035 = vmatpush3.bf16.msra.mxu1 %v2255_v28  ;;  %v2320_v28 = vld [vmem:[%s2898_s1 + $0x3d0] sm:$0xff]  }
  0x58   :  { %2036 = vmatprep.subr.bf16.mxu1 %v2258_v29  ;;  %2117 = vmatpush3.bf16.msra.mxu0 %v2287_v58  ;;  %v39_v29 = vld [vmem:[%s2899_s0 + $0xc0] sm:$0x33] }
  0x59   :  { %2118 = vmatprep.subr.bf16.mxu0 %v2290_v61  ;;  %v1795_v31 = vcombine.high %v39_v29, %v39_v29  ;;  %v1794_v33 = vcombine.low %v39_v29, %v39_v29 }
  0x5b   :  { %2037 = vmatpush3.bf16.msra.mxu1 %v2259_v34  ;;  %v2324_v34 = vld [vmem:[%s2898_s1 + $0x420] sm:$0xff]  }
  0x5c   :  { %2038 = vmatprep.subr.bf16.mxu1 %v2265_v35  ;;  %2119 = vmatpush3.bf16.msra.mxu0 %v2291_v62  ;;  %v2325_v35 = vld [vmem:[%s2898_s1 + $0x3d8] sm:$0xff]  }
  0x5d   :  { %2120 = vmatprep.subr.bf16.mxu0 %v2294_v2 }
  0x5f   :  { %2039 = vmatpush3.bf16.msra.mxu1 %v2266_v37  ;;  %v2326_v37 = vld [vmem:[%s2898_s1 + $0x398] sm:$0xff]  }
  0x60   :  { %2080 = vmatprep.subr.bf16.mxu1 %v2272_v41  ;;  %2121 = vmatpush3.bf16.msra.mxu0 %v2295_v3  ;;  %v2330_v41 = vld [vmem:[%s2898_s1 + $0x430] sm:$0xff]  }
  0x61   :  { %2122 = vmatprep.subr.bf16.mxu0 %v2298_v7 }
  0x62   :  { %1499 = vmatmul.mubr.bf16.vlgmr.msra.gmra.mrb[16].mxu1 %v2268_v40  ;;  %v2329_v40 = vld [vmem:[%s2898_s1 + $0x3a0] sm:$0xff]  }
  0x63   :  { %2081 = vmatpush3.bf16.msra.mxu1 %v2273_v42  ;;  %1506 = vmatprep.mubr.bf16.mxu1 %v1789_v49  ;;  %v2331_v42 = vld [vmem:[%s2898_s1 + $0x3e8] sm:$0xff]   ;;  %v2337_v49 = vld [vmem:[%s2898_s1 + $0x3f8] sm:$0xff]  }
  0x64   :  { %2082 = vmatprep.subr.bf16.mxu1 %v2276_v45  ;;  %2123 = vmatpush3.bf16.msra.mxu0 %v2299_v8  ;;  %v2334_v45 = vld [vmem:[%s2898_s1 + $0x3f0] sm:$0xff]  }
  0x65   :  { %1706 = vmatprep.subr.bf16.mxu0 %v2350_v1 }
  0x67   :  { %2083 = vmatpush3.bf16.msra.mxu1 %v2277_v46  ;;  %1643 = vmatmul.mubr.bf16.vlgmr.msra.gmra.mrb[16].mxu0 %v2302_v12  ;;  %v2335_v46 = vld [vmem:[%s2898_s1 + $0x3b0] sm:$0xff]  }
  0x68   :  { %2084 = vmatprep.subr.bf16.mxu1 %v2282_v51  ;;  %1707 = vmatpush1.bf16.msra.mxu0 %v2305_v14  ;;  %v2342_v51 = vld [vmem:[%s2898_s1 + $0x448] ss:$0 sps:$4 sm:$0xff]  }
  0x69   :  { %1708 = vmatprep.subr.bf16.mxu0 %v2350_v1  ;;  %1650 = vmatprep.mubr.bf16.mxu0 %v1795_v31  ;;  %v1320_v54 = vsel %vm1318_vm1, %v2342_v51, 0 }
  0x6a   :  { %1507 = vmatmul.mubr.bf16.gmra.mrb[20].mxu1 %v1788_v53  ;;  %v40_v53 = vld [vmem:[%s2899_s0 + $0xc8] sm:$0x33] }
  0x6b   :  { %2085 = vmatpush3.bf16.msra.mxu1 %v2284_v55  ;;  %1594 = vmatprep.mubr.bf16.mxu1 %v2310_v18  ;;  %v41_v55 = vld [vmem:[%s2899_s0 + $0xd0] sm:$0x33]  ;;  %v1797_v58 = vcombine.high %v40_v53, %v40_v53 }
  0x6c   :  { %2086 = vmatprep.subr.bf16.mxu1 %v2288_v59  ;;  %1709 = vmatpush1.bf16.msra.mxu0 %v2311_v19  ;;  %v1799_v59 = vcombine.high %v41_v55, %v41_v55 }
  0x6d   :  { %1710 = vmatprep.subr.bf16.mxu0 %v2350_v1 }
  0x6f   :  { %2087 = vmatpush3.bf16.msra.mxu1 %v2289_v60  ;;  %1651 = vmatmul.mubr.bf16.gmra.mrb[20].mxu0 %v1794_v33  ;;  %v1798_v60 = vcombine.low %v41_v55, %v41_v55 }
  0x70   :  { %2088 = vmatprep.subr.bf16.mxu1 %v2292_v63  ;;  %1711 = vmatpush1.bf16.msra.mxu0 %v2314_v22 }
  0x71   :  { %1712 = vmatprep.subr.bf16.mxu0 %v2350_v1  ;;  %1938 = vmatprep.mubr.msk.bf16.mxu0 %vm1311_vm0, %v2345_v50 }
  0x73   :  { %2089 = vmatpush3.bf16.msra.mxu1 %v2293_v0 }
  0x74   :  { %2090 = vmatprep.subr.bf16.mxu1 %v2296_v4  ;;  %1713 = vmatpush1.bf16.msra.mxu0 %v2318_v27 }
  0x75   :  { %1714 = vmatprep.subr.bf16.mxu0 %v2350_v1 }
  0x77   :  { %2091 = vmatpush3.bf16.msra.mxu1 %v2297_v6 }
  0x78   :  { %2092 = vmatprep.subr.bf16.mxu1 %v2300_v9  ;;  %1715 = vmatpush1.bf16.msra.mxu0 %v2324_v34 }
  0x79   :  { %1716 = vmatprep.subr.bf16.mxu0 %v2350_v1 }
  0x7b   :  { %2093 = vmatpush3.bf16.msra.mxu1 %v2301_v11 }
  0x7c   :  { %2094 = vmatprep.subr.bf16.mxu1 %v2306_v15  ;;  %1717 = vmatpush1.bf16.msra.mxu0 %v2327_v38 }
  0x7d   :  { %1718 = vmatprep.subr.bf16.mxu0 %v2350_v1 }
  0x7f   :  { %2095 = vmatpush3.bf16.msra.mxu1 %v2307_v16 }
  0x80   :  { %2136 = vmatprep.subr.bf16.mxu1 %v2312_v20  ;;  %1719 = vmatpush1.bf16.msra.mxu0 %v2330_v41 }
  0x81   :  { %1720 = vmatprep.subr.bf16.mxu0 %v2350_v1 }
  0x82   :  { %1595 = vmatmul.mubr.bf16.vlgmr.msra.gmra.mrb[24].mxu1 %v2308_v17 }
  0x83   :  { %2137 = vmatpush3.bf16.msra.mxu1 %v2313_v21  ;;  %1602 = vmatprep.mubr.bf16.mxu1 %v1793_v26 }
  0x84   :  { %2138 = vmatprep.subr.bf16.mxu1 %v2315_v23  ;;  %1721 = vmatpush1.bf16.msra.mxu0 %v2333_v44 }
  0x85   :  { %1722 = vmatprep.subr.bf16.mxu0 %v2350_v1 }
  0x87   :  { %2139 = vmatpush3.bf16.msra.mxu1 %v2316_v24 }
  0x88   :  { %2140 = vmatprep.subr.bf16.mxu1 %v2320_v28  ;;  %1723 = vmatpush1.bf16.msra.mxu0 %v2336_v48 }
  0x89   :  { %1724 = vmatprep.subr.bf16.mxu0 %v2350_v1  ;;  %v1796_v1 = vcombine.low %v40_v53, %v40_v53 }
  0x8a   :  { %1603 = vmatmul.mubr.bf16.gmra.mrb[28].mxu1 %v1792_v30 }
  0x8b   :  { %2141 = vmatpush3.bf16.msra.mxu1 %v2322_v32  ;;  %1690 = vmatprep.mubr.bf16.mxu1 %v2341_v47 }
  0x8c   :  { %2142 = vmatprep.subr.bf16.mxu1 %v2325_v35  ;;  %1725 = vmatpush1.bf16.msra.mxu0 %v1320_v54 }
  0x8f   :  { %2143 = vmatpush3.bf16.msra.mxu1 %v2326_v37  ;;  %1739 = vmatmul.mubr.bf16.vlgmr.msra.gmra.mrb[24].mxu0 %v2343_v57 }
  0x90   :  { %2144 = vmatprep.subr.bf16.mxu1 %v2328_v39  ;;  %1939 = vmatprep.mubr.msk.bf16.mxu0 %vm1311_vm0, %v1799_v59 }
  0x93   :  { %2145 = vmatpush3.bf16.msra.mxu1 %v2329_v40 }
  0x94   :  { %2146 = vmatprep.subr.bf16.mxu1 %v2331_v42 }
  0x97   :  { %2147 = vmatpush3.bf16.msra.mxu1 %v2332_v43  ;;  %1747 = vmatmul.mubr.bf16.gmra.mrb[28].mxu0 %v1798_v60 }
  0x98   :  { %2148 = vmatprep.subr.bf16.mxu1 %v2334_v45 }
  0x9b   :  { %2149 = vmatpush3.bf16.msra.mxu1 %v2335_v46 }
  0x9c   :  { %2150 = vmatprep.subr.bf16.mxu1 %v2337_v49 }
  0x9f   :  { %2151 = vmatpush3.bf16.msra.mxu1 %v2338_v52 }
  0xa1   :  { %v323_v15 = vpop.permute.xlu0 %322 }
  0xa2   :  { %1691 = vmatmul.mubr.bf16.vlgmr.msra.gmra.mrb[32].mxu1 %v2339_v56 }
  0xa3   :  { %1698 = vmatprep.mubr.bf16.mxu1 %v1797_v58 }
  0xaa   :  { %1699 = vmatmul.mubr.bf16.gmra.mrb[36].mxu1 %v1796_v1 }
  0xc9   :  { %v328_v17 = vpop.permute.xlu0 %327 }
  0xcc   :  { %v333_v33 = vpop.permute.xlu1 %332 }
  0xf5   :  { %v1956_v61 = vpop.f32.mrb[0].mxu1 }
  0xf6   :  { %v1957_v62 = vpop.f32.mrb[1].mxu1 }
  0xf7   :  { %v1958_v63 = vadd.f32 %v1957_v62, %v1956_v61  ;;  %v1959_v0 = vpop.f32.mrb[2].mxu1 }
  0xf8   :  { %v1960_v2 = vpop.f32.mrb[3].mxu1 }
  0xf9   :  { %v1961_v3 = vadd.f32 %v1960_v2, %v1959_v0  ;;  %v1357_v19 = vadd.f32 %v1958_v63, %v323_v15 }
  0xfa   :  { %v2012_v9 = vpop.f32.mrb[0].mxu0 }
  0xfb   :  { %v2013_v10 = vpop.f32.mrb[1].mxu0  ;;  %v1360_v24 = vadd.f32 %v1961_v3, %v328_v17 }
  0xfc   :  { %v2014_v11 = vadd.f32 %v2013_v10, %v2012_v9  ;;  %v2015_v12 = vpop.f32.mrb[2].mxu0 }
  0xfd   :  { %v1962_v4 = vpop.f32.mrb[4].mxu1  ;;  %v2016_v13 = vpop.f32.mrb[3].mxu0 }
  0xfe   :  { %v1963_v5 = vpop.f32.mrb[5].mxu1  ;;  %v2017_v14 = vadd.f32 %v2016_v13, %v2015_v12 }
  0xff   :  { %v1964_v6 = vadd.f32 %v1963_v5, %v1962_v4  ;;  %v1965_v7 = vpop.f32.mrb[6].mxu1 }
 0x100   :  { %v1966_v8 = vpop.f32.mrb[7].mxu1 }
 0x101   :  { %v1365_v37 = vadd.f32 %v1964_v6, %v333_v33 }
 0x102   :  { %v2018_v23 = vpop.f32.mrb[4].mxu0 }
 0x103   :  { %v2019_v27 = vpop.f32.mrb[5].mxu0 }
 0x104   :  { %v2020_v28 = vadd.f32 %v2019_v27, %v2018_v23  ;;  %v2021_v29 = vpop.f32.mrb[6].mxu0 }
 0x105   :  { %v2022_v31 = vpop.f32.mrb[7].mxu0 }
 0x115   :  { %v1984_v16 = vpop.f32.mrb[8].mxu1 }
 0x116   :  { %v1985_v18 = vpop.f32.mrb[9].mxu1 }
 0x117   :  { %v1986_v20 = vadd.f32 %v1985_v18, %v1984_v16  ;;  %v1987_v21 = vpop.f32.mrb[10].mxu1 }
 0x118   :  { %v1988_v22 = vpop.f32.mrb[11].mxu1 }
 0x119   :  { %v1405_v25 = vadd.f32 %v1986_v20, %v1357_v19  ;;  %v1989_v26 = vadd.f32 %v1988_v22, %v1987_v21 }
 0x11a   :  { %v2068_v43 = vpop.f32.mrb[8].mxu0 }
 0x11b   :  { %v1408_v30 = vadd.f32 %v1989_v26, %v1360_v24  ;;  %v1453_v32 = vadd.f32 %v2014_v11, %v1405_v25  ;;  %v2069_v44 = vpop.f32.mrb[9].mxu0 }
 0x11c   :  { %v2070_v45 = vadd.f32 %v2069_v44, %v2068_v43  ;;  %v2071_v46 = vpop.f32.mrb[10].mxu0 }
 0x11d   :  { %v1990_v34 = vpop.f32.mrb[12].mxu1  ;;  %v1456_v35 = vadd.f32 %v2017_v14, %v1408_v30  ;;  %v2072_v47 = vpop.f32.mrb[11].mxu0 }
 0x11e   :  { %v1991_v36 = vpop.f32.mrb[13].mxu1  ;;  %v2073_v48 = vadd.f32 %v2072_v47, %v2071_v46 }
 0x11f   :  { %v1992_v38 = vadd.f32 %v1991_v36, %v1990_v34  ;;  %v1993_v39 = vpop.f32.mrb[14].mxu1 }
 0x120   :  { %v1994_v40 = vpop.f32.mrb[15].mxu1 }
 0x121   :  { %v1413_v41 = vadd.f32 %v1992_v38, %v1365_v37 }
 0x122   :  { %v2074_v58 = vpop.f32.mrb[12].mxu0 }
 0x123   :  { %v1461_v42 = vadd.f32 %v2020_v28, %v1413_v41  ;;  %v2075_v1 = vpop.f32.mrb[13].mxu0 }
 0x124   :  { %v2076_v62 = vadd.f32 %v2075_v1, %v2074_v58  ;;  %v2077_v63 = vpop.f32.mrb[14].mxu0 }
 0x125   :  { %v2078_v2 = vpop.f32.mrb[15].mxu0 }
 0x135   :  { %v2040_v49 = vpop.f32.mrb[16].mxu1 }
 0x136   :  { %v2041_v50 = vpop.f32.mrb[17].mxu1 }
 0x137   :  { %v2042_v51 = vadd.f32 %v2041_v50, %v2040_v49  ;;  %v2043_v52 = vpop.f32.mrb[18].mxu1 }
 0x138   :  { %v2044_v53 = vpop.f32.mrb[19].mxu1 }
 0x139   :  { %v1501_v54 = vadd.f32 %v2042_v51, %v1453_v32  ;;  %v2045_v55 = vadd.f32 %v2044_v53, %v2043_v52 }
 0x13a   :  { %v2124_v7 = vpop.f32.mrb[16].mxu0 }
 0x13b   :  { %v1504_v56 = vadd.f32 %v2045_v55, %v1456_v35  ;;  %v1549_v57 = vadd.f32 %v2070_v45, %v1501_v54  ;;  %v2125_v8 = vpop.f32.mrb[17].mxu0 }
 0x13c   :  { %v2126_v9 = vadd.f32 %v2125_v8, %v2124_v7  ;;  %v2127_v10 = vpop.f32.mrb[18].mxu0 }
 0x13d   :  { %v2046_v59 = vpop.f32.mrb[20].mxu1  ;;  %v1552_v60 = vadd.f32 %v2073_v48, %v1504_v56  ;;  %v2128_v11 = vpop.f32.mrb[19].mxu0 }
 0x13e   :  { %v2047_v61 = vpop.f32.mrb[21].mxu1  ;;  %v2129_v12 = vadd.f32 %v2128_v11, %v2127_v10 }
 0x13f   :  { %v2048_v0 = vadd.f32 %v2047_v61, %v2046_v59  ;;  %v2049_v3 = vpop.f32.mrb[22].mxu1 }
 0x140   :  { %v2050_v4 = vpop.f32.mrb[23].mxu1 }
 0x141   :  { %v1509_v5 = vadd.f32 %v2048_v0, %v1461_v42 }
 0x142   :  { %v2130_v23 = vpop.f32.mrb[20].mxu0 }
 0x143   :  { %v1557_v6 = vadd.f32 %v2076_v62, %v1509_v5  ;;  %v2131_v26 = vpop.f32.mrb[21].mxu0 }
 0x144   :  { %v2132_v28 = vadd.f32 %v2131_v26, %v2130_v23  ;;  %v2133_v30 = vpop.f32.mrb[22].mxu0 }
 0x145   :  { %v2134_v32 = vpop.f32.mrb[23].mxu0 }
 0x155   :  { %v2096_v13 = vpop.f32.mrb[24].mxu1 }
 0x156   :  { %v2097_v14 = vpop.f32.mrb[25].mxu1 }
 0x157   :  { %v2098_v15 = vadd.f32 %v2097_v14, %v2096_v13  ;;  %v2099_v16 = vpop.f32.mrb[26].mxu1 }
 0x158   :  { %v2100_v17 = vpop.f32.mrb[27].mxu1 }
 0x159   :  { %v1597_v18 = vadd.f32 %v2098_v15, %v1549_v57  ;;  %v2101_v19 = vadd.f32 %v2100_v17, %v2099_v16 }
 0x15b   :  { %v1600_v20 = vadd.f32 %v2101_v19, %v1552_v60  ;;  %v1645_v21 = vadd.f32 %v2126_v9, %v1597_v18 }
 0x15d   :  { %v2102_v22 = vpop.f32.mrb[28].mxu1  ;;  %v1648_v24 = vadd.f32 %v2129_v12, %v1600_v20 }
 0x15e   :  { %v2103_v25 = vpop.f32.mrb[29].mxu1 }
 0x15f   :  { %v2104_v27 = vadd.f32 %v2103_v25, %v2102_v22  ;;  %v2105_v29 = vpop.f32.mrb[30].mxu1 }
 0x160   :  { %v2106_v31 = vpop.f32.mrb[31].mxu1 }
 0x161   :  { %v1605_v33 = vadd.f32 %v2104_v27, %v1557_v6 }
 0x162   :  { %v1740_v37 = vpop.f32.mrb[24].mxu0 }
 0x163   :  { %v1653_v34 = vadd.f32 %v2132_v28, %v1605_v33  ;;  %v1742_v40 = vpop.f32.mrb[25].mxu0 }
 0x164   :  { %v1743_v42 = vpop.f32.mrb[26].mxu0 }
 0x165   :  { %v1745_v45 = vpop.f32.mrb[27].mxu0 }
 0x16a   :  { %v1748_v52 = vpop.f32.mrb[28].mxu0 }
 0x16b   :  { %v1750_v56 = vpop.f32.mrb[29].mxu0 }
 0x16c   :  { %v1751_v58 = vpop.f32.mrb[30].mxu0 }
 0x16d   :  { %v1752_v1 = vpop.f32.mrb[31].mxu0 }
 0x175   :  { %v2152_v35 = vpop.f32.mrb[32].mxu1 }
 0x176   :  { %v2153_v36 = vpop.f32.mrb[33].mxu1 }
 0x177   :  { %v2154_v38 = vadd.f32 %v2153_v36, %v2152_v35  ;;  %v2155_v39 = vpop.f32.mrb[34].mxu1 }
 0x178   :  { %v2156_v41 = vpop.f32.mrb[35].mxu1 }
 0x179   :  { %v1693_v43 = vadd.f32 %v2154_v38, %v1645_v21  ;;  %v2157_v44 = vadd.f32 %v2156_v41, %v2155_v39 }
 0x17b   :  { %v1741_v46 = vadd.f32 %v1740_v37, %v1693_v43  ;;  %v1696_v47 = vadd.f32 %v2157_v44, %v1648_v24 }
 0x17d   :  { %v1754_v48 = vmax.f32 %v1741_v46, 0.0  ;;  %v1744_v49 = vadd.f32 %v1743_v42, %v1696_v47  ;;  %v2158_v50 = vpop.f32.mrb[36].mxu1 }
 0x17e   :  { %v2159_v51 = vpop.f32.mrb[37].mxu1 }
 0x17f   :  { %1757 = vst [vmem:[%s2901_s3] sm:$0xff] %v1754_v48  ;;  %v1755_v53 = vmax.f32 %v1744_v49, 0.0  ;;  %v2160_v54 = vadd.f32 %v2159_v51, %v2158_v50  ;;  %v2161_v55 = vpop.f32.mrb[38].mxu1 }
 0x180   :  { %v2162_v57 = vpop.f32.mrb[39].mxu1 }
 0x181   :  { %1758 = vst [vmem:[%s2901_s3 + $0x8] sm:$0xff] %v1755_v53  ;;  %v1701_v59 = vadd.f32 %v2160_v54, %v1653_v34 }
 0x183   :  { %v1749_v60 = vadd.f32 %v1748_v52, %v1701_v59 }
 0x185   :  { %v1756_v61 = vmax.f32 %v1749_v60, 0.0 }
 0x187   :  { %1759 = vst [vmem:[%s2901_s3 + $0x10] sm:$0xf] %v1756_v61 }

// kernel: net_forward.25
= control target key start
LH: loop header
LB: loop body
LE: loop exit
PB: predicated region body
PF: predicated region fallthrough
CT: control target
= control target key end

     0   :  { %vm50_vm0 = vcmask 1043456   ;;  %v124_v0 = vmov 0.0   ;;  %vm125_vm1 = vmmov 0   ;;  %v126_v3 = vmov 0   ;;  %s168_s1 = inlined_call_operand.vmem [shape: bf16[24,32], index: 1, kind: input, shape index: {}]   ;;  %s169_s2 = inlined_call_operand.vmem [shape: f32[16,1], index: 2, kind: input, shape index: {}]   ;;  %s170_s0 = inlined_call_operand.vmem [shape: bf16[16,24], index: 0, kind: input, shape index: {}]   ;;  %s171_s3 = inlined_call_operand.vmem [shape: f32[16,32], index: 3, kind: output, shape index: {}]  }
   0x1   :  { %109 = vmatprep.subr.bf16.mxu0 %v124_v0  ;;  %v121_v1 = vld [vmem:[%s168_s1] sm:$0xff]   ;;  %113 = vmatprep.mubr.msk.bf16.mxu0 %vm125_vm1, %v124_v0  ;;  %v122_v2 = vld [vmem:[%s168_s1 + $0x8] ss:$0 sps:$4 sm:$0xff]   ;;  %vm46_vm2 = vcmask 195584   ;;  %vm95_vm3 = vcmask 261120  }
   0x2   :  { %120 = vset.pattern.permute.xlu0 %v126_v3  ;;  %110 = vmatpush3.bf16.msra.mxu0 %v121_v1  ;;  %v20_v4 = vld [vmem:[%s169_s2] sm:$0xff]  ;;  %v52_v5 = vsel %vm50_vm0, %v122_v2, 0  ;;  %v21_v6 = vld [vmem:[%s169_s2 + $0x8] sm:$0xff] }
   0x3   :  { %111 = vmatprep.subr.bf16.mxu0 %v124_v0  ;;  %24 = vperm.xlu0 %120, %v20_v4   ;;  %v123_v7 = vld [vmem:[%s170_s0] sm:$0xff]  }
   0x6   :  { %112 = vmatpush3.bf16.msra.mxu0 %v52_v5 }
   0x7   :  { %29 = vperm.xlu0 %120, %v21_v6  }
   0x9   :  { %114 = vmatmul.mubr.msk.bf16.vlgmr.msra.gmra.mrb[0].mxu0 %vm46_vm2, %v123_v7 }
  0x82   :  { %v25_v8 = vpop.permute.xlu0 %24 }
  0x86   :  { %v30_v12 = vpop.permute.xlu0 %29 }
  0xdc   :  { %v88_v9 = vpop.f32.mrb[0].mxu0 }
  0xdd   :  { %v89_v10 = vadd.f32 %v88_v9, %v25_v8  ;;  %v115_v11 = vpop.f32.mrb[1].mxu0 }
  0xde   :  { %v91_v13 = vpop.f32.mrb[2].mxu0 }
  0xdf   :  { %96 = vst.msk [vmem:[%s171_s3] sm:$0xff] %vm95_vm3, %v89_v10  ;;  %v92_v14 = vadd.f32 %v91_v13, %v30_v12  ;;  %v116_v15 = vpop.f32.mrb[3].mxu0 }
  0xe1   :  { %97 = vst.msk [vmem:[%s171_s3 + $0x8] sm:$0xff] %vm95_vm3, %v92_v14 }

// kernel: net_forward.26
= control target key start
LH: loop header
LB: loop body
LE: loop exit
PB: predicated region body
PF: predicated region fallthrough
CT: control target
= control target key end

     0   :  { %v483_v0 = vmov 0   ;;  %vm271_vm0 = vcmask 130048   ;;  %vm374_vm1 = vcmask 261120   ;;  %s631_s1 = inlined_call_operand.vmem [shape: bf16[400,32], index: 1, kind: input, shape index: {}]   ;;  %s632_s0 = inlined_call_operand.vmem [shape: bf16[24,400], index: 0, kind: input, shape index: {}]   ;;  %s633_s2 = inlined_call_operand.vmem [shape: f32[24,1], index: 2, kind: input, shape index: {}]   ;;  %s634_s3 = inlined_call_operand.vmem [shape: f32[24,32], index: 3, kind: output, shape index: {}]  }
   0x1   :  { %326 = vmatprep.subr.bf16.mxu1 %v483_v0  ;;  %v448_v1 = vld [vmem:[%s631_s1 + $0x40] sm:$0xff]   ;;  %446 = vset.pattern.permute.xlu0 %v483_v0  ;;  %v451_v4 = vld [vmem:[%s631_s1 + $0x48] sm:$0xff]   ;;  %v454_v7 = vld [vmem:[%s631_s1 + $0x50] sm:$0xff]  }
   0x2   :  { %v449_v2 = vld [vmem:[%s631_s1 + $0x80] sm:$0xff]   ;;  %447 = vset.pattern.permute.xlu1 %v483_v0  ;;  %417 = vmatprep.subr.bf16.mxu0 %v448_v1  ;;  %v452_v5 = vld [vmem:[%s631_s1 + $0x88] sm:$0xff]   ;;  %v455_v8 = vld [vmem:[%s631_s1 + $0x90] sm:$0xff]  }
   0x3   :  { %v450_v3 = vld [vmem:[%s631_s1] sm:$0xff]   ;;  %327 = vmatpush1.bf16.msra.mxu1 %v449_v2  ;;  %v453_v6 = vld [vmem:[%s631_s1 + $0x8] sm:$0xff]   ;;  %v456_v9 = vld [vmem:[%s631_s1 + $0x10] sm:$0xff]  }
   0x4   :  { %418 = vmatpush3.bf16.msra.mxu0 %v450_v3  ;;  %328 = vmatprep.subr.bf16.mxu1 %v483_v0  ;;  %v457_v10 = vld [vmem:[%s631_s1 + $0x58] sm:$0xff]   ;;  %v460_v13 = vld [vmem:[%s631_s1 + $0x60] sm:$0xff]   ;;  %v463_v16 = vld [vmem:[%s631_s1 + $0x68] sm:$0xff]  }
   0x5   :  { %419 = vmatprep.subr.bf16.mxu0 %v451_v4  ;;  %v458_v11 = vld [vmem:[%s631_s1 + $0x98] sm:$0xff]   ;;  %v461_v14 = vld [vmem:[%s631_s1 + $0xa0] sm:$0xff]   ;;  %v464_v17 = vld [vmem:[%s631_s1 + $0xa8] sm:$0xff]  }
   0x6   :  { %v459_v12 = vld [vmem:[%s631_s1 + $0x18] sm:$0xff]   ;;  %v462_v15 = vld [vmem:[%s631_s1 + $0x20] sm:$0xff]   ;;  %v465_v18 = vld [vmem:[%s631_s1 + $0x28] sm:$0xff]  }
   0x7   :  { %329 = vmatpush1.bf16.msra.mxu1 %v452_v5  ;;  %v466_v19 = vld [vmem:[%s631_s1 + $0x70] sm:$0xff]   ;;  %v469_v22 = vld [vmem:[%s631_s1 + $0x78] sm:$0xff]   ;;  %v71_v27 = vld [vmem:[%s633_s2] sm:$0xff] }
   0x8   :  { %420 = vmatpush3.bf16.msra.mxu0 %v453_v6  ;;  %330 = vmatprep.subr.bf16.mxu1 %v483_v0  ;;  %v467_v20 = vld [vmem:[%s631_s1 + $0xb0] sm:$0xff]   ;;  %v470_v24 = vld [vmem:[%s631_s1 + $0xb8] sm:$0xff]   ;;  %v19_v28 = vld [vmem:[%s632_s0 + $0x20] sm:$0xff] }
   0x9   :  { %421 = vmatprep.subr.bf16.mxu0 %v454_v7  ;;  %v468_v21 = vld [vmem:[%s631_s1 + $0x30] sm:$0xff]   ;;  %v478_v25 = vld [vmem:[%s632_s0 + $0xc] ss:$16 sps:$4 sm:$0xff]   ;;  %76 = vperm.xlu0 %446, %v71_v27   ;;  %v475_v31 = vld [vmem:[%s631_s1 + $0xc0] sm:$0xff]   ;;  %v387_v33 = vcombine.high %v19_v28, %v19_v28  ;;  %v386_v37 = vcombine.low %v19_v28, %v19_v28 }
   0xa   :  { %v474_v23 = vld [vmem:[%s632_s0 + $0x4] ss:$16 sps:$4 sm:$0xff]   ;;  %v471_v26 = vld [vmem:[%s631_s1 + $0x38] sm:$0xff]   ;;  %415 = vmatprep.mubr.msk.bf16.mxu1 %vm271_vm0, %v478_v25  ;;  %v472_v30 = vld [vmem:[%s632_s0] ss:$16 sps:$4 sm:$0xff]  }
   0xb   :  { %331 = vmatpush1.bf16.msra.mxu1 %v455_v8  ;;  %310 = vmatprep.mubr.bf16.mxu0 %v474_v23  ;;  %v73_v29 = vld [vmem:[%s633_s2 + $0x10] sm:$0xff]  ;;  %v72_v32 = vld [vmem:[%s633_s2 + $0x8] sm:$0xff] }
   0xc   :  { %422 = vmatpush3.bf16.msra.mxu0 %v456_v9  ;;  %332 = vmatprep.subr.bf16.mxu1 %v483_v0  ;;  %v20_v34 = vld [vmem:[%s632_s0 + $0x28] sm:$0xff] }
   0xd   :  { %423 = vmatprep.subr.bf16.mxu0 %v457_v10  ;;  %86 = vperm.xlu1 %447, %v73_v29   ;;  %v476_v35 = vld [vmem:[%s632_s0 + $0x8] ss:$16 sps:$4 sm:$0xff]   ;;  %v389_v36 = vcombine.high %v20_v34, %v20_v34  ;;  %v388_v38 = vcombine.low %v20_v34, %v20_v34 }
   0xe   :  { %81 = vperm.xlu0 %446, %v72_v32  }
   0xf   :  { %333 = vmatpush1.bf16.msra.mxu1 %v458_v11 }
  0x10   :  { %424 = vmatpush3.bf16.msra.mxu0 %v459_v12  ;;  %334 = vmatprep.subr.bf16.mxu1 %v483_v0 }
  0x11   :  { %425 = vmatprep.subr.bf16.mxu0 %v460_v13 }
  0x13   :  { %335 = vmatpush1.bf16.msra.mxu1 %v461_v14 }
  0x14   :  { %426 = vmatpush3.bf16.msra.mxu0 %v462_v15  ;;  %336 = vmatprep.subr.bf16.mxu1 %v483_v0 }
  0x15   :  { %427 = vmatprep.subr.bf16.mxu0 %v463_v16 }
  0x17   :  { %337 = vmatpush1.bf16.msra.mxu1 %v464_v17 }
  0x18   :  { %428 = vmatpush3.bf16.msra.mxu0 %v465_v18  ;;  %338 = vmatprep.subr.bf16.mxu1 %v483_v0 }
  0x19   :  { %429 = vmatprep.subr.bf16.mxu0 %v466_v19 }
  0x1b   :  { %339 = vmatpush1.bf16.msra.mxu1 %v467_v20 }
  0x1c   :  { %430 = vmatpush3.bf16.msra.mxu0 %v468_v21  ;;  %340 = vmatprep.subr.bf16.mxu1 %v483_v0 }
  0x1d   :  { %431 = vmatprep.subr.bf16.mxu0 %v469_v22 }
  0x1f   :  { %341 = vmatpush1.bf16.msra.mxu1 %v470_v24 }
  0x20   :  { %432 = vmatpush3.bf16.msra.mxu0 %v471_v26  ;;  %342 = vmatprep.subr.bf16.mxu1 %v483_v0 }
  0x23   :  { %311 = vmatmul.mubr.bf16.vlgmr.msra.gmra.mrb[0].mxu0 %v472_v30  ;;  %343 = vmatpush1.bf16.msra.mxu1 %v475_v31 }
  0x24   :  { %318 = vmatprep.mubr.bf16.mxu0 %v387_v33 }
  0x26   :  { %359 = vmatmul.mubr.bf16.vlgmr.msra.gmra.mrb[0].mxu1 %v476_v35 }
  0x27   :  { %416 = vmatprep.mubr.msk.bf16.mxu1 %vm271_vm0, %v389_v36 }
  0x2b   :  { %319 = vmatmul.mubr.bf16.gmra.mrb[4].mxu0 %v386_v37 }
  0x2e   :  { %367 = vmatmul.mubr.bf16.gmra.mrb[4].mxu1 %v388_v38 }
  0x88   :  { %v77_v39 = vpop.permute.xlu0 %76 }
  0x8c   :  { %v87_v57 = vpop.permute.xlu1 %86 }
  0x8d   :  { %v82_v44 = vpop.permute.xlu0 %81 }
  0xf6   :  { %v433_v40 = vpop.f32.mrb[0].mxu0 }
  0xf7   :  { %v434_v41 = vpop.f32.mrb[1].mxu0 }
  0xf8   :  { %v435_v42 = vadd.f32 %v434_v41, %v433_v40  ;;  %v436_v43 = vpop.f32.mrb[2].mxu0 }
  0xf9   :  { %v437_v45 = vpop.f32.mrb[3].mxu0  ;;  %v360_v46 = vpop.f32.mrb[0].mxu1 }
  0xfa   :  { %v438_v47 = vadd.f32 %v437_v45, %v436_v43  ;;  %v313_v48 = vadd.f32 %v435_v42, %v77_v39  ;;  %v362_v49 = vpop.f32.mrb[1].mxu1 }
  0xfb   :  { %v363_v50 = vpop.f32.mrb[2].mxu1 }
  0xfc   :  { %v361_v51 = vadd.f32 %v360_v46, %v313_v48  ;;  %v316_v52 = vadd.f32 %v438_v47, %v82_v44  ;;  %v365_v53 = vpop.f32.mrb[3].mxu1 }
  0xfe   :  { %375 = vst.msk [vmem:[%s634_s3] sm:$0xff] %vm374_vm1, %v361_v51  ;;  %v364_v54 = vadd.f32 %v363_v50, %v316_v52  ;;  %v439_v55 = vpop.f32.mrb[4].mxu0 }
  0xff   :  { %v440_v56 = vpop.f32.mrb[5].mxu0 }
 0x100   :  { %376 = vst.msk [vmem:[%s634_s3 + $0x8] sm:$0xff] %vm374_vm1, %v364_v54  ;;  %v441_v58 = vadd.f32 %v440_v56, %v439_v55  ;;  %v442_v59 = vpop.f32.mrb[6].mxu0 }
 0x101   :  { %v443_v60 = vpop.f32.mrb[7].mxu0  ;;  %v368_v61 = vpop.f32.mrb[4].mxu1 }
 0x102   :  { %v321_v62 = vadd.f32 %v441_v58, %v87_v57  ;;  %v370_v63 = vpop.f32.mrb[5].mxu1 }
 0x103   :  { %v371_v0 = vpop.f32.mrb[6].mxu1 }
 0x104   :  { %v369_v1 = vadd.f32 %v368_v61, %v321_v62  ;;  %v372_v2 = vpop.f32.mrb[7].mxu1 }
 0x106   :  { %377 = vst.msk [vmem:[%s634_s3 + $0x10] sm:$0xff] %vm374_vm1, %v369_v1 }

// kernel: net_forward.27
= control target key start
LH: loop header
LB: loop body
LE: loop exit
PB: predicated region body
PF: predicated region fallthrough
CT: control target
= control target key end

     0   :  { %v236_v0 = vmov 0   ;;  %vm123_vm0 = vcmask 130048   ;;  %vm178_vm1 = vcmask 261120   ;;  %s311_s1 = inlined_call_operand.vmem [shape: bf16[144,32], index: 1, kind: input, shape index: {}]   ;;  %s312_s0 = inlined_call_operand.vmem [shape: bf16[24,144], index: 0, kind: input, shape index: {}]   ;;  %s313_s2 = inlined_call_operand.vmem [shape: f32[24,1], index: 2, kind: input, shape index: {}]   ;;  %s314_s3 = inlined_call_operand.vmem [shape: f32[24,32], index: 3, kind: output, shape index: {}]  }
   0x1   :  { %130 = vmatprep.subr.bf16.mxu0 %v236_v0  ;;  %201 = vmatprep.subr.bf16.mxu1 %v236_v0  ;;  %v222_v1 = vld [vmem:[%s311_s1] sm:$0xff]   ;;  %v223_v2 = vld [vmem:[%s311_s1 + $0x8] sm:$0xff]   ;;  %v224_v3 = vld [vmem:[%s311_s1 + $0x10] sm:$0xff]  }
   0x2   :  { %220 = vset.pattern.permute.xlu0 %v236_v0  ;;  %221 = vset.pattern.permute.xlu1 %v236_v0  ;;  %v225_v4 = vld [vmem:[%s311_s1 + $0x18] sm:$0xff]   ;;  %v233_v5 = vld [vmem:[%s312_s0 + $0x4] ss:$8 sps:$4 sm:$0xff]   ;;  %v17_v6 = vld [vmem:[%s312_s0 + $0x10] sm:$0xff] }
   0x3   :  { %131 = vmatpush1.bf16.msra.mxu0 %v222_v1  ;;  %210 = vmatpush1.bf16.msra.mxu1 %v222_v1  ;;  %v36_v7 = vld [vmem:[%s313_s2] sm:$0xff]  ;;  %v189_v8 = vcombine.high %v17_v6, %v17_v6  ;;  %v38_v9 = vld [vmem:[%s313_s2 + $0x10] sm:$0xff]  ;;  %v37_v10 = vld [vmem:[%s313_s2 + $0x8] sm:$0xff]  ;;  %v188_v17 = vcombine.low %v17_v6, %v17_v6 }
   0x4   :  { %132 = vmatprep.subr.bf16.mxu0 %v236_v0  ;;  %202 = vmatprep.subr.bf16.mxu1 %v236_v0  ;;  %v226_v11 = vld [vmem:[%s311_s1 + $0x20] sm:$0xff]   ;;  %v227_v12 = vld [vmem:[%s311_s1 + $0x28] sm:$0xff]   ;;  %v228_v13 = vld [vmem:[%s311_s1 + $0x30] sm:$0xff]  }
   0x5   :  { %199 = vmatprep.mubr.msk.bf16.mxu0 %vm123_vm0, %v233_v5  ;;  %41 = vperm.xlu0 %220, %v36_v7   ;;  %v229_v14 = vld [vmem:[%s311_s1 + $0x38] sm:$0xff]   ;;  %v230_v15 = vld [vmem:[%s311_s1 + $0x40] sm:$0xff]  }
   0x6   :  { %200 = vmatprep.mubr.msk.bf16.mxu1 %vm123_vm0, %v189_v8  ;;  %51 = vperm.xlu1 %221, %v38_v9   ;;  %v231_v16 = vld [vmem:[%s312_s0] ss:$8 sps:$4 sm:$0xff]  }
   0x7   :  { %133 = vmatpush1.bf16.msra.mxu0 %v223_v2  ;;  %211 = vmatpush1.bf16.msra.mxu1 %v223_v2 }
   0x8   :  { %134 = vmatprep.subr.bf16.mxu0 %v236_v0  ;;  %203 = vmatprep.subr.bf16.mxu1 %v236_v0 }
   0x9   :  { %46 = vperm.xlu0 %220, %v37_v10  }
   0xb   :  { %135 = vmatpush1.bf16.msra.mxu0 %v224_v3  ;;  %212 = vmatpush1.bf16.msra.mxu1 %v224_v3 }
   0xc   :  { %136 = vmatprep.subr.bf16.mxu0 %v236_v0  ;;  %204 = vmatprep.subr.bf16.mxu1 %v236_v0 }
   0xf   :  { %137 = vmatpush1.bf16.msra.mxu0 %v225_v4  ;;  %213 = vmatpush1.bf16.msra.mxu1 %v225_v4 }
  0x10   :  { %138 = vmatprep.subr.bf16.mxu0 %v236_v0  ;;  %205 = vmatprep.subr.bf16.mxu1 %v236_v0 }
  0x13   :  { %139 = vmatpush1.bf16.msra.mxu0 %v226_v11  ;;  %214 = vmatpush1.bf16.msra.mxu1 %v226_v11 }
  0x14   :  { %140 = vmatprep.subr.bf16.mxu0 %v236_v0  ;;  %206 = vmatprep.subr.bf16.mxu1 %v236_v0 }
  0x17   :  { %141 = vmatpush1.bf16.msra.mxu0 %v227_v12  ;;  %215 = vmatpush1.bf16.msra.mxu1 %v227_v12 }
  0x18   :  { %142 = vmatprep.subr.bf16.mxu0 %v236_v0  ;;  %207 = vmatprep.subr.bf16.mxu1 %v236_v0 }
  0x1b   :  { %143 = vmatpush1.bf16.msra.mxu0 %v228_v13  ;;  %216 = vmatpush1.bf16.msra.mxu1 %v228_v13 }
  0x1c   :  { %144 = vmatprep.subr.bf16.mxu0 %v236_v0  ;;  %208 = vmatprep.subr.bf16.mxu1 %v236_v0 }
  0x1f   :  { %145 = vmatpush1.bf16.msra.mxu0 %v229_v14  ;;  %217 = vmatpush1.bf16.msra.mxu1 %v229_v14 }
  0x20   :  { %146 = vmatprep.subr.bf16.mxu0 %v236_v0  ;;  %209 = vmatprep.subr.bf16.mxu1 %v236_v0 }
  0x23   :  { %147 = vmatpush1.bf16.msra.mxu0 %v230_v15  ;;  %218 = vmatpush1.bf16.msra.mxu1 %v230_v15 }
  0x26   :  { %163 = vmatmul.mubr.bf16.vlgmr.msra.gmra.mrb[0].mxu0 %v231_v16  ;;  %171 = vmatmul.mubr.bf16.vlgmr.msra.gmra.mrb[0].mxu1 %v188_v17 }
  0x84   :  { %v42_v18 = vpop.permute.xlu0 %41 }
  0x85   :  { %v52_v19 = vpop.permute.xlu1 %51 }
  0x88   :  { %v47_v20 = vpop.permute.xlu0 %46 }
  0xf9   :  { %v164_v21 = vpop.f32.mrb[0].mxu0  ;;  %v172_v22 = vpop.f32.mrb[0].mxu1 }
  0xfa   :  { %v165_v23 = vadd.f32 %v164_v21, %v42_v18  ;;  %v166_v24 = vpop.f32.mrb[1].mxu0  ;;  %v174_v25 = vpop.f32.mrb[1].mxu1  ;;  %v173_v26 = vadd.f32 %v172_v22, %v52_v19 }
  0xfb   :  { %v167_v27 = vpop.f32.mrb[2].mxu0  ;;  %v175_v28 = vpop.f32.mrb[2].mxu1 }
  0xfc   :  { %179 = vst.msk [vmem:[%s314_s3] sm:$0xff] %vm178_vm1, %v165_v23  ;;  %181 = vst.msk [vmem:[%s314_s3 + $0x10] sm:$0xff] %vm178_vm1, %v173_v26  ;;  %v168_v29 = vadd.f32 %v167_v27, %v47_v20  ;;  %v169_v30 = vpop.f32.mrb[3].mxu0  ;;  %v176_v31 = vpop.f32.mrb[3].mxu1 }
  0xfe   :  { %180 = vst.msk [vmem:[%s314_s3 + $0x8] sm:$0xff] %vm178_vm1, %v168_v29 }

// kernel: net_forward.28
= control target key start
LH: loop header
LB: loop body
LE: loop exit
PB: predicated region body
PF: predicated region fallthrough
CT: control target
= control target key end

     0   :  { %v296_v0 = vmov 0   ;;  %vm159_vm0 = vcmask 719872   ;;  %vm166_vm1 = vcmask 1043456   ;;  %vm218_vm2 = vcmask 261120   ;;  %s418_s1 = inlined_call_operand.vmem [shape: bf16[216,32], index: 1, kind: input, shape index: {}]   ;;  %s419_s0 = inlined_call_operand.vmem [shape: bf16[24,216], index: 0, kind: input, shape index: {}]   ;;  %s420_s2 = inlined_call_operand.vmem [shape: f32[24,1], index: 2, kind: input, shape index: {}]   ;;  %s421_s3 = inlined_call_operand.vmem [shape: f32[24,32], index: 3, kind: output, shape index: {}]  }
   0x1   :  { %170 = vmatprep.subr.bf16.mxu0 %v296_v0  ;;  %246 = vmatprep.subr.bf16.mxu1 %v296_v0  ;;  %v277_v1 = vld [vmem:[%s418_s1] sm:$0xff]   ;;  %v278_v2 = vld [vmem:[%s418_s1 + $0x8] sm:$0xff]   ;;  %v279_v3 = vld [vmem:[%s418_s1 + $0x10] sm:$0xff]  }
   0x2   :  { %275 = vset.pattern.permute.xlu0 %v296_v0  ;;  %276 = vset.pattern.permute.xlu1 %v296_v0  ;;  %v280_v4 = vld [vmem:[%s418_s1 + $0x18] sm:$0xff]   ;;  %v281_v5 = vld [vmem:[%s418_s1 + $0x20] sm:$0xff]   ;;  %v17_v7 = vld [vmem:[%s419_s0 + $0x10] sm:$0xff] }
   0x3   :  { %171 = vmatpush1.bf16.msra.mxu0 %v277_v1  ;;  %260 = vmatpush1.bf16.msra.mxu1 %v277_v1  ;;  %v293_v6 = vld [vmem:[%s419_s0 + $0x4] ss:$8 sps:$4 sm:$0xff]   ;;  %v229_v9 = vcombine.high %v17_v7, %v17_v7  ;;  %v47_v10 = vld [vmem:[%s420_s2 + $0x10] sm:$0xff]  ;;  %v284_v14 = vld [vmem:[%s418_s1 + $0x38] sm:$0xff]   ;;  %v228_v23 = vcombine.low %v17_v7, %v17_v7 }
   0x4   :  { %172 = vmatprep.subr.bf16.mxu0 %v296_v0  ;;  %247 = vmatprep.subr.bf16.mxu1 %v296_v0  ;;  %v45_v8 = vld [vmem:[%s420_s2] sm:$0xff]  ;;  %v46_v11 = vld [vmem:[%s420_s2 + $0x8] sm:$0xff]  ;;  %v283_v13 = vld [vmem:[%s418_s1 + $0x30] sm:$0xff]  }
   0x5   :  { %244 = vmatprep.mubr.msk.bf16.mxu0 %vm159_vm0, %v293_v6  ;;  %50 = vperm.xlu0 %275, %v45_v8   ;;  %v282_v12 = vld [vmem:[%s418_s1 + $0x28] sm:$0xff]   ;;  %v285_v15 = vld [vmem:[%s418_s1 + $0x40] sm:$0xff]   ;;  %v287_v17 = vld [vmem:[%s418_s1 + $0x50] sm:$0xff]  }
   0x6   :  { %60 = vperm.xlu1 %276, %v47_v10   ;;  %245 = vmatprep.mubr.msk.bf16.mxu1 %vm159_vm0, %v229_v9  ;;  %v286_v16 = vld [vmem:[%s418_s1 + $0x48] sm:$0xff]   ;;  %v288_v18 = vld [vmem:[%s418_s1 + $0x58] sm:$0xff]   ;;  %v289_v19 = vld [vmem:[%s418_s1 + $0x60] sm:$0xff]  }
   0x7   :  { %173 = vmatpush1.bf16.msra.mxu0 %v278_v2  ;;  %261 = vmatpush1.bf16.msra.mxu1 %v278_v2  ;;  %v290_v20 = vld [vmem:[%s418_s1 + $0x68] ss:$0 sps:$4 sm:$0xff]  }
   0x8   :  { %174 = vmatprep.subr.bf16.mxu0 %v296_v0  ;;  %248 = vmatprep.subr.bf16.mxu1 %v296_v0  ;;  %v168_v21 = vsel %vm166_vm1, %v290_v20, 0  ;;  %v291_v22 = vld [vmem:[%s419_s0] ss:$8 sps:$4 sm:$0xff]  }
   0x9   :  { %55 = vperm.xlu0 %275, %v46_v11  }
   0xb   :  { %175 = vmatpush1.bf16.msra.mxu0 %v279_v3  ;;  %262 = vmatpush1.bf16.msra.mxu1 %v279_v3 }
   0xc   :  { %176 = vmatprep.subr.bf16.mxu0 %v296_v0  ;;  %249 = vmatprep.subr.bf16.mxu1 %v296_v0 }
   0xf   :  { %177 = vmatpush1.bf16.msra.mxu0 %v280_v4  ;;  %263 = vmatpush1.bf16.msra.mxu1 %v280_v4 }
  0x10   :  { %178 = vmatprep.subr.bf16.mxu0 %v296_v0  ;;  %250 = vmatprep.subr.bf16.mxu1 %v296_v0 }
  0x13   :  { %179 = vmatpush1.bf16.msra.mxu0 %v281_v5  ;;  %264 = vmatpush1.bf16.msra.mxu1 %v281_v5 }
  0x14   :  { %180 = vmatprep.subr.bf16.mxu0 %v296_v0  ;;  %251 = vmatprep.subr.bf16.mxu1 %v296_v0 }
  0x17   :  { %181 = vmatpush1.bf16.msra.mxu0 %v282_v12  ;;  %265 = vmatpush1.bf16.msra.mxu1 %v282_v12 }
  0x18   :  { %182 = vmatprep.subr.bf16.mxu0 %v296_v0  ;;  %252 = vmatprep.subr.bf16.mxu1 %v296_v0 }
  0x1b   :  { %183 = vmatpush1.bf16.msra.mxu0 %v283_v13  ;;  %266 = vmatpush1.bf16.msra.mxu1 %v283_v13 }
  0x1c   :  { %184 = vmatprep.subr.bf16.mxu0 %v296_v0  ;;  %253 = vmatprep.subr.bf16.mxu1 %v296_v0 }
  0x1f   :  { %185 = vmatpush1.bf16.msra.mxu0 %v284_v14  ;;  %267 = vmatpush1.bf16.msra.mxu1 %v284_v14 }
  0x20   :  { %186 = vmatprep.subr.bf16.mxu0 %v296_v0  ;;  %254 = vmatprep.subr.bf16.mxu1 %v296_v0 }
  0x23   :  { %187 = vmatpush1.bf16.msra.mxu0 %v285_v15  ;;  %268 = vmatpush1.bf16.msra.mxu1 %v285_v15 }
  0x24   :  { %188 = vmatprep.subr.bf16.mxu0 %v296_v0  ;;  %255 = vmatprep.subr.bf16.mxu1 %v296_v0 }
  0x27   :  { %189 = vmatpush1.bf16.msra.mxu0 %v286_v16  ;;  %269 = vmatpush1.bf16.msra.mxu1 %v286_v16 }
  0x28   :  { %190 = vmatprep.subr.bf16.mxu0 %v296_v0  ;;  %256 = vmatprep.subr.bf16.mxu1 %v296_v0 }
  0x2b   :  { %191 = vmatpush1.bf16.msra.mxu0 %v287_v17  ;;  %270 = vmatpush1.bf16.msra.mxu1 %v287_v17 }
  0x2c   :  { %192 = vmatprep.subr.bf16.mxu0 %v296_v0  ;;  %257 = vmatprep.subr.bf16.mxu1 %v296_v0 }
  0x2f   :  { %193 = vmatpush1.bf16.msra.mxu0 %v288_v18  ;;  %271 = vmatpush1.bf16.msra.mxu1 %v288_v18 }
  0x30   :  { %194 = vmatprep.subr.bf16.mxu0 %v296_v0  ;;  %258 = vmatprep.subr.bf16.mxu1 %v296_v0 }
  0x33   :  { %195 = vmatpush1.bf16.msra.mxu0 %v289_v19  ;;  %272 = vmatpush1.bf16.msra.mxu1 %v289_v19 }
  0x34   :  { %196 = vmatprep.subr.bf16.mxu0 %v296_v0  ;;  %259 = vmatprep.subr.bf16.mxu1 %v296_v0 }
  0x37   :  { %197 = vmatpush1.bf16.msra.mxu0 %v168_v21  ;;  %273 = vmatpush1.bf16.msra.mxu1 %v168_v21 }
  0x3a   :  { %203 = vmatmul.mubr.bf16.vlgmr.msra.gmra.mrb[0].mxu0 %v291_v22  ;;  %211 = vmatmul.mubr.bf16.vlgmr.msra.gmra.mrb[0].mxu1 %v228_v23 }
  0x84   :  { %v51_v24 = vpop.permute.xlu0 %50 }
  0x85   :  { %v61_v25 = vpop.permute.xlu1 %60 }
  0x88   :  { %v56_v26 = vpop.permute.xlu0 %55 }
 0x10d   :  { %v204_v27 = vpop.f32.mrb[0].mxu0  ;;  %v212_v28 = vpop.f32.mrb[0].mxu1 }
 0x10e   :  { %v205_v29 = vadd.f32 %v204_v27, %v51_v24  ;;  %v206_v30 = vpop.f32.mrb[1].mxu0  ;;  %v214_v31 = vpop.f32.mrb[1].mxu1  ;;  %v213_v32 = vadd.f32 %v212_v28, %v61_v25 }
 0x10f   :  { %v207_v33 = vpop.f32.mrb[2].mxu0  ;;  %v215_v34 = vpop.f32.mrb[2].mxu1 }
 0x110   :  { %219 = vst.msk [vmem:[%s421_s3] sm:$0xff] %vm218_vm2, %v205_v29  ;;  %221 = vst.msk [vmem:[%s421_s3 + $0x10] sm:$0xff] %vm218_vm2, %v213_v32  ;;  %v208_v35 = vadd.f32 %v207_v33, %v56_v26  ;;  %v209_v36 = vpop.f32.mrb[3].mxu0  ;;  %v216_v37 = vpop.f32.mrb[3].mxu1 }
 0x112   :  { %220 = vst.msk [vmem:[%s421_s3 + $0x8] sm:$0xff] %vm218_vm2, %v208_v35 }

// kernel: net_forward.24
= control target key start
LH: loop header
LB: loop body
LE: loop exit
PB: predicated region body
PF: predicated region fallthrough
CT: control target
= control target key end

     0   :  { %v149_v0 = vmov 0   ;;  %vm56_vm0 = vcmask 195584   ;;  %vm63_vm1 = vcmask 1043456   ;;  %vm115_vm2 = vcmask 261120   ;;  %s202_s1 = inlined_call_operand.vmem [shape: bf16[24,32], index: 1, kind: input, shape index: {}]   ;;  %s203_s0 = inlined_call_operand.vmem [shape: bf16[24,24], index: 0, kind: input, shape index: {}]   ;;  %s204_s2 = inlined_call_operand.vmem [shape: f32[24,1], index: 2, kind: input, shape index: {}]   ;;  %s205_s3 = inlined_call_operand.vmem [shape: f32[24,32], index: 3, kind: output, shape index: {}]  }
   0x1   :  { %143 = vset.pattern.permute.xlu0 %v149_v0  ;;  %144 = vset.pattern.permute.xlu1 %v149_v0  ;;  %v145_v1 = vld [vmem:[%s202_s1] sm:$0xff]   ;;  %v146_v2 = vld [vmem:[%s202_s1 + $0x8] ss:$0 sps:$4 sm:$0xff]   ;;  %v23_v5 = vld [vmem:[%s204_s2 + $0x10] sm:$0xff] }
   0x2   :  { %v147_v3 = vld [vmem:[%s203_s0] sm:$0xff]   ;;  %133 = vmatprep.subr.bf16.mxu0 %v145_v1  ;;  %v65_v6 = vsel %vm63_vm1, %v146_v2, 0  ;;  %v22_v7 = vld [vmem:[%s204_s2 + $0x8] sm:$0xff]  ;;  %36 = vperm.xlu1 %144, %v23_v5  }
   0x3   :  { %v21_v4 = vld [vmem:[%s204_s2] sm:$0xff]  ;;  %134 = vmatpush3.bf16.msra.mxu0 %v145_v1  ;;  %137 = vmatprep.mubr.msk.bf16.mxu0 %vm56_vm0, %v147_v3  ;;  %v148_v8 = vld [vmem:[%s203_s0 + $0x8] ss:$0 sps:$4 sm:$0xff]  }
   0x4   :  { %141 = vmatprep.subr.msk.bf16.mxu0 %vm63_vm1, %v146_v2  ;;  %26 = vperm.xlu0 %143, %v21_v4  }
   0x7   :  { %136 = vmatpush3.bf16.msra.mxu0 %v65_v6 }
   0x8   :  { %31 = vperm.xlu0 %143, %v22_v7  }
   0xa   :  { %138 = vmatmul.mubr.msk.bf16.vlgmr.msra.gmra.mrb[0].mxu0 %vm56_vm0, %v148_v8 }
  0x81   :  { %v37_v10 = vpop.permute.xlu1 %36 }
  0x83   :  { %v27_v9 = vpop.permute.xlu0 %26 }
  0x87   :  { %v32_v16 = vpop.permute.xlu0 %31 }
  0xdd   :  { %v139_v11 = vpop.f32.mrb[0].mxu0 }
  0xde   :  { %v110_v12 = vadd.f32 %v139_v11, %v37_v10  ;;  %v101_v13 = vpop.f32.mrb[1].mxu0 }
  0xdf   :  { %v102_v14 = vadd.f32 %v101_v13, %v27_v9  ;;  %v140_v15 = vpop.f32.mrb[2].mxu0 }
  0xe0   :  { %118 = vst.msk [vmem:[%s205_s3 + $0x10] sm:$0xff] %vm115_vm2, %v110_v12  ;;  %v104_v17 = vpop.f32.mrb[3].mxu0 }
  0xe1   :  { %116 = vst.msk [vmem:[%s205_s3] sm:$0xff] %vm115_vm2, %v102_v14  ;;  %v105_v18 = vadd.f32 %v104_v17, %v32_v16 }
  0xe3   :  { %117 = vst.msk [vmem:[%s205_s3 + $0x8] sm:$0xff] %vm115_vm2, %v105_v18 }

// kernel: net_forward.23
= control target key start
LH: loop header
LB: loop body
LE: loop exit
PB: predicated region body
PF: predicated region fallthrough
CT: control target
= control target key end

     0   :  { %s1469_s10 = smov 127   ;;  %s1470_s2 = smov 126   ;;  %vm1368_vm0 = vcmask 27648   ;;  %s3615_s0 = inlined_call_operand.vmem [shape: f32[40,6,6], index: 0, kind: input, shape index: {}]   ;;  %s3616_s1 = inlined_call_operand.vmem [shape: f32[40,4,4], index: 1, kind: output, shape index: {}]  }
   0x1   :  { %v1484_v0 = vld [vmem:[%s3615_s0 + $0x10] sm:$0xf]  ;;  %v1489_v1 = vld [vmem:[%s3615_s0] sm:$0xf]  ;;  %v1498_v2 = vld [vmem:[%s3615_s0 + $0x18] sm:$0xf] }
   0x2   :  { %132 = vrot.lane.b32.xlu1 %v1484_v0, %s1469_s10  ;;  %128 = vrot.lane.b32.xlu0 %v1489_v1, %s1469_s10  ;;  %v1503_v3 = vld [vmem:[%s3615_s0 + $0x8] sm:$0xf]  ;;  %v1517_v5 = vld [vmem:[%s3615_s0 + $0x20] sm:$0xf] }
   0x3   :  { %v1512_v4 = vld [vmem:[%s3615_s0 + $0x28] sm:$0xf]  ;;  %v1526_v6 = vld [vmem:[%s3615_s0 + $0x38] sm:$0xf]  ;;  %v1531_v7 = vld [vmem:[%s3615_s0 + $0x30] sm:$0xf] }
   0x4   :  { %v1540_v8 = vld [vmem:[%s3615_s0 + $0x48] sm:$0xf]  ;;  %v1545_v9 = vld [vmem:[%s3615_s0 + $0x40] sm:$0xf]  ;;  %v1554_v10 = vld [vmem:[%s3615_s0 + $0x58] sm:$0xf] }
   0x5   :  { %v1559_v11 = vld [vmem:[%s3615_s0 + $0x50] sm:$0xf]  ;;  %v1568_v12 = vld [vmem:[%s3615_s0 + $0x68] sm:$0xf]  ;;  %v1573_v13 = vld [vmem:[%s3615_s0 + $0x60] sm:$0xf] }
   0x6   :  { %134 = vrot.lane.b32.xlu1 %v1498_v2, %s1469_s10  ;;  %130 = vrot.lane.b32.xlu0 %v1503_v3, %s1469_s10  ;;  %v1582_v14 = vld [vmem:[%s3615_s0 + $0x78] sm:$0xf]  ;;  %v1587_v15 = vld [vmem:[%s3615_s0 + $0x70] sm:$0xf] }
   0x7   :  { %v1596_v16 = vld [vmem:[%s3615_s0 + $0x88] sm:$0xf]  ;;  %v1601_v17 = vld [vmem:[%s3615_s0 + $0x80] sm:$0xf]  ;;  %v1610_v18 = vld [vmem:[%s3615_s0 + $0x98] sm:$0xf] }
   0x8   :  { %v1615_v19 = vld [vmem:[%s3615_s0 + $0x90] sm:$0xf]  ;;  %v1624_v20 = vld [vmem:[%s3615_s0 + $0xa8] sm:$0xf]  ;;  %v1629_v21 = vld [vmem:[%s3615_s0 + $0xa0] sm:$0xf] }
   0x9   :  { %v1638_v22 = vld [vmem:[%s3615_s0 + $0xb8] sm:$0xf]  ;;  %v1643_v23 = vld [vmem:[%s3615_s0 + $0xb0] sm:$0xf]  ;;  %v1652_v24 = vld [vmem:[%s3615_s0 + $0xc8] sm:$0xf] }
   0xa   :  { %138 = vrot.lane.b32.xlu1 %v1512_v4, %s1469_s10  ;;  %136 = vrot.lane.b32.xlu0 %v1517_v5, %s1469_s10  ;;  %v1657_v25 = vld [vmem:[%s3615_s0 + $0xc0] sm:$0xf]  ;;  %v1666_v26 = vld [vmem:[%s3615_s0 + $0xd8] sm:$0xf] }
   0xb   :  { %v1671_v27 = vld [vmem:[%s3615_s0 + $0xd0] sm:$0xf]  ;;  %v1680_v28 = vld [vmem:[%s3615_s0 + $0xe8] sm:$0xf]  ;;  %v1685_v29 = vld [vmem:[%s3615_s0 + $0xe0] sm:$0xf] }
   0xc   :  { %3663 = vst [vmem:[#allocation2_spill] sm:$0xff] %v1680_v28  ;;  %3664 = vst [vmem:[#allocation3_spill] sm:$0xff] %v1685_v29  ;;  %v1694_v30 = vld [vmem:[%s3615_s0 + $0xf8] sm:$0xf]  ;;  %v1699_v31 = vld [vmem:[%s3615_s0 + $0xf0] sm:$0xf] }
   0xd   :  { %v1708_v32 = vld [vmem:[%s3615_s0 + $0x108] sm:$0xf]  ;;  %v1713_v33 = vld [vmem:[%s3615_s0 + $0x100] sm:$0xf]  ;;  %v1722_v34 = vld [vmem:[%s3615_s0 + $0x118] sm:$0xf] }
   0xe   :  { %142 = vrot.lane.b32.xlu1 %v1526_v6, %s1469_s10  ;;  %140 = vrot.lane.b32.xlu0 %v1531_v7, %s1469_s10  ;;  %v1727_v35 = vld [vmem:[%s3615_s0 + $0x110] sm:$0xf]  ;;  %v1736_v36 = vld [vmem:[%s3615_s0 + $0x128] sm:$0xf] }
   0xf   :  { %v1741_v37 = vld [vmem:[%s3615_s0 + $0x120] sm:$0xf]  ;;  %v1750_v38 = vld [vmem:[%s3615_s0 + $0x138] sm:$0xf]  ;;  %v1755_v39 = vld [vmem:[%s3615_s0 + $0x130] sm:$0xf] }
  0x10   :  { %v1888_v62 = vld [vmem:[%s3615_s0 + $0x9] sm:$0xf]  ;;  %v1893_v63 = vld [vmem:[%s3615_s0 + $0x1] sm:$0xf] }
  0x12   :  { %146 = vrot.lane.b32.xlu1 %v1540_v8, %s1469_s10  ;;  %144 = vrot.lane.b32.xlu0 %v1545_v9, %s1469_s10 }
  0x16   :  { %150 = vrot.lane.b32.xlu1 %v1554_v10, %s1469_s10  ;;  %148 = vrot.lane.b32.xlu0 %v1559_v11, %s1469_s10 }
  0x1a   :  { %154 = vrot.lane.b32.xlu1 %v1568_v12, %s1469_s10  ;;  %152 = vrot.lane.b32.xlu0 %v1573_v13, %s1469_s10 }
  0x1e   :  { %158 = vrot.lane.b32.xlu1 %v1582_v14, %s1469_s10  ;;  %156 = vrot.lane.b32.xlu0 %v1587_v15, %s1469_s10 }
  0x22   :  { %162 = vrot.lane.b32.xlu1 %v1596_v16, %s1469_s10  ;;  %160 = vrot.lane.b32.xlu0 %v1601_v17, %s1469_s10 }
  0x26   :  { %166 = vrot.lane.b32.xlu1 %v1610_v18, %s1469_s10  ;;  %164 = vrot.lane.b32.xlu0 %v1615_v19, %s1469_s10 }
  0x2a   :  { %170 = vrot.lane.b32.xlu1 %v1624_v20, %s1469_s10  ;;  %168 = vrot.lane.b32.xlu0 %v1629_v21, %s1469_s10 }
  0x2e   :  { %174 = vrot.lane.b32.xlu1 %v1638_v22, %s1469_s10  ;;  %172 = vrot.lane.b32.xlu0 %v1643_v23, %s1469_s10 }
  0x32   :  { %178 = vrot.lane.b32.xlu1 %v1652_v24, %s1469_s10  ;;  %176 = vrot.lane.b32.xlu0 %v1657_v25, %s1469_s10 }
  0x36   :  { %182 = vrot.lane.b32.xlu1 %v1666_v26, %s1469_s10  ;;  %180 = vrot.lane.b32.xlu0 %v1671_v27, %s1469_s10 }
  0x3a   :  { %186 = vrot.lane.b32.xlu1 %v1680_v28, %s1469_s10  ;;  %184 = vrot.lane.b32.xlu0 %v1685_v29, %s1469_s10 }
  0x3e   :  { %190 = vrot.lane.b32.xlu1 %v1694_v30, %s1469_s10  ;;  %188 = vrot.lane.b32.xlu0 %v1699_v31, %s1469_s10 }
  0x42   :  { %194 = vrot.lane.b32.xlu1 %v1708_v32, %s1469_s10  ;;  %192 = vrot.lane.b32.xlu0 %v1713_v33, %s1469_s10 }
  0x46   :  { %198 = vrot.lane.b32.xlu1 %v1722_v34, %s1469_s10  ;;  %196 = vrot.lane.b32.xlu0 %v1727_v35, %s1469_s10 }
  0x4a   :  { %202 = vrot.lane.b32.xlu1 %v1736_v36, %s1469_s10  ;;  %200 = vrot.lane.b32.xlu0 %v1741_v37, %s1469_s10 }
  0x4e   :  { %206 = vrot.lane.b32.xlu1 %v1750_v38, %s1469_s10  ;;  %204 = vrot.lane.b32.xlu0 %v1755_v39, %s1469_s10 }
  0x52   :  { %290 = vrot.lane.b32.xlu1 %v1503_v3, %s1470_s2  ;;  %288 = vrot.lane.b32.xlu0 %v1489_v1, %s1470_s2  ;;  %v1911_v3 = vld [vmem:[%s3615_s0 + $0x11] sm:$0xf] }
  0x56   :  { %294 = vrot.lane.b32.xlu1 %v1498_v2, %s1470_s2  ;;  %292 = vrot.lane.b32.xlu0 %v1484_v0, %s1470_s2  ;;  %v1906_v2 = vld [vmem:[%s3615_s0 + $0x19] sm:$0xf] }
  0x5a   :  { %298 = vrot.lane.b32.xlu1 %v1512_v4, %s1470_s2  ;;  %296 = vrot.lane.b32.xlu0 %v1517_v5, %s1470_s2 }
  0x5e   :  { %302 = vrot.lane.b32.xlu1 %v1526_v6, %s1470_s2  ;;  %300 = vrot.lane.b32.xlu0 %v1531_v7, %s1470_s2  ;;  %v1924_v6 = vld [vmem:[%s3615_s0 + $0x29] sm:$0xf]  ;;  %v1929_v7 = vld [vmem:[%s3615_s0 + $0x21] sm:$0xf] }
  0x62   :  { %306 = vrot.lane.b32.xlu1 %v1540_v8, %s1470_s2  ;;  %304 = vrot.lane.b32.xlu0 %v1545_v9, %s1470_s2 }
  0x66   :  { %310 = vrot.lane.b32.xlu1 %v1554_v10, %s1470_s2  ;;  %308 = vrot.lane.b32.xlu0 %v1559_v11, %s1470_s2  ;;  %v1942_v10 = vld [vmem:[%s3615_s0 + $0x39] sm:$0xf]  ;;  %v1947_v11 = vld [vmem:[%s3615_s0 + $0x31] sm:$0xf] }
  0x6a   :  { %314 = vrot.lane.b32.xlu1 %v1568_v12, %s1470_s2  ;;  %312 = vrot.lane.b32.xlu0 %v1573_v13, %s1470_s2 }
  0x6e   :  { %318 = vrot.lane.b32.xlu1 %v1582_v14, %s1470_s2  ;;  %316 = vrot.lane.b32.xlu0 %v1587_v15, %s1470_s2  ;;  %v1960_v14 = vld [vmem:[%s3615_s0 + $0x49] sm:$0xf]  ;;  %v1965_v15 = vld [vmem:[%s3615_s0 + $0x41] sm:$0xf] }
  0x72   :  { %322 = vrot.lane.b32.xlu1 %v1596_v16, %s1470_s2  ;;  %320 = vrot.lane.b32.xlu0 %v1601_v17, %s1470_s2 }
  0x74   :  { %v1797_v40 = vpop.permute.xlu1 %132  ;;  %v1799_v41 = vpop.permute.xlu0 %128 }
  0x75   :  { %3665 = vst [vmem:[#allocation4_spill] sm:$0xff] %v1797_v40  ;;  %3666 = vst [vmem:[#allocation5_spill] sm:$0xff] %v1799_v41  ;;  %v2737_v40 = vld [vmem:[%s3615_s0 + $0x122] sm:$0xf] }
  0x76   :  { %326 = vrot.lane.b32.xlu1 %v1610_v18, %s1470_s2  ;;  %324 = vrot.lane.b32.xlu0 %v1615_v19, %s1470_s2  ;;  %v1978_v18 = vld [vmem:[%s3615_s0 + $0x59] sm:$0xf]  ;;  %v1983_v19 = vld [vmem:[%s3615_s0 + $0x51] sm:$0xf]  ;;  %3829 = vst [vmem:[#allocation168_spill] sm:$0xff] %v2737_v40 }
  0x78   :  { %v1805_v42 = vpop.permute.xlu1 %134  ;;  %v1807_v43 = vpop.permute.xlu0 %130 }
  0x79   :  { %3667 = vst [vmem:[#allocation6_spill] sm:$0xff] %v1805_v42  ;;  %3668 = vst [vmem:[#allocation7_spill] sm:$0xff] %v1807_v43 }
  0x7a   :  { %330 = vrot.lane.b32.xlu1 %v1624_v20, %s1470_s2  ;;  %328 = vrot.lane.b32.xlu0 %v1629_v21, %s1470_s2 }
  0x7c   :  { %v1813_v44 = vpop.permute.xlu1 %138  ;;  %v1815_v45 = vpop.permute.xlu0 %136 }
  0x7d   :  { %3669 = vst [vmem:[#allocation8_spill] sm:$0xff] %v1813_v44  ;;  %3670 = vst [vmem:[#allocation9_spill] sm:$0xff] %v1815_v45 }
  0x7e   :  { %334 = vrot.lane.b32.xlu1 %v1638_v22, %s1470_s2  ;;  %332 = vrot.lane.b32.xlu0 %v1643_v23, %s1470_s2 }
  0x80   :  { %v1821_v46 = vpop.permute.xlu1 %142  ;;  %v1823_v47 = vpop.permute.xlu0 %140 }
  0x81   :  { %3671 = vst [vmem:[#allocation10_spill] sm:$0xff] %v1821_v46  ;;  %3672 = vst [vmem:[#allocation11_spill] sm:$0xff] %v1823_v47  ;;  %v2217_v46 = vld [vmem:[%s3615_s0 + $0x121] sm:$0xf] }
  0x82   :  { %338 = vrot.lane.b32.xlu1 %v1652_v24, %s1470_s2  ;;  %336 = vrot.lane.b32.xlu0 %v1657_v25, %s1470_s2  ;;  %3730 = vst [vmem:[#allocation69_spill] sm:$0xff] %v2217_v46 }
  0x84   :  { %v1829_v48 = vpop.permute.xlu1 %146  ;;  %v1831_v49 = vpop.permute.xlu0 %144 }
  0x85   :  { %3673 = vst [vmem:[#allocation12_spill] sm:$0xff] %v1829_v48  ;;  %3674 = vst [vmem:[#allocation13_spill] sm:$0xff] %v1831_v49  ;;  %v2181_v48 = vld [vmem:[%s3615_s0 + $0x101] sm:$0xf] }
  0x86   :  { %342 = vrot.lane.b32.xlu1 %v1666_v26, %s1470_s2  ;;  %340 = vrot.lane.b32.xlu0 %v1671_v27, %s1470_s2  ;;  %3722 = vst [vmem:[#allocation61_spill] sm:$0xff] %v2181_v48 }
  0x88   :  { %v1837_v50 = vpop.permute.xlu1 %150  ;;  %v1839_v51 = vpop.permute.xlu0 %148 }
  0x89   :  { %3675 = vst [vmem:[#allocation14_spill] sm:$0xff] %v1837_v50  ;;  %3676 = vst [vmem:[#allocation15_spill] sm:$0xff] %v1839_v51  ;;  %v2145_v50 = vld [vmem:[%s3615_s0 + $0xe1] sm:$0xf] }
  0x8a   :  { %346 = vrot.lane.b32.xlu1 %v1680_v28, %s1470_s2  ;;  %344 = vrot.lane.b32.xlu0 %v1685_v29, %s1470_s2  ;;  %3714 = vst [vmem:[#allocation53_spill] sm:$0xff] %v2145_v50  ;;  %v2701_v29 = vld [vmem:[%s3615_s0 + $0x102] sm:$0xf]  ;;  %v2719_v28 = vld [vmem:[%s3615_s0 + $0x112] sm:$0xf] }
  0x8c   :  { %v1845_v52 = vpop.permute.xlu1 %154  ;;  %v1847_v53 = vpop.permute.xlu0 %152 }
  0x8d   :  { %3677 = vst [vmem:[#allocation16_spill] sm:$0xff] %v1845_v52  ;;  %3678 = vst [vmem:[#allocation17_spill] sm:$0xff] %v1847_v53  ;;  %v2109_v52 = vld [vmem:[%s3615_s0 + $0xc1] sm:$0xf] }
  0x8e   :  { %350 = vrot.lane.b32.xlu1 %v1694_v30, %s1470_s2  ;;  %348 = vrot.lane.b32.xlu0 %v1699_v31, %s1470_s2  ;;  %v1996_v30 = vld [vmem:[%s3615_s0 + $0x69] sm:$0xf]  ;;  %v2001_v31 = vld [vmem:[%s3615_s0 + $0x61] sm:$0xf]  ;;  %3706 = vst [vmem:[#allocation45_spill] sm:$0xff] %v2109_v52 }
  0x90   :  { %v1853_v54 = vpop.permute.xlu1 %158  ;;  %v1855_v55 = vpop.permute.xlu0 %156 }
  0x91   :  { %3679 = vst [vmem:[#allocation18_spill] sm:$0xff] %v1853_v54  ;;  %3680 = vst [vmem:[#allocation19_spill] sm:$0xff] %v1855_v55  ;;  %v2068_v55 = vld [vmem:[%s3615_s0 + $0xa9] sm:$0xf]  ;;  %v2073_v54 = vld [vmem:[%s3615_s0 + $0xa1] sm:$0xf] }
  0x92   :  { %354 = vrot.lane.b32.xlu1 %v1708_v32, %s1470_s2  ;;  %352 = vrot.lane.b32.xlu0 %v1713_v33, %s1470_s2 }
  0x94   :  { %v1861_v56 = vpop.permute.xlu1 %162  ;;  %v1863_v57 = vpop.permute.xlu0 %160 }
  0x95   :  { %3681 = vst [vmem:[#allocation20_spill] sm:$0xff] %v1861_v56  ;;  %3682 = vst [vmem:[#allocation21_spill] sm:$0xff] %v1863_v57 }
  0x96   :  { %358 = vrot.lane.b32.xlu1 %v1722_v34, %s1470_s2  ;;  %356 = vrot.lane.b32.xlu0 %v1727_v35, %s1470_s2  ;;  %v2014_v34 = vld [vmem:[%s3615_s0 + $0x79] sm:$0xf]  ;;  %v2019_v35 = vld [vmem:[%s3615_s0 + $0x71] sm:$0xf] }
  0x98   :  { %v1869_v58 = vpop.permute.xlu1 %166  ;;  %v1871_v59 = vpop.permute.xlu0 %164 }
  0x99   :  { %3683 = vst [vmem:[#allocation22_spill] sm:$0xff] %v1869_v58  ;;  %3684 = vst [vmem:[#allocation23_spill] sm:$0xff] %v1871_v59  ;;  %v2050_v59 = vld [vmem:[%s3615_s0 + $0x99] sm:$0xf]  ;;  %v2055_v58 = vld [vmem:[%s3615_s0 + $0x91] sm:$0xf] }
  0x9a   :  { %362 = vrot.lane.b32.xlu1 %v1736_v36, %s1470_s2  ;;  %360 = vrot.lane.b32.xlu0 %v1741_v37, %s1470_s2 }
  0x9c   :  { %v1877_v60 = vpop.permute.xlu1 %170  ;;  %v1879_v61 = vpop.permute.xlu0 %168 }
  0x9d   :  { %3685 = vst [vmem:[#allocation24_spill] sm:$0xff] %v1877_v60  ;;  %3686 = vst [vmem:[#allocation25_spill] sm:$0xff] %v1879_v61 }
  0x9e   :  { %366 = vrot.lane.b32.xlu1 %v1750_v38, %s1470_s2  ;;  %364 = vrot.lane.b32.xlu0 %v1755_v39, %s1470_s2  ;;  %v2032_v38 = vld [vmem:[%s3615_s0 + $0x89] sm:$0xf]  ;;  %v2037_v39 = vld [vmem:[%s3615_s0 + $0x81] sm:$0xf] }
  0xa0   :  { %v1895_v0 = vpop.permute.xlu1 %174  ;;  %v1897_v1 = vpop.permute.xlu0 %172 }
  0xa2   :  { %570 = vrot.lane.b32.xlu1 %v1888_v62, %s1469_s10  ;;  %568 = vrot.lane.b32.xlu0 %v1893_v63, %s1469_s10 }
  0xa4   :  { %v1913_v4 = vpop.permute.xlu1 %178  ;;  %v1915_v5 = vpop.permute.xlu0 %176 }
  0xa6   :  { %574 = vrot.lane.b32.xlu1 %v1906_v2, %s1469_s10  ;;  %572 = vrot.lane.b32.xlu0 %v1911_v3, %s1469_s10 }
  0xa8   :  { %v1931_v8 = vpop.permute.xlu1 %182  ;;  %v1933_v9 = vpop.permute.xlu0 %180 }
  0xaa   :  { %578 = vrot.lane.b32.xlu1 %v1924_v6, %s1469_s10  ;;  %576 = vrot.lane.b32.xlu0 %v1929_v7, %s1469_s10 }
  0xac   :  { %v1949_v12 = vpop.permute.xlu1 %186  ;;  %v1951_v13 = vpop.permute.xlu0 %184 }
  0xad   :  { %3687 = vst [vmem:[#allocation26_spill] sm:$0xff] %v1949_v12  ;;  %3688 = vst [vmem:[#allocation27_spill] sm:$0xff] %v1951_v13 }
  0xae   :  { %582 = vrot.lane.b32.xlu1 %v1942_v10, %s1469_s10  ;;  %580 = vrot.lane.b32.xlu0 %v1947_v11, %s1469_s10 }
  0xb0   :  { %v1967_v16 = vpop.permute.xlu1 %190  ;;  %v1969_v17 = vpop.permute.xlu0 %188 }
  0xb1   :  { %3689 = vst [vmem:[#allocation28_spill] sm:$0xff] %v1967_v16  ;;  %3690 = vst [vmem:[#allocation29_spill] sm:$0xff] %v1969_v17  ;;  %v2235_v17 = vld [vmem:[%s3615_s0 + $0x131] sm:$0xf] }
  0xb2   :  { %586 = vrot.lane.b32.xlu1 %v1960_v14, %s1469_s10  ;;  %584 = vrot.lane.b32.xlu0 %v1965_v15, %s1469_s10  ;;  %3734 = vst [vmem:[#allocation73_spill] sm:$0xff] %v2235_v17 }
  0xb4   :  { %v1985_v20 = vpop.permute.xlu1 %194  ;;  %v1987_v21 = vpop.permute.xlu0 %192 }
  0xb5   :  { %3691 = vst [vmem:[#allocation30_spill] sm:$0xff] %v1985_v20  ;;  %3692 = vst [vmem:[#allocation31_spill] sm:$0xff] %v1987_v21  ;;  %v2199_v21 = vld [vmem:[%s3615_s0 + $0x111] sm:$0xf] }
  0xb6   :  { %590 = vrot.lane.b32.xlu1 %v1978_v18, %s1469_s10  ;;  %588 = vrot.lane.b32.xlu0 %v1983_v19, %s1469_s10  ;;  %3726 = vst [vmem:[#allocation65_spill] sm:$0xff] %v2199_v21 }
  0xb8   :  { %v2003_v32 = vpop.permute.xlu1 %198  ;;  %v2005_v33 = vpop.permute.xlu0 %196 }
  0xb9   :  { %3693 = vst [vmem:[#allocation32_spill] sm:$0xff] %v2003_v32  ;;  %3694 = vst [vmem:[#allocation33_spill] sm:$0xff] %v2005_v33  ;;  %v2163_v33 = vld [vmem:[%s3615_s0 + $0xf1] sm:$0xf] }
  0xba   :  { %594 = vrot.lane.b32.xlu1 %v1996_v30, %s1469_s10  ;;  %592 = vrot.lane.b32.xlu0 %v2001_v31, %s1469_s10  ;;  %3718 = vst [vmem:[#allocation57_spill] sm:$0xff] %v2163_v33 }
  0xbc   :  { %v2021_v36 = vpop.permute.xlu1 %202  ;;  %v2023_v37 = vpop.permute.xlu0 %200 }
  0xbd   :  { %3695 = vst [vmem:[#allocation34_spill] sm:$0xff] %v2021_v36  ;;  %3696 = vst [vmem:[#allocation35_spill] sm:$0xff] %v2023_v37  ;;  %v2127_v37 = vld [vmem:[%s3615_s0 + $0xd1] sm:$0xf] }
  0xbe   :  { %598 = vrot.lane.b32.xlu1 %v2014_v34, %s1469_s10  ;;  %596 = vrot.lane.b32.xlu0 %v2019_v35, %s1469_s10  ;;  %3710 = vst [vmem:[#allocation49_spill] sm:$0xff] %v2127_v37 }
  0xc0   :  { %v2039_v61 = vpop.permute.xlu1 %206  ;;  %v2041_v60 = vpop.permute.xlu0 %204 }
  0xc1   :  { %3697 = vst [vmem:[#allocation36_spill] sm:$0xff] %v2039_v61  ;;  %3698 = vst [vmem:[#allocation37_spill] sm:$0xff] %v2041_v60  ;;  %v2091_v60 = vld [vmem:[%s3615_s0 + $0xb1] sm:$0xf] }
  0xc2   :  { %602 = vrot.lane.b32.xlu1 %v2032_v38, %s1469_s10  ;;  %600 = vrot.lane.b32.xlu0 %v2037_v39, %s1469_s10 }
  0xc4   :  { %v2057_v57 = vpop.permute.xlu1 %290  ;;  %v2059_v56 = vpop.permute.xlu0 %288 }
  0xc5   :  { %3699 = vst [vmem:[#allocation38_spill] sm:$0xff] %v2057_v57  ;;  %3700 = vst [vmem:[#allocation39_spill] sm:$0xff] %v2059_v56  ;;  %v2086_v56 = vld [vmem:[%s3615_s0 + $0xb9] sm:$0xf] }
  0xc6   :  { %606 = vrot.lane.b32.xlu1 %v2050_v59, %s1469_s10  ;;  %604 = vrot.lane.b32.xlu0 %v2055_v58, %s1469_s10 }
  0xc8   :  { %v2075_v53 = vpop.permute.xlu1 %294  ;;  %v2077_v57 = vpop.permute.xlu0 %292 }
  0xc9   :  { %3701 = vst [vmem:[#allocation40_spill] sm:$0xff] %v2075_v53  ;;  %3702 = vst [vmem:[#allocation41_spill] sm:$0xff] %v2077_v57  ;;  %v2104_v57 = vld [vmem:[%s3615_s0 + $0xc9] sm:$0xf] }
  0xca   :  { %610 = vrot.lane.b32.xlu1 %v2068_v55, %s1469_s10  ;;  %608 = vrot.lane.b32.xlu0 %v2073_v54, %s1469_s10  ;;  %3705 = vst [vmem:[#allocation44_spill] sm:$0xff] %v2104_v57 }
  0xcc   :  { %v2093_v61 = vpop.permute.xlu1 %298  ;;  %v2095_v53 = vpop.permute.xlu0 %296 }
  0xcd   :  { %3703 = vst [vmem:[#allocation42_spill] sm:$0xff] %v2093_v61  ;;  %3704 = vst [vmem:[#allocation43_spill] sm:$0xff] %v2095_v53  ;;  %v2122_v53 = vld [vmem:[%s3615_s0 + $0xd9] sm:$0xf] }
  0xce   :  { %614 = vrot.lane.b32.xlu1 %v2086_v56, %s1469_s10  ;;  %612 = vrot.lane.b32.xlu0 %v2091_v60, %s1469_s10  ;;  %3709 = vst [vmem:[#allocation48_spill] sm:$0xff] %v2122_v53 }
  0xd0   :  { %v2111_v51 = vpop.permute.xlu1 %302  ;;  %v2113_v61 = vpop.permute.xlu0 %300 }
  0xd1   :  { %3707 = vst [vmem:[#allocation46_spill] sm:$0xff] %v2111_v51  ;;  %3708 = vst [vmem:[#allocation47_spill] sm:$0xff] %v2113_v61  ;;  %v2140_v61 = vld [vmem:[%s3615_s0 + $0xe9] sm:$0xf] }
  0xd2   :  { %618 = vrot.lane.b32.xlu1 %v2104_v57, %s1469_s10  ;;  %616 = vrot.lane.b32.xlu0 %v2109_v52, %s1469_s10  ;;  %3713 = vst [vmem:[#allocation52_spill] sm:$0xff] %v2140_v61 }
  0xd4   :  { %v2129_v36 = vpop.permute.xlu1 %306  ;;  %v2131_v51 = vpop.permute.xlu0 %304 }
  0xd5   :  { %3711 = vst [vmem:[#allocation50_spill] sm:$0xff] %v2129_v36  ;;  %3712 = vst [vmem:[#allocation51_spill] sm:$0xff] %v2131_v51  ;;  %v2158_v51 = vld [vmem:[%s3615_s0 + $0xf9] sm:$0xf] }
  0xd6   :  { %622 = vrot.lane.b32.xlu1 %v2122_v53, %s1469_s10  ;;  %620 = vrot.lane.b32.xlu0 %v2127_v37, %s1469_s10  ;;  %3717 = vst [vmem:[#allocation56_spill] sm:$0xff] %v2158_v51 }
  0xd8   :  { %v2147_v49 = vpop.permute.xlu1 %310  ;;  %v2149_v36 = vpop.permute.xlu0 %308 }
  0xd9   :  { %3715 = vst [vmem:[#allocation54_spill] sm:$0xff] %v2147_v49  ;;  %3716 = vst [vmem:[#allocation55_spill] sm:$0xff] %v2149_v36  ;;  %v2176_v36 = vld [vmem:[%s3615_s0 + $0x109] sm:$0xf] }
  0xda   :  { %626 = vrot.lane.b32.xlu1 %v2140_v61, %s1469_s10  ;;  %624 = vrot.lane.b32.xlu0 %v2145_v50, %s1469_s10  ;;  %3721 = vst [vmem:[#allocation60_spill] sm:$0xff] %v2176_v36 }
  0xdc   :  { %v2165_v32 = vpop.permute.xlu1 %314  ;;  %v2167_v49 = vpop.permute.xlu0 %312 }
  0xdd   :  { %3719 = vst [vmem:[#allocation58_spill] sm:$0xff] %v2165_v32  ;;  %3720 = vst [vmem:[#allocation59_spill] sm:$0xff] %v2167_v49  ;;  %v2194_v49 = vld [vmem:[%s3615_s0 + $0x119] sm:$0xf] }
  0xde   :  { %630 = vrot.lane.b32.xlu1 %v2158_v51, %s1469_s10  ;;  %628 = vrot.lane.b32.xlu0 %v2163_v33, %s1469_s10  ;;  %3725 = vst [vmem:[#allocation64_spill] sm:$0xff] %v2194_v49 }
  0xe0   :  { %v2183_v47 = vpop.permute.xlu1 %318  ;;  %v2185_v32 = vpop.permute.xlu0 %316 }
  0xe1   :  { %3723 = vst [vmem:[#allocation62_spill] sm:$0xff] %v2183_v47  ;;  %3724 = vst [vmem:[#allocation63_spill] sm:$0xff] %v2185_v32  ;;  %v2212_v32 = vld [vmem:[%s3615_s0 + $0x129] sm:$0xf] }
  0xe2   :  { %634 = vrot.lane.b32.xlu1 %v2176_v36, %s1469_s10  ;;  %632 = vrot.lane.b32.xlu0 %v2181_v48, %s1469_s10  ;;  %3729 = vst [vmem:[#allocation68_spill] sm:$0xff] %v2212_v32 }
  0xe4   :  { %v2201_v20 = vpop.permute.xlu1 %322  ;;  %v2203_v47 = vpop.permute.xlu0 %320 }
  0xe5   :  { %3727 = vst [vmem:[#allocation66_spill] sm:$0xff] %v2201_v20  ;;  %3728 = vst [vmem:[#allocation67_spill] sm:$0xff] %v2203_v47  ;;  %v2230_v47 = vld [vmem:[%s3615_s0 + $0x139] sm:$0xf] }
  0xe6   :  { %638 = vrot.lane.b32.xlu1 %v2194_v49, %s1469_s10  ;;  %636 = vrot.lane.b32.xlu0 %v2199_v21, %s1469_s10  ;;  %3733 = vst [vmem:[#allocation72_spill] sm:$0xff] %v2230_v47 }
  0xe8   :  { %v2219_v45 = vpop.permute.xlu1 %326  ;;  %v2221_v20 = vpop.permute.xlu0 %324 }
  0xe9   :  { %3731 = vst [vmem:[#allocation70_spill] sm:$0xff] %v2219_v45  ;;  %3732 = vst [vmem:[#allocation71_spill] sm:$0xff] %v2221_v20 }
  0xea   :  { %642 = vrot.lane.b32.xlu1 %v2212_v32, %s1469_s10  ;;  %640 = vrot.lane.b32.xlu0 %v2217_v46, %s1469_s10 }
  0xec   :  { %v2237_v16 = vpop.permute.xlu1 %330  ;;  %v2239_v45 = vpop.permute.xlu0 %328 }
  0xed   :  { %3735 = vst [vmem:[#allocation74_spill] sm:$0xff] %v2237_v16  ;;  %3736 = vst [vmem:[#allocation75_spill] sm:$0xff] %v2239_v45 }
  0xee   :  { %646 = vrot.lane.b32.xlu1 %v2230_v47, %s1469_s10  ;;  %644 = vrot.lane.b32.xlu0 %v2235_v17, %s1469_s10 }
  0xf0   :  { %v2245_v20 = vpop.permute.xlu1 %334  ;;  %v2247_v44 = vpop.permute.xlu0 %332 }
  0xf2   :  { %730 = vrot.lane.b32.xlu1 %v1888_v62, %s1470_s2  ;;  %728 = vrot.lane.b32.xlu0 %v1893_v63, %s1470_s2 }
  0xf4   :  { %v2253_v43 = vpop.permute.xlu1 %338  ;;  %v2255_v16 = vpop.permute.xlu0 %336 }
  0xf6   :  { %734 = vrot.lane.b32.xlu1 %v1906_v2, %s1470_s2  ;;  %732 = vrot.lane.b32.xlu0 %v1911_v3, %s1470_s2 }
  0xf8   :  { %v2261_v45 = vpop.permute.xlu1 %342  ;;  %v2263_v42 = vpop.permute.xlu0 %340 }
  0xf9   :  { %3737 = vst [vmem:[#allocation76_spill] sm:$0xff] %v2263_v42 }
  0xfa   :  { %738 = vrot.lane.b32.xlu1 %v1924_v6, %s1470_s2  ;;  %736 = vrot.lane.b32.xlu0 %v1929_v7, %s1470_s2 }
  0xfc   :  { %v2269_v62 = vpop.permute.xlu1 %346  ;;  %v2271_v63 = vpop.permute.xlu0 %344 }
  0xfd   :  { %3738 = vst [vmem:[#allocation77_spill] sm:$0xff] %v2269_v62  ;;  %3739 = vst [vmem:[#allocation78_spill] sm:$0xff] %v2271_v63  ;;  %v2647_v63 = vld [vmem:[%s3615_s0 + $0xd2] sm:$0xf] }
  0xfe   :  { %742 = vrot.lane.b32.xlu1 %v1942_v10, %s1470_s2  ;;  %740 = vrot.lane.b32.xlu0 %v1947_v11, %s1470_s2 }
 0x100   :  { %v2277_v2 = vpop.permute.xlu1 %350  ;;  %v2279_v3 = vpop.permute.xlu0 %348 }
 0x101   :  { %3740 = vst [vmem:[#allocation79_spill] sm:$0xff] %v2277_v2  ;;  %3741 = vst [vmem:[#allocation80_spill] sm:$0xff] %v2279_v3  ;;  %v2611_v2 = vld [vmem:[%s3615_s0 + $0xb2] sm:$0xf] }
 0x102   :  { %746 = vrot.lane.b32.xlu1 %v1960_v14, %s1470_s2  ;;  %744 = vrot.lane.b32.xlu0 %v1965_v15, %s1470_s2 }
 0x104   :  { %v2285_v6 = vpop.permute.xlu1 %354  ;;  %v2287_v7 = vpop.permute.xlu0 %352 }
 0x105   :  { %3742 = vst [vmem:[#allocation81_spill] sm:$0xff] %v2285_v6  ;;  %3743 = vst [vmem:[#allocation82_spill] sm:$0xff] %v2287_v7  ;;  %v2557_v6 = vld [vmem:[%s3615_s0 + $0x82] sm:$0xf] }
 0x106   :  { %750 = vrot.lane.b32.xlu1 %v1978_v18, %s1470_s2  ;;  %748 = vrot.lane.b32.xlu0 %v1983_v19, %s1470_s2  ;;  %3803 = vst [vmem:[#allocation142_spill] sm:$0xff] %v2557_v6 }
 0x108   :  { %v2293_v10 = vpop.permute.xlu1 %358  ;;  %v2295_v11 = vpop.permute.xlu0 %356 }
 0x109   :  { %3744 = vst [vmem:[#allocation83_spill] sm:$0xff] %v2293_v10  ;;  %3745 = vst [vmem:[#allocation84_spill] sm:$0xff] %v2295_v11 }
 0x10a   :  { %754 = vrot.lane.b32.xlu1 %v1996_v30, %s1470_s2  ;;  %752 = vrot.lane.b32.xlu0 %v2001_v31, %s1470_s2 }
 0x10c   :  { %v2301_v14 = vpop.permute.xlu1 %362  ;;  %v2303_v15 = vpop.permute.xlu0 %360 }
 0x10d   :  { %3746 = vst [vmem:[#allocation85_spill] sm:$0xff] %v2301_v14  ;;  %3747 = vst [vmem:[#allocation86_spill] sm:$0xff] %v2303_v15 }
 0x10e   :  { %758 = vrot.lane.b32.xlu1 %v2014_v34, %s1470_s2  ;;  %756 = vrot.lane.b32.xlu0 %v2019_v35, %s1470_s2 }
 0x110   :  { %v2309_v18 = vpop.permute.xlu1 %366  ;;  %v2311_v19 = vpop.permute.xlu0 %364 }
 0x111   :  { %3748 = vst [vmem:[#allocation87_spill] sm:$0xff] %v2309_v18  ;;  %3749 = vst [vmem:[#allocation88_spill] sm:$0xff] %v2311_v19 }
 0x112   :  { %762 = vrot.lane.b32.xlu1 %v2032_v38, %s1470_s2  ;;  %760 = vrot.lane.b32.xlu0 %v2037_v39, %s1470_s2 }
 0x114   :  { %v2317_v30 = vpop.permute.xlu1 %570  ;;  %v2319_v31 = vpop.permute.xlu0 %568 }
 0x115   :  { %3750 = vst [vmem:[#allocation89_spill] sm:$0xff] %v2317_v30  ;;  %3751 = vst [vmem:[#allocation90_spill] sm:$0xff] %v2319_v31  ;;  %v2444_v31 = vld [vmem:[%s3615_s0 + $0x2a] sm:$0xf]  ;;  %v2449_v30 = vld [vmem:[%s3615_s0 + $0x22] sm:$0xf] }
 0x116   :  { %766 = vrot.lane.b32.xlu1 %v2050_v59, %s1470_s2  ;;  %764 = vrot.lane.b32.xlu0 %v2055_v58, %s1470_s2  ;;  %3778 = vst [vmem:[#allocation117_spill] sm:$0xff] %v2444_v31  ;;  %3779 = vst [vmem:[#allocation118_spill] sm:$0xff] %v2449_v30 }
 0x118   :  { %v2325_v34 = vpop.permute.xlu1 %574  ;;  %v2327_v35 = vpop.permute.xlu0 %572 }
 0x119   :  { %3752 = vst [vmem:[#allocation91_spill] sm:$0xff] %v2325_v34  ;;  %3753 = vst [vmem:[#allocation92_spill] sm:$0xff] %v2327_v35 }
 0x11a   :  { %770 = vrot.lane.b32.xlu1 %v2068_v55, %s1470_s2  ;;  %768 = vrot.lane.b32.xlu0 %v2073_v54, %s1470_s2 }
 0x11c   :  { %v2333_v38 = vpop.permute.xlu1 %578  ;;  %v2335_v39 = vpop.permute.xlu0 %576 }
 0x11d   :  { %3754 = vst [vmem:[#allocation93_spill] sm:$0xff] %v2333_v38  ;;  %3755 = vst [vmem:[#allocation94_spill] sm:$0xff] %v2335_v39  ;;  %v2431_v38 = vld [vmem:[%s3615_s0 + $0x12] sm:$0xf] }
 0x11e   :  { %774 = vrot.lane.b32.xlu1 %v2086_v56, %s1470_s2  ;;  %772 = vrot.lane.b32.xlu0 %v2091_v60, %s1470_s2  ;;  %3775 = vst [vmem:[#allocation114_spill] sm:$0xff] %v2431_v38 }
 0x120   :  { %v2341_v58 = vpop.permute.xlu1 %582  ;;  %v2343_v59 = vpop.permute.xlu0 %580 }
 0x121   :  { %3756 = vst [vmem:[#allocation95_spill] sm:$0xff] %v2341_v58  ;;  %3757 = vst [vmem:[#allocation96_spill] sm:$0xff] %v2343_v59 }
 0x122   :  { %778 = vrot.lane.b32.xlu1 %v2104_v57, %s1470_s2  ;;  %776 = vrot.lane.b32.xlu0 %v2109_v52, %s1470_s2  ;;  %v2755_v57 = vld [vmem:[%s3615_s0 + $0x132] sm:$0xf] }
 0x123   :  { %3832 = vst [vmem:[#allocation171_spill] sm:$0xff] %v2755_v57 }
 0x124   :  { %v2349_v54 = vpop.permute.xlu1 %586  ;;  %v2351_v55 = vpop.permute.xlu0 %584 }
 0x125   :  { %3758 = vst [vmem:[#allocation97_spill] sm:$0xff] %v2349_v54  ;;  %3759 = vst [vmem:[#allocation98_spill] sm:$0xff] %v2351_v55 }
 0x126   :  { %782 = vrot.lane.b32.xlu1 %v2122_v53, %s1470_s2  ;;  %780 = vrot.lane.b32.xlu0 %v2127_v37, %s1470_s2  ;;  %v2665_v53 = vld [vmem:[%s3615_s0 + $0xe2] sm:$0xf] }
 0x128   :  { %v2357_v39 = vpop.permute.xlu1 %590  ;;  %v2359_v58 = vpop.permute.xlu0 %588 }
 0x129   :  { %3760 = vst [vmem:[#allocation99_spill] sm:$0xff] %v2357_v39  ;;  %3761 = vst [vmem:[#allocation100_spill] sm:$0xff] %v2359_v58 }
 0x12a   :  { %786 = vrot.lane.b32.xlu1 %v2140_v61, %s1470_s2  ;;  %784 = vrot.lane.b32.xlu0 %v2145_v50, %s1470_s2  ;;  %v2593_v61 = vld [vmem:[%s3615_s0 + $0xa2] sm:$0xf] }
 0x12b   :  { %3811 = vst [vmem:[#allocation150_spill] sm:$0xff] %v2593_v61 }
 0x12c   :  { %v2365_v59 = vpop.permute.xlu1 %594  ;;  %v2367_v54 = vpop.permute.xlu0 %592 }
 0x12d   :  { %3762 = vst [vmem:[#allocation101_spill] sm:$0xff] %v2365_v59  ;;  %3763 = vst [vmem:[#allocation102_spill] sm:$0xff] %v2367_v54 }
 0x12e   :  { %790 = vrot.lane.b32.xlu1 %v2158_v51, %s1470_s2  ;;  %788 = vrot.lane.b32.xlu0 %v2163_v33, %s1470_s2  ;;  %v2539_v51 = vld [vmem:[%s3615_s0 + $0x72] sm:$0xf] }
 0x12f   :  { %3799 = vst [vmem:[#allocation138_spill] sm:$0xff] %v2539_v51 }
 0x130   :  { %v2373_v55 = vpop.permute.xlu1 %598  ;;  %v2375_v39 = vpop.permute.xlu0 %596 }
 0x131   :  { %3764 = vst [vmem:[#allocation103_spill] sm:$0xff] %v2373_v55  ;;  %3765 = vst [vmem:[#allocation104_spill] sm:$0xff] %v2375_v39 }
 0x132   :  { %794 = vrot.lane.b32.xlu1 %v2176_v36, %s1470_s2  ;;  %792 = vrot.lane.b32.xlu0 %v2181_v48, %s1470_s2  ;;  %v2498_v48 = vld [vmem:[%s3615_s0 + $0x5a] sm:$0xf]  ;;  %v2503_v36 = vld [vmem:[%s3615_s0 + $0x52] sm:$0xf] }
 0x133   :  { %3790 = vst [vmem:[#allocation129_spill] sm:$0xff] %v2498_v48  ;;  %3791 = vst [vmem:[#allocation130_spill] sm:$0xff] %v2503_v36 }
 0x134   :  { %v2381_v58 = vpop.permute.xlu1 %602  ;;  %v2383_v59 = vpop.permute.xlu0 %600 }
 0x135   :  { %3766 = vst [vmem:[#allocation105_spill] sm:$0xff] %v2381_v58  ;;  %3767 = vst [vmem:[#allocation106_spill] sm:$0xff] %v2383_v59 }
 0x136   :  { %798 = vrot.lane.b32.xlu1 %v2194_v49, %s1470_s2  ;;  %796 = vrot.lane.b32.xlu0 %v2199_v21, %s1470_s2  ;;  %v2480_v21 = vld [vmem:[%s3615_s0 + $0x4a] sm:$0xf]  ;;  %v2485_v49 = vld [vmem:[%s3615_s0 + $0x42] sm:$0xf] }
 0x137   :  { %3786 = vst [vmem:[#allocation125_spill] sm:$0xff] %v2480_v21  ;;  %3787 = vst [vmem:[#allocation126_spill] sm:$0xff] %v2485_v49 }
 0x138   :  { %v2389_v54 = vpop.permute.xlu1 %606  ;;  %v2391_v55 = vpop.permute.xlu0 %604 }
 0x139   :  { %3768 = vst [vmem:[#allocation107_spill] sm:$0xff] %v2389_v54  ;;  %3769 = vst [vmem:[#allocation108_spill] sm:$0xff] %v2391_v55  ;;  %v2408_v55 = vld [vmem:[%s3615_s0 + $0xa] sm:$0xf]  ;;  %v2413_v54 = vld [vmem:[%s3615_s0 + $0x2] sm:$0xf] }
 0x13a   :  { %802 = vrot.lane.b32.xlu1 %v2212_v32, %s1470_s2  ;;  %800 = vrot.lane.b32.xlu0 %v2217_v46, %s1470_s2  ;;  %3772 = vst [vmem:[#allocation111_spill] sm:$0xff] %v2408_v55  ;;  %3773 = vst [vmem:[#allocation112_spill] sm:$0xff] %v2413_v54  ;;  %v2462_v46 = vld [vmem:[%s3615_s0 + $0x3a] sm:$0xf]  ;;  %v2467_v32 = vld [vmem:[%s3615_s0 + $0x32] sm:$0xf] }
 0x13b   :  { %3782 = vst [vmem:[#allocation121_spill] sm:$0xff] %v2462_v46  ;;  %3783 = vst [vmem:[#allocation122_spill] sm:$0xff] %v2467_v32 }
 0x13c   :  { %v2397_v39 = vpop.permute.xlu1 %610  ;;  %v2399_v58 = vpop.permute.xlu0 %608 }
 0x13d   :  { %3770 = vst [vmem:[#allocation109_spill] sm:$0xff] %v2397_v39  ;;  %3771 = vst [vmem:[#allocation110_spill] sm:$0xff] %v2399_v58  ;;  %v2426_v58 = vld [vmem:[%s3615_s0 + $0x1a] sm:$0xf] }
 0x13e   :  { %806 = vrot.lane.b32.xlu1 %v2230_v47, %s1470_s2  ;;  %804 = vrot.lane.b32.xlu0 %v2235_v17, %s1470_s2  ;;  %3774 = vst [vmem:[#allocation113_spill] sm:$0xff] %v2426_v58 }
 0x140   :  { %v2415_v59 = vpop.permute.xlu1 %614  ;;  %v2417_v39 = vpop.permute.xlu0 %612 }
 0x142   :  { %1010 = vrot.lane.b32.xlu1 %v2408_v55, %s1469_s10  ;;  %1008 = vrot.lane.b32.xlu0 %v2413_v54, %s1469_s10 }
 0x144   :  { %v2433_v35 = vpop.permute.xlu1 %618  ;;  %v2435_v34 = vpop.permute.xlu0 %616 }
 0x145   :  { %3776 = vst [vmem:[#allocation115_spill] sm:$0xff] %v2433_v35  ;;  %3777 = vst [vmem:[#allocation116_spill] sm:$0xff] %v2435_v34  ;;  %v2683_v35 = vld [vmem:[%s3615_s0 + $0xf2] sm:$0xf] }
 0x146   :  { %1014 = vrot.lane.b32.xlu1 %v2426_v58, %s1469_s10  ;;  %1012 = vrot.lane.b32.xlu0 %v2431_v38, %s1469_s10 }
 0x148   :  { %v2451_v17 = vpop.permute.xlu1 %622  ;;  %v2453_v47 = vpop.permute.xlu0 %620 }
 0x149   :  { %3780 = vst [vmem:[#allocation119_spill] sm:$0xff] %v2451_v17  ;;  %3781 = vst [vmem:[#allocation120_spill] sm:$0xff] %v2453_v47  ;;  %v2629_v17 = vld [vmem:[%s3615_s0 + $0xc2] sm:$0xf] }
 0x14a   :  { %1018 = vrot.lane.b32.xlu1 %v2444_v31, %s1469_s10  ;;  %1016 = vrot.lane.b32.xlu0 %v2449_v30, %s1469_s10 }
 0x14c   :  { %v2469_v19 = vpop.permute.xlu1 %626  ;;  %v2471_v18 = vpop.permute.xlu0 %624 }
 0x14d   :  { %3784 = vst [vmem:[#allocation123_spill] sm:$0xff] %v2469_v19  ;;  %3785 = vst [vmem:[#allocation124_spill] sm:$0xff] %v2471_v18  ;;  %v2575_v19 = vld [vmem:[%s3615_s0 + $0x92] sm:$0xf] }
 0x14e   :  { %1022 = vrot.lane.b32.xlu1 %v2462_v46, %s1469_s10  ;;  %1020 = vrot.lane.b32.xlu0 %v2467_v32, %s1469_s10  ;;  %3807 = vst [vmem:[#allocation146_spill] sm:$0xff] %v2575_v19 }
 0x150   :  { %v2487_v15 = vpop.permute.xlu1 %630  ;;  %v2489_v14 = vpop.permute.xlu0 %628 }
 0x151   :  { %3788 = vst [vmem:[#allocation127_spill] sm:$0xff] %v2487_v15  ;;  %3789 = vst [vmem:[#allocation128_spill] sm:$0xff] %v2489_v14  ;;  %v2516_v14 = vld [vmem:[%s3615_s0 + $0x6a] sm:$0xf]  ;;  %v2521_v15 = vld [vmem:[%s3615_s0 + $0x62] sm:$0xf] }
 0x152   :  { %1026 = vrot.lane.b32.xlu1 %v2480_v21, %s1469_s10  ;;  %1024 = vrot.lane.b32.xlu0 %v2485_v49, %s1469_s10  ;;  %3794 = vst [vmem:[#allocation133_spill] sm:$0xff] %v2516_v14  ;;  %3795 = vst [vmem:[#allocation134_spill] sm:$0xff] %v2521_v15 }
 0x154   :  { %v2505_v11 = vpop.permute.xlu1 %634  ;;  %v2507_v10 = vpop.permute.xlu0 %632 }
 0x155   :  { %3792 = vst [vmem:[#allocation131_spill] sm:$0xff] %v2505_v11  ;;  %3793 = vst [vmem:[#allocation132_spill] sm:$0xff] %v2507_v10  ;;  %v2534_v10 = vld [vmem:[%s3615_s0 + $0x7a] sm:$0xf] }
 0x156   :  { %1030 = vrot.lane.b32.xlu1 %v2498_v48, %s1469_s10  ;;  %1028 = vrot.lane.b32.xlu0 %v2503_v36, %s1469_s10  ;;  %3798 = vst [vmem:[#allocation137_spill] sm:$0xff] %v2534_v10 }
 0x158   :  { %v2523_v33 = vpop.permute.xlu1 %638  ;;  %v2525_v11 = vpop.permute.xlu0 %636 }
 0x159   :  { %3796 = vst [vmem:[#allocation135_spill] sm:$0xff] %v2523_v33  ;;  %3797 = vst [vmem:[#allocation136_spill] sm:$0xff] %v2525_v11  ;;  %v2552_v11 = vld [vmem:[%s3615_s0 + $0x8a] sm:$0xf] }
 0x15a   :  { %1034 = vrot.lane.b32.xlu1 %v2516_v14, %s1469_s10  ;;  %1032 = vrot.lane.b32.xlu0 %v2521_v15, %s1469_s10  ;;  %3802 = vst [vmem:[#allocation141_spill] sm:$0xff] %v2552_v11 }
 0x15c   :  { %v2541_v7 = vpop.permute.xlu1 %642  ;;  %v2543_v33 = vpop.permute.xlu0 %640 }
 0x15d   :  { %3800 = vst [vmem:[#allocation139_spill] sm:$0xff] %v2541_v7  ;;  %3801 = vst [vmem:[#allocation140_spill] sm:$0xff] %v2543_v33  ;;  %v2570_v33 = vld [vmem:[%s3615_s0 + $0x9a] sm:$0xf] }
 0x15e   :  { %1038 = vrot.lane.b32.xlu1 %v2534_v10, %s1469_s10  ;;  %1036 = vrot.lane.b32.xlu0 %v2539_v51, %s1469_s10  ;;  %3806 = vst [vmem:[#allocation145_spill] sm:$0xff] %v2570_v33 }
 0x160   :  { %v2559_v18 = vpop.permute.xlu1 %646  ;;  %v2561_v7 = vpop.permute.xlu0 %644 }
 0x161   :  { %3804 = vst [vmem:[#allocation143_spill] sm:$0xff] %v2559_v18  ;;  %3805 = vst [vmem:[#allocation144_spill] sm:$0xff] %v2561_v7  ;;  %v2588_v7 = vld [vmem:[%s3615_s0 + $0xaa] sm:$0xf] }
 0x162   :  { %1042 = vrot.lane.b32.xlu1 %v2552_v11, %s1469_s10  ;;  %1040 = vrot.lane.b32.xlu0 %v2557_v6, %s1469_s10  ;;  %3810 = vst [vmem:[#allocation149_spill] sm:$0xff] %v2588_v7 }
 0x164   :  { %v2577_v50 = vpop.permute.xlu1 %730  ;;  %v2579_v18 = vpop.permute.xlu0 %728 }
 0x165   :  { %3808 = vst [vmem:[#allocation147_spill] sm:$0xff] %v2577_v50  ;;  %3809 = vst [vmem:[#allocation148_spill] sm:$0xff] %v2579_v18  ;;  %v2606_v18 = vld [vmem:[%s3615_s0 + $0xba] sm:$0xf] }
 0x166   :  { %1046 = vrot.lane.b32.xlu1 %v2570_v33, %s1469_s10  ;;  %1044 = vrot.lane.b32.xlu0 %v2575_v19, %s1469_s10 }
 0x168   :  { %v2595_v3 = vpop.permute.xlu1 %734  ;;  %v2597_v50 = vpop.permute.xlu0 %732 }
 0x169   :  { %3812 = vst [vmem:[#allocation151_spill] sm:$0xff] %v2595_v3  ;;  %3813 = vst [vmem:[#allocation152_spill] sm:$0xff] %v2597_v50  ;;  %v2624_v50 = vld [vmem:[%s3615_s0 + $0xca] sm:$0xf] }
 0x16a   :  { %1050 = vrot.lane.b32.xlu1 %v2588_v7, %s1469_s10  ;;  %1048 = vrot.lane.b32.xlu0 %v2593_v61, %s1469_s10 }
 0x16c   :  { %v2613_v47 = vpop.permute.xlu1 %738  ;;  %v2615_v3 = vpop.permute.xlu0 %736 }
 0x16d   :  { %3814 = vst [vmem:[#allocation153_spill] sm:$0xff] %v2613_v47  ;;  %3815 = vst [vmem:[#allocation154_spill] sm:$0xff] %v2615_v3  ;;  %v2642_v3 = vld [vmem:[%s3615_s0 + $0xda] sm:$0xf] }
 0x16e   :  { %1054 = vrot.lane.b32.xlu1 %v2606_v18, %s1469_s10  ;;  %1052 = vrot.lane.b32.xlu0 %v2611_v2, %s1469_s10 }
 0x170   :  { %v2631_v37 = vpop.permute.xlu1 %742  ;;  %v2633_v47 = vpop.permute.xlu0 %740 }
 0x171   :  { %3816 = vst [vmem:[#allocation155_spill] sm:$0xff] %v2631_v37  ;;  %3817 = vst [vmem:[#allocation156_spill] sm:$0xff] %v2633_v47  ;;  %v2660_v47 = vld [vmem:[%s3615_s0 + $0xea] sm:$0xf] }
 0x172   :  { %1058 = vrot.lane.b32.xlu1 %v2624_v50, %s1469_s10  ;;  %1056 = vrot.lane.b32.xlu0 %v2629_v17, %s1469_s10 }
 0x174   :  { %v2649_v62 = vpop.permute.xlu1 %746  ;;  %v2651_v37 = vpop.permute.xlu0 %744 }
 0x175   :  { %3818 = vst [vmem:[#allocation157_spill] sm:$0xff] %v2649_v62  ;;  %3819 = vst [vmem:[#allocation158_spill] sm:$0xff] %v2651_v37  ;;  %v2678_v37 = vld [vmem:[%s3615_s0 + $0xfa] sm:$0xf] }
 0x176   :  { %1062 = vrot.lane.b32.xlu1 %v2642_v3, %s1469_s10  ;;  %1060 = vrot.lane.b32.xlu0 %v2647_v63, %s1469_s10 }
 0x178   :  { %v2667_v34 = vpop.permute.xlu1 %750  ;;  %v2669_v62 = vpop.permute.xlu0 %748 }
 0x179   :  { %3820 = vst [vmem:[#allocation159_spill] sm:$0xff] %v2667_v34  ;;  %3821 = vst [vmem:[#allocation160_spill] sm:$0xff] %v2669_v62  ;;  %v2696_v62 = vld [vmem:[%s3615_s0 + $0x10a] sm:$0xf] }
 0x17a   :  { %1066 = vrot.lane.b32.xlu1 %v2660_v47, %s1469_s10  ;;  %1064 = vrot.lane.b32.xlu0 %v2665_v53, %s1469_s10 }
 0x17c   :  { %v2685_v13 = vpop.permute.xlu1 %754  ;;  %v2687_v34 = vpop.permute.xlu0 %752 }
 0x17d   :  { %3822 = vst [vmem:[#allocation161_spill] sm:$0xff] %v2685_v13  ;;  %3823 = vst [vmem:[#allocation162_spill] sm:$0xff] %v2687_v34  ;;  %v2714_v34 = vld [vmem:[%s3615_s0 + $0x11a] sm:$0xf] }
 0x17e   :  { %1070 = vrot.lane.b32.xlu1 %v2678_v37, %s1469_s10  ;;  %1068 = vrot.lane.b32.xlu0 %v2683_v35, %s1469_s10 }
 0x180   :  { %v2703_v12 = vpop.permute.xlu1 %758  ;;  %v2705_v13 = vpop.permute.xlu0 %756 }
 0x181   :  { %3824 = vst [vmem:[#allocation163_spill] sm:$0xff] %v2703_v12  ;;  %3825 = vst [vmem:[#allocation164_spill] sm:$0xff] %v2705_v13  ;;  %v2732_v13 = vld [vmem:[%s3615_s0 + $0x12a] sm:$0xf] }
 0x182   :  { %1074 = vrot.lane.b32.xlu1 %v2696_v62, %s1469_s10  ;;  %1072 = vrot.lane.b32.xlu0 %v2701_v29, %s1469_s10  ;;  %3828 = vst [vmem:[#allocation167_spill] sm:$0xff] %v2732_v13 }
 0x184   :  { %v2721_v41 = vpop.permute.xlu1 %762  ;;  %v2723_v12 = vpop.permute.xlu0 %760 }
 0x185   :  { %3826 = vst [vmem:[#allocation165_spill] sm:$0xff] %v2721_v41  ;;  %3827 = vst [vmem:[#allocation166_spill] sm:$0xff] %v2723_v12  ;;  %v2750_v12 = vld [vmem:[%s3615_s0 + $0x13a] sm:$0xf] }
 0x186   :  { %1078 = vrot.lane.b32.xlu1 %v2714_v34, %s1469_s10  ;;  %1076 = vrot.lane.b32.xlu0 %v2719_v28, %s1469_s10 }
 0x188   :  { %v2739_v52 = vpop.permute.xlu1 %766  ;;  %v2741_v41 = vpop.permute.xlu0 %764 }
 0x189   :  { %3830 = vst [vmem:[#allocation169_spill] sm:$0xff] %v2739_v52  ;;  %3831 = vst [vmem:[#allocation170_spill] sm:$0xff] %v2741_v41 }
 0x18a   :  { %1082 = vrot.lane.b32.xlu1 %v2732_v13, %s1469_s10  ;;  %1080 = vrot.lane.b32.xlu0 %v2737_v40, %s1469_s10 }
 0x18c   :  { %v2757_v42 = vpop.permute.xlu1 %770  ;;  %v2759_v52 = vpop.permute.xlu0 %768 }
 0x18d   :  { %3833 = vst [vmem:[#allocation172_spill] sm:$0xff] %v2757_v42  ;;  %3834 = vst [vmem:[#allocation173_spill] sm:$0xff] %v2759_v52 }
 0x18e   :  { %1086 = vrot.lane.b32.xlu1 %v2750_v12, %s1469_s10  ;;  %1084 = vrot.lane.b32.xlu0 %v2755_v57, %s1469_s10 }
 0x190   :  { %v2765_v41 = vpop.permute.xlu1 %774  ;;  %v2767_v40 = vpop.permute.xlu0 %772 }
 0x192   :  { %1170 = vrot.lane.b32.xlu1 %v2408_v55, %s1470_s2  ;;  %1168 = vrot.lane.b32.xlu0 %v2413_v54, %s1470_s2 }
 0x194   :  { %v2773_v13 = vpop.permute.xlu1 %778  ;;  %v2775_v42 = vpop.permute.xlu0 %776 }
 0x196   :  { %1174 = vrot.lane.b32.xlu1 %v2426_v58, %s1470_s2  ;;  %1172 = vrot.lane.b32.xlu0 %v2431_v38, %s1470_s2 }
 0x198   :  { %v2781_v52 = vpop.permute.xlu1 %782  ;;  %v2783_v57 = vpop.permute.xlu0 %780 }
 0x19a   :  { %1178 = vrot.lane.b32.xlu1 %v2444_v31, %s1470_s2  ;;  %1176 = vrot.lane.b32.xlu0 %v2449_v30, %s1470_s2 }
 0x19c   :  { %v2789_v54 = vpop.permute.xlu1 %786  ;;  %v2791_v55 = vpop.permute.xlu0 %784 }
 0x19e   :  { %1182 = vrot.lane.b32.xlu1 %v2462_v46, %s1470_s2  ;;  %1180 = vrot.lane.b32.xlu0 %v2467_v32, %s1470_s2 }
 0x1a0   :  { %v2797_v38 = vpop.permute.xlu1 %790  ;;  %v2799_v58 = vpop.permute.xlu0 %788 }
 0x1a2   :  { %1186 = vrot.lane.b32.xlu1 %v2480_v21, %s1470_s2  ;;  %1184 = vrot.lane.b32.xlu0 %v2485_v49, %s1470_s2 }
 0x1a4   :  { %v2805_v30 = vpop.permute.xlu1 %794  ;;  %v2807_v31 = vpop.permute.xlu0 %792 }
 0x1a6   :  { %1190 = vrot.lane.b32.xlu1 %v2498_v48, %s1470_s2  ;;  %1188 = vrot.lane.b32.xlu0 %v2503_v36, %s1470_s2 }
 0x1a8   :  { %v2813_v32 = vpop.permute.xlu1 %798  ;;  %v2815_v46 = vpop.permute.xlu0 %796 }
 0x1aa   :  { %1194 = vrot.lane.b32.xlu1 %v2516_v14, %s1470_s2  ;;  %1192 = vrot.lane.b32.xlu0 %v2521_v15, %s1470_s2 }
 0x1ac   :  { %v2821_v49 = vpop.permute.xlu1 %802  ;;  %v2823_v21 = vpop.permute.xlu0 %800 }
 0x1ae   :  { %1198 = vrot.lane.b32.xlu1 %v2534_v10, %s1470_s2  ;;  %1196 = vrot.lane.b32.xlu0 %v2539_v51, %s1470_s2 }
 0x1b0   :  { %v2829_v36 = vpop.permute.xlu1 %806  ;;  %v2831_v48 = vpop.permute.xlu0 %804 }
 0x1b2   :  { %1202 = vrot.lane.b32.xlu1 %v2552_v11, %s1470_s2  ;;  %1200 = vrot.lane.b32.xlu0 %v2557_v6, %s1470_s2 }
 0x1b4   :  { %v2837_v15 = vpop.permute.xlu1 %1010  ;;  %v2839_v14 = vpop.permute.xlu0 %1008 }
 0x1b5   :  { %3835 = vst [vmem:[#allocation174_spill] sm:$0xff] %v2839_v14 }
 0x1b6   :  { %1206 = vrot.lane.b32.xlu1 %v2570_v33, %s1470_s2  ;;  %1204 = vrot.lane.b32.xlu0 %v2575_v19, %s1470_s2 }
 0x1b8   :  { %v2845_v51 = vpop.permute.xlu1 %1014  ;;  %v2847_v10 = vpop.permute.xlu0 %1012 }
 0x1b9   :  { %3836 = vst [vmem:[#allocation175_spill] sm:$0xff] %v2845_v51  ;;  %3837 = vst [vmem:[#allocation176_spill] sm:$0xff] %v2847_v10  ;;  %v3884_v51 = vld [vmem:[#allocation53_spill] sm:$0xff] }
 0x1ba   :  { %1210 = vrot.lane.b32.xlu1 %v2588_v7, %s1470_s2  ;;  %1208 = vrot.lane.b32.xlu0 %v2593_v61, %s1470_s2 }
 0x1bc   :  { %v2853_v6 = vpop.permute.xlu1 %1018  ;;  %v2855_v11 = vpop.permute.xlu0 %1016 }
 0x1bd   :  { %3838 = vst [vmem:[#allocation177_spill] sm:$0xff] %v2853_v6  ;;  %3839 = vst [vmem:[#allocation178_spill] sm:$0xff] %v2855_v11  ;;  %v270_v6 = vadd.f32 %v1897_v1, %v1643_v23  ;;  %v272_v23 = vadd.f32 %v1915_v5, %v1657_v25  ;;  %v274_v25 = vadd.f32 %v1933_v9, %v1671_v27 }
 0x1be   :  { %1214 = vrot.lane.b32.xlu1 %v2606_v18, %s1470_s2  ;;  %1212 = vrot.lane.b32.xlu0 %v2611_v2, %s1470_s2 }
 0x1bf   :  { %v432_v1 = vadd.f32 %v2255_v16, %v272_v23  ;;  %v3855_v16 = vld [vmem:[#allocation167_spill] sm:$0xff]  ;;  %v1416_v23 = vld [vmem:[%s3615_s0] sm:$0xf] }
 0x1c0   :  { %v2861_v19 = vpop.permute.xlu1 %1022  ;;  %v2863_v33 = vpop.permute.xlu0 %1020 }
 0x1c1   :  { %3840 = vst [vmem:[#allocation179_spill] sm:$0xff] %v2861_v19  ;;  %3841 = vst [vmem:[#allocation180_spill] sm:$0xff] %v2863_v33 }
 0x1c2   :  { %1218 = vrot.lane.b32.xlu1 %v2624_v50, %s1470_s2  ;;  %1216 = vrot.lane.b32.xlu0 %v2629_v17, %s1470_s2 }
 0x1c4   :  { %v2869_v61 = vpop.permute.xlu1 %1026  ;;  %v2871_v7 = vpop.permute.xlu0 %1024 }
 0x1c5   :  { %3842 = vst [vmem:[#allocation181_spill] sm:$0xff] %v2869_v61  ;;  %3843 = vst [vmem:[#allocation182_spill] sm:$0xff] %v2871_v7 }
 0x1c6   :  { %1222 = vrot.lane.b32.xlu1 %v2642_v3, %s1470_s2  ;;  %1220 = vrot.lane.b32.xlu0 %v2647_v63, %s1470_s2 }
 0x1c8   :  { %v2877_v11 = vpop.permute.xlu1 %1030  ;;  %v2879_v19 = vpop.permute.xlu0 %1028 }
 0x1c9   :  { %3844 = vst [vmem:[#allocation183_spill] sm:$0xff] %v2877_v11  ;;  %3845 = vst [vmem:[#allocation184_spill] sm:$0xff] %v2879_v19  ;;  %v271_v19 = vadd.f32 %v1895_v0, %v1638_v22  ;;  %v273_v22 = vadd.f32 %v1913_v4, %v1652_v24  ;;  %v275_v0 = vadd.f32 %v1931_v8, %v1666_v26 }
 0x1ca   :  { %1226 = vrot.lane.b32.xlu1 %v2660_v47, %s1470_s2  ;;  %1224 = vrot.lane.b32.xlu0 %v2665_v53, %s1470_s2 }
 0x1cb   :  { %v435_v5 = vadd.f32 %v2261_v45, %v275_v0  ;;  %v3860_v0 = vld [vmem:[#allocation5_spill] sm:$0xff] }
 0x1cc   :  { %v2885_v33 = vpop.permute.xlu1 %1034  ;;  %v2887_v61 = vpop.permute.xlu0 %1032 }
 0x1cd   :  { %3846 = vst [vmem:[#allocation185_spill] sm:$0xff] %v2885_v33  ;;  %3847 = vst [vmem:[#allocation186_spill] sm:$0xff] %v2887_v61  ;;  %v431_v61 = vadd.f32 %v2245_v20, %v271_v19  ;;  %v430_v33 = vadd.f32 %v2247_v44, %v270_v6  ;;  %v433_v44 = vadd.f32 %v2253_v43, %v273_v22  ;;  %v3854_v43 = vld [vmem:[#allocation76_spill] sm:$0xff] }
 0x1ce   :  { %1230 = vrot.lane.b32.xlu1 %v2678_v37, %s1470_s2  ;;  %1228 = vrot.lane.b32.xlu0 %v2683_v35, %s1470_s2  ;;  %v434_v19 = vadd.f32 %v3854_v43, %v274_v25  ;;  %v3864_v25 = vld [vmem:[#allocation27_spill] sm:$0xff]  ;;  %v1417_v43 = vld [vmem:[%s3615_s0 + $0x18] sm:$0xf] }
 0x1cf   :  { %v511_v20 = vadd.f32 %v2086_v56, %v431_v61  ;;  %v510_v24 = vadd.f32 %v2091_v60, %v430_v33  ;;  %v3856_v56 = vld [vmem:[#allocation168_spill] sm:$0xff]  ;;  %v3858_v61 = vld [vmem:[#allocation45_spill] sm:$0xff] }
 0x1d0   :  { %v2893_v7 = vpop.permute.xlu1 %1038  ;;  %v2895_v11 = vpop.permute.xlu0 %1036  ;;  %v3857_v60 = vld [vmem:[#allocation44_spill] sm:$0xff]  ;;  %v512_v9 = vadd.f32 %v3858_v61, %v432_v1  ;;  %v3862_v1 = vld [vmem:[#allocation26_spill] sm:$0xff] }
 0x1d1   :  { %3848 = vst [vmem:[#allocation187_spill] sm:$0xff] %v2893_v7  ;;  %3849 = vst [vmem:[#allocation188_spill] sm:$0xff] %v2895_v11  ;;  %v711_v8 = vadd.f32 %v2415_v59, %v511_v20  ;;  %v710_v6 = vadd.f32 %v2417_v39, %v510_v24  ;;  %v513_v27 = vadd.f32 %v3857_v60, %v433_v44  ;;  %v1415_v39 = vld [vmem:[%s3615_s0 + $0x10] sm:$0xf]  ;;  %v3861_v44 = vld [vmem:[#allocation2_spill] sm:$0xff] }
 0x1d2   :  { %1234 = vrot.lane.b32.xlu1 %v2696_v62, %s1470_s2  ;;  %1232 = vrot.lane.b32.xlu0 %v2701_v29, %s1470_s2  ;;  %v3859_v59 = vld [vmem:[#allocation4_spill] sm:$0xff]  ;;  %v2953_v20 = vadd.f32 %v1416_v23, %v3860_v0  ;;  %v277_v24 = vadd.f32 %v3862_v1, %v3861_v44  ;;  %v3867_v60 = vld [vmem:[#allocation6_spill] sm:$0xff]  ;;  %v3871_v1 = vld [vmem:[#allocation77_spill] sm:$0xff] }
 0x1d3   :  { %v871_v33 = vadd.f32 %v2765_v41, %v711_v8  ;;  %v870_v45 = vadd.f32 %v2767_v40, %v710_v6  ;;  %v2947_v22 = vadd.f32 %v1415_v39, %v3859_v59  ;;  %v3863_v41 = vld [vmem:[#allocation3_spill] sm:$0xff]  ;;  %v2967_v61 = vadd.f32 %v1417_v43, %v3867_v60  ;;  %v3869_v23 = vld [vmem:[#allocation116_spill] sm:$0xff] }
 0x1d4   :  { %v2907_v10 = vpop.permute.xlu1 %1042  ;;  %v2909_v7 = vpop.permute.xlu0 %1040  ;;  %v276_v40 = vadd.f32 %v3864_v25, %v3863_v41  ;;  %v3868_v39 = vld [vmem:[#allocation115_spill] sm:$0xff]  ;;  %v712_v0 = vadd.f32 %v3869_v23, %v512_v9  ;;  %v3872_v41 = vld [vmem:[#allocation78_spill] sm:$0xff] }
 0x1d5   :  { %3850 = vst [vmem:[#allocation189_spill] sm:$0xff] %v2907_v10  ;;  %3851 = vst [vmem:[#allocation190_spill] sm:$0xff] %v2909_v7  ;;  %v713_v59 = vadd.f32 %v3868_v39, %v513_v27  ;;  %v951_v9 = vadd.f32 %v2606_v18, %v871_v33  ;;  %v1421_v18 = vld [vmem:[%s3615_s0 + $0xf0] sm:$0xf]  ;;  %v3878_v33 = vld [vmem:[#allocation29_spill] sm:$0xff] }
 0x1d6   :  { %1238 = vrot.lane.b32.xlu1 %v2714_v34, %s1470_s2  ;;  %1236 = vrot.lane.b32.xlu0 %v2719_v28, %s1470_s2  ;;  %v436_v25 = vadd.f32 %v3872_v41, %v276_v40  ;;  %v872_v27 = vadd.f32 %v2775_v42, %v712_v0  ;;  %v1419_v40 = vld [vmem:[%s3615_s0 + $0x28] sm:$0xf]  ;;  %v1420_v42 = vld [vmem:[%s3615_s0 + $0xf8] sm:$0xf]  ;;  %v3882_v10 = vld [vmem:[#allocation80_spill] sm:$0xff] }
 0x1d7   :  { %v873_v43 = vadd.f32 %v2773_v13, %v713_v59  ;;  %v3877_v13 = vld [vmem:[#allocation28_spill] sm:$0xff]  ;;  %v3879_v23 = vld [vmem:[#allocation119_spill] sm:$0xff] }
 0x1d8   :  { %v2927_v4 = vpop.permute.xlu1 %1046  ;;  %v2929_v26 = vpop.permute.xlu0 %1044  ;;  %v516_v14 = vadd.f32 %v3884_v51, %v436_v25  ;;  %v3886_v51 = vld [vmem:[#allocation10_spill] sm:$0xff]  ;;  %v3888_v25 = vld [vmem:[#allocation31_spill] sm:$0xff] }
 0x1d9   :  { %3852 = vst [vmem:[#allocation191_spill] sm:$0xff] %v2927_v4  ;;  %3853 = vst [vmem:[#allocation192_spill] sm:$0xff] %v2929_v26  ;;  %v3870_v26 = vld [vmem:[#allocation48_spill] sm:$0xff]  ;;  %v437_v4 = vadd.f32 %v3871_v1, %v277_v24  ;;  %v3875_v24 = vld [vmem:[#allocation7_spill] sm:$0xff] }
 0x1da   :  { %1242 = vrot.lane.b32.xlu1 %v3855_v16, %s1470_s2  ;;  %1240 = vrot.lane.b32.xlu0 %v3856_v56, %s1470_s2  ;;  %v515_v44 = vadd.f32 %v3870_v26, %v435_v5  ;;  %v950_v26 = vadd.f32 %v2611_v2, %v870_v45  ;;  %v1418_v5 = vld [vmem:[%s3615_s0 + $0x8] sm:$0xf]  ;;  %v279_v2 = vadd.f32 %v1420_v42, %v3877_v13  ;;  %v3880_v1 = vld [vmem:[#allocation120_spill] sm:$0xff] }
 0x1db   :  { %v278_v45 = vadd.f32 %v1421_v18, %v3878_v33  ;;  %v3883_v13 = vld [vmem:[#allocation52_spill] sm:$0xff] }
 0x1dc   :  { %v2959_v8 = vpop.permute.xlu1 %1050  ;;  %v2961_v6 = vpop.permute.xlu0 %1048  ;;  %v715_v0 = vadd.f32 %v3879_v23, %v515_v44  ;;  %v517_v11 = vadd.f32 %v3883_v13, %v437_v4  ;;  %v953_v44 = vadd.f32 %v2624_v50, %v873_v43  ;;  %v1424_v50 = vld [vmem:[%s3615_s0 + $0x108] sm:$0xf]  ;;  %v3890_v23 = vld [vmem:[#allocation124_spill] sm:$0xff] }
 0x1dd   :  { %3865 = vst [vmem:[#allocation76_spill] sm:$0xff] %v2959_v8  ;;  %3866 = vst [vmem:[#allocation167_spill] sm:$0xff] %v2961_v6  ;;  %v3873_v8 = vld [vmem:[#allocation49_spill] sm:$0xff]  ;;  %v3874_v6 = vld [vmem:[#allocation171_spill] sm:$0xff]  ;;  %v438_v42 = vadd.f32 %v3882_v10, %v278_v45 }
 0x1de   :  { %v514_v7 = vadd.f32 %v3873_v8, %v434_v19  ;;  %1246 = vrot.lane.b32.xlu1 %v2750_v12, %s1470_s2  ;;  %1244 = vrot.lane.b32.xlu0 %v3874_v6, %s1470_s2  ;;  %v2987_v19 = vadd.f32 %v1418_v5, %v3875_v24  ;;  %v3876_v8 = vld [vmem:[#allocation8_spill] sm:$0xff]  ;;  %v875_v18 = vadd.f32 %v2781_v52, %v715_v0  ;;  %v1423_v10 = vld [vmem:[%s3615_s0 + $0x38] sm:$0xf]  ;;  %v3887_v52 = vld [vmem:[#allocation30_spill] sm:$0xff] }
 0x1df   :  { %v2993_v60 = vadd.f32 %v1419_v40, %v3876_v8  ;;  %v3881_v40 = vld [vmem:[#allocation79_spill] sm:$0xff]  ;;  %v3027_v4 = vadd.f32 %v1423_v10, %v3886_v51  ;;  %v716_v0 = vadd.f32 %v3890_v23, %v516_v14  ;;  %v3893_v10 = vld [vmem:[#allocation56_spill] sm:$0xff] }
 0x1e0   :  { %v1055_v39 = vpop.permute.xlu1 %1054  ;;  %v1053_v59 = vpop.permute.xlu0 %1052  ;;  %v714_v41 = vadd.f32 %v3880_v1, %v514_v7  ;;  %v439_v8 = vadd.f32 %v3881_v40, %v279_v2  ;;  %v952_v7 = vadd.f32 %v2629_v17, %v872_v27  ;;  %v1425_v17 = vld [vmem:[%s3615_s0 + $0x100] sm:$0xf]  ;;  %v3891_v40 = vld [vmem:[#allocation81_spill] sm:$0xff]  ;;  %v3900_v23 = vld [vmem:[#allocation128_spill] sm:$0xff] }
 0x1e1   :  { %v3005_v5 = vadd.f32 %v1055_v39, %v951_v9  ;;  %v3007_v24 = vadd.f32 %v1053_v59, %v950_v26  ;;  %v1422_v9 = vld [vmem:[%s3615_s0 + $0x20] sm:$0xf]  ;;  %v3885_v26 = vld [vmem:[#allocation9_spill] sm:$0xff]  ;;  %v280_v43 = vadd.f32 %v1425_v17, %v3888_v25  ;;  %v3889_v39 = vld [vmem:[#allocation123_spill] sm:$0xff]  ;;  %v876_v25 = vadd.f32 %v2791_v55, %v716_v0 }
 0x1e2   :  { %v874_v33 = vadd.f32 %v2783_v57, %v714_v41  ;;  %v3021_v2 = vadd.f32 %v1422_v9, %v3885_v26  ;;  %v281_v57 = vadd.f32 %v1424_v50, %v3887_v52  ;;  %v717_v59 = vadd.f32 %v3889_v39, %v517_v11  ;;  %v3892_v9 = vld [vmem:[#allocation82_spill] sm:$0xff]  ;;  %v3894_v50 = vld [vmem:[#allocation57_spill] sm:$0xff]  ;;  %v1429_v55 = vld [vmem:[%s3615_s0 + $0x110] sm:$0xf] }
 0x1e3   :  { %v440_v26 = vadd.f32 %v3892_v9, %v280_v43  ;;  %v519_v51 = vadd.f32 %v3893_v10, %v439_v8  ;;  %v518_v52 = vadd.f32 %v3894_v50, %v438_v42  ;;  %v955_v11 = vadd.f32 %v2642_v3, %v875_v18  ;;  %v1427_v8 = vld [vmem:[%s3615_s0 + $0x48] sm:$0xf]  ;;  %v3896_v42 = vld [vmem:[#allocation12_spill] sm:$0xff]  ;;  %v1428_v3 = vld [vmem:[%s3615_s0 + $0x118] sm:$0xf] }
 0x1e4   :  { %v1059_v27 = vpop.permute.xlu1 %1058  ;;  %v1057_v45 = vpop.permute.xlu0 %1056  ;;  %v441_v13 = vadd.f32 %v3891_v40, %v281_v57  ;;  %v877_v17 = vadd.f32 %v2789_v54, %v717_v59  ;;  %v954_v14 = vadd.f32 %v2647_v63, %v874_v33  ;;  %v3061_v43 = vadd.f32 %v1427_v8, %v3896_v42  ;;  %v3897_v54 = vld [vmem:[#allocation32_spill] sm:$0xff]  ;;  %v3898_v18 = vld [vmem:[#allocation33_spill] sm:$0xff]  ;;  %v3899_v39 = vld [vmem:[#allocation127_spill] sm:$0xff] }
 0x1e5   :  { %v3039_v1 = vadd.f32 %v1059_v27, %v953_v44  ;;  %v3041_v41 = vadd.f32 %v1057_v45, %v952_v7  ;;  %v1426_v44 = vld [vmem:[%s3615_s0 + $0x30] sm:$0xf]  ;;  %v3895_v7 = vld [vmem:[#allocation11_spill] sm:$0xff]  ;;  %v283_v63 = vadd.f32 %v1428_v3, %v3897_v54  ;;  %v282_v33 = vadd.f32 %v1429_v55, %v3898_v18  ;;  %v3904_v3 = vld [vmem:[#allocation61_spill] sm:$0xff] }
 0x1e6   :  { %v3055_v57 = vadd.f32 %v1426_v44, %v3895_v7  ;;  %v719_v59 = vadd.f32 %v3899_v39, %v519_v51  ;;  %v718_v0 = vadd.f32 %v3900_v23, %v518_v52  ;;  %v3901_v10 = vld [vmem:[#allocation83_spill] sm:$0xff]  ;;  %v3902_v44 = vld [vmem:[#allocation84_spill] sm:$0xff]  ;;  %v520_v54 = vadd.f32 %v3904_v3, %v440_v26  ;;  %v3906_v26 = vld [vmem:[#allocation14_spill] sm:$0xff] }
 0x1e7   :  { %v443_v50 = vadd.f32 %v3901_v10, %v283_v63  ;;  %v442_v7 = vadd.f32 %v3902_v44, %v282_v33  ;;  %v3903_v8 = vld [vmem:[#allocation60_spill] sm:$0xff]  ;;  %v957_v51 = vadd.f32 %v2660_v47, %v877_v17  ;;  %v956_v52 = vadd.f32 %v2665_v53, %v876_v25  ;;  %v1432_v47 = vld [vmem:[%s3615_s0 + $0x128] sm:$0xf] }
 0x1e8   :  { %v1063_v27 = vpop.permute.xlu1 %1062  ;;  %v1061_v45 = vpop.permute.xlu0 %1060  ;;  %v521_v42 = vadd.f32 %v3903_v8, %v441_v13  ;;  %v879_v55 = vadd.f32 %v2797_v38, %v719_v59  ;;  %v878_v18 = vadd.f32 %v2799_v58, %v718_v0  ;;  %v1431_v13 = vld [vmem:[%s3615_s0 + $0x58] sm:$0xf]  ;;  %v3907_v38 = vld [vmem:[#allocation34_spill] sm:$0xff]  ;;  %v3908_v17 = vld [vmem:[#allocation35_spill] sm:$0xff] }
 0x1e9   :  { %v3073_v40 = vadd.f32 %v1063_v27, %v955_v11  ;;  %v3075_v9 = vadd.f32 %v1061_v45, %v954_v14  ;;  %v1430_v11 = vld [vmem:[%s3615_s0 + $0x40] sm:$0xf]  ;;  %v3905_v14 = vld [vmem:[#allocation13_spill] sm:$0xff]  ;;  %v3095_v33 = vadd.f32 %v1431_v13, %v3906_v26  ;;  %v285_v53 = vadd.f32 %v1432_v47, %v3907_v38  ;;  %v3909_v39 = vld [vmem:[#allocation131_spill] sm:$0xff] }
 0x1ea   :  { %v3089_v63 = vadd.f32 %v1430_v11, %v3905_v14  ;;  %v1433_v58 = vld [vmem:[%s3615_s0 + $0x120] sm:$0xf]  ;;  %v721_v59 = vadd.f32 %v3909_v39, %v521_v42  ;;  %v3910_v23 = vld [vmem:[#allocation132_spill] sm:$0xff]  ;;  %v3911_v8 = vld [vmem:[#allocation85_spill] sm:$0xff]  ;;  %v959_v42 = vadd.f32 %v2678_v37, %v879_v55 }
 0x1eb   :  { %v284_v25 = vadd.f32 %v1433_v58, %v3908_v17  ;;  %v720_v0 = vadd.f32 %v3910_v23, %v520_v54  ;;  %v445_v3 = vadd.f32 %v3911_v8, %v285_v53  ;;  %v3912_v11 = vld [vmem:[#allocation86_spill] sm:$0xff]  ;;  %v3913_v13 = vld [vmem:[#allocation64_spill] sm:$0xff]  ;;  %v3914_v47 = vld [vmem:[#allocation65_spill] sm:$0xff]  ;;  %v958_v54 = vadd.f32 %v2683_v35, %v878_v18 }
 0x1ec   :  { %v1067_v27 = vpop.permute.xlu1 %1066  ;;  %v1065_v45 = vpop.permute.xlu0 %1064  ;;  %v523_v26 = vadd.f32 %v3913_v13, %v443_v50  ;;  %v522_v38 = vadd.f32 %v3914_v47, %v442_v7  ;;  %v881_v58 = vadd.f32 %v2805_v30, %v721_v59  ;;  %v1435_v50 = vld [vmem:[%s3615_s0 + $0x68] sm:$0xf]  ;;  %v3916_v7 = vld [vmem:[#allocation16_spill] sm:$0xff]  ;;  %v1436_v37 = vld [vmem:[%s3615_s0 + $0x138] sm:$0xf] }
 0x1ed   :  { %v3107_v10 = vadd.f32 %v1067_v27, %v957_v51  ;;  %v3109_v44 = vadd.f32 %v1065_v45, %v956_v52  ;;  %v444_v14 = vadd.f32 %v3912_v11, %v284_v25  ;;  %v880_v17 = vadd.f32 %v2807_v31, %v720_v0  ;;  %v1434_v51 = vld [vmem:[%s3615_s0 + $0x50] sm:$0xf]  ;;  %v3915_v52 = vld [vmem:[#allocation15_spill] sm:$0xff]  ;;  %v3918_v55 = vld [vmem:[#allocation37_spill] sm:$0xff] }
 0x1ee   :  { %v3123_v53 = vadd.f32 %v1434_v51, %v3915_v52  ;;  %v3129_v25 = vadd.f32 %v1435_v50, %v3916_v7  ;;  %v3917_v30 = vld [vmem:[#allocation36_spill] sm:$0xff]  ;;  %v3919_v39 = vld [vmem:[#allocation135_spill] sm:$0xff] }
 0x1ef   :  { %v287_v31 = vadd.f32 %v1436_v37, %v3917_v30  ;;  %v1437_v35 = vld [vmem:[%s3615_s0 + $0x130] sm:$0xf]  ;;  %v723_v59 = vadd.f32 %v3919_v39, %v523_v26  ;;  %v3921_v13 = vld [vmem:[#allocation87_spill] sm:$0xff]  ;;  %v3924_v37 = vld [vmem:[#allocation69_spill] sm:$0xff]  ;;  %v961_v26 = vadd.f32 %v2696_v62, %v881_v58 }
 0x1f0   :  { %v286_v18 = vadd.f32 %v1437_v35, %v3918_v55  ;;  %v1071_v27 = vpop.permute.xlu1 %1070  ;;  %v1069_v45 = vpop.permute.xlu0 %1068  ;;  %v3920_v23 = vld [vmem:[#allocation136_spill] sm:$0xff]  ;;  %v524_v30 = vadd.f32 %v3924_v37, %v444_v14  ;;  %v3926_v14 = vld [vmem:[#allocation18_spill] sm:$0xff]  ;;  %v3928_v62 = vld [vmem:[#allocation39_spill] sm:$0xff] }
 0x1f1   :  { %v722_v0 = vadd.f32 %v3920_v23, %v522_v38  ;;  %v3141_v8 = vadd.f32 %v1071_v27, %v959_v42  ;;  %v3143_v11 = vadd.f32 %v1069_v45, %v958_v54  ;;  %v447_v47 = vadd.f32 %v3921_v13, %v287_v31  ;;  %v3922_v51 = vld [vmem:[#allocation88_spill] sm:$0xff]  ;;  %v1438_v42 = vld [vmem:[%s3615_s0 + $0x60] sm:$0xf]  ;;  %v3925_v54 = vld [vmem:[#allocation17_spill] sm:$0xff] }
 0x1f2   :  { %v446_v52 = vadd.f32 %v3922_v51, %v286_v18  ;;  %v3923_v50 = vld [vmem:[#allocation68_spill] sm:$0xff]  ;;  %v883_v35 = vadd.f32 %v2813_v32, %v723_v59  ;;  %v960_v38 = vadd.f32 %v2701_v29, %v880_v17  ;;  %v3157_v31 = vadd.f32 %v1438_v42, %v3925_v54  ;;  %v3929_v27 = vld [vmem:[#allocation139_spill] sm:$0xff] }
 0x1f3   :  { %v525_v7 = vadd.f32 %v3923_v50, %v445_v3  ;;  %v882_v55 = vadd.f32 %v2815_v46, %v722_v0  ;;  %v1439_v3 = vld [vmem:[%s3615_s0 + $0x78] sm:$0xf]  ;;  %v3927_v46 = vld [vmem:[#allocation38_spill] sm:$0xff]  ;;  %v408_v29 = vadd.f32 %v3928_v62, %v2953_v20  ;;  %v3930_v39 = vld [vmem:[#allocation140_spill] sm:$0xff] }
 0x1f4   :  { %v3163_v18 = vadd.f32 %v1439_v3, %v3926_v14  ;;  %v409_v32 = vadd.f32 %v3927_v46, %v2987_v19  ;;  %v1075_v58 = vpop.permute.xlu1 %1074  ;;  %v1073_v17 = vpop.permute.xlu0 %1072  ;;  %v724_v59 = vadd.f32 %v3930_v39, %v524_v30  ;;  %v1440_v13 = vld [vmem:[%s3615_s0 + $0x70] sm:$0xf]  ;;  %v3931_v51 = vld [vmem:[#allocation19_spill] sm:$0xff]  ;;  %v963_v3 = vadd.f32 %v2714_v34, %v883_v35 }
 0x1f5   :  { %v725_v45 = vadd.f32 %v3929_v27, %v525_v7  ;;  %v3171_v23 = vadd.f32 %v1075_v58, %v961_v26  ;;  %v3173_v0 = vadd.f32 %v1073_v17, %v960_v38  ;;  %v3179_v50 = vadd.f32 %v1440_v13, %v3931_v51  ;;  %v1441_v20 = vld [vmem:[%s3615_s0 + $0x88] sm:$0xf]  ;;  %v3932_v19 = vld [vmem:[#allocation20_spill] sm:$0xff]  ;;  %v3934_v26 = vld [vmem:[#allocation73_spill] sm:$0xff] }
 0x1f6   :  { %v3185_v37 = vadd.f32 %v1441_v20, %v3932_v19  ;;  %v3933_v7 = vld [vmem:[#allocation72_spill] sm:$0xff]  ;;  %v526_v42 = vadd.f32 %v3934_v26, %v446_v52  ;;  %v884_v54 = vadd.f32 %v2823_v21, %v724_v59  ;;  %v962_v14 = vadd.f32 %v2719_v28, %v882_v55  ;;  %v3936_v58 = vld [vmem:[#allocation41_spill] sm:$0xff]  ;;  %v3937_v35 = vld [vmem:[#allocation143_spill] sm:$0xff] }
 0x1f7   :  { %v527_v30 = vadd.f32 %v3933_v7, %v447_v47  ;;  %v885_v38 = vadd.f32 %v2821_v49, %v725_v45  ;;  %v3935_v46 = vld [vmem:[#allocation40_spill] sm:$0xff]  ;;  %v410_v17 = vadd.f32 %v3936_v58, %v2947_v22  ;;  %v1442_v47 = vld [vmem:[%s3615_s0 + $0x9] sm:$0xf]  ;;  %v1443_v49 = vld [vmem:[%s3615_s0 + $0x1] sm:$0xf] }
 0x1f8   :  { %v411_v62 = vadd.f32 %v3935_v46, %v2967_v61  ;;  %v489_v27 = vadd.f32 %v1442_v47, %v409_v32  ;;  %v488_v21 = vadd.f32 %v1443_v49, %v408_v29  ;;  %v1079_v52 = vpop.permute.xlu1 %1078  ;;  %v1077_v34 = vpop.permute.xlu0 %1076  ;;  %v3938_v55 = vld [vmem:[#allocation144_spill] sm:$0xff]  ;;  %v1444_v22 = vld [vmem:[%s3615_s0 + $0x80] sm:$0xf]  ;;  %v3939_v32 = vld [vmem:[#allocation21_spill] sm:$0xff] }
 0x1f9   :  { %v727_v28 = vadd.f32 %v3937_v35, %v527_v30  ;;  %v726_v45 = vadd.f32 %v3938_v55, %v526_v42  ;;  %v3205_v61 = vadd.f32 %v1079_v52, %v963_v3  ;;  %v3207_v39 = vadd.f32 %v1077_v34, %v962_v14  ;;  %v1445_v29 = vld [vmem:[%s3615_s0 + $0x98] sm:$0xf]  ;;  %v3940_v13 = vld [vmem:[#allocation22_spill] sm:$0xff]  ;;  %v3944_v47 = vld [vmem:[#allocation43_spill] sm:$0xff] }
 0x1fa   :  { %v3213_v59 = vadd.f32 %v1444_v22, %v3939_v32  ;;  %v3219_v51 = vadd.f32 %v1445_v29, %v3940_v13  ;;  %v3941_v20 = vld [vmem:[#allocation89_spill] sm:$0xff]  ;;  %v3942_v7 = vld [vmem:[#allocation90_spill] sm:$0xff]  ;;  %v965_v3 = vadd.f32 %v3855_v16, %v885_v38  ;;  %v964_v14 = vadd.f32 %v3856_v56, %v884_v54  ;;  %v3945_v38 = vld [vmem:[#allocation147_spill] sm:$0xff] }
 0x1fb   :  { %v689_v19 = vadd.f32 %v3941_v20, %v489_v27  ;;  %v688_v30 = vadd.f32 %v3942_v7, %v488_v21  ;;  %v887_v26 = vadd.f32 %v2829_v36, %v727_v28  ;;  %v886_v42 = vadd.f32 %v2831_v48, %v726_v45  ;;  %v3943_v46 = vld [vmem:[#allocation42_spill] sm:$0xff]  ;;  %v1446_v27 = vld [vmem:[%s3615_s0 + $0x19] sm:$0xf]  ;;  %v1447_v36 = vld [vmem:[%s3615_s0 + $0x11] sm:$0xf] }
 0x1fc   :  { %v413_v58 = vadd.f32 %v3943_v46, %v2993_v60  ;;  %v412_v49 = vadd.f32 %v3944_v47, %v3021_v2  ;;  %v491_v52 = vadd.f32 %v1446_v27, %v411_v62  ;;  %v490_v48 = vadd.f32 %v1447_v36, %v410_v17  ;;  %v1083_v21 = vpop.permute.xlu1 %1082  ;;  %v1081_v16 = vpop.permute.xlu0 %1080  ;;  %v3946_v54 = vld [vmem:[#allocation148_spill] sm:$0xff]  ;;  %v3947_v2 = vld [vmem:[#allocation46_spill] sm:$0xff]  ;;  %v3948_v62 = vld [vmem:[#allocation47_spill] sm:$0xff] }
 0x1fd   :  { %v849_v56 = vadd.f32 %v3945_v38, %v689_v19  ;;  %v848_v34 = vadd.f32 %v3946_v54, %v688_v30  ;;  %v3239_v60 = vadd.f32 %v1083_v21, %v965_v3  ;;  %v3241_v35 = vadd.f32 %v1081_v16, %v964_v14  ;;  %v3949_v45 = vld [vmem:[#allocation91_spill] sm:$0xff]  ;;  %v3950_v32 = vld [vmem:[#allocation92_spill] sm:$0xff]  ;;  %v1451_v46 = vld [vmem:[%s3615_s0 + $0x21] sm:$0xf] }
 0x1fe   :  { %v415_v28 = vadd.f32 %v3947_v2, %v3027_v4  ;;  %v414_v55 = vadd.f32 %v3948_v62, %v3055_v57  ;;  %v691_v22 = vadd.f32 %v3949_v45, %v491_v52  ;;  %v690_v17 = vadd.f32 %v3950_v32, %v490_v48  ;;  %v1448_v29 = vld [vmem:[%s3615_s0 + $0x90] sm:$0xf]  ;;  %v3951_v13 = vld [vmem:[#allocation23_spill] sm:$0xff]  ;;  %v3957_v2 = vld [vmem:[#allocation25_spill] sm:$0xff] }
 0x1ff   :  { %v3253_v20 = vadd.f32 %v1448_v29, %v3951_v13  ;;  %v1449_v19 = vld [vmem:[%s3615_s0 + $0xa8] sm:$0xf]  ;;  %v3952_v7 = vld [vmem:[#allocation24_spill] sm:$0xff]  ;;  %v967_v57 = vadd.f32 %v2750_v12, %v887_v26  ;;  %v966_v30 = vadd.f32 %v3874_v6, %v886_v42  ;;  %v492_v47 = vadd.f32 %v1451_v46, %v412_v49  ;;  %v3958_v62 = vld [vmem:[#allocation50_spill] sm:$0xff] }
 0x200   :  { %v3259_v4 = vadd.f32 %v1449_v19, %v3952_v7  ;;  %v1450_v3 = vld [vmem:[%s3615_s0 + $0x29] sm:$0xf]  ;;  %v3954_v36 = vld [vmem:[#allocation152_spill] sm:$0xff]  ;;  %v1087_v21 = vpop.permute.xlu1 %1086  ;;  %v1085_v16 = vpop.permute.xlu0 %1084  ;;  %v417_v45 = vadd.f32 %v3958_v62, %v3061_v43  ;;  %v3960_v13 = vld [vmem:[#allocation94_spill] sm:$0xff] }
 0x201   :  { %v493_v14 = vadd.f32 %v1450_v3, %v413_v58  ;;  %v3953_v27 = vld [vmem:[#allocation151_spill] sm:$0xff]  ;;  %v850_v48 = vadd.f32 %v3954_v36, %v690_v17  ;;  %v3956_v26 = vld [vmem:[#allocation112_spill] sm:$0xff]  ;;  %v3273_v42 = vadd.f32 %v1087_v21, %v967_v57  ;;  %v3275_v54 = vadd.f32 %v1085_v16, %v966_v30  ;;  %v1452_v58 = vld [vmem:[%s3615_s0 + $0xa0] sm:$0xf] }
 0x202   :  { %v851_v52 = vadd.f32 %v3953_v27, %v691_v22  ;;  %v3955_v38 = vld [vmem:[#allocation111_spill] sm:$0xff]  ;;  %v928_v6 = vadd.f32 %v3956_v26, %v848_v34  ;;  %v3281_v49 = vadd.f32 %v1452_v58, %v3957_v2  ;;  %v1454_v34 = vld [vmem:[%s3615_s0 + $0x31] sm:$0xf]  ;;  %v3959_v17 = vld [vmem:[#allocation93_spill] sm:$0xff]  ;;  %v692_v19 = vadd.f32 %v3960_v13, %v492_v47 }
 0x203   :  { %v929_v12 = vadd.f32 %v3955_v38, %v849_v56  ;;  %v1453_v56 = vld [vmem:[%s3615_s0 + $0x39] sm:$0xf]  ;;  %v494_v32 = vadd.f32 %v1454_v34, %v414_v55  ;;  %v693_v29 = vadd.f32 %v3959_v17, %v493_v14  ;;  %v3961_v57 = vld [vmem:[#allocation174_spill] sm:$0xff]  ;;  %v3962_v43 = vld [vmem:[#allocation51_spill] sm:$0xff] }
 0x204   :  { %v495_v22 = vadd.f32 %v1453_v56, %v415_v28  ;;  %v1128_v30 = vadd.f32 %v3961_v57, %v928_v6  ;;  %v416_v3 = vadd.f32 %v3962_v43, %v3089_v63  ;;  %v3963_v46 = vld [vmem:[#allocation54_spill] sm:$0xff]  ;;  %v3964_v28 = vld [vmem:[#allocation113_spill] sm:$0xff]  ;;  %v1171_v38 = vpop.permute.xlu1 %1170  ;;  %v1169_v55 = vpop.permute.xlu0 %1168  ;;  %v3969_v62 = vld [vmem:[#allocation95_spill] sm:$0xff] }
 0x205   :  { %v1129_v7 = vadd.f32 %v2837_v15, %v929_v12  ;;  %v419_v27 = vadd.f32 %v3963_v46, %v3095_v33  ;;  %v931_v36 = vadd.f32 %v3964_v28, %v851_v52  ;;  %v3965_v21 = vld [vmem:[#allocation114_spill] sm:$0xff]  ;;  %v3966_v26 = vld [vmem:[#allocation153_spill] sm:$0xff]  ;;  %v3968_v12 = vld [vmem:[#allocation55_spill] sm:$0xff] }
 0x206   :  { %v930_v16 = vadd.f32 %v3965_v21, %v850_v48  ;;  %v853_v14 = vadd.f32 %v3966_v26, %v693_v29  ;;  %v3967_v58 = vld [vmem:[#allocation154_spill] sm:$0xff]  ;;  %v1288_v15 = vadd.f32 %v1169_v55, %v1128_v30  ;;  %v418_v6 = vadd.f32 %v3968_v12, %v3123_v53  ;;  %v3970_v56 = vld [vmem:[#allocation96_spill] sm:$0xff]  ;;  %v3971_v33 = vld [vmem:[#allocation175_spill] sm:$0xff] }
 0x207   :  { %v852_v47 = vadd.f32 %v3967_v58, %v692_v19  ;;  %v1289_v2 = vadd.f32 %v1171_v38, %v1129_v7  ;;  %v695_v63 = vadd.f32 %v3969_v62, %v495_v22  ;;  %v694_v34 = vadd.f32 %v3970_v56, %v494_v32  ;;  %v3972_v17 = vld [vmem:[#allocation176_spill] sm:$0xff]  ;;  %v1455_v29 = vld [vmem:[%s3615_s0 + $0x49] sm:$0xf]  ;;  %v1456_v53 = vld [vmem:[%s3615_s0 + $0x41] sm:$0xf] }
 0x208   :  { %v1131_v52 = vadd.f32 %v3971_v33, %v931_v36  ;;  %v1130_v48 = vadd.f32 %v3972_v17, %v930_v16  ;;  %v1328_v57 = vmul.f32 0.11111111, %v1288_v15  ;;  %v497_v19 = vadd.f32 %v1455_v29, %v417_v45  ;;  %v3973_v22 = vld [vmem:[#allocation155_spill] sm:$0xff]  ;;  %v3974_v32 = vld [vmem:[#allocation156_spill] sm:$0xff]  ;;  %v1175_v46 = vpop.permute.xlu1 %1174  ;;  %v1173_v28 = vpop.permute.xlu0 %1172  ;;  %v3975_v36 = vld [vmem:[#allocation117_spill] sm:$0xff] }
 0x209   :  { %v1329_v13 = vmul.f32 0.11111111, %v1289_v2  ;;  %v496_v7 = vadd.f32 %v1456_v53, %v416_v3  ;;  %v855_v30 = vadd.f32 %v3973_v22, %v695_v63  ;;  %v854_v43 = vadd.f32 %v3974_v32, %v694_v34  ;;  %v3976_v16 = vld [vmem:[#allocation118_spill] sm:$0xff]  ;;  %v3977_v55 = vld [vmem:[#allocation97_spill] sm:$0xff]  ;;  %v1458_v15 = vld [vmem:[%s3615_s0 + $0x51] sm:$0xf] }
 0x20a   :  { %v933_v21 = vadd.f32 %v3975_v36, %v853_v14  ;;  %v932_v38 = vadd.f32 %v3976_v16, %v852_v47  ;;  %1369 = vst.msk [vmem:[%s3616_s1] sm:$0xf] %vm1368_vm0, %v1328_v57  ;;  %v1291_v45 = vadd.f32 %v1175_v46, %v1131_v52  ;;  %v1290_v3 = vadd.f32 %v1173_v28, %v1130_v48  ;;  %v3978_v58 = vld [vmem:[#allocation98_spill] sm:$0xff]  ;;  %v1457_v14 = vld [vmem:[%s3615_s0 + $0x59] sm:$0xf]  ;;  %v3988_v36 = vld [vmem:[#allocation63_spill] sm:$0xff] }
 0x20b   :  { %1370 = vst.msk [vmem:[%s3616_s1 + $0x4] sm:$0xf] %vm1368_vm0, %v1329_v13  ;;  %v697_v26 = vadd.f32 %v3977_v55, %v497_v19  ;;  %v696_v2 = vadd.f32 %v3978_v58, %v496_v7  ;;  %v499_v47 = vadd.f32 %v1457_v14, %v419_v27  ;;  %v498_v12 = vadd.f32 %v1458_v15, %v418_v6  ;;  %v3979_v62 = vld [vmem:[#allocation177_spill] sm:$0xff]  ;;  %v3980_v56 = vld [vmem:[#allocation178_spill] sm:$0xff]  ;;  %v3982_v13 = vld [vmem:[#allocation59_spill] sm:$0xff] }
 0x20c   :  { %v1133_v63 = vadd.f32 %v3979_v62, %v933_v21  ;;  %v1132_v34 = vadd.f32 %v3980_v56, %v932_v38  ;;  %v1331_v33 = vmul.f32 0.11111111, %v1291_v45  ;;  %v1330_v52 = vmul.f32 0.11111111, %v1290_v3  ;;  %v3981_v17 = vld [vmem:[#allocation58_spill] sm:$0xff]  ;;  %v3983_v29 = vld [vmem:[#allocation121_spill] sm:$0xff]  ;;  %v1179_v7 = vpop.permute.xlu1 %1178  ;;  %v1177_v22 = vpop.permute.xlu0 %1176 }
 0x20d   :  { %v421_v48 = vadd.f32 %v3981_v17, %v3129_v25  ;;  %v420_v57 = vadd.f32 %v3982_v13, %v3157_v31  ;;  %v935_v19 = vadd.f32 %v3983_v29, %v855_v30  ;;  %v3984_v27 = vld [vmem:[#allocation122_spill] sm:$0xff]  ;;  %v3985_v32 = vld [vmem:[#allocation157_spill] sm:$0xff]  ;;  %v422_v21 = vadd.f32 %v3988_v36, %v3179_v50  ;;  %v3989_v16 = vld [vmem:[#allocation99_spill] sm:$0xff] }
 0x20e   :  { %v934_v53 = vadd.f32 %v3984_v27, %v854_v43  ;;  %v857_v6 = vadd.f32 %v3985_v32, %v697_v26  ;;  %v3986_v46 = vld [vmem:[#allocation158_spill] sm:$0xff]  ;;  %1372 = vst.msk [vmem:[%s3616_s1 + $0xc] sm:$0xf] %vm1368_vm0, %v1331_v33  ;;  %1371 = vst.msk [vmem:[%s3616_s1 + $0x8] sm:$0xf] %vm1368_vm0, %v1330_v52  ;;  %v1293_v25 = vadd.f32 %v1179_v7, %v1133_v63  ;;  %v3990_v45 = vld [vmem:[#allocation100_spill] sm:$0xff] }
 0x20f   :  { %v856_v28 = vadd.f32 %v3986_v46, %v696_v2  ;;  %v1292_v31 = vadd.f32 %v1177_v22, %v1132_v34  ;;  %v3987_v30 = vld [vmem:[#allocation62_spill] sm:$0xff]  ;;  %v699_v38 = vadd.f32 %v3989_v16, %v499_v47  ;;  %v698_v3 = vadd.f32 %v3990_v45, %v498_v12  ;;  %v3991_v55 = vld [vmem:[#allocation179_spill] sm:$0xff]  ;;  %v3992_v58 = vld [vmem:[#allocation180_spill] sm:$0xff] }
 0x210   :  { %v423_v43 = vadd.f32 %v3987_v30, %v3163_v18  ;;  %v1135_v26 = vadd.f32 %v3991_v55, %v935_v19  ;;  %v1134_v2 = vadd.f32 %v3992_v58, %v934_v53  ;;  %v1333_v14 = vmul.f32 0.11111111, %v1293_v25  ;;  %v1459_v62 = vld [vmem:[%s3615_s0 + $0x69] sm:$0xf]  ;;  %v1460_v18 = vld [vmem:[%s3615_s0 + $0x61] sm:$0xf]  ;;  %v1183_v33 = vpop.permute.xlu1 %1182  ;;  %v1181_v52 = vpop.permute.xlu0 %1180 }
 0x211   :  { %v1332_v15 = vmul.f32 0.11111111, %v1292_v31  ;;  %v501_v63 = vadd.f32 %v1459_v62, %v421_v48  ;;  %v500_v50 = vadd.f32 %v1460_v18, %v420_v57  ;;  %v3993_v56 = vld [vmem:[#allocation159_spill] sm:$0xff]  ;;  %v3994_v34 = vld [vmem:[#allocation160_spill] sm:$0xff]  ;;  %v3995_v17 = vld [vmem:[#allocation125_spill] sm:$0xff] }
 0x212   :  { %v859_v47 = vadd.f32 %v3993_v56, %v699_v38  ;;  %v858_v12 = vadd.f32 %v3994_v34, %v698_v3  ;;  %v937_v13 = vadd.f32 %v3995_v17, %v857_v6  ;;  %v3996_v29 = vld [vmem:[#allocation126_spill] sm:$0xff]  ;;  %1374 = vst.msk [vmem:[%s3616_s1 + $0x14] sm:$0xf] %vm1368_vm0, %v1333_v14  ;;  %v1295_v48 = vadd.f32 %v1183_v33, %v1135_v26  ;;  %v3997_v27 = vld [vmem:[#allocation101_spill] sm:$0xff]  ;;  %v1462_v46 = vld [vmem:[%s3615_s0 + $0x71] sm:$0xf] }
 0x213   :  { %v936_v19 = vadd.f32 %v3996_v29, %v856_v28  ;;  %1373 = vst.msk [vmem:[%s3616_s1 + $0x10] sm:$0xf] %vm1368_vm0, %v1332_v15  ;;  %v1294_v57 = vadd.f32 %v1181_v52, %v1134_v2  ;;  %v701_v53 = vadd.f32 %v3997_v27, %v501_v63  ;;  %v3998_v7 = vld [vmem:[#allocation102_spill] sm:$0xff]  ;;  %v1461_v32 = vld [vmem:[%s3615_s0 + $0x79] sm:$0xf]  ;;  %v502_v28 = vadd.f32 %v1462_v46, %v422_v21  ;;  %v4002_v55 = vld [vmem:[#allocation67_spill] sm:$0xff] }
 0x214   :  { %v700_v22 = vadd.f32 %v3998_v7, %v500_v50  ;;  %v503_v6 = vadd.f32 %v1461_v32, %v423_v43  ;;  %v3999_v25 = vld [vmem:[#allocation181_spill] sm:$0xff]  ;;  %v4000_v30 = vld [vmem:[#allocation182_spill] sm:$0xff]  ;;  %v1335_v16 = vmul.f32 0.11111111, %v1295_v48  ;;  %v424_v26 = vadd.f32 %v4002_v55, %v3213_v59  ;;  %v1187_v15 = vpop.permute.xlu1 %1186  ;;  %v1185_v62 = vpop.permute.xlu0 %1184  ;;  %v4008_v34 = vld [vmem:[#allocation71_spill] sm:$0xff] }
 0x215   :  { %v1137_v31 = vadd.f32 %v3999_v25, %v937_v13  ;;  %v1136_v36 = vadd.f32 %v4000_v30, %v936_v19  ;;  %v1334_v38 = vmul.f32 0.11111111, %v1294_v57  ;;  %v4001_v45 = vld [vmem:[#allocation66_spill] sm:$0xff]  ;;  %v4003_v58 = vld [vmem:[#allocation129_spill] sm:$0xff]  ;;  %v4009_v33 = vld [vmem:[#allocation103_spill] sm:$0xff] }
 0x216   :  { %v425_v3 = vadd.f32 %v4001_v45, %v3185_v37  ;;  %v939_v2 = vadd.f32 %v4003_v58, %v859_v47  ;;  %v4004_v43 = vld [vmem:[#allocation130_spill] sm:$0xff]  ;;  %v4005_v63 = vld [vmem:[#allocation161_spill] sm:$0xff]  ;;  %1376 = vst.msk [vmem:[%s3616_s1 + $0x1c] sm:$0xf] %vm1368_vm0, %v1335_v16  ;;  %v703_v52 = vadd.f32 %v4009_v33, %v503_v6  ;;  %v4010_v17 = vld [vmem:[#allocation104_spill] sm:$0xff] }
 0x217   :  { %v938_v14 = vadd.f32 %v4004_v43, %v858_v12  ;;  %v861_v21 = vadd.f32 %v4005_v63, %v701_v53  ;;  %v4006_v18 = vld [vmem:[#allocation162_spill] sm:$0xff]  ;;  %1375 = vst.msk [vmem:[%s3616_s1 + $0x18] sm:$0xf] %vm1368_vm0, %v1334_v38  ;;  %v1297_v37 = vadd.f32 %v1187_v15, %v1137_v31  ;;  %v1296_v59 = vadd.f32 %v1185_v62, %v1136_v36  ;;  %v4011_v29 = vld [vmem:[#allocation183_spill] sm:$0xff]  ;;  %v4012_v48 = vld [vmem:[#allocation184_spill] sm:$0xff] }
 0x218   :  { %v860_v50 = vadd.f32 %v4006_v18, %v700_v22  ;;  %v4007_v56 = vld [vmem:[#allocation70_spill] sm:$0xff]  ;;  %v426_v12 = vadd.f32 %v4008_v34, %v3253_v20  ;;  %v702_v13 = vadd.f32 %v4010_v17, %v502_v28  ;;  %v1139_v19 = vadd.f32 %v4011_v29, %v939_v2  ;;  %v1463_v7 = vld [vmem:[%s3615_s0 + $0x89] sm:$0xf]  ;;  %v4014_v46 = vld [vmem:[#allocation164_spill] sm:$0xff]  ;;  %v1191_v25 = vpop.permute.xlu1 %1190  ;;  %v1189_v31 = vpop.permute.xlu0 %1188 }
 0x219   :  { %v427_v47 = vadd.f32 %v4007_v56, %v3219_v51  ;;  %v1138_v57 = vadd.f32 %v4012_v48, %v938_v14  ;;  %v1337_v27 = vmul.f32 0.11111111, %v1297_v37  ;;  %v1336_v53 = vmul.f32 0.11111111, %v1296_v59  ;;  %v1464_v51 = vld [vmem:[%s3615_s0 + $0x81] sm:$0xf] }
 0x21a   :  { %v505_v22 = vadd.f32 %v1463_v7, %v425_v3  ;;  %v504_v20 = vadd.f32 %v1464_v51, %v424_v26  ;;  %v4013_v32 = vld [vmem:[#allocation163_spill] sm:$0xff]  ;;  %v862_v28 = vadd.f32 %v4014_v46, %v702_v13  ;;  %v4015_v30 = vld [vmem:[#allocation133_spill] sm:$0xff]  ;;  %v4016_v16 = vld [vmem:[#allocation134_spill] sm:$0xff]  ;;  %v1299_v45 = vadd.f32 %v1191_v25, %v1139_v19 }
 0x21b   :  { %v863_v6 = vadd.f32 %v4013_v32, %v703_v52  ;;  %v941_v36 = vadd.f32 %v4015_v30, %v861_v21  ;;  %v940_v38 = vadd.f32 %v4016_v16, %v860_v50  ;;  %1378 = vst.msk [vmem:[%s3616_s1 + $0x24] sm:$0xf] %vm1368_vm0, %v1337_v27  ;;  %1377 = vst.msk [vmem:[%s3616_s1 + $0x20] sm:$0xf] %vm1368_vm0, %v1336_v53  ;;  %v4017_v55 = vld [vmem:[#allocation105_spill] sm:$0xff]  ;;  %v4018_v58 = vld [vmem:[#allocation106_spill] sm:$0xff] }
 0x21c   :  { %v1298_v3 = vadd.f32 %v1189_v31, %v1138_v57  ;;  %v705_v26 = vadd.f32 %v4017_v55, %v505_v22  ;;  %v704_v2 = vadd.f32 %v4018_v58, %v504_v20  ;;  %v1465_v43 = vld [vmem:[%s3615_s0 + $0x99] sm:$0xf]  ;;  %v1466_v15 = vld [vmem:[%s3615_s0 + $0x91] sm:$0xf]  ;;  %v4020_v18 = vld [vmem:[#allocation186_spill] sm:$0xff]  ;;  %v1195_v19 = vpop.permute.xlu1 %1194  ;;  %v1193_v48 = vpop.permute.xlu0 %1192 }
 0x21d   :  { %v507_v14 = vadd.f32 %v1465_v43, %v427_v47  ;;  %v506_v62 = vadd.f32 %v1466_v15, %v426_v12  ;;  %v4019_v63 = vld [vmem:[#allocation185_spill] sm:$0xff]  ;;  %v1140_v50 = vadd.f32 %v4020_v18, %v940_v38  ;;  %v1339_v37 = vmul.f32 0.11111111, %v1299_v45  ;;  %v4021_v56 = vld [vmem:[#allocation74_spill] sm:$0xff]  ;;  %v4022_v33 = vld [vmem:[#allocation75_spill] sm:$0xff] }
 0x21e   :  { %v1141_v21 = vadd.f32 %v4019_v63, %v941_v36  ;;  %v1338_v59 = vmul.f32 0.11111111, %v1298_v3  ;;  %v429_v34 = vadd.f32 %v4021_v56, %v3259_v4  ;;  %v428_v52 = vadd.f32 %v4022_v33, %v3281_v49  ;;  %v4023_v17 = vld [vmem:[#allocation137_spill] sm:$0xff]  ;;  %v4024_v47 = vld [vmem:[#allocation138_spill] sm:$0xff]  ;;  %v4027_v7 = vld [vmem:[#allocation107_spill] sm:$0xff] }
 0x21f   :  { %v943_v13 = vadd.f32 %v4023_v17, %v863_v6  ;;  %v942_v29 = vadd.f32 %v4024_v47, %v862_v28  ;;  %v4025_v57 = vld [vmem:[#allocation165_spill] sm:$0xff]  ;;  %v4026_v27 = vld [vmem:[#allocation166_spill] sm:$0xff]  ;;  %1380 = vst.msk [vmem:[%s3616_s1 + $0x2c] sm:$0xf] %vm1368_vm0, %v1339_v37  ;;  %v1300_v49 = vadd.f32 %v1193_v48, %v1140_v50  ;;  %v707_v22 = vadd.f32 %v4027_v7, %v507_v14  ;;  %v4028_v51 = vld [vmem:[#allocation108_spill] sm:$0xff] }
 0x220   :  { %v865_v12 = vadd.f32 %v4025_v57, %v705_v26  ;;  %v864_v53 = vadd.f32 %v4026_v27, %v704_v2  ;;  %1379 = vst.msk [vmem:[%s3616_s1 + $0x28] sm:$0xf] %vm1368_vm0, %v1338_v59  ;;  %v1301_v4 = vadd.f32 %v1195_v19, %v1141_v21  ;;  %v706_v20 = vadd.f32 %v4028_v51, %v506_v62  ;;  %v4029_v32 = vld [vmem:[#allocation187_spill] sm:$0xff]  ;;  %v4030_v46 = vld [vmem:[#allocation188_spill] sm:$0xff]  ;;  %v1468_v16 = vld [vmem:[%s3615_s0 + $0xa1] sm:$0xf]  ;;  %v1199_v58 = vpop.permute.xlu1 %1198  ;;  %v1197_v2 = vpop.permute.xlu0 %1196 }
 0x221   :  { %v1143_v6 = vadd.f32 %v4029_v32, %v943_v13  ;;  %v1142_v28 = vadd.f32 %v4030_v46, %v942_v29  ;;  %v1340_v31 = vmul.f32 0.11111111, %v1300_v49  ;;  %v1467_v30 = vld [vmem:[%s3615_s0 + $0xa9] sm:$0xf]  ;;  %v508_v38 = vadd.f32 %v1468_v16, %v428_v52  ;;  %v4031_v45 = vld [vmem:[#allocation169_spill] sm:$0xff]  ;;  %v4032_v55 = vld [vmem:[#allocation170_spill] sm:$0xff] }
 0x222   :  { %v1341_v25 = vmul.f32 0.11111111, %v1301_v4  ;;  %v509_v36 = vadd.f32 %v1467_v30, %v429_v34  ;;  %v867_v3 = vadd.f32 %v4031_v45, %v707_v22  ;;  %v866_v26 = vadd.f32 %v4032_v55, %v706_v20  ;;  %v4033_v43 = vld [vmem:[#allocation141_spill] sm:$0xff]  ;;  %v4034_v15 = vld [vmem:[#allocation142_spill] sm:$0xff]  ;;  %v4041_v27 = vld [vmem:[#allocation172_spill] sm:$0xff] }
 0x223   :  { %v945_v14 = vadd.f32 %v4033_v43, %v865_v12  ;;  %v944_v62 = vadd.f32 %v4034_v15, %v864_v53  ;;  %1381 = vst.msk [vmem:[%s3616_s1 + $0x30] sm:$0xf] %vm1368_vm0, %v1340_v31  ;;  %v1303_v63 = vadd.f32 %v1199_v58, %v1143_v6  ;;  %v1302_v21 = vadd.f32 %v1197_v2, %v1142_v28  ;;  %v4035_v18 = vld [vmem:[#allocation109_spill] sm:$0xff]  ;;  %v4036_v37 = vld [vmem:[#allocation110_spill] sm:$0xff]  ;;  %v4043_v51 = vld [vmem:[#allocation191_spill] sm:$0xff] }
 0x224   :  { %1382 = vst.msk [vmem:[%s3616_s1 + $0x34] sm:$0xf] %vm1368_vm0, %v1341_v25  ;;  %v709_v50 = vadd.f32 %v4035_v18, %v509_v36  ;;  %v708_v59 = vadd.f32 %v4036_v37, %v508_v38  ;;  %v4037_v56 = vld [vmem:[#allocation189_spill] sm:$0xff]  ;;  %v4038_v33 = vld [vmem:[#allocation190_spill] sm:$0xff]  ;;  %v1203_v57 = vpop.permute.xlu1 %1202  ;;  %v1201_v12 = vpop.permute.xlu0 %1200  ;;  %v4044_v32 = vld [vmem:[#allocation192_spill] sm:$0xff] }
 0x225   :  { %v1145_v34 = vadd.f32 %v4037_v56, %v945_v14  ;;  %v1144_v52 = vadd.f32 %v4038_v33, %v944_v62  ;;  %v1343_v17 = vmul.f32 0.11111111, %v1303_v63  ;;  %v1342_v13 = vmul.f32 0.11111111, %v1302_v21  ;;  %v4039_v47 = vld [vmem:[#allocation145_spill] sm:$0xff]  ;;  %v4040_v19 = vld [vmem:[#allocation146_spill] sm:$0xff] }
 0x226   :  { %v947_v29 = vadd.f32 %v4039_v47, %v867_v3  ;;  %v946_v48 = vadd.f32 %v4040_v19, %v866_v26  ;;  %v869_v53 = vadd.f32 %v4041_v27, %v709_v50  ;;  %v4042_v4 = vld [vmem:[#allocation173_spill] sm:$0xff]  ;;  %v4046_v16 = vld [vmem:[#allocation150_spill] sm:$0xff]  ;;  %v4047_v55 = vld [vmem:[#allocation76_spill] sm:$0xff] }
 0x227   :  { %v868_v49 = vadd.f32 %v4042_v4, %v708_v59  ;;  %1384 = vst.msk [vmem:[%s3616_s1 + $0x3c] sm:$0xf] %vm1368_vm0, %v1343_v17  ;;  %1383 = vst.msk [vmem:[%s3616_s1 + $0x38] sm:$0xf] %vm1368_vm0, %v1342_v13  ;;  %v1305_v7 = vadd.f32 %v1203_v57, %v1145_v34  ;;  %v1304_v22 = vadd.f32 %v1201_v12, %v1144_v52  ;;  %v4045_v30 = vld [vmem:[#allocation149_spill] sm:$0xff]  ;;  %v4048_v58 = vld [vmem:[#allocation167_spill] sm:$0xff] }
 0x228   :  { %v1147_v20 = vadd.f32 %v4043_v51, %v947_v29  ;;  %v1146_v6 = vadd.f32 %v4044_v32, %v946_v48  ;;  %v1207_v25 = vpop.permute.xlu1 %1206  ;;  %v1205_v31 = vpop.permute.xlu0 %1204  ;;  %v949_v36 = vadd.f32 %v4045_v30, %v869_v53 }
 0x229   :  { %v1345_v46 = vmul.f32 0.11111111, %v1305_v7  ;;  %v1344_v28 = vmul.f32 0.11111111, %v1304_v22  ;;  %v948_v38 = vadd.f32 %v4046_v16, %v868_v49 }
 0x22a   :  { %v1307_v45 = vadd.f32 %v1207_v25, %v1147_v20  ;;  %v1306_v3 = vadd.f32 %v1205_v31, %v1146_v6  ;;  %v1149_v26 = vadd.f32 %v4047_v55, %v949_v36 }
 0x22b   :  { %1386 = vst.msk [vmem:[%s3616_s1 + $0x44] sm:$0xf] %vm1368_vm0, %v1345_v46  ;;  %1385 = vst.msk [vmem:[%s3616_s1 + $0x40] sm:$0xf] %vm1368_vm0, %v1344_v28  ;;  %v1148_v2 = vadd.f32 %v4048_v58, %v948_v38 }
 0x22c   :  { %v1347_v43 = vmul.f32 0.11111111, %v1307_v45  ;;  %v1346_v14 = vmul.f32 0.11111111, %v1306_v3  ;;  %v1211_v15 = vpop.permute.xlu1 %1210  ;;  %v1209_v62 = vpop.permute.xlu0 %1208 }
 0x22d   :  { %v1309_v63 = vadd.f32 %v1211_v15, %v1149_v26  ;;  %v1308_v21 = vadd.f32 %v1209_v62, %v1148_v2 }
 0x22e   :  { %1388 = vst.msk [vmem:[%s3616_s1 + $0x4c] sm:$0xf] %vm1368_vm0, %v1347_v43  ;;  %1387 = vst.msk [vmem:[%s3616_s1 + $0x48] sm:$0xf] %vm1368_vm0, %v1346_v14 }
 0x22f   :  { %v1349_v18 = vmul.f32 0.11111111, %v1309_v63  ;;  %v1348_v50 = vmul.f32 0.11111111, %v1308_v21 }
 0x230   :  { %v1215_v37 = vpop.permute.xlu1 %1214  ;;  %v1213_v59 = vpop.permute.xlu0 %1212 }
 0x231   :  { %1390 = vst.msk [vmem:[%s3616_s1 + $0x54] sm:$0xf] %vm1368_vm0, %v1349_v18  ;;  %1389 = vst.msk [vmem:[%s3616_s1 + $0x50] sm:$0xf] %vm1368_vm0, %v1348_v50  ;;  %v1311_v56 = vadd.f32 %v1215_v37, %v3005_v5  ;;  %v1310_v34 = vadd.f32 %v1213_v59, %v3007_v24 }
 0x233   :  { %v1351_v33 = vmul.f32 0.11111111, %v1311_v56  ;;  %v1350_v52 = vmul.f32 0.11111111, %v1310_v34 }
 0x234   :  { %v1219_v17 = vpop.permute.xlu1 %1218  ;;  %v1217_v13 = vpop.permute.xlu0 %1216 }
 0x235   :  { %1392 = vst.msk [vmem:[%s3616_s1 + $0x5c] sm:$0xf] %vm1368_vm0, %v1351_v33  ;;  %1391 = vst.msk [vmem:[%s3616_s1 + $0x58] sm:$0xf] %vm1368_vm0, %v1350_v52  ;;  %v1313_v47 = vadd.f32 %v1219_v17, %v3039_v1  ;;  %v1312_v5 = vadd.f32 %v1217_v13, %v3041_v41 }
 0x237   :  { %v1353_v29 = vmul.f32 0.11111111, %v1313_v47  ;;  %v1352_v24 = vmul.f32 0.11111111, %v1312_v5 }
 0x238   :  { %v1223_v19 = vpop.permute.xlu1 %1222  ;;  %v1221_v48 = vpop.permute.xlu0 %1220 }
 0x239   :  { %1394 = vst.msk [vmem:[%s3616_s1 + $0x64] sm:$0xf] %vm1368_vm0, %v1353_v29  ;;  %1393 = vst.msk [vmem:[%s3616_s1 + $0x60] sm:$0xf] %vm1368_vm0, %v1352_v24  ;;  %v1315_v57 = vadd.f32 %v1223_v19, %v3073_v40  ;;  %v1314_v1 = vadd.f32 %v1221_v48, %v3075_v9 }
 0x23b   :  { %v1355_v12 = vmul.f32 0.11111111, %v1315_v57  ;;  %v1354_v41 = vmul.f32 0.11111111, %v1314_v1 }
 0x23c   :  { %v1227_v27 = vpop.permute.xlu1 %1226  ;;  %v1225_v53 = vpop.permute.xlu0 %1224 }
 0x23d   :  { %1396 = vst.msk [vmem:[%s3616_s1 + $0x6c] sm:$0xf] %vm1368_vm0, %v1355_v12  ;;  %1395 = vst.msk [vmem:[%s3616_s1 + $0x68] sm:$0xf] %vm1368_vm0, %v1354_v41  ;;  %v1317_v4 = vadd.f32 %v1227_v27, %v3107_v10  ;;  %v1316_v40 = vadd.f32 %v1225_v53, %v3109_v44 }
 0x23f   :  { %v1357_v49 = vmul.f32 0.11111111, %v1317_v4  ;;  %v1356_v9 = vmul.f32 0.11111111, %v1316_v40 }
 0x240   :  { %v1231_v7 = vpop.permute.xlu1 %1230  ;;  %v1229_v22 = vpop.permute.xlu0 %1228 }
 0x241   :  { %1398 = vst.msk [vmem:[%s3616_s1 + $0x74] sm:$0xf] %vm1368_vm0, %v1357_v49  ;;  %1397 = vst.msk [vmem:[%s3616_s1 + $0x70] sm:$0xf] %vm1368_vm0, %v1356_v9  ;;  %v1319_v51 = vadd.f32 %v1231_v7, %v3141_v8  ;;  %v1318_v10 = vadd.f32 %v1229_v22, %v3143_v11 }
 0x243   :  { %v1359_v20 = vmul.f32 0.11111111, %v1319_v51  ;;  %v1358_v44 = vmul.f32 0.11111111, %v1318_v10 }
 0x244   :  { %v1235_v32 = vpop.permute.xlu1 %1234  ;;  %v1233_v6 = vpop.permute.xlu0 %1232 }
 0x245   :  { %1400 = vst.msk [vmem:[%s3616_s1 + $0x7c] sm:$0xf] %vm1368_vm0, %v1359_v20  ;;  %1399 = vst.msk [vmem:[%s3616_s1 + $0x78] sm:$0xf] %vm1368_vm0, %v1358_v44  ;;  %v1321_v46 = vadd.f32 %v1235_v32, %v3171_v23  ;;  %v1320_v8 = vadd.f32 %v1233_v6, %v3173_v0 }
 0x247   :  { %v1361_v28 = vmul.f32 0.11111111, %v1321_v46  ;;  %v1360_v11 = vmul.f32 0.11111111, %v1320_v8 }
 0x248   :  { %v1239_v25 = vpop.permute.xlu1 %1238  ;;  %v1237_v31 = vpop.permute.xlu0 %1236 }
 0x249   :  { %1402 = vst.msk [vmem:[%s3616_s1 + $0x84] sm:$0xf] %vm1368_vm0, %v1361_v28  ;;  %1401 = vst.msk [vmem:[%s3616_s1 + $0x80] sm:$0xf] %vm1368_vm0, %v1360_v11  ;;  %v1323_v30 = vadd.f32 %v1239_v25, %v3205_v61  ;;  %v1322_v23 = vadd.f32 %v1237_v31, %v3207_v39 }
 0x24b   :  { %v1363_v36 = vmul.f32 0.11111111, %v1323_v30  ;;  %v1362_v0 = vmul.f32 0.11111111, %v1322_v23 }
 0x24c   :  { %v1243_v16 = vpop.permute.xlu1 %1242  ;;  %v1241_v38 = vpop.permute.xlu0 %1240 }
 0x24d   :  { %1404 = vst.msk [vmem:[%s3616_s1 + $0x8c] sm:$0xf] %vm1368_vm0, %v1363_v36  ;;  %1403 = vst.msk [vmem:[%s3616_s1 + $0x88] sm:$0xf] %vm1368_vm0, %v1362_v0  ;;  %v1325_v45 = vadd.f32 %v1243_v16, %v3239_v60  ;;  %v1324_v61 = vadd.f32 %v1241_v38, %v3241_v35 }
 0x24f   :  { %v1365_v3 = vmul.f32 0.11111111, %v1325_v45  ;;  %v1364_v39 = vmul.f32 0.11111111, %v1324_v61 }
 0x250   :  { %v1247_v55 = vpop.permute.xlu1 %1246  ;;  %v1245_v26 = vpop.permute.xlu0 %1244 }
 0x251   :  { %1406 = vst.msk [vmem:[%s3616_s1 + $0x94] sm:$0xf] %vm1368_vm0, %v1365_v3  ;;  %1405 = vst.msk [vmem:[%s3616_s1 + $0x90] sm:$0xf] %vm1368_vm0, %v1364_v39  ;;  %v1327_v58 = vadd.f32 %v1247_v55, %v3273_v42  ;;  %v1326_v60 = vadd.f32 %v1245_v26, %v3275_v54 }
 0x253   :  { %v1367_v2 = vmul.f32 0.11111111, %v1327_v58  ;;  %v1366_v35 = vmul.f32 0.11111111, %v1326_v60 }
 0x255   :  { %1408 = vst.msk [vmem:[%s3616_s1 + $0x9c] sm:$0xf] %vm1368_vm0, %v1367_v2  ;;  %1407 = vst.msk [vmem:[%s3616_s1 + $0x98] sm:$0xf] %vm1368_vm0, %v1366_v35 }

// kernel: net_forward.29
= control target key start
LH: loop header
LB: loop body
LE: loop exit
PB: predicated region body
PF: predicated region fallthrough
CT: control target
= control target key end

     0   :  { %v1399_v1 = vmov 0   ;;  %vm1401_vm0 = vmmov 0   ;;  %vm1045_vm1 = vcmask 15360   ;;  %vm1047_vm2 = vcmask 9216   ;;  %s1731_s1 = inlined_call_operand.vmem [shape: bf16[1408,2], index: 1, kind: input, shape index: {}]   ;;  %s1732_s0 = inlined_call_operand.vmem [shape: bf16[10,1408], index: 0, kind: input, shape index: {}]   ;;  %s1733_s2 = inlined_call_operand.vmem [shape: f32[10,1], index: 2, kind: input, shape index: {}]   ;;  %s1734_s3 = inlined_call_operand.vmem [shape: f32[10,2], index: 3, kind: output, shape index: {}]  }
   0x1   :  { %v1295_v0 = vld [vmem:[%s1731_s1 + $0x40] sm:$0xff]   ;;  %1294 = vset.pattern.permute.xlu0 %v1399_v1  ;;  %v1299_v5 = vld [vmem:[%s1731_s1 + $0x48] sm:$0xff]   ;;  %v1303_v9 = vld [vmem:[%s1731_s1 + $0x50] sm:$0xff]  }
   0x2   :  { %v1296_v2 = vld [vmem:[%s1731_s1] sm:$0xff]   ;;  %1152 = vmatprep.subr.bf16.mxu0 %v1295_v0  ;;  %v1300_v6 = vld [vmem:[%s1731_s1 + $0x8] sm:$0xff]   ;;  %v1304_v10 = vld [vmem:[%s1731_s1 + $0x10] sm:$0xff]  }
   0x3   :  { %v1297_v3 = vld [vmem:[%s1731_s1 + $0xc0] sm:$0xff]   ;;  %1153 = vmatpush3.bf16.msra.mxu0 %v1296_v2  ;;  %v1301_v7 = vld [vmem:[%s1731_s1 + $0xc8] sm:$0xff]   ;;  %v1305_v11 = vld [vmem:[%s1731_s1 + $0xd0] sm:$0xff]  }
   0x4   :  { %v1298_v4 = vld [vmem:[%s1731_s1 + $0x80] sm:$0xff]   ;;  %1174 = vmatprep.subr.bf16.mxu1 %v1297_v3  ;;  %1154 = vmatprep.subr.bf16.mxu0 %v1299_v5  ;;  %v1302_v8 = vld [vmem:[%s1731_s1 + $0x88] sm:$0xff]   ;;  %v1306_v12 = vld [vmem:[%s1731_s1 + $0x90] sm:$0xff]  }
   0x5   :  { %1175 = vmatpush3.bf16.msra.mxu1 %v1298_v4  ;;  %v1307_v13 = vld [vmem:[%s1731_s1 + $0x58] sm:$0xff]   ;;  %v1311_v17 = vld [vmem:[%s1731_s1 + $0x60] sm:$0xff]   ;;  %v1315_v21 = vld [vmem:[%s1731_s1 + $0x68] sm:$0xff]  }
   0x6   :  { %1176 = vmatprep.subr.bf16.mxu1 %v1301_v7  ;;  %v1308_v14 = vld [vmem:[%s1731_s1 + $0x18] sm:$0xff]   ;;  %v1312_v18 = vld [vmem:[%s1731_s1 + $0x20] sm:$0xff]   ;;  %v1316_v22 = vld [vmem:[%s1731_s1 + $0x28] sm:$0xff]  }
   0x7   :  { %1155 = vmatpush3.bf16.msra.mxu0 %v1300_v6  ;;  %v1309_v15 = vld [vmem:[%s1731_s1 + $0xd8] sm:$0xff]   ;;  %v1313_v19 = vld [vmem:[%s1731_s1 + $0xe0] sm:$0xff]   ;;  %v1317_v23 = vld [vmem:[%s1731_s1 + $0xe8] sm:$0xff]  }
   0x8   :  { %1156 = vmatprep.subr.bf16.mxu0 %v1303_v9  ;;  %v1310_v16 = vld [vmem:[%s1731_s1 + $0x98] sm:$0xff]   ;;  %v1314_v20 = vld [vmem:[%s1731_s1 + $0xa0] sm:$0xff]   ;;  %v1318_v24 = vld [vmem:[%s1731_s1 + $0xa8] sm:$0xff]  }
   0x9   :  { %1177 = vmatpush3.bf16.msra.mxu1 %v1302_v8  ;;  %v1319_v25 = vld [vmem:[%s1731_s1 + $0x70] sm:$0xff]   ;;  %v1323_v29 = vld [vmem:[%s1731_s1 + $0x78] sm:$0xff]   ;;  %v1326_v32 = vld [vmem:[%s1732_s0] ss:$44 sps:$4 sm:$0x1f]  }
   0xa   :  { %1178 = vmatprep.subr.bf16.mxu1 %v1305_v11  ;;  %v1320_v26 = vld [vmem:[%s1731_s1 + $0x30] sm:$0xff]   ;;  %v1324_v30 = vld [vmem:[%s1731_s1 + $0x38] sm:$0xff]   ;;  %v1330_v35 = vld [vmem:[%s1731_s1 + $0x140] sm:$0xff]  }
   0xb   :  { %1157 = vmatpush3.bf16.msra.mxu0 %v1304_v10  ;;  %v1321_v27 = vld [vmem:[%s1731_s1 + $0xf0] sm:$0xff]   ;;  %v1325_v31 = vld [vmem:[%s1731_s1 + $0xf8] sm:$0xff]   ;;  %v1334_v38 = vld [vmem:[%s1731_s1 + $0x100] sm:$0xff]   ;;  %v1400_v10 = vmov 0.0  }
   0xc   :  { %1158 = vmatprep.subr.bf16.mxu0 %v1307_v13  ;;  %v1322_v28 = vld [vmem:[%s1731_s1 + $0xb0] sm:$0xff]   ;;  %v1329_v34 = vld [vmem:[%s1731_s1 + $0xb8] sm:$0xff]   ;;  %v1335_v39 = vld [vmem:[%s1731_s1 + $0x1c0] sm:$0xff]  }
   0xd   :  { %1179 = vmatpush3.bf16.msra.mxu1 %v1306_v12  ;;  %v1328_v33 = vld [vmem:[%s1732_s0 + $0x4] ss:$44 sps:$4 sm:$0x1f]   ;;  %v1331_v36 = vld [vmem:[%s1732_s0 + $0x8] ss:$44 sps:$4 sm:$0x1f]  }
   0xe   :  { %1180 = vmatprep.subr.bf16.mxu1 %v1309_v15  ;;  %831 = vmatprep.mubr.bf16.mxu0 %v1328_v33  ;;  %v1333_v37 = vld [vmem:[%s1732_s0 + $0xc] ss:$44 sps:$4 sm:$0x1f]   ;;  %v1336_v40 = vld [vmem:[%s1731_s1 + $0x180] sm:$0xff]   ;;  %v1341_v45 = vld [vmem:[%s1731_s1 + $0x150] sm:$0xff]  }
   0xf   :  { %1159 = vmatpush3.bf16.msra.mxu0 %v1308_v14  ;;  %872 = vmatprep.mubr.bf16.mxu1 %v1333_v37  ;;  %v1337_v41 = vld [vmem:[%s1731_s1 + $0x148] sm:$0xff]   ;;  %v1342_v46 = vld [vmem:[%s1731_s1 + $0x110] sm:$0xff]   ;;  %v1345_v49 = vld [vmem:[%s1731_s1 + $0x158] sm:$0xff]  }
  0x10   :  { %1160 = vmatprep.subr.bf16.mxu0 %v1311_v17  ;;  %v1338_v42 = vld [vmem:[%s1731_s1 + $0x108] sm:$0xff]   ;;  %v1343_v47 = vld [vmem:[%s1731_s1 + $0x1d0] sm:$0xff]   ;;  %v1346_v50 = vld [vmem:[%s1731_s1 + $0x118] sm:$0xff]  }
  0x11   :  { %1181 = vmatpush3.bf16.msra.mxu1 %v1310_v16  ;;  %v1339_v43 = vld [vmem:[%s1731_s1 + $0x1c8] sm:$0xff]   ;;  %v1344_v48 = vld [vmem:[%s1731_s1 + $0x190] sm:$0xff]   ;;  %v1347_v51 = vld [vmem:[%s1731_s1 + $0x1d8] sm:$0xff]  }
  0x12   :  { %1182 = vmatprep.subr.bf16.mxu1 %v1313_v19  ;;  %v1340_v44 = vld [vmem:[%s1731_s1 + $0x188] sm:$0xff]   ;;  %v1348_v52 = vld [vmem:[%s1731_s1 + $0x198] sm:$0xff]   ;;  %v1349_v53 = vld [vmem:[%s1731_s1 + $0x160] sm:$0xff]  }
  0x13   :  { %1161 = vmatpush3.bf16.msra.mxu0 %v1312_v18  ;;  %v1350_v54 = vld [vmem:[%s1731_s1 + $0x120] sm:$0xff]   ;;  %v1353_v57 = vld [vmem:[%s1731_s1 + $0x168] sm:$0xff]   ;;  %v1357_v61 = vld [vmem:[%s1731_s1 + $0x170] sm:$0xff]  }
  0x14   :  { %1162 = vmatprep.subr.bf16.mxu0 %v1315_v21  ;;  %v1351_v55 = vld [vmem:[%s1731_s1 + $0x1e0] sm:$0xff]   ;;  %v1354_v58 = vld [vmem:[%s1731_s1 + $0x128] sm:$0xff]   ;;  %v1358_v62 = vld [vmem:[%s1731_s1 + $0x130] sm:$0xff]  }
  0x15   :  { %1183 = vmatpush3.bf16.msra.mxu1 %v1314_v20  ;;  %v1352_v56 = vld [vmem:[%s1731_s1 + $0x1a0] sm:$0xff]   ;;  %v1355_v59 = vld [vmem:[%s1731_s1 + $0x1e8] sm:$0xff]   ;;  %v1359_v63 = vld [vmem:[%s1731_s1 + $0x1f0] sm:$0xff]  }
  0x16   :  { %1184 = vmatprep.subr.bf16.mxu1 %v1317_v23  ;;  %v1356_v60 = vld [vmem:[%s1731_s1 + $0x1a8] sm:$0xff]   ;;  %v1360_v0 = vld [vmem:[%s1731_s1 + $0x1b0] sm:$0xff]   ;;  %v1361_v1 = vld [vmem:[%s1731_s1 + $0x178] sm:$0xff]  }
  0x17   :  { %1163 = vmatpush3.bf16.msra.mxu0 %v1316_v22  ;;  %v1362_v2 = vld [vmem:[%s1731_s1 + $0x138] sm:$0xff]   ;;  %v1366_v5 = vld [vmem:[%s1732_s0 + $0x14] ss:$44 sps:$4 sm:$0x1f]   ;;  %v1374_v13 = vld [vmem:[%s1731_s1 + $0x248] sm:$0xff]  }
  0x18   :  { %1164 = vmatprep.subr.bf16.mxu0 %v1319_v25  ;;  %v1363_v3 = vld [vmem:[%s1731_s1 + $0x1f8] sm:$0xff]   ;;  %v1368_v7 = vld [vmem:[%s1731_s1 + $0x240] sm:$0xff]   ;;  %v1375_v14 = vld [vmem:[%s1731_s1 + $0x208] sm:$0xff]  }
  0x19   :  { %1185 = vmatpush3.bf16.msra.mxu1 %v1318_v24  ;;  %v1364_v4 = vld [vmem:[%s1732_s0 + $0x10] ss:$44 sps:$4 sm:$0x1f]   ;;  %v1369_v8 = vld [vmem:[%s1732_s0 + $0x18] ss:$44 sps:$4 sm:$0x1f]  }
  0x1a   :  { %1186 = vmatprep.subr.bf16.mxu1 %v1321_v27  ;;  %v1367_v6 = vld [vmem:[%s1731_s1 + $0x1b8] sm:$0xff]   ;;  %v1372_v11 = vld [vmem:[%s1731_s1 + $0x200] sm:$0xff]   ;;  %v1376_v15 = vld [vmem:[%s1731_s1 + $0x288] sm:$0xff]  }
  0x1b   :  { %1165 = vmatpush3.bf16.msra.mxu0 %v1320_v26  ;;  %v1371_v9 = vld [vmem:[%s1732_s0 + $0x1c] ss:$44 sps:$4 sm:$0x1f]   ;;  %v1373_v12 = vld [vmem:[%s1731_s1 + $0x280] sm:$0xff]   ;;  %v1377_v16 = vld [vmem:[%s1731_s1 + $0x250] sm:$0xff]  }
  0x1c   :  { %1166 = vmatprep.subr.bf16.mxu0 %v1323_v29  ;;  %v1378_v17 = vld [vmem:[%s1731_s1 + $0x210] sm:$0xff]   ;;  %v1380_v19 = vld [vmem:[%s1731_s1 + $0x258] sm:$0xff]   ;;  %v1383_v22 = vld [vmem:[%s1731_s1 + $0x260] sm:$0xff]  }
  0x1d   :  { %1187 = vmatpush3.bf16.msra.mxu1 %v1322_v28  ;;  %v1379_v18 = vld [vmem:[%s1731_s1 + $0x290] sm:$0xff]   ;;  %v1381_v20 = vld [vmem:[%s1731_s1 + $0x218] sm:$0xff]   ;;  %v1384_v23 = vld [vmem:[%s1731_s1 + $0x220] sm:$0xff]  }
  0x1e   :  { %1188 = vmatprep.subr.bf16.mxu1 %v1325_v31  ;;  %v1382_v21 = vld [vmem:[%s1731_s1 + $0x298] sm:$0xff]   ;;  %v1385_v24 = vld [vmem:[%s1731_s1 + $0x2a0] sm:$0xff]   ;;  %v1386_v25 = vld [vmem:[%s1731_s1 + $0x268] sm:$0xff]  }
  0x1f   :  { %1167 = vmatpush3.bf16.msra.mxu0 %v1324_v30  ;;  %v1387_v26 = vld [vmem:[%s1731_s1 + $0x228] sm:$0xff]   ;;  %v1389_v28 = vld [vmem:[%s1731_s1 + $0x270] sm:$0xff]   ;;  %v1392_v31 = vld [vmem:[%s1731_s1 + $0x278] sm:$0xff]  }
  0x20   :  { %1196 = vmatprep.subr.bf16.mxu0 %v1330_v35  ;;  %v1388_v27 = vld [vmem:[%s1731_s1 + $0x2a8] sm:$0xff]   ;;  %v1390_v29 = vld [vmem:[%s1731_s1 + $0x230] sm:$0xff]   ;;  %v203_v33 = vld [vmem:[%s1733_s2] sm:$0xff] }
  0x21   :  { %1189 = vmatpush3.bf16.msra.mxu1 %v1329_v34  ;;  %v1391_v30 = vld [vmem:[%s1731_s1 + $0x2b0] sm:$0xff]   ;;  %v1393_v34 = vld [vmem:[%s1731_s1 + $0x238] sm:$0xff]   ;;  %207 = vperm.xlu0 %1294, %v203_v33   ;;  %v1394_v37 = vld [vmem:[%s1732_s0 + $0x20] ss:$44 sps:$4 sm:$0x1f]  }
  0x22   :  { %832 = vmatmul.mubr.bf16.vlgmr.msra.gmra.mrb[0].mxu0 %v1326_v32  ;;  %1218 = vmatprep.subr.bf16.mxu1 %v1335_v39  ;;  %v1396_v32 = vld [vmem:[%s1732_s0 + $0x24] ss:$44 sps:$4 sm:$0x1f]   ;;  %v1397_v35 = vld [vmem:[%s1731_s1 + $0x2b8] sm:$0xff]  }
  0x23   :  { %1197 = vmatpush3.bf16.msra.mxu0 %v1334_v38  ;;  %913 = vmatprep.mubr.bf16.mxu0 %v1366_v5  ;;  %v1398_v38 = vld [vmem:[%s1732_s0 + $0x28] ss:$44 sps:$4 sm:$0x1f]  }
  0x24   :  { %873 = vmatmul.mubr.bf16.vlgmr.msra.gmra.mrb[0].mxu1 %v1331_v36  ;;  %1198 = vmatprep.subr.bf16.mxu0 %v1337_v41  ;;  %v204_v36 = vld [vmem:[%s1733_s2 + $0x8] sm:$0x3] }
  0x25   :  { %1219 = vmatpush3.bf16.msra.mxu1 %v1336_v40  ;;  %954 = vmatprep.mubr.bf16.mxu1 %v1371_v9 }
  0x26   :  { %1220 = vmatprep.subr.bf16.mxu1 %v1339_v43  ;;  %212 = vperm.xlu0 %1294, %v204_v36  }
  0x27   :  { %1199 = vmatpush3.bf16.msra.mxu0 %v1338_v42 }
  0x28   :  { %1200 = vmatprep.subr.bf16.mxu0 %v1341_v45 }
  0x29   :  { %1221 = vmatpush3.bf16.msra.mxu1 %v1340_v44 }
  0x2a   :  { %1222 = vmatprep.subr.bf16.mxu1 %v1343_v47 }
  0x2b   :  { %1201 = vmatpush3.bf16.msra.mxu0 %v1342_v46 }
  0x2c   :  { %1202 = vmatprep.subr.bf16.mxu0 %v1345_v49 }
  0x2d   :  { %1223 = vmatpush3.bf16.msra.mxu1 %v1344_v48 }
  0x2e   :  { %1224 = vmatprep.subr.bf16.mxu1 %v1347_v51 }
  0x2f   :  { %1203 = vmatpush3.bf16.msra.mxu0 %v1346_v50 }
  0x30   :  { %1204 = vmatprep.subr.bf16.mxu0 %v1349_v53 }
  0x31   :  { %1225 = vmatpush3.bf16.msra.mxu1 %v1348_v52 }
  0x32   :  { %1226 = vmatprep.subr.bf16.mxu1 %v1351_v55 }
  0x33   :  { %1205 = vmatpush3.bf16.msra.mxu0 %v1350_v54 }
  0x34   :  { %1206 = vmatprep.subr.bf16.mxu0 %v1353_v57 }
  0x35   :  { %1227 = vmatpush3.bf16.msra.mxu1 %v1352_v56 }
  0x36   :  { %1228 = vmatprep.subr.bf16.mxu1 %v1355_v59 }
  0x37   :  { %1207 = vmatpush3.bf16.msra.mxu0 %v1354_v58 }
  0x38   :  { %1208 = vmatprep.subr.bf16.mxu0 %v1357_v61 }
  0x39   :  { %1229 = vmatpush3.bf16.msra.mxu1 %v1356_v60 }
  0x3a   :  { %1230 = vmatprep.subr.bf16.mxu1 %v1359_v63 }
  0x3b   :  { %1209 = vmatpush3.bf16.msra.mxu0 %v1358_v62 }
  0x3c   :  { %1210 = vmatprep.subr.bf16.mxu0 %v1361_v1 }
  0x3d   :  { %1231 = vmatpush3.bf16.msra.mxu1 %v1360_v0 }
  0x3e   :  { %1232 = vmatprep.subr.bf16.mxu1 %v1363_v3 }
  0x3f   :  { %1211 = vmatpush3.bf16.msra.mxu0 %v1362_v2 }
  0x40   :  { %1240 = vmatprep.subr.bf16.mxu0 %v1368_v7 }
  0x41   :  { %1233 = vmatpush3.bf16.msra.mxu1 %v1367_v6 }
  0x42   :  { %914 = vmatmul.mubr.bf16.vlgmr.msra.gmra.mrb[4].mxu0 %v1364_v4  ;;  %1271 = vmatprep.subr.bf16.mxu1 %v1400_v10 }
  0x43   :  { %1241 = vmatpush3.bf16.msra.mxu0 %v1372_v11  ;;  %995 = vmatprep.mubr.bf16.mxu0 %v1396_v32 }
  0x44   :  { %955 = vmatmul.mubr.bf16.vlgmr.msra.gmra.mrb[4].mxu1 %v1369_v8  ;;  %1242 = vmatprep.subr.bf16.mxu0 %v1374_v13 }
  0x45   :  { %1272 = vmatpush3.bf16.msra.mxu1 %v1373_v12  ;;  %1287 = vmatprep.mubr.msk.bf16.mxu1 %vm1401_vm0, %v1400_v10 }
  0x46   :  { %1273 = vmatprep.subr.bf16.mxu1 %v1400_v10 }
  0x47   :  { %1243 = vmatpush3.bf16.msra.mxu0 %v1375_v14 }
  0x48   :  { %1244 = vmatprep.subr.bf16.mxu0 %v1377_v16 }
  0x49   :  { %1274 = vmatpush3.bf16.msra.mxu1 %v1376_v15 }
  0x4a   :  { %1275 = vmatprep.subr.bf16.mxu1 %v1400_v10 }
  0x4b   :  { %1245 = vmatpush3.bf16.msra.mxu0 %v1378_v17 }
  0x4c   :  { %1246 = vmatprep.subr.bf16.mxu0 %v1380_v19 }
  0x4d   :  { %1276 = vmatpush3.bf16.msra.mxu1 %v1379_v18 }
  0x4e   :  { %1277 = vmatprep.subr.bf16.mxu1 %v1400_v10 }
  0x4f   :  { %1247 = vmatpush3.bf16.msra.mxu0 %v1381_v20 }
  0x50   :  { %1248 = vmatprep.subr.bf16.mxu0 %v1383_v22 }
  0x51   :  { %1278 = vmatpush3.bf16.msra.mxu1 %v1382_v21 }
  0x52   :  { %1279 = vmatprep.subr.bf16.mxu1 %v1400_v10 }
  0x53   :  { %1249 = vmatpush3.bf16.msra.mxu0 %v1384_v23 }
  0x54   :  { %1250 = vmatprep.subr.bf16.mxu0 %v1386_v25 }
  0x55   :  { %1280 = vmatpush3.bf16.msra.mxu1 %v1385_v24 }
  0x56   :  { %1281 = vmatprep.subr.bf16.mxu1 %v1400_v10 }
  0x57   :  { %1251 = vmatpush3.bf16.msra.mxu0 %v1387_v26 }
  0x58   :  { %1252 = vmatprep.subr.bf16.mxu0 %v1389_v28 }
  0x59   :  { %1282 = vmatpush3.bf16.msra.mxu1 %v1388_v27 }
  0x5a   :  { %1283 = vmatprep.subr.bf16.mxu1 %v1400_v10 }
  0x5b   :  { %1253 = vmatpush3.bf16.msra.mxu0 %v1390_v29 }
  0x5c   :  { %1254 = vmatprep.subr.bf16.mxu0 %v1392_v31 }
  0x5d   :  { %1284 = vmatpush3.bf16.msra.mxu1 %v1391_v30 }
  0x5e   :  { %1285 = vmatprep.subr.bf16.mxu1 %v1400_v10 }
  0x5f   :  { %1255 = vmatpush3.bf16.msra.mxu0 %v1393_v34 }
  0x61   :  { %1286 = vmatpush3.bf16.msra.mxu1 %v1397_v35 }
  0x62   :  { %996 = vmatmul.mubr.bf16.vlgmr.msra.gmra.mrb[8].mxu0 %v1394_v37 }
  0x64   :  { %1288 = vmatmul.mubr.bf16.vlgmr.msra.gmra.mrb[8].mxu1 %v1398_v38 }
  0xa0   :  { %v208_v39 = vpop.permute.xlu0 %207 }
  0xa5   :  { %v213_v44 = vpop.permute.xlu0 %212 }
  0xf5   :  { %v1168_v40 = vpop.f32.mrb[0].mxu0 }
  0xf6   :  { %v1169_v41 = vpop.f32.mrb[1].mxu0 }
  0xf7   :  { %v1170_v42 = vadd.f32 %v1169_v41, %v1168_v40  ;;  %v1171_v43 = vpop.f32.mrb[2].mxu0  ;;  %v1190_v45 = vpop.f32.mrb[0].mxu1 }
  0xf8   :  { %v1172_v46 = vpop.f32.mrb[3].mxu0  ;;  %v1191_v49 = vpop.f32.mrb[1].mxu1 }
  0xf9   :  { %v834_v47 = vadd.f32 %v1170_v42, %v208_v39  ;;  %v1173_v48 = vadd.f32 %v1172_v46, %v1171_v43  ;;  %v1192_v50 = vadd.f32 %v1191_v49, %v1190_v45  ;;  %v1193_v51 = vpop.f32.mrb[2].mxu1 }
  0xfa   :  { %v1194_v53 = vpop.f32.mrb[3].mxu1 }
  0xfb   :  { %v837_v52 = vadd.f32 %v1173_v48, %v213_v44  ;;  %v875_v54 = vadd.f32 %v1192_v50, %v834_v47  ;;  %v1195_v55 = vadd.f32 %v1194_v53, %v1193_v51 }
  0xfd   :  { %v878_v56 = vadd.f32 %v1195_v55, %v837_v52 }
 0x115   :  { %v1212_v57 = vpop.f32.mrb[4].mxu0 }
 0x116   :  { %v1213_v58 = vpop.f32.mrb[5].mxu0 }
 0x117   :  { %v1214_v59 = vadd.f32 %v1213_v58, %v1212_v57  ;;  %v1215_v60 = vpop.f32.mrb[6].mxu0  ;;  %v1234_v61 = vpop.f32.mrb[4].mxu1 }
 0x118   :  { %v1216_v62 = vpop.f32.mrb[7].mxu0  ;;  %v1235_v1 = vpop.f32.mrb[5].mxu1 }
 0x119   :  { %v916_v63 = vadd.f32 %v1214_v59, %v875_v54  ;;  %v1217_v0 = vadd.f32 %v1216_v62, %v1215_v60  ;;  %v1236_v2 = vadd.f32 %v1235_v1, %v1234_v61  ;;  %v1237_v3 = vpop.f32.mrb[6].mxu1 }
 0x11a   :  { %v1238_v5 = vpop.f32.mrb[7].mxu1 }
 0x11b   :  { %v919_v4 = vadd.f32 %v1217_v0, %v878_v56  ;;  %v957_v6 = vadd.f32 %v1236_v2, %v916_v63  ;;  %v1239_v7 = vadd.f32 %v1238_v5, %v1237_v3 }
 0x11d   :  { %v960_v8 = vadd.f32 %v1239_v7, %v919_v4 }
 0x135   :  { %v1256_v9 = vpop.f32.mrb[8].mxu0 }
 0x136   :  { %v1257_v10 = vpop.f32.mrb[9].mxu0 }
 0x137   :  { %v1038_v11 = vpop.f32.mrb[8].mxu1  ;;  %v1258_v12 = vadd.f32 %v1257_v10, %v1256_v9  ;;  %v1259_v13 = vpop.f32.mrb[10].mxu0 }
 0x138   :  { %v1289_v14 = vpop.f32.mrb[9].mxu1  ;;  %v1260_v15 = vpop.f32.mrb[11].mxu0 }
 0x139   :  { %v1041_v16 = vpop.f32.mrb[10].mxu1  ;;  %v998_v17 = vadd.f32 %v1258_v12, %v957_v6  ;;  %v1261_v18 = vadd.f32 %v1260_v15, %v1259_v13 }
 0x13a   :  { %v1290_v19 = vpop.f32.mrb[11].mxu1 }
 0x13b   :  { %v1039_v20 = vadd.f32 %v1038_v11, %v998_v17  ;;  %v1001_v21 = vadd.f32 %v1261_v18, %v960_v8 }
 0x13d   :  { %1046 = vst.msk [vmem:[%s1734_s3] sm:$0xff] %vm1045_vm1, %v1039_v20  ;;  %v1042_v22 = vadd.f32 %v1041_v16, %v1001_v21 }
 0x13f   :  { %1048 = vst.msk [vmem:[%s1734_s3 + $0x8] sm:$0x3] %vm1047_vm2, %v1042_v22 }

</bundles_post_ra>
